<compile_context>
chip_gen: v6e
topology: v6e:2x2x1
jax: 0.10.0
libtpu: 0.0.40
codegen_flags: <defaults>
</compile_context>

<pallas_src>
import functools

import jax
import jax.numpy as jnp
from jax import lax
from jax.experimental import pallas as pl
from jax.experimental.pallas import tpu as pltpu


# ----------------------------------------------------------------------------
# Static model dimensions / blob layout constants
# ----------------------------------------------------------------------------
EMB = 128                      # pointnet embedding / gconv_dim / edge-vec dim
ATTR_PAD = 128                 # attribute block padded to a full 128-lane tile
OBJ0_DIM = EMB + ATTR_PAD      # 256  (gconv0 object-vector width, padded)
GDIM = 128                     # gconv output dim
GH = 512                       # gconv hidden dim
NET1_OUT = 2 * GH + GDIM       # 1152 (net1 second-linear output width)
KIN0 = 2 * OBJ0_DIM + EMB      # 640  (net1 input width, gconv0, padded)
KINL = 3 * GDIM                # 384  (net1 input width, gconv_net layers)
RB0 = KIN0                     # 640  row-band height in gconv0 blob
RBL = GH                       # 512  row-band height in layer blobs
BLOB_ROWS = RB0 + GH + 8       # 1160 rows per stacked gconv blob
OUT_PAD = 128                  # Linear4 output padded to 128 lanes (lane-dense store)
PN_HID = 128                   # pointnet stand-in hidden width

# misc blob (pointnet + Linear4), width 128, all weight blocks start 8-row aligned
PN_ROWS = 272                  # pw1[0:8] pw2[8:136] pw3[136:264] biases rows 264..266
LE_W1, LE_W2, LE_W3 = 272, 400, 528
LE_B = 656                     # lb1/lb2/lb3 rows 656..658
MISC_ROWS = 664


# ----------------------------------------------------------------------------
# Fused, weight-streaming forward kernel (grid = (num_gconv_layers,))
# ----------------------------------------------------------------------------
def _graphnet_kernel(st_num, dr_num,
                     pcs_ref, attr_ref, idx_ref, idxt_ref, emb_ref,
                     misc_ref, gblob_ref,
                     out_ref,
                     obj_sc, pred_sc):
    f32 = jnp.float32
    l = pl.program_id(0)
    nsteps = pl.num_programs(0)
    O = attr_ref.shape[0]
    T = idx_ref.shape[0]
    P = pcs_ref.shape[0] // O

    def mm(x, w):
        # bf16 MXU matmul with f32 accumulation
        return jnp.dot(x.astype(w.dtype), w, preferred_element_type=f32)

    def relu(v):
        return jnp.maximum(v, 0.0)

    # ---- graph structure (rebuilt each step from tiny int arrays; pure VPU, negligible) ----
    iota_to = lax.broadcasted_iota(jnp.int32, (T, O), 1)
    iota_ot = lax.broadcasted_iota(jnp.int32, (O, T), 0)
    s_gather = (idx_ref[:, 0:1] == iota_to).astype(f32)        # (T, O) one-hot of start
    o_gather = (idx_ref[:, 3:4] == iota_to).astype(f32)        # (T, O) one-hot of end
    s_scatter = (idxt_ref[0:1, :] == iota_ot).astype(f32)      # (O, T)
    o_scatter = (idxt_ref[3:4, :] == iota_ot).astype(f32)      # (O, T)
    counts = jnp.sum(s_scatter + o_scatter, axis=1, keepdims=True)   # (O, 1)
    inv_c = 1.0 / jnp.maximum(counts, 1.0)                     # avg pooling, clamp(min=1)

    def gconv(obj_v, pred_v, kin, rb):
        # per-layer weight blob (streamed into VMEM by the grid pipeline); 8/128-aligned slices
        w1 = gblob_ref[0:kin, 0:GH]
        w2a = gblob_ref[0:GH, GH:2 * GH]
        w2b = gblob_ref[0:GH, 2 * GH:2 * GH + GDIM]
        w1b = gblob_ref[rb:rb + GH, :]
        b1 = gblob_ref[rb + GH:rb + GH + 1, 0:GH]
        b2a = gblob_ref[rb + GH:rb + GH + 1, GH:2 * GH]
        b2b = gblob_ref[rb + GH:rb + GH + 1, 2 * GH:2 * GH + GDIM]
        b1b = gblob_ref[rb + GH + 1:rb + GH + 2, :]
        # gather obj_vecs[s_idx], obj_vecs[o_idx] as one-hot matmuls (MXU)
        cur_s = jnp.dot(s_gather, obj_v, preferred_element_type=f32)
        cur_o = jnp.dot(o_gather, obj_v, preferred_element_type=f32)
        # net1: Linear([s, p, o]) -> ReLU -> Linear -> ReLU (lane-aligned concat, single matmuls)
        t_in = jnp.concatenate([cur_s, pred_v, cur_o], axis=1)
        hh = relu(mm(t_in, w1) + b1)                           # (T, GH)
        tv = relu(mm(hh, w1b) + b1b)                           # (T, 2GH + GDIM)
        new_s = tv[:, :GH]
        new_p = tv[:, GH:GH + GDIM]
        new_o = tv[:, GH + GDIM:]
        # scatter_add pooling + avg (one-hot transpose matmuls)
        pooled = (jnp.dot(s_scatter, new_s, preferred_element_type=f32)
                  + jnp.dot(o_scatter, new_o, preferred_element_type=f32)) * inv_c
        # net2: Linear -> ReLU -> Linear -> ReLU
        h2 = relu(mm(pooled, w2a) + b2a)
        new_obj = relu(mm(h2, w2b) + b2b)
        return new_obj, new_p

    # ---- step 0: pointnet stand-in + edge embeddings + first GraphTripleConv ----
    @pl.when(l == 0)
    def _():
        # TODO(synk): real pointnet2 not available; shared per-point MLP + max pool.
        pw1 = misc_ref[0:8, :]
        pw2 = misc_ref[8:136, :]
        pw3 = misc_ref[136:264, :]
        pb1 = misc_ref[264:265, :]
        pb2 = misc_ref[265:266, :]
        pb3 = misc_ref[266:267, :]
        pts = pcs_ref[...]                                     # (O*P, 8) f32 (xyz + zero pad)
        h = relu(mm(pts, pw1) + pb1)                           # (O*P, 128)
        h = relu(mm(h, pw2) + pb2)                             # (O*P, 128)
        gmax = jnp.max(h.reshape(O, P, PN_HID), axis=1)        # per-object max pool
        pc_vecs = mm(gmax, pw3) + pb3                          # (O, 128)
        obj0 = jnp.concatenate([pc_vecs, attr_ref[...]], axis=1)   # (O, 256), 128-aligned

        # edge embedding: one-hot over [state | direct] x block-diag [state_emb; drt_emb] table
        iota_e = lax.broadcasted_iota(jnp.int32, (T, st_num + dr_num), 1)
        onehot = (((iota_e < st_num) & (iota_e == idx_ref[:, 1:2]))
                  | ((iota_e >= st_num) & ((iota_e - st_num) == idx_ref[:, 2:3]))).astype(f32)
        pred0 = jnp.dot(onehot, emb_ref[...], preferred_element_type=f32)   # (T, 128)

        new_obj, new_p = gconv(obj0, pred0, KIN0, RB0)
        obj_sc[...] = new_obj
        pred_sc[...] = new_p

    # ---- steps 1..L-1: one GraphTripleConvNet layer per grid step (streamed weights) ----
    @pl.when(l > 0)
    def _():
        new_obj, new_p = gconv(obj_sc[...], pred_sc[...], KINL, RBL)
        obj_sc[...] = new_obj
        pred_sc[...] = new_p

    # ---- last step: Linear4 edge predictor (LeakyReLU 0.01) + lane-dense padded store ----
    @pl.when(l == nsteps - 1)
    def _():
        lw1 = misc_ref[LE_W1:LE_W1 + 128, :]
        lw2 = misc_ref[LE_W2:LE_W2 + 128, :]
        lw3 = misc_ref[LE_W3:LE_W3 + 128, :]
        lb1 = misc_ref[LE_B:LE_B + 1, :]
        lb2 = misc_ref[LE_B + 1:LE_B + 2, :]
        lb3 = misc_ref[LE_B + 2:LE_B + 3, :]

        def leaky(v):
            return jnp.where(v > 0, v, 0.01 * v)

        e = leaky(mm(pred_sc[...], lw1) + lb1)
        e = leaky(mm(e, lw2) + lb2)
        out_ref[...] = (mm(e, lw3) + lb3).astype(out_ref.dtype)


# ----------------------------------------------------------------------------
# Parameter initialization (deterministic, synthetic) + weight-blob packing
# ----------------------------------------------------------------------------
def _kaiming(key, fan_in, fan_out, std_fan_in=None):
    fi = fan_in if std_fan_in is None else std_fan_in
    return jax.random.normal(key, (fan_in, fan_out), jnp.float32) * jnp.sqrt(2.0 / fi)


def _bias(key, n):
    return jax.random.uniform(key, (1, n), jnp.float32, -0.05, 0.05)


def _init_gconv_weights(key, dobj, dp, h, dout, pad_obj_to):
    """One GraphTripleConv layer; the s/o row blocks of net1's first Linear are zero-padded
    to pad_obj_to so lane concats stay 128-aligned (results unchanged)."""
    ks = jax.random.split(key, 10)
    fan1 = 2 * dobj + dp
    w_s = _kaiming(ks[0], dobj, h, std_fan_in=fan1)
    w_p = _kaiming(ks[1], dp, h, std_fan_in=fan1)
    w_o = _kaiming(ks[2], dobj, h, std_fan_in=fan1)
    if pad_obj_to > dobj:
        rpad = ((0, pad_obj_to - dobj), (0, 0))
        w_s = jnp.pad(w_s, rpad)
        w_o = jnp.pad(w_o, rpad)
    w1 = jnp.concatenate([w_s, w_p, w_o], axis=0)
    return (w1, _bias(ks[3], h),
            _kaiming(ks[4], h, 2 * h + dout), _bias(ks[5], 2 * h + dout),
            _kaiming(ks[6], h, h), _bias(ks[7], h),
            _kaiming(ks[8], h, dout), _bias(ks[9], dout))


def _pack_gconv_blob(w1, b1, w1b, b1b, w2a, b2a, w2b, b2b, *, rb):
    """Pack one gconv layer into a single (BLOB_ROWS, NET1_OUT) f32 blob with 8-row-aligned
    sub-blocks (w1 / w2a / w2b side-by-side in a row band, w1b below, biases in 2 rows)."""
    kin = w1.shape[0]
    blob = jnp.zeros((BLOB_ROWS, NET1_OUT), jnp.float32)
    blob = blob.at[0:kin, 0:GH].set(w1)
    blob = blob.at[0:GH, GH:2 * GH].set(w2a)
    blob = blob.at[0:GH, 2 * GH:2 * GH + GDIM].set(w2b)
    blob = blob.at[rb:rb + GH, :].set(w1b)
    blob = blob.at[rb + GH, 0:GH].set(b1[0])
    blob = blob.at[rb + GH, GH:2 * GH].set(b2a[0])
    blob = blob.at[rb + GH, 2 * GH:2 * GH + GDIM].set(b2b[0])
    blob = blob.at[rb + GH + 1, :].set(b1b[0])
    return blob


def init_graphnet_params(key, emb=128, attr=15, gdim=128, gh=512, nlayers=5,
                         pred_dim=16, st_num=10, dr_num=6):
    assert emb == EMB and gdim == GDIM and gh == GH
    ks = jax.random.split(key, 5)
    bf = jnp.bfloat16

    # --- pointnet stand-in + Linear4, packed into one "misc" blob (width 128) ---
    kp = jax.random.split(ks[0], 6)
    pw1 = jnp.pad(_kaiming(kp[0], 3, PN_HID), ((0, 5), (0, 0)))   # K padded 3 -> 8 (zero rows)
    pb1 = _bias(kp[1], PN_HID)
    pw2 = _kaiming(kp[2], PN_HID, PN_HID)
    pb2 = _bias(kp[3], PN_HID)
    pw3 = _kaiming(kp[4], PN_HID, emb)
    pb3 = _bias(kp[5], emb)

    kl = jax.random.split(ks[1], 6)
    lw1 = _kaiming(kl[0], 128, 128)
    lb1 = _bias(kl[1], 128)
    lw2 = _kaiming(kl[2], 128, 128)
    lb2 = _bias(kl[3], 128)
    lw3 = jnp.pad(_kaiming(kl[4], 128, pred_dim), ((0, 0), (0, OUT_PAD - pred_dim)))
    lb3 = jnp.pad(_bias(kl[5], pred_dim), ((0, 0), (0, OUT_PAD - pred_dim)))

    misc = jnp.zeros((MISC_ROWS, 128), jnp.float32)
    misc = misc.at[0:8, :].set(pw1)
    misc = misc.at[8:136, :].set(pw2)
    misc = misc.at[136:264, :].set(pw3)
    misc = misc.at[264, :].set(pb1[0])
    misc = misc.at[265, :].set(pb2[0])
    misc = misc.at[266, :].set(pb3[0])
    misc = misc.at[LE_W1:LE_W1 + 128, :].set(lw1)
    misc = misc.at[LE_W2:LE_W2 + 128, :].set(lw2)
    misc = misc.at[LE_W3:LE_W3 + 128, :].set(lw3)
    misc = misc.at[LE_B, :].set(lb1[0])
    misc = misc.at[LE_B + 1, :].set(lb2[0])
    misc = misc.at[LE_B + 2, :].set(lb3[0])

    # --- state / direction embeddings as one block-diagonal table (for one-hot matmul) ---
    state_emb = jax.random.normal(ks[2], (st_num, emb // 2), jnp.float32)
    drt_emb = jax.random.normal(ks[3], (dr_num, emb // 2), jnp.float32)
    emb_table = jnp.zeros((st_num + dr_num, emb), jnp.float32)
    emb_table = emb_table.at[:st_num, :emb // 2].set(state_emb)
    emb_table = emb_table.at[st_num:, emb // 2:].set(drt_emb)

    # --- gconv0 + (nlayers-1) gconv_net layers, all stacked into one streamable blob ---
    kg = jax.random.split(ks[4], nlayers)
    blobs = [_pack_gconv_blob(*_init_gconv_weights(kg[0], emb + attr, emb, gh, gdim,
                                                   pad_obj_to=OBJ0_DIM), rb=RB0)]
    for i in range(1, nlayers):
        blobs.append(_pack_gconv_blob(*_init_gconv_weights(kg[i], gdim, gdim, gh, gdim,
                                                           pad_obj_to=gdim), rb=RBL))
    gconv_blob = jnp.stack(blobs, axis=0).astype(bf)           # (nlayers, 1160, 1152) bf16

    return {"misc": misc.astype(bf), "emb_table": emb_table, "gconv": gconv_blob}


# ----------------------------------------------------------------------------
# GraphNet forward (single pallas_call with a layer-streaming grid)
# ----------------------------------------------------------------------------
def graphnet_forward(params, objs, triples, pcs, nodes_to_graph=None, edge_to_graph=None,
                     *, pred_dim=16, st_num=10, dr_num=6):
    # nodes_to_graph / edge_to_graph are unused in the PyTorch forward as well.
    f32 = jnp.float32
    O, attr_dim = objs.shape
    T = triples.shape[0]
    P = pcs.shape[1]
    nsteps = params["gconv"].shape[0]           # gconv0 + (nlayers-1) gconv_net layers

    # Tiny glue only (column select + zero pads); one-hots, embedding lookup and inverse
    # counts are built inside the kernel from these int32 index arrays.
    idx = jnp.stack([triples[:, 0], triples[:, 1], triples[:, 2], triples[:, 4]],
                    axis=1).astype(jnp.int32)                                   # (T, 4)
    idx_t = idx.T                                                               # (4, T)
    attr_pad = jnp.pad(objs.astype(f32), ((0, 0), (0, ATTR_PAD - attr_dim)))    # (O, 128)
    pcs_flat = jnp.pad(pcs.reshape(O * P, 3).astype(f32), ((0, 0), (0, 5)))     # (O*P, 8)

    kernel = functools.partial(_graphnet_kernel, st_num, dr_num)

    out = pl.pallas_call(
        kernel,
        out_shape=jax.ShapeDtypeStruct((T, OUT_PAD), f32),
        grid=(nsteps,),
        in_specs=[
            pl.BlockSpec((O * P, 8), lambda l: (0, 0)),
            pl.BlockSpec((O, ATTR_PAD), lambda l: (0, 0)),
            pl.BlockSpec((T, 4), lambda l: (0, 0)),
            pl.BlockSpec((4, T), lambda l: (0, 0)),
            pl.BlockSpec((st_num + dr_num, EMB), lambda l: (0, 0)),
            pl.BlockSpec((MISC_ROWS, 128), lambda l: (0, 0)),
            # stacked per-layer weight blob: layer l streamed in at grid step l
            pl.BlockSpec((None, BLOB_ROWS, NET1_OUT), lambda l: (l, 0, 0)),
        ],
        out_specs=pl.BlockSpec((T, OUT_PAD), lambda l: (0, 0)),
        scratch_shapes=[
            pltpu.VMEM((O, GDIM), f32),     # obj_vecs carried across layers
            pltpu.VMEM((T, GDIM), f32),     # pred_vecs carried across layers
        ],
        compiler_params=pltpu.CompilerParams(
            dimension_semantics=("arbitrary",),
            vmem_limit_bytes=16 * 1024 * 1024),
    )(pcs_flat, attr_pad, idx, idx_t, params["emb_table"], params["misc"], params["gconv"])
    return out[:, :pred_dim]


# ----------------------------------------------------------------------------
# Main
# ----------------------------------------------------------------------------
if __name__ == "__main__":
    O, T, P = 6, 8, 32
    ATTR, NLAYERS, PRED_DIM = 15, 5, 16
    ST_NUM, DR_NUM = 10, 6   # TODO(synk): Space_Category constants unknown.

    key = jax.random.PRNGKey(0)
    k_param, k_obj, k_pc, k_tri = jax.random.split(key, 4)

    params = init_graphnet_params(k_param, EMB, ATTR, GDIM, GH, NLAYERS,
                                  PRED_DIM, ST_NUM, DR_NUM)

    objs = jax.random.normal(k_obj, (O, ATTR), jnp.float32)        # attributes
    pcs = jax.random.normal(k_pc, (O, P, 3), jnp.float32)          # point clouds
    kt = jax.random.split(k_tri, 5)
    start = jax.random.randint(kt[0], (T,), 0, O, jnp.int32)
    state = jax.random.randint(kt[1], (T,), 0, ST_NUM, jnp.int32)
    direct = jax.random.randint(kt[2], (T,), 0, DR_NUM, jnp.int32)
    v_direct = jax.random.randint(kt[3], (T,), 0, 4, jnp.int32)
    end = jax.random.randint(kt[4], (T,), 0, O, jnp.int32)
    triples = jnp.stack([start, state, direct, v_direct, end], axis=1)   # (T, 5)
    nodes_to_graph = jnp.zeros((O,), jnp.int32)   # unused (as in PyTorch)
    edge_to_graph = jnp.zeros((T,), jnp.int32)    # unused (as in PyTorch)

    fwd = jax.jit(functools.partial(graphnet_forward, pred_dim=PRED_DIM,
                                    st_num=ST_NUM, dr_num=DR_NUM))
    pred = fwd(params, objs, triples, pcs, nodes_to_graph, edge_to_graph)
    pred = jax.block_until_ready(pred)
    assert pred.shape == (T, PRED_DIM), pred.shape
    assert bool(jnp.all(jnp.isfinite(pred)))
    print("KERNEL_OK")
</pallas_src>

<mosaic_0001>
module attributes {stable_mosaic.version = 11 : i64} {
  func.func @_graphnet_kernel(%arg0: i32, %arg1: memref<192x8xf32, #tpu.memory_space<vmem>>, %arg2: memref<6x128xf32, #tpu.memory_space<vmem>>, %arg3: memref<8x4xi32, #tpu.memory_space<vmem>>, %arg4: memref<4x8xi32, #tpu.memory_space<vmem>>, %arg5: memref<16x128xf32, #tpu.memory_space<vmem>>, %arg6: memref<664x128xbf16, #tpu.memory_space<vmem>>, %arg7: memref<1x1160x1152xbf16, #tpu.memory_space<vmem>>, %arg8: memref<8x128xf32, #tpu.memory_space<vmem>>, %arg9: memref<6x128xf32, #tpu.memory_space<vmem>>, %arg10: memref<8x128xf32, #tpu.memory_space<vmem>>) attributes {dimension_semantics = [#tpu.dimension_semantics<arbitrary>], iteration_bounds = array<i64: 5>, scalar_prefetch = 0 : i64, scratch_operands = 2 : i64, tpu.core_type = #tpu.core_type<tc>, window_params = [{pipeline_mode = #tpu.pipeline_mode<synchronous>, transform_indices = @transform_0, window_bounds = array<i64: 192, 8>}, {pipeline_mode = #tpu.pipeline_mode<synchronous>, transform_indices = @transform_1, window_bounds = array<i64: 6, 128>}, {pipeline_mode = #tpu.pipeline_mode<synchronous>, transform_indices = @transform_2, window_bounds = array<i64: 8, 4>}, {pipeline_mode = #tpu.pipeline_mode<synchronous>, transform_indices = @transform_3, window_bounds = array<i64: 4, 8>}, {pipeline_mode = #tpu.pipeline_mode<synchronous>, transform_indices = @transform_4, window_bounds = array<i64: 16, 128>}, {pipeline_mode = #tpu.pipeline_mode<synchronous>, transform_indices = @transform_5, window_bounds = array<i64: 664, 128>}, {transform_indices = @transform_6, window_bounds = array<i64: 1, 1160, 1152>}, {pipeline_mode = #tpu.pipeline_mode<synchronous>, transform_indices = @transform_7, window_bounds = array<i64: 8, 128>}]} {
    %0 = tpu.iota {dimensions = array<i32: 1>} : vector<8x6xi32>
    %1 = tpu.iota {dimensions = array<i32: 0>} : vector<6x8xi32>
    %c0 = arith.constant 0 : index
    %c0_0 = arith.constant 0 : index
    %2 = vector.load %arg3[%c0, %c0_0] : memref<8x4xi32, #tpu.memory_space<vmem>>, vector<8x1xi32>
    %3 = vector.broadcast %2 : vector<8x1xi32> to vector<8x6xi32>
    %4 = arith.cmpi eq, %3, %0 : vector<8x6xi32>
    %5 = arith.extui %4 : vector<8x6xi1> to vector<8x6xi32>
    %6 = arith.sitofp %5 : vector<8x6xi32> to vector<8x6xf32>
    %c0_1 = arith.constant 0 : index
    %c3 = arith.constant 3 : index
    %7 = vector.load %arg3[%c0_1, %c3] : memref<8x4xi32, #tpu.memory_space<vmem>>, vector<8x1xi32>
    %8 = vector.broadcast %7 : vector<8x1xi32> to vector<8x6xi32>
    %9 = arith.cmpi eq, %8, %0 : vector<8x6xi32>
    %10 = arith.extui %9 : vector<8x6xi1> to vector<8x6xi32>
    %11 = arith.sitofp %10 : vector<8x6xi32> to vector<8x6xf32>
    %c0_2 = arith.constant 0 : index
    %c0_3 = arith.constant 0 : index
    %12 = vector.load %arg4[%c0_2, %c0_3] : memref<4x8xi32, #tpu.memory_space<vmem>>, vector<1x8xi32>
    %13 = vector.broadcast %12 : vector<1x8xi32> to vector<6x8xi32>
    %14 = arith.cmpi eq, %13, %1 : vector<6x8xi32>
    %15 = arith.extui %14 : vector<6x8xi1> to vector<6x8xi32>
    %16 = arith.sitofp %15 : vector<6x8xi32> to vector<6x8xf32>
    %c3_4 = arith.constant 3 : index
    %c0_5 = arith.constant 0 : index
    %17 = vector.load %arg4[%c3_4, %c0_5] : memref<4x8xi32, #tpu.memory_space<vmem>>, vector<1x8xi32>
    %18 = vector.broadcast %17 : vector<1x8xi32> to vector<6x8xi32>
    %19 = arith.cmpi eq, %18, %1 : vector<6x8xi32>
    %20 = arith.extui %19 : vector<6x8xi1> to vector<6x8xi32>
    %21 = arith.sitofp %20 : vector<6x8xi32> to vector<6x8xf32>
    %22 = arith.addf %16, %21 : vector<6x8xf32>
    %cst = arith.constant dense<0.000000e+00> : vector<6xf32>
    %23 = vector.multi_reduction <add>, %22, %cst [1] : vector<6x8xf32> to vector<6xf32>
    %24 = vector.shape_cast %23 : vector<6xf32> to vector<6x1xf32>
    %cst_6 = arith.constant 1.000000e+00 : f32
    %25 = vector.broadcast %cst_6 : f32 to vector<6x1xf32>
    %26 = arith.maximumf %24, %25 : vector<6x1xf32>
    %cst_7 = arith.constant 1.000000e+00 : f32
    %27 = vector.broadcast %cst_7 : f32 to vector<6x1xf32>
    %28 = arith.divf %27, %26 : vector<6x1xf32>
    %c0_i32 = arith.constant 0 : i32
    %29 = arith.cmpi eq, %arg0, %c0_i32 : i32
    %30 = arith.extui %29 : i1 to i32
    %c0_i32_8 = arith.constant 0 : i32
    %31 = arith.cmpi ne, %30, %c0_i32_8 : i32
    scf.if %31 {
      %c0_12 = arith.constant 0 : index
      %c0_13 = arith.constant 0 : index
      %38 = vector.load %arg6[%c0_12, %c0_13] : memref<664x128xbf16, #tpu.memory_space<vmem>>, vector<8x128xbf16>
      %c8 = arith.constant 8 : index
      %c0_14 = arith.constant 0 : index
      %39 = vector.load %arg6[%c8, %c0_14] : memref<664x128xbf16, #tpu.memory_space<vmem>>, vector<128x128xbf16>
      %c136 = arith.constant 136 : index
      %c0_15 = arith.constant 0 : index
      %40 = vector.load %arg6[%c136, %c0_15] : memref<664x128xbf16, #tpu.memory_space<vmem>>, vector<128x128xbf16>
      %c264 = arith.constant 264 : index
      %c0_16 = arith.constant 0 : index
      %41 = vector.load %arg6[%c264, %c0_16] : memref<664x128xbf16, #tpu.memory_space<vmem>>, vector<1x128xbf16>
      %c265 = arith.constant 265 : index
      %c0_17 = arith.constant 0 : index
      %42 = vector.load %arg6[%c265, %c0_17] : memref<664x128xbf16, #tpu.memory_space<vmem>>, vector<1x128xbf16>
      %c266 = arith.constant 266 : index
      %c0_18 = arith.constant 0 : index
      %43 = vector.load %arg6[%c266, %c0_18] : memref<664x128xbf16, #tpu.memory_space<vmem>>, vector<1x128xbf16>
      %c0_19 = arith.constant 0 : index
      %c0_20 = arith.constant 0 : index
      %44 = vector.load %arg1[%c0_19, %c0_20] : memref<192x8xf32, #tpu.memory_space<vmem>>, vector<192x8xf32>
      %45 = arith.truncf %44 : vector<192x8xf32> to vector<192x8xbf16>
      %cst_21 = arith.constant dense<0.000000e+00> : vector<192x128xf32>
      %46 = tpu.matmul %45, %38, %cst_21 {dimension_numbers = #tpu.dot_dimension_numbers<[1], [0], [0], [1], [0, 0, 1, 1], [], []>} : vector<192x8xbf16>, vector<8x128xbf16>, vector<192x128xf32> -> vector<192x128xf32>
      %47 = arith.extf %41 : vector<1x128xbf16> to vector<1x128xf32>
      %48 = vector.broadcast %47 : vector<1x128xf32> to vector<192x128xf32>
      %49 = arith.addf %46, %48 : vector<192x128xf32>
      %cst_22 = arith.constant 0.000000e+00 : f32
      %50 = vector.broadcast %cst_22 : f32 to vector<192x128xf32>
      %51 = arith.maximumf %49, %50 : vector<192x128xf32>
      %52 = arith.truncf %51 : vector<192x128xf32> to vector<192x128xbf16>
      %cst_23 = arith.constant dense<0.000000e+00> : vector<192x128xf32>
      %53 = tpu.matmul %52, %39, %cst_23 {dimension_numbers = #tpu.dot_dimension_numbers<[1], [0], [0], [1], [0, 0, 1, 1], [], []>} : vector<192x128xbf16>, vector<128x128xbf16>, vector<192x128xf32> -> vector<192x128xf32>
      %54 = arith.extf %42 : vector<1x128xbf16> to vector<1x128xf32>
      %55 = vector.broadcast %54 : vector<1x128xf32> to vector<192x128xf32>
      %56 = arith.addf %53, %55 : vector<192x128xf32>
      %cst_24 = arith.constant 0.000000e+00 : f32
      %57 = vector.broadcast %cst_24 : f32 to vector<192x128xf32>
      %58 = arith.maximumf %56, %57 : vector<192x128xf32>
      %59 = vector.shape_cast %58 : vector<192x128xf32> to vector<6x32x128xf32>
      %cst_25 = arith.constant dense<0xFF800000> : vector<6x128xf32>
      %60 = vector.multi_reduction <maximumf>, %59, %cst_25 [1] : vector<6x32x128xf32> to vector<6x128xf32>
      %61 = arith.truncf %60 : vector<6x128xf32> to vector<6x128xbf16>
      %cst_26 = arith.constant dense<0.000000e+00> : vector<6x128xf32>
      %62 = tpu.matmul %61, %40, %cst_26 {dimension_numbers = #tpu.dot_dimension_numbers<[1], [0], [0], [1], [0, 0, 1, 1], [], []>} : vector<6x128xbf16>, vector<128x128xbf16>, vector<6x128xf32> -> vector<6x128xf32>
      %63 = arith.extf %43 : vector<1x128xbf16> to vector<1x128xf32>
      %64 = vector.broadcast %63 : vector<1x128xf32> to vector<6x128xf32>
      %65 = arith.addf %62, %64 : vector<6x128xf32>
      %c0_27 = arith.constant 0 : index
      %c0_28 = arith.constant 0 : index
      %66 = vector.load %arg2[%c0_27, %c0_28] : memref<6x128xf32, #tpu.memory_space<vmem>>, vector<6x128xf32>
      %67 = tpu.concatenate %65, %66 in 1 : vector<6x128xf32>, vector<6x128xf32> -> vector<6x256xf32>
      %68 = tpu.iota {dimensions = array<i32: 1>} : vector<8x16xi32>
      %c10_i32 = arith.constant 10 : i32
      %69 = vector.broadcast %c10_i32 : i32 to vector<8x16xi32>
      %70 = arith.cmpi slt, %68, %69 : vector<8x16xi32>
      %c0_29 = arith.constant 0 : index
      %c1 = arith.constant 1 : index
      %71 = vector.load %arg3[%c0_29, %c1] : memref<8x4xi32, #tpu.memory_space<vmem>>, vector<8x1xi32>
      %72 = vector.broadcast %71 : vector<8x1xi32> to vector<8x16xi32>
      %73 = arith.cmpi eq, %68, %72 : vector<8x16xi32>
      %74 = arith.andi %70, %73 : vector<8x16xi1>
      %c10_i32_30 = arith.constant 10 : i32
      %75 = vector.broadcast %c10_i32_30 : i32 to vector<8x16xi32>
      %76 = arith.cmpi sge, %68, %75 : vector<8x16xi32>
      %c10_i32_31 = arith.constant 10 : i32
      %77 = vector.broadcast %c10_i32_31 : i32 to vector<8x16xi32>
      %78 = arith.subi %68, %77 : vector<8x16xi32>
      %c0_32 = arith.constant 0 : index
      %c2 = arith.constant 2 : index
      %79 = vector.load %arg3[%c0_32, %c2] : memref<8x4xi32, #tpu.memory_space<vmem>>, vector<8x1xi32>
      %80 = vector.broadcast %79 : vector<8x1xi32> to vector<8x16xi32>
      %81 = arith.cmpi eq, %78, %80 : vector<8x16xi32>
      %82 = arith.andi %76, %81 : vector<8x16xi1>
      %83 = arith.ori %74, %82 : vector<8x16xi1>
      %84 = arith.extui %83 : vector<8x16xi1> to vector<8x16xi32>
      %85 = arith.sitofp %84 : vector<8x16xi32> to vector<8x16xf32>
      %c0_33 = arith.constant 0 : index
      %c0_34 = arith.constant 0 : index
      %86 = vector.load %arg5[%c0_33, %c0_34] : memref<16x128xf32, #tpu.memory_space<vmem>>, vector<16x128xf32>
      %cst_35 = arith.constant dense<0.000000e+00> : vector<8x128xf32>
      %87 = tpu.matmul %85, %86, %cst_35 {dimension_numbers = #tpu.dot_dimension_numbers<[1], [0], [0], [1], [0, 0, 1, 1], [], []>} : vector<8x16xf32>, vector<16x128xf32>, vector<8x128xf32> -> vector<8x128xf32>
      %c0_36 = arith.constant 0 : index
      %c0_37 = arith.constant 0 : index
      %c0_38 = arith.constant 0 : index
      %88 = vector.load %arg7[%c0_36, %c0_37, %c0_38] : memref<1x1160x1152xbf16, #tpu.memory_space<vmem>>, vector<1x640x512xbf16>
      %89 = vector.shape_cast %88 : vector<1x640x512xbf16> to vector<640x512xbf16>
      %c0_39 = arith.constant 0 : index
      %c0_40 = arith.constant 0 : index
      %c512 = arith.constant 512 : index
      %90 = vector.load %arg7[%c0_39, %c0_40, %c512] : memref<1x1160x1152xbf16, #tpu.memory_space<vmem>>, vector<1x512x512xbf16>
      %91 = vector.shape_cast %90 : vector<1x512x512xbf16> to vector<512x512xbf16>
      %c0_41 = arith.constant 0 : index
      %c0_42 = arith.constant 0 : index
      %c1024 = arith.constant 1024 : index
      %92 = vector.load %arg7[%c0_41, %c0_42, %c1024] : memref<1x1160x1152xbf16, #tpu.memory_space<vmem>>, vector<1x512x128xbf16>
      %93 = vector.shape_cast %92 : vector<1x512x128xbf16> to vector<512x128xbf16>
      %c0_43 = arith.constant 0 : index
      %c640 = arith.constant 640 : index
      %c0_44 = arith.constant 0 : index
      %94 = vector.load %arg7[%c0_43, %c640, %c0_44] : memref<1x1160x1152xbf16, #tpu.memory_space<vmem>>, vector<1x512x1152xbf16>
      %95 = vector.shape_cast %94 : vector<1x512x1152xbf16> to vector<512x1152xbf16>
      %c0_45 = arith.constant 0 : index
      %c1152 = arith.constant 1152 : index
      %c0_46 = arith.constant 0 : index
      %96 = vector.load %arg7[%c0_45, %c1152, %c0_46] : memref<1x1160x1152xbf16, #tpu.memory_space<vmem>>, vector<1x1x512xbf16>
      %97 = vector.shape_cast %96 : vector<1x1x512xbf16> to vector<1x512xbf16>
      %c0_47 = arith.constant 0 : index
      %c1152_48 = arith.constant 1152 : index
      %c512_49 = arith.constant 512 : index
      %98 = vector.load %arg7[%c0_47, %c1152_48, %c512_49] : memref<1x1160x1152xbf16, #tpu.memory_space<vmem>>, vector<1x1x512xbf16>
      %99 = vector.shape_cast %98 : vector<1x1x512xbf16> to vector<1x512xbf16>
      %c0_50 = arith.constant 0 : index
      %c1152_51 = arith.constant 1152 : index
      %c1024_52 = arith.constant 1024 : index
      %100 = vector.load %arg7[%c0_50, %c1152_51, %c1024_52] : memref<1x1160x1152xbf16, #tpu.memory_space<vmem>>, vector<1x1x128xbf16>
      %101 = vector.shape_cast %100 : vector<1x1x128xbf16> to vector<1x128xbf16>
      %c0_53 = arith.constant 0 : index
      %c1153 = arith.constant 1153 : index
      %c0_54 = arith.constant 0 : index
      %102 = vector.load %arg7[%c0_53, %c1153, %c0_54] : memref<1x1160x1152xbf16, #tpu.memory_space<vmem>>, vector<1x1x1152xbf16>
      %103 = vector.shape_cast %102 : vector<1x1x1152xbf16> to vector<1x1152xbf16>
      %cst_55 = arith.constant dense<0.000000e+00> : vector<8x256xf32>
      %104 = tpu.matmul %6, %67, %cst_55 {dimension_numbers = #tpu.dot_dimension_numbers<[1], [0], [0], [1], [0, 0, 1, 1], [], []>} : vector<8x6xf32>, vector<6x256xf32>, vector<8x256xf32> -> vector<8x256xf32>
      %cst_56 = arith.constant dense<0.000000e+00> : vector<8x256xf32>
      %105 = tpu.matmul %11, %67, %cst_56 {dimension_numbers = #tpu.dot_dimension_numbers<[1], [0], [0], [1], [0, 0, 1, 1], [], []>} : vector<8x6xf32>, vector<6x256xf32>, vector<8x256xf32> -> vector<8x256xf32>
      %106 = tpu.concatenate %104, %87, %105 in 1 : vector<8x256xf32>, vector<8x128xf32>, vector<8x256xf32> -> vector<8x640xf32>
      %107 = arith.truncf %106 : vector<8x640xf32> to vector<8x640xbf16>
      %cst_57 = arith.constant dense<0.000000e+00> : vector<8x512xf32>
      %108 = tpu.matmul %107, %89, %cst_57 {dimension_numbers = #tpu.dot_dimension_numbers<[1], [0], [0], [1], [0, 0, 1, 1], [], []>} : vector<8x640xbf16>, vector<640x512xbf16>, vector<8x512xf32> -> vector<8x512xf32>
      %109 = arith.extf %97 : vector<1x512xbf16> to vector<1x512xf32>
      %110 = vector.broadcast %109 : vector<1x512xf32> to vector<8x512xf32>
      %111 = arith.addf %108, %110 : vector<8x512xf32>
      %cst_58 = arith.constant 0.000000e+00 : f32
      %112 = vector.broadcast %cst_58 : f32 to vector<8x512xf32>
      %113 = arith.maximumf %111, %112 : vector<8x512xf32>
      %114 = arith.truncf %113 : vector<8x512xf32> to vector<8x512xbf16>
      %cst_59 = arith.constant dense<0.000000e+00> : vector<8x1152xf32>
      %115 = tpu.matmul %114, %95, %cst_59 {dimension_numbers = #tpu.dot_dimension_numbers<[1], [0], [0], [1], [0, 0, 1, 1], [], []>} : vector<8x512xbf16>, vector<512x1152xbf16>, vector<8x1152xf32> -> vector<8x1152xf32>
      %116 = arith.extf %103 : vector<1x1152xbf16> to vector<1x1152xf32>
      %117 = vector.broadcast %116 : vector<1x1152xf32> to vector<8x1152xf32>
      %118 = arith.addf %115, %117 : vector<8x1152xf32>
      %cst_60 = arith.constant 0.000000e+00 : f32
      %119 = vector.broadcast %cst_60 : f32 to vector<8x1152xf32>
      %120 = arith.maximumf %118, %119 : vector<8x1152xf32>
      %121 = vector.extract_strided_slice %120 {offsets = [0, 0], sizes = [8, 512], strides = [1, 1]} : vector<8x1152xf32> to vector<8x512xf32>
      %122 = vector.extract_strided_slice %120 {offsets = [0, 512], sizes = [8, 128], strides = [1, 1]} : vector<8x1152xf32> to vector<8x128xf32>
      %123 = vector.extract_strided_slice %120 {offsets = [0, 640], sizes = [8, 512], strides = [1, 1]} : vector<8x1152xf32> to vector<8x512xf32>
      %cst_61 = arith.constant dense<0.000000e+00> : vector<6x512xf32>
      %124 = tpu.matmul %16, %121, %cst_61 {dimension_numbers = #tpu.dot_dimension_numbers<[1], [0], [0], [1], [0, 0, 1, 1], [], []>} : vector<6x8xf32>, vector<8x512xf32>, vector<6x512xf32> -> vector<6x512xf32>
      %cst_62 = arith.constant dense<0.000000e+00> : vector<6x512xf32>
      %125 = tpu.matmul %21, %123, %cst_62 {dimension_numbers = #tpu.dot_dimension_numbers<[1], [0], [0], [1], [0, 0, 1, 1], [], []>} : vector<6x8xf32>, vector<8x512xf32>, vector<6x512xf32> -> vector<6x512xf32>
      %126 = arith.addf %124, %125 : vector<6x512xf32>
      %127 = vector.broadcast %28 : vector<6x1xf32> to vector<6x512xf32>
      %128 = arith.mulf %126, %127 : vector<6x512xf32>
      %129 = arith.truncf %128 : vector<6x512xf32> to vector<6x512xbf16>
      %cst_63 = arith.constant dense<0.000000e+00> : vector<6x512xf32>
      %130 = tpu.matmul %129, %91, %cst_63 {dimension_numbers = #tpu.dot_dimension_numbers<[1], [0], [0], [1], [0, 0, 1, 1], [], []>} : vector<6x512xbf16>, vector<512x512xbf16>, vector<6x512xf32> -> vector<6x512xf32>
      %131 = arith.extf %99 : vector<1x512xbf16> to vector<1x512xf32>
      %132 = vector.broadcast %131 : vector<1x512xf32> to vector<6x512xf32>
      %133 = arith.addf %130, %132 : vector<6x512xf32>
      %cst_64 = arith.constant 0.000000e+00 : f32
      %134 = vector.broadcast %cst_64 : f32 to vector<6x512xf32>
      %135 = arith.maximumf %133, %134 : vector<6x512xf32>
      %136 = arith.truncf %135 : vector<6x512xf32> to vector<6x512xbf16>
      %cst_65 = arith.constant dense<0.000000e+00> : vector<6x128xf32>
      %137 = tpu.matmul %136, %93, %cst_65 {dimension_numbers = #tpu.dot_dimension_numbers<[1], [0], [0], [1], [0, 0, 1, 1], [], []>} : vector<6x512xbf16>, vector<512x128xbf16>, vector<6x128xf32> -> vector<6x128xf32>
      %138 = arith.extf %101 : vector<1x128xbf16> to vector<1x128xf32>
      %139 = vector.broadcast %138 : vector<1x128xf32> to vector<6x128xf32>
      %140 = arith.addf %137, %139 : vector<6x128xf32>
      %cst_66 = arith.constant 0.000000e+00 : f32
      %141 = vector.broadcast %cst_66 : f32 to vector<6x128xf32>
      %142 = arith.maximumf %140, %141 : vector<6x128xf32>
      %c0_67 = arith.constant 0 : index
      %c0_68 = arith.constant 0 : index
      %143 = vector.load %arg9[%c0_67, %c0_68] : memref<6x128xf32, #tpu.memory_space<vmem>>, vector<6x128xf32>
      tpu.vector_store %arg9[%c0_67, %c0_68], %142 {strides = array<i32>} : memref<6x128xf32, #tpu.memory_space<vmem>>, vector<6x128xf32>,
      %c0_69 = arith.constant 0 : index
      %c0_70 = arith.constant 0 : index
      %144 = vector.load %arg10[%c0_69, %c0_70] : memref<8x128xf32, #tpu.memory_space<vmem>>, vector<8x128xf32>
      tpu.vector_store %arg10[%c0_69, %c0_70], %122 {strides = array<i32>} : memref<8x128xf32, #tpu.memory_space<vmem>>, vector<8x128xf32>,
    } else {
    }
    %c0_i32_9 = arith.constant 0 : i32
    %32 = arith.cmpi sgt, %arg0, %c0_i32_9 : i32
    %33 = arith.extui %32 : i1 to i32
    %c0_i32_10 = arith.constant 0 : i32
    %34 = arith.cmpi ne, %33, %c0_i32_10 : i32
    scf.if %34 {
      %c0_12 = arith.constant 0 : index
      %c0_13 = arith.constant 0 : index
      %38 = vector.load %arg9[%c0_12, %c0_13] : memref<6x128xf32, #tpu.memory_space<vmem>>, vector<6x128xf32>
      %c0_14 = arith.constant 0 : index
      %c0_15 = arith.constant 0 : index
      %39 = vector.load %arg10[%c0_14, %c0_15] : memref<8x128xf32, #tpu.memory_space<vmem>>, vector<8x128xf32>
      %c0_16 = arith.constant 0 : index
      %c0_17 = arith.constant 0 : index
      %c0_18 = arith.constant 0 : index
      %40 = vector.load %arg7[%c0_16, %c0_17, %c0_18] : memref<1x1160x1152xbf16, #tpu.memory_space<vmem>>, vector<1x384x512xbf16>
      %41 = vector.shape_cast %40 : vector<1x384x512xbf16> to vector<384x512xbf16>
      %c0_19 = arith.constant 0 : index
      %c0_20 = arith.constant 0 : index
      %c512 = arith.constant 512 : index
      %42 = vector.load %arg7[%c0_19, %c0_20, %c512] : memref<1x1160x1152xbf16, #tpu.memory_space<vmem>>, vector<1x512x512xbf16>
      %43 = vector.shape_cast %42 : vector<1x512x512xbf16> to vector<512x512xbf16>
      %c0_21 = arith.constant 0 : index
      %c0_22 = arith.constant 0 : index
      %c1024 = arith.constant 1024 : index
      %44 = vector.load %arg7[%c0_21, %c0_22, %c1024] : memref<1x1160x1152xbf16, #tpu.memory_space<vmem>>, vector<1x512x128xbf16>
      %45 = vector.shape_cast %44 : vector<1x512x128xbf16> to vector<512x128xbf16>
      %c0_23 = arith.constant 0 : index
      %c512_24 = arith.constant 512 : index
      %c0_25 = arith.constant 0 : index
      %46 = vector.load %arg7[%c0_23, %c512_24, %c0_25] : memref<1x1160x1152xbf16, #tpu.memory_space<vmem>>, vector<1x512x1152xbf16>
      %47 = vector.shape_cast %46 : vector<1x512x1152xbf16> to vector<512x1152xbf16>
      %c0_26 = arith.constant 0 : index
      %c1024_27 = arith.constant 1024 : index
      %c0_28 = arith.constant 0 : index
      %48 = vector.load %arg7[%c0_26, %c1024_27, %c0_28] : memref<1x1160x1152xbf16, #tpu.memory_space<vmem>>, vector<1x1x512xbf16>
      %49 = vector.shape_cast %48 : vector<1x1x512xbf16> to vector<1x512xbf16>
      %c0_29 = arith.constant 0 : index
      %c1024_30 = arith.constant 1024 : index
      %c512_31 = arith.constant 512 : index
      %50 = vector.load %arg7[%c0_29, %c1024_30, %c512_31] : memref<1x1160x1152xbf16, #tpu.memory_space<vmem>>, vector<1x1x512xbf16>
      %51 = vector.shape_cast %50 : vector<1x1x512xbf16> to vector<1x512xbf16>
      %c0_32 = arith.constant 0 : index
      %c1024_33 = arith.constant 1024 : index
      %c1024_34 = arith.constant 1024 : index
      %52 = vector.load %arg7[%c0_32, %c1024_33, %c1024_34] : memref<1x1160x1152xbf16, #tpu.memory_space<vmem>>, vector<1x1x128xbf16>
      %53 = vector.shape_cast %52 : vector<1x1x128xbf16> to vector<1x128xbf16>
      %c0_35 = arith.constant 0 : index
      %c1025 = arith.constant 1025 : index
      %c0_36 = arith.constant 0 : index
      %54 = vector.load %arg7[%c0_35, %c1025, %c0_36] : memref<1x1160x1152xbf16, #tpu.memory_space<vmem>>, vector<1x1x1152xbf16>
      %55 = vector.shape_cast %54 : vector<1x1x1152xbf16> to vector<1x1152xbf16>
      %cst_37 = arith.constant dense<0.000000e+00> : vector<8x128xf32>
      %56 = tpu.matmul %6, %38, %cst_37 {dimension_numbers = #tpu.dot_dimension_numbers<[1], [0], [0], [1], [0, 0, 1, 1], [], []>} : vector<8x6xf32>, vector<6x128xf32>, vector<8x128xf32> -> vector<8x128xf32>
      %cst_38 = arith.constant dense<0.000000e+00> : vector<8x128xf32>
      %57 = tpu.matmul %11, %38, %cst_38 {dimension_numbers = #tpu.dot_dimension_numbers<[1], [0], [0], [1], [0, 0, 1, 1], [], []>} : vector<8x6xf32>, vector<6x128xf32>, vector<8x128xf32> -> vector<8x128xf32>
      %58 = tpu.concatenate %56, %39, %57 in 1 : vector<8x128xf32>, vector<8x128xf32>, vector<8x128xf32> -> vector<8x384xf32>
      %59 = arith.truncf %58 : vector<8x384xf32> to vector<8x384xbf16>
      %cst_39 = arith.constant dense<0.000000e+00> : vector<8x512xf32>
      %60 = tpu.matmul %59, %41, %cst_39 {dimension_numbers = #tpu.dot_dimension_numbers<[1], [0], [0], [1], [0, 0, 1, 1], [], []>} : vector<8x384xbf16>, vector<384x512xbf16>, vector<8x512xf32> -> vector<8x512xf32>
      %61 = arith.extf %49 : vector<1x512xbf16> to vector<1x512xf32>
      %62 = vector.broadcast %61 : vector<1x512xf32> to vector<8x512xf32>
      %63 = arith.addf %60, %62 : vector<8x512xf32>
      %cst_40 = arith.constant 0.000000e+00 : f32
      %64 = vector.broadcast %cst_40 : f32 to vector<8x512xf32>
      %65 = arith.maximumf %63, %64 : vector<8x512xf32>
      %66 = arith.truncf %65 : vector<8x512xf32> to vector<8x512xbf16>
      %cst_41 = arith.constant dense<0.000000e+00> : vector<8x1152xf32>
      %67 = tpu.matmul %66, %47, %cst_41 {dimension_numbers = #tpu.dot_dimension_numbers<[1], [0], [0], [1], [0, 0, 1, 1], [], []>} : vector<8x512xbf16>, vector<512x1152xbf16>, vector<8x1152xf32> -> vector<8x1152xf32>
      %68 = arith.extf %55 : vector<1x1152xbf16> to vector<1x1152xf32>
      %69 = vector.broadcast %68 : vector<1x1152xf32> to vector<8x1152xf32>
      %70 = arith.addf %67, %69 : vector<8x1152xf32>
      %cst_42 = arith.constant 0.000000e+00 : f32
      %71 = vector.broadcast %cst_42 : f32 to vector<8x1152xf32>
      %72 = arith.maximumf %70, %71 : vector<8x1152xf32>
      %73 = vector.extract_strided_slice %72 {offsets = [0, 0], sizes = [8, 512], strides = [1, 1]} : vector<8x1152xf32> to vector<8x512xf32>
      %74 = vector.extract_strided_slice %72 {offsets = [0, 512], sizes = [8, 128], strides = [1, 1]} : vector<8x1152xf32> to vector<8x128xf32>
      %75 = vector.extract_strided_slice %72 {offsets = [0, 640], sizes = [8, 512], strides = [1, 1]} : vector<8x1152xf32> to vector<8x512xf32>
      %cst_43 = arith.constant dense<0.000000e+00> : vector<6x512xf32>
      %76 = tpu.matmul %16, %73, %cst_43 {dimension_numbers = #tpu.dot_dimension_numbers<[1], [0], [0], [1], [0, 0, 1, 1], [], []>} : vector<6x8xf32>, vector<8x512xf32>, vector<6x512xf32> -> vector<6x512xf32>
      %cst_44 = arith.constant dense<0.000000e+00> : vector<6x512xf32>
      %77 = tpu.matmul %21, %75, %cst_44 {dimension_numbers = #tpu.dot_dimension_numbers<[1], [0], [0], [1], [0, 0, 1, 1], [], []>} : vector<6x8xf32>, vector<8x512xf32>, vector<6x512xf32> -> vector<6x512xf32>
      %78 = arith.addf %76, %77 : vector<6x512xf32>
      %79 = vector.broadcast %28 : vector<6x1xf32> to vector<6x512xf32>
      %80 = arith.mulf %78, %79 : vector<6x512xf32>
      %81 = arith.truncf %80 : vector<6x512xf32> to vector<6x512xbf16>
      %cst_45 = arith.constant dense<0.000000e+00> : vector<6x512xf32>
      %82 = tpu.matmul %81, %43, %cst_45 {dimension_numbers = #tpu.dot_dimension_numbers<[1], [0], [0], [1], [0, 0, 1, 1], [], []>} : vector<6x512xbf16>, vector<512x512xbf16>, vector<6x512xf32> -> vector<6x512xf32>
      %83 = arith.extf %51 : vector<1x512xbf16> to vector<1x512xf32>
      %84 = vector.broadcast %83 : vector<1x512xf32> to vector<6x512xf32>
      %85 = arith.addf %82, %84 : vector<6x512xf32>
      %cst_46 = arith.constant 0.000000e+00 : f32
      %86 = vector.broadcast %cst_46 : f32 to vector<6x512xf32>
      %87 = arith.maximumf %85, %86 : vector<6x512xf32>
      %88 = arith.truncf %87 : vector<6x512xf32> to vector<6x512xbf16>
      %cst_47 = arith.constant dense<0.000000e+00> : vector<6x128xf32>
      %89 = tpu.matmul %88, %45, %cst_47 {dimension_numbers = #tpu.dot_dimension_numbers<[1], [0], [0], [1], [0, 0, 1, 1], [], []>} : vector<6x512xbf16>, vector<512x128xbf16>, vector<6x128xf32> -> vector<6x128xf32>
      %90 = arith.extf %53 : vector<1x128xbf16> to vector<1x128xf32>
      %91 = vector.broadcast %90 : vector<1x128xf32> to vector<6x128xf32>
      %92 = arith.addf %89, %91 : vector<6x128xf32>
      %cst_48 = arith.constant 0.000000e+00 : f32
      %93 = vector.broadcast %cst_48 : f32 to vector<6x128xf32>
      %94 = arith.maximumf %92, %93 : vector<6x128xf32>
      %c0_49 = arith.constant 0 : index
      %c0_50 = arith.constant 0 : index
      %95 = vector.load %arg9[%c0_49, %c0_50] : memref<6x128xf32, #tpu.memory_space<vmem>>, vector<6x128xf32>
      tpu.vector_store %arg9[%c0_49, %c0_50], %94 {strides = array<i32>} : memref<6x128xf32, #tpu.memory_space<vmem>>, vector<6x128xf32>,
      %c0_51 = arith.constant 0 : index
      %c0_52 = arith.constant 0 : index
      %96 = vector.load %arg10[%c0_51, %c0_52] : memref<8x128xf32, #tpu.memory_space<vmem>>, vector<8x128xf32>
      tpu.vector_store %arg10[%c0_51, %c0_52], %74 {strides = array<i32>} : memref<8x128xf32, #tpu.memory_space<vmem>>, vector<8x128xf32>,
    } else {
    }
    %c4_i32 = arith.constant 4 : i32
    %35 = arith.cmpi eq, %arg0, %c4_i32 : i32
    %36 = arith.extui %35 : i1 to i32
    %c0_i32_11 = arith.constant 0 : i32
    %37 = arith.cmpi ne, %36, %c0_i32_11 : i32
    scf.if %37 {
      %c272 = arith.constant 272 : index
      %c0_12 = arith.constant 0 : index
      %38 = vector.load %arg6[%c272, %c0_12] : memref<664x128xbf16, #tpu.memory_space<vmem>>, vector<128x128xbf16>
      %c400 = arith.constant 400 : index
      %c0_13 = arith.constant 0 : index
      %39 = vector.load %arg6[%c400, %c0_13] : memref<664x128xbf16, #tpu.memory_space<vmem>>, vector<128x128xbf16>
      %c528 = arith.constant 528 : index
      %c0_14 = arith.constant 0 : index
      %40 = vector.load %arg6[%c528, %c0_14] : memref<664x128xbf16, #tpu.memory_space<vmem>>, vector<128x128xbf16>
      %c656 = arith.constant 656 : index
      %c0_15 = arith.constant 0 : index
      %41 = vector.load %arg6[%c656, %c0_15] : memref<664x128xbf16, #tpu.memory_space<vmem>>, vector<1x128xbf16>
      %c657 = arith.constant 657 : index
      %c0_16 = arith.constant 0 : index
      %42 = vector.load %arg6[%c657, %c0_16] : memref<664x128xbf16, #tpu.memory_space<vmem>>, vector<1x128xbf16>
      %c658 = arith.constant 658 : index
      %c0_17 = arith.constant 0 : index
      %43 = vector.load %arg6[%c658, %c0_17] : memref<664x128xbf16, #tpu.memory_space<vmem>>, vector<1x128xbf16>
      %c0_18 = arith.constant 0 : index
      %c0_19 = arith.constant 0 : index
      %44 = vector.load %arg10[%c0_18, %c0_19] : memref<8x128xf32, #tpu.memory_space<vmem>>, vector<8x128xf32>
      %45 = arith.truncf %44 : vector<8x128xf32> to vector<8x128xbf16>
      %cst_20 = arith.constant dense<0.000000e+00> : vector<8x128xf32>
      %46 = tpu.matmul %45, %38, %cst_20 {dimension_numbers = #tpu.dot_dimension_numbers<[1], [0], [0], [1], [0, 0, 1, 1], [], []>} : vector<8x128xbf16>, vector<128x128xbf16>, vector<8x128xf32> -> vector<8x128xf32>
      %47 = arith.extf %41 : vector<1x128xbf16> to vector<1x128xf32>
      %48 = vector.broadcast %47 : vector<1x128xf32> to vector<8x128xf32>
      %49 = arith.addf %46, %48 : vector<8x128xf32>
      %cst_21 = arith.constant 0.000000e+00 : f32
      %50 = vector.broadcast %cst_21 : f32 to vector<8x128xf32>
      %51 = arith.cmpf ogt, %49, %50 : vector<8x128xf32>
      %cst_22 = arith.constant 0.00999999977 : f32
      %52 = vector.broadcast %cst_22 : f32 to vector<8x128xf32>
      %53 = arith.mulf %52, %49 : vector<8x128xf32>
      %54 = arith.select %51, %49, %53 : vector<8x128xi1>, vector<8x128xf32>
      %55 = arith.truncf %54 : vector<8x128xf32> to vector<8x128xbf16>
      %cst_23 = arith.constant dense<0.000000e+00> : vector<8x128xf32>
      %56 = tpu.matmul %55, %39, %cst_23 {dimension_numbers = #tpu.dot_dimension_numbers<[1], [0], [0], [1], [0, 0, 1, 1], [], []>} : vector<8x128xbf16>, vector<128x128xbf16>, vector<8x128xf32> -> vector<8x128xf32>
      %57 = arith.extf %42 : vector<1x128xbf16> to vector<1x128xf32>
      %58 = vector.broadcast %57 : vector<1x128xf32> to vector<8x128xf32>
      %59 = arith.addf %56, %58 : vector<8x128xf32>
      %cst_24 = arith.constant 0.000000e+00 : f32
      %60 = vector.broadcast %cst_24 : f32 to vector<8x128xf32>
      %61 = arith.cmpf ogt, %59, %60 : vector<8x128xf32>
      %cst_25 = arith.constant 0.00999999977 : f32
      %62 = vector.broadcast %cst_25 : f32 to vector<8x128xf32>
      %63 = arith.mulf %62, %59 : vector<8x128xf32>
      %64 = arith.select %61, %59, %63 : vector<8x128xi1>, vector<8x128xf32>
      %65 = arith.truncf %64 : vector<8x128xf32> to vector<8x128xbf16>
      %cst_26 = arith.constant dense<0.000000e+00> : vector<8x128xf32>
      %66 = tpu.matmul %65, %40, %cst_26 {dimension_numbers = #tpu.dot_dimension_numbers<[1], [0], [0], [1], [0, 0, 1, 1], [], []>} : vector<8x128xbf16>, vector<128x128xbf16>, vector<8x128xf32> -> vector<8x128xf32>
      %67 = arith.extf %43 : vector<1x128xbf16> to vector<1x128xf32>
      %68 = vector.broadcast %67 : vector<1x128xf32> to vector<8x128xf32>
      %69 = arith.addf %66, %68 : vector<8x128xf32>
      %c0_27 = arith.constant 0 : index
      %c0_28 = arith.constant 0 : index
      %70 = vector.load %arg8[%c0_27, %c0_28] : memref<8x128xf32, #tpu.memory_space<vmem>>, vector<8x128xf32>
      tpu.vector_store %arg8[%c0_27, %c0_28], %69 {strides = array<i32>} : memref<8x128xf32, #tpu.memory_space<vmem>>, vector<8x128xf32>,
    } else {
    }
    return
  }
  func.func @transform_0(%arg0: i32) -> (i32, i32) {
    %c0_i32 = arith.constant 0 : i32
    %c0_i32_0 = arith.constant 0 : i32
    %c0_i32_1 = arith.constant 0 : i32
    return %c0_i32, %c0_i32_0 : i32, i32
  }
  func.func @transform_1(%arg0: i32) -> (i32, i32) {
    %c0_i32 = arith.constant 0 : i32
    %c0_i32_0 = arith.constant 0 : i32
    %c0_i32_1 = arith.constant 0 : i32
    return %c0_i32, %c0_i32_0 : i32, i32
  }
  func.func @transform_2(%arg0: i32) -> (i32, i32) {
    %c0_i32 = arith.constant 0 : i32
    %c0_i32_0 = arith.constant 0 : i32
    %c0_i32_1 = arith.constant 0 : i32
    return %c0_i32, %c0_i32_0 : i32, i32
  }
  func.func @transform_3(%arg0: i32) -> (i32, i32) {
    %c0_i32 = arith.constant 0 : i32
    %c0_i32_0 = arith.constant 0 : i32
    %c0_i32_1 = arith.constant 0 : i32
    return %c0_i32, %c0_i32_0 : i32, i32
  }
  func.func @transform_4(%arg0: i32) -> (i32, i32) {
    %c0_i32 = arith.constant 0 : i32
    %c0_i32_0 = arith.constant 0 : i32
    %c0_i32_1 = arith.constant 0 : i32
    return %c0_i32, %c0_i32_0 : i32, i32
  }
  func.func @transform_5(%arg0: i32) -> (i32, i32) {
    %c0_i32 = arith.constant 0 : i32
    %c0_i32_0 = arith.constant 0 : i32
    %c0_i32_1 = arith.constant 0 : i32
    return %c0_i32, %c0_i32_0 : i32, i32
  }
  func.func @transform_6(%arg0: i32) -> (i32, i32, i32) {
    %c0_i32 = arith.constant 0 : i32
    %c0_i32_0 = arith.constant 0 : i32
    %c0_i32_1 = arith.constant 0 : i32
    return %arg0, %c0_i32, %c0_i32_0 : i32, i32, i32
  }
  func.func @transform_7(%arg0: i32) -> (i32, i32) {
    %c0_i32 = arith.constant 0 : i32
    %c0_i32_0 = arith.constant 0 : i32
    %c0_i32_1 = arith.constant 0 : i32
    return %c0_i32, %c0_i32_0 : i32, i32
  }
}

</mosaic_0001>

<bundles_post_ra>
// kernel: graphnet_forward.1
= control target key start
LH: loop header
LB: loop body
LE: loop exit
PB: predicated region body
PF: predicated region fallthrough
CT: control target
= control target key end

     0   :  { %s17137_s0 = inlined_call_operand.vmem [shape: f32[192,8], index: 0, kind: input, shape index: {}]   ;;  %s17138_s1 = inlined_call_operand.vmem [shape: f32[6,128], index: 1, kind: input, shape index: {}]   ;;  %s17139_s2 = inlined_call_operand.vmem [shape: s32[8,4], index: 2, kind: input, shape index: {}]   ;;  %s17140_s3 = inlined_call_operand.vmem [shape: s32[4,8], index: 3, kind: input, shape index: {}]   ;;  %s17141_s4 = inlined_call_operand.hbm [shape: f32[16,128], index: 4, kind: input, shape index: {}]   ;;  %s17142_s5 = inlined_call_operand.hbm [shape: bf16[664,128], index: 5, kind: input, shape index: {}]   ;;  %s17143_s6 = inlined_call_operand.hbm [shape: bf16[5,1160,1152], index: 6, kind: input, shape index: {}]   ;;  %s17144_s7 = inlined_call_operand.hbm [shape: f32[8,128], index: 7, kind: output, shape index: {}]  }
   0x1   :  { %17148 = sst [smem:[#allocation15_spill]] %s17141_s4 }
   0x2   :  { %12 = vsyncpa [#allocation5], 0 }
   0x3   :  { %13 = vsyncpa [#allocation8], 0 }
   0x4   :  { %14 = vsyncpa [#allocation6], 0  ;;  %s15253_s24 = smov 0   ;;  %s15255_s25 = smov 0  }
   0x5   :  { %s15257_s26 = smov 0   ;;  %s15259_s27 = smov 0  }
   0x6 LB: > { %s15272_s28 = sadd.s32 4294967295, %s15188_s27   ;;  %s15275_s29 = sadd.s32 1, %s15188_s27   ;;  %s15188_s27 = sphi %s15259_s27, %s17165_s27   ;;  %s15184_s26 = sphi %s15257_s26, %s17164_s26   ;;  %s15180_s25 = sphi %s15255_s25, %s17163_s25   ;;  %s15176_s24 = sphi %s15253_s24, %s17162_s24  }
   0x7   : > { %s150_s30 = ssub.s32 %s15188_s27, %s15275_s29  ;;  %s153_s8 = sadd.s32 1, %s15184_s26 }
   0x8   : > { %p151_p0 = scmp.eq.s32.totalorder %s150_s30, 0  ;;  %p160_p1 = scmp.ne.s32.totalorder %s15184_s26, %s15180_s25 }
   0x9   : > { %p161_p2 = scmp.eq.s32.totalorder %s15188_s27, 0  ;;  %p166_p3 = scmp.ne.s32.totalorder %s15180_s25, %s15176_s24 }
   0xa   : > { %s15285_s9 = scalar_select %p151_p0, %s15184_s26, %s153_s8  }
   0xb   : > { %p15287_p4 = por %p161_p2, %p160_p1  ;;  %p17145_p5 = scmp.eq.s32.totalorder %s15272_s28, 0 }
   0xc   : > { %p11576_p6 = scmp.ge.s32.totalorder %s15188_s27, 1  ;;  %p198_p7 = scmp.lt.s32.totalorder %s15188_s27, 6 }
   0xd   : > { %p15296_p8 = por %p17145_p5, %p166_p3  ;;  %s15190_s13 = smov [#allocation4]  }
   0xe   : > { %p15301_p10 = pnand %p11576_p6, %p198_p7  ;;  %s222_s14 = sshll.u32 %s15190_s13, 4  ;;  %s223_s14 = int_to_ptr.vmem [resolvable:$true] %s222_s14 }
   0xf   : > { %s17150_s11 = scalar_select %p15296_p8, 1, 0 }
  0x10   : > { %s17151_s12 = scalar_select %p15301_p10, 1, 0 }
  0x11   : > { %p13255_p11 = pneg %p15301_p10  ;;  %p13268_p13 = scmp.lt.s32.totalorder %s15188_s27, 5 }
  0x12   : > { %s15049_s17 = scalar_lea.vmem %s223_s14, 256  ;;  %p15057_p7 = scmp.lt.s32.totalorder %s223_s14, %s223_s14 }
  0x13   : > { %p15309_p12 = pnand %p13255_p11, %p17145_p5  ;;  %p15316_p0 = pnand %p13268_p13, %p15287_p4 }
  0x14   : > { %p15050_p2 = scmp.ne.s32.totalorder %s223_s14, %s15049_s17  ;;  %p15058_p11 = scmp.lt.s32.totalorder %s15049_s17, %s15049_s17 }
  0x15   : > { %p15040_p1 = pneg %p15309_p12 }
  0x16   : > { %p15059_p9 = por %p15058_p11, %p15057_p7 }
  0x17   : > { %p15052_p3 = pnand %p15050_p2, %p15040_p1 }
  0x19   : > { %p15053_p6 = pneg %p15052_p3 }
  0x1b   : > { %p15060_p5 = pnand %p15059_p9, %p15053_p6 }
  0x1d   : > { %15063 = shalt.err (!%p15060_p5)
}
  0x1e   : > { %s15191_s18 = smov 128   ;;  %s15192_s19 = smov 8  }
  0x1f   : > { %s17154_s4 = sld [smem:[#allocation15_spill]]  ;;  %s15193_s22 = smov [#allocation7]  }
  0x20   : > { %s235_s23 = sshll.u32 %s15193_s22, 4  ;;  %s236_s23 = int_to_ptr.vmem [resolvable:$true] %s235_s23 }
  0x21   : > { %s15075_s24 = scalar_lea.vmem %s236_s23, 5312  ;;  %p15083_p9 = scmp.lt.s32.totalorder %s236_s23, %s236_s23 }
  0x22   : > { %p15076_p4 = scmp.ne.s32.totalorder %s236_s23, %s15075_s24  ;;  %p15084_p5 = scmp.lt.s32.totalorder %s15075_s24, %s15075_s24 }
  0x24   : > { %p15078_p13 = pnand %p15076_p4, %p15040_p1  ;;  %p15085_p3 = por %p15084_p5, %p15083_p9 }
  0x25   : > { %13258 = dma.hbm_to_vmem [thread:$0]  (!%p15309_p12), %s17154_s4, 256, %s223_s14, [#allocation5], %s15191_s18, %s15191_s18, %s15192_s19  }
  0x26   : > { %p15079_p2 = pneg %p15078_p13 }
  0x28   : > { %p15086_p6 = pnand %p15085_p3, %p15079_p2 }
  0x2a   : > { %15089 = shalt.err (!%p15086_p6)
}
  0x2b   : > { %s15194_s30 = smov 64   ;;  %s15195_s8 = smov 4  }
  0x2c   : > { %13261 = dma.hbm_to_vmem [thread:$0]  (!%p15309_p12), %s17142_s5, 5312, %s236_s23, [#allocation8], %s15194_s30, %s15194_s30, %s15195_s8  }
  0x2d   : > { %s249_s14 = sand.u32 1, %s15188_s27   ;;  %s251_s17 = sand.u32 1, %s15184_s26  }
  0x2e   : > { %s13238_s18 = smul.u32 5220, %s251_s17  ;;  %s15348_s15 = scalar_lea.sflag [#allocation5], %s249_s14 }
  0x2f   : > { %s13239_s19 = smul.u32 83520, %s15188_s27  ;;  %p15092_p1 = pneg %p15316_p0 }
  0x30   : > { %s253_s24 = scalar_lea.vmem [#allocation9], %s13238_s18  ;;  %s15095_s30 = scalar_lea.hbm %s17143_s6, 417600 }
  0x31   : > { %s15344_s22 = scalar_lea.hbm %s17143_s6, %s13239_s19  ;;  %s260_s4 = sshll.u32 %s253_s24, 4  ;;  %s15346_s4 = int_to_ptr.vmem [resolvable:$true] %s260_s4 }
  0x32   : > { %s15090_s10 = scalar_lea.hbm %s15344_s22, 83520  ;;  %p15096_p4 = scmp.lt.s32.totalorder %s15344_s22, %s17143_s6 }
  0x33   : > { %p15091_p12 = scmp.ne.s32.totalorder %s15344_s22, %s15090_s10  ;;  %p15097_p13 = scmp.lt.s32.totalorder %s15095_s30, %s15090_s10 }
  0x35   : > { %p15093_p7 = pnand %p15092_p1, %p15091_p12  ;;  %p15098_p2 = por %p15097_p13, %p15096_p4 }
  0x37   : > { %p15094_p11 = pneg %p15093_p7 }
  0x39   : > { %p15099_p9 = pnand %p15098_p2, %p15094_p11 }
  0x3b   : > { %15102 = shalt.err (!%p15099_p9)
}
  0x3c   : > { %s15103_s14 = scalar_lea.vmem %s15346_s4, 83520  ;;  %s15196_s17 = smov [#allocation9]  }
  0x3d   : > { %p15104_p5 = scmp.ne.s32.totalorder %s15346_s4, %s15103_s14  ;;  %s15108_s18 = sshll.u32 %s15196_s17, 4  ;;  %s15109_s18 = int_to_ptr.vmem [resolvable:$false] %s15108_s18 }
  0x3e   : > { %s15110_s19 = scalar_lea.vmem %s15109_s18, 167040  ;;  %p15111_p12 = scmp.lt.s32.totalorder %s15346_s4, %s15109_s18 }
  0x3f   : > { %p15106_p3 = pnand %p15104_p5, %p15092_p1  ;;  %p15112_p7 = scmp.lt.s32.totalorder %s15110_s19, %s15103_s14 }
  0x41   : > { %p15107_p6 = pneg %p15106_p3  ;;  %p15113_p8 = por %p15112_p7, %p15111_p12 }
  0x43   : > { %p15114_p10 = pnand %p15113_p8, %p15107_p6 }
  0x45   : > { %15117 = shalt.err (!%p15114_p10)
}
  0x46   : > { %s15197_s20 = smov 576   ;;  %s15198_s21 = smov 36  }
  0x47   : > { %13265 = dma.hbm_to_vmem [thread:$0]  (!%p15316_p0), %s15344_s22, 83520, %s15346_s4, %s15348_s15, %s15197_s20, %s15197_s20, %s15198_s21  }
  0x48   : > { %p17155_p1 = scmp.ne.s32.totalorder %s17151_s12, 0 }
  0x49   : > { %p17156_p11 = scmp.eq.s32.totalorder (!%p17155_p1), %s15272_s28, 0 }
  0x4a   : > { %272 = sbr.rel (%p17155_p1) target bundleno = 4789 (0x12b5), region = 48 }
  0x4f   : > { %15159 = dma.done.wait (%p17156_p11), [#allocation5], 256   ;;  %p17157_p4 = pmov %p17156_p11 }
  0x51   : > { %15161 = vsyncadd (%p17157_p4), [#allocation5], 4294967040  ;;  %p17158_p8 = pmov %p17157_p4 }
  0x52   : > { %p17159_p10 = pmov %p17157_p4 }
  0x53   : > { %15163 = dma.done.wait (%p17158_p8), [#allocation8], 5312  }
  0x54   : > { %15165 = vsyncadd (%p17159_p10), [#allocation8], 4294961984  ;;  %s282_s16 = sand.u32 1, %s15272_s28   ;;  %s284_s4 = sand.u32 1, %s15180_s25  }
  0x55   : > { %s13240_s22 = smul.u32 5220, %s284_s4  ;;  %s283_s12 = scalar_lea.sflag [#allocation5], %s282_s16 }
  0x56   : > { %p17160_p0 = scmp.ne.s32.totalorder %s17150_s11, 0 }
  0x57   : > { %s15381_s24 = scalar_lea.vmem [#allocation9], %s13240_s22 }
  0x58   : > { %15167 = dma.done.wait (%p17160_p0), %s283_s12, 83520  }
  0x59   : > { %15169 = vsyncadd (%p17160_p0), %s283_s12, 4294883776  ;;  %v313_v0 = vlaneseq  ;;  %v15199_v1 = vmov 3   ;;  %v15200_v2 = vmov 0   ;;  %v11586_v4 = vld [vmem:[%s17140_s3] ss:$0 sm:$0xff]  ;;  %v15201_v7 = vmov 0.0  }
  0x5a   : > { %13328 = vset.pattern.permute.xlu1 %v15199_v1  ;;  %13327 = vset.pattern.permute.xlu0 %v15200_v2  ;;  %v11588_v5 = vld [vmem:[%s17140_s3 + $0x3] ss:$0 sm:$0xff]  ;;  %vm347_vm2 = vcmask 62464   ;;  %p17161_p13 = scmp.ne.s32.totalorder %s15272_s28, 0 }
  0x5b   : > { %v15387_v3 = vshrl.u32 %v313_v0, 7  ;;  %v317_v6 = vld [vmem:[%s17139_s2] sm:$0xff]  ;;  %v15406_v12 = vand.u32 127, %v313_v0 }
  0x5c   : > { %325 = vperm.xlu1 %13328, %v317_v6  }
  0x5d   : > { %vm335_vm0 = vcmp.eq.s32.totalorder %v11586_v4, %v15387_v3  ;;  %vm343_vm1 = vcmp.eq.s32.totalorder %v11588_v5, %v15387_v3 }
  0x5e   : > { %v15400_v8 = vsel %vm335_vm0, 1.0, %v15201_v7  ;;  %v15402_v9 = vsel %vm343_vm1, 1.0, %v15201_v7 }
  0x5f   : > { %v346_v10 = vadd.f32 %v15402_v9, %v15400_v8 }
  0x61   : > { %v348_v11 = vsel %vm347_vm2, %v346_v10, 0.0 }
  0x62   : > { %349 = vadd.xlane.f32.xlu0 %v348_v11 }
  0x78   : > { %319 = vperm.xlu0 %13327, %v317_v6  }
  0x7c   : > { %13329 = vset.pattern.permute.xlu0 %v15199_v1 }
  0xd7   : > { %v326_v13 = vpop.permute.xlu1 %325 }
  0xd8   : > { %vm327_vm3 = vcmp.eq.s32.totalorder %v326_v13, %v15406_v12 }
  0xd9   : > { %v15409_v14 = vsel %vm327_vm3, 1.0, %v15201_v7 }
  0xeb   : > { %v350_v15 = vpop.xlane.xlu0 %349 }
  0xec   : > { %v351_v16 = vmax.f32 %v350_v15, 1.0 }
  0xee   : > { %13330 = vrcp.f32 %v351_v16 }
  0xf3   : > { %v320_v17 = vpop.permute.xlu0 %319 }
  0xf4   : > { %vm321_vm4 = vcmp.eq.s32.totalorder %v320_v17, %v15406_v12 }
  0xf5   : > { %v15412_v18 = vsel %vm321_vm4, 1.0, %v15201_v7 }
  0xf7   : > { %357 = sbr.rel (%p17161_p13) target bundleno = 2560 (0xa00), region = 64 }
  0xfb   : > { %v15414_v19 = vpop.eup %13330 }
  0xfc   : > { %v358_v20 = vld [vmem:[#allocation7] sm:$0xf]  ;;  %vm471_vm5 = vcmask 1043456   ;;  %v394_v22 = vld [vmem:[%s17137_s0 + $0x8] sm:$0xff]  ;;  %vm434_vm6 = vcmask 64512   ;;  %v395_v25 = vld [vmem:[%s17137_s0 + $0x10] sm:$0xff] }
  0xfd   : > { %v393_v21 = vld [vmem:[%s17137_s0] sm:$0xff]  ;;  %13237 = vmatprep.subr.msk.bf16.mxu0 %vm471_vm5, %v358_v20  ;;  %v473_v23 = vsel %vm471_vm5, %v358_v20, 0  ;;  %v396_v26 = vld [vmem:[%s17137_s0 + $0x18] sm:$0xff]  ;;  %v398_v29 = vld [vmem:[%s17137_s0 + $0x28] sm:$0xff]  ;;  %v15506_v5 = vsub.s32 0, %v15387_v3  ;;  %vm15203_vm7 = vmmov 0  }
  0xfe   : > { %v417_v24 = vpack.c.bf16 %v394_v22, %v393_v21  ;;  %v397_v27 = vld [vmem:[%s17137_s0 + $0x20] sm:$0xff]  ;;  %13075 = vmatpush3.bf16.msra.mxu0 %v473_v23  ;;  %v418_v28 = vpack.c.bf16 %v396_v26, %v395_v25  ;;  %v399_v31 = vld [vmem:[%s17137_s0 + $0x30] sm:$0xff]  ;;  %v400_v32 = vld [vmem:[%s17137_s0 + $0x38] sm:$0xff]  ;;  %vm922_vm8 = vcmask 1041409   ;;  %vm924_vm9 = vcmask 1042434  }
  0xff   : > { %v419_v30 = vpack.c.bf16 %v398_v29, %v397_v27  ;;  %v401_v33 = vld [vmem:[%s17137_s0 + $0x40] sm:$0xff]  ;;  %v402_v34 = vld [vmem:[%s17137_s0 + $0x48] sm:$0xff]  ;;  %v420_v35 = vpack.c.bf16 %v400_v32, %v399_v31  ;;  %v13335_v38 = vld [vmem:[#allocation7 + $0x34] sm:$0xff]   ;;  %vm926_vm10 = vcmask 1043459   ;;  %vm928_vm11 = vcmask 1044484  }
 0x100   : > { %13076 = vmatprep.mubr.msk.bf16.mxu0 %vm434_vm6, %v417_v24  ;;  %v13334_v36 = vld [vmem:[#allocation7 + $0x3c] sm:$0xff]   ;;  %v421_v37 = vpack.c.bf16 %v402_v34, %v401_v33  ;;  %v403_v39 = vld [vmem:[%s17137_s0 + $0x50] sm:$0xff]  ;;  %v406_v42 = vld [vmem:[%s17137_s0 + $0x68] sm:$0xff]  ;;  %vm930_vm12 = vcmask 1045509   ;;  %vm1023_vm13 = vcmp.lt.s32.totalorder %v15406_v12, 10  ;;  %vm1030_vm15 = vcmp.ge.s32.totalorder %v15406_v12, 10 }
 0x101   : > { %13077 = vmatmul.mubr.msk.bf16.vlgmr.msra.gmra.mxu0 %vm434_vm6, %v418_v28  ;;  %13100 = vmatprep.subr.bf16.mxu1 %v13334_v36  ;;  %v404_v40 = vld [vmem:[%s17137_s0 + $0x58] sm:$0xff]  ;;  %v405_v41 = vld [vmem:[%s17137_s0 + $0x60] sm:$0xff]  ;;  %v13336_v43 = vld [vmem:[#allocation7 + $0x2c] sm:$0xff]   ;;  %vm1042_vm4 = vcmask 130048   ;;  %vm1801_vm5 = vcmask 1045504  }
 0x102   : > { %13080 = vmatprep.mubr.msk.bf16.mxu0 %vm434_vm6, %v419_v30  ;;  %13101 = vmatpush3.bf16.msra.mxu1 %v13334_v36  ;;  %v13337_v44 = vld [vmem:[#allocation7 + $0x24] sm:$0xff]   ;;  %v422_v45 = vpack.c.bf16 %v404_v40, %v403_v39  ;;  %v423_v46 = vpack.c.bf16 %v406_v42, %v405_v41  ;;  %v13338_v47 = vld [vmem:[#allocation7 + $0x1c] sm:$0xff]   ;;  %v407_v48 = vld [vmem:[%s17137_s0 + $0x70] sm:$0xff] }
 0x103   : > { %13102 = vmatprep.subr.bf16.mxu1 %v13335_v38  ;;  %v408_v49 = vld [vmem:[%s17137_s0 + $0x78] sm:$0xff]  ;;  %v409_v50 = vld [vmem:[%s17137_s0 + $0x80] sm:$0xff]  ;;  %v410_v51 = vld [vmem:[%s17137_s0 + $0x88] sm:$0xff] }
 0x104   : > { %v424_v52 = vpack.c.bf16 %v408_v49, %v407_v48  ;;  %v425_v53 = vpack.c.bf16 %v410_v51, %v409_v50  ;;  %v411_v54 = vld [vmem:[%s17137_s0 + $0x90] sm:$0xff]  ;;  %v412_v55 = vld [vmem:[%s17137_s0 + $0x98] sm:$0xff]  ;;  %v413_v56 = vld [vmem:[%s17137_s0 + $0xa0] sm:$0xff] }
 0x105   : > { %v414_v57 = vld [vmem:[%s17137_s0 + $0xa8] sm:$0xff]  ;;  %v426_v58 = vpack.c.bf16 %v412_v55, %v411_v54  ;;  %v415_v60 = vld [vmem:[%s17137_s0 + $0xb0] sm:$0xff]  ;;  %v416_v61 = vld [vmem:[%s17137_s0 + $0xb8] sm:$0xff] }
 0x106   : > { %13103 = vmatpush3.bf16.msra.mxu1 %v13335_v38  ;;  %v427_v59 = vpack.c.bf16 %v414_v57, %v413_v56  ;;  %v428_v62 = vpack.c.bf16 %v416_v61, %v415_v60  ;;  %v13339_v63 = vld [vmem:[#allocation7 + $0x14] sm:$0xff]   ;;  %v13340_v0 = vld [vmem:[#allocation7 + $0xc] sm:$0xff]   ;;  %v13341_v1 = vld [vmem:[#allocation7 + $0x4] sm:$0xff]  }
 0x107   : > { %13104 = vmatprep.subr.bf16.mxu1 %v13336_v43  ;;  %v15502_v2 = vld [vmem:[#allocation7 + $0x84] sm:$0x1] }
 0x108   : > { %v429_v4 = vunpack.c.l.bf16 %v15502_v2 }
 0x109   : > { %13081 = vmatmul.mubr.msk.bf16.gmra.mxu0 %vm434_vm6, %v420_v35 }
 0x10a   : > { %13084 = vmatprep.mubr.msk.bf16.mxu0 %vm434_vm6, %v421_v37  ;;  %13105 = vmatpush3.bf16.msra.mxu1 %v13336_v43  ;;  %v15511_v7 = vrot.slane %v429_v4, %v15506_v5 }
 0x10b   : > { %13106 = vmatprep.subr.bf16.mxu1 %v13337_v44 }
 0x10e   : > { %13107 = vmatpush3.bf16.msra.mxu1 %v13337_v44 }
 0x10f   : > { %13108 = vmatprep.subr.bf16.mxu1 %v13338_v47 }
 0x111   : > { %13085 = vmatmul.mubr.msk.bf16.gmra.mxu0 %vm434_vm6, %v422_v45 }
 0x112   : > { %13088 = vmatprep.mubr.msk.bf16.mxu0 %vm434_vm6, %v423_v46  ;;  %13109 = vmatpush3.bf16.msra.mxu1 %v13338_v47 }
 0x113   : > { %13110 = vmatprep.subr.bf16.mxu1 %v13339_v63 }
 0x116   : > { %13111 = vmatpush3.bf16.msra.mxu1 %v13339_v63 }
 0x117   : > { %13112 = vmatprep.subr.bf16.mxu1 %v13340_v0 }
 0x119   : > { %13089 = vmatmul.mubr.msk.bf16.gmra.mxu0 %vm434_vm6, %v424_v52 }
 0x11a   : > { %13092 = vmatprep.mubr.msk.bf16.mxu0 %vm434_vm6, %v425_v53  ;;  %13113 = vmatpush3.bf16.msra.mxu1 %v13340_v0 }
 0x11b   : > { %13114 = vmatprep.subr.bf16.mxu1 %v13341_v1 }
 0x11e   : > { %13115 = vmatpush3.bf16.msra.mxu1 %v13341_v1 }
 0x121   : > { %13093 = vmatmul.mubr.msk.bf16.gmra.mxu0 %vm434_vm6, %v426_v58 }
 0x122   : > { %13096 = vmatprep.mubr.msk.bf16.mxu0 %vm434_vm6, %v427_v59 }
 0x129   : > { %13097 = vmatmul.mubr.msk.bf16.gmra.mxu0 %vm434_vm6, %v428_v62 }
 0x1c1   : > { %v13078_v6 = vpop.f32.mrf.mxu0 }
 0x1c2   : > { %v518_v16 = vadd.f32 %v13078_v6, %v15511_v7 }
 0x1c3   : > { %v509_v10 = vpop.f32.mrf.mxu0 }
 0x1c4   : > { %v510_v13 = vadd.f32 %v509_v10, %v15511_v7  ;;  %v606_v25 = vmax.f32 %v518_v16, 0.0 }
 0x1c5   : > { %v13079_v11 = vpop.f32.mrf.mxu0 }
 0x1c6   : > { %v521_v15 = vadd.f32 %v13079_v11, %v15511_v7  ;;  %v604_v23 = vmax.f32 %v510_v13, 0.0 }
 0x1c7   : > { %v512_v17 = vpop.f32.mrf.mxu0 }
 0x1c8   : > { %v513_v20 = vadd.f32 %v512_v17, %v15511_v7  ;;  %v607_v21 = vmax.f32 %v521_v15, 0.0 }
 0x1c9   : > { %v13082_v22 = vpop.f32.mrf.mxu0 }
 0x1ca   : > { %v605_v24 = vmax.f32 %v513_v20, 0.0  ;;  %v629_v28 = vpack.c.bf16 %v607_v21, %v606_v25  ;;  %v534_v32 = vadd.f32 %v13082_v22, %v15511_v7 }
 0x1cb   : > { %v525_v26 = vpop.f32.mrf.mxu0 }
 0x1cc   : > { %v628_v27 = vpack.c.bf16 %v605_v24, %v604_v23  ;;  %v526_v30 = vadd.f32 %v525_v26, %v15511_v7  ;;  %v610_v39 = vmax.f32 %v534_v32, 0.0 }
 0x1cd   : > { %v13083_v29 = vpop.f32.mrf.mxu0 }
 0x1ce   : > { %v537_v31 = vadd.f32 %v13083_v29, %v15511_v7  ;;  %13116 = vmatprep.mubr.bf16.mxu1 %v628_v27  ;;  %v608_v37 = vmax.f32 %v526_v30, 0.0 }
 0x1cf   : > { %v528_v33 = vpop.f32.mrf.mxu0  ;;  %13117 = vmatmul.mubr.bf16.vlgmr.msra.gmra.mxu1 %v629_v28 }
 0x1d0   : > { %v529_v34 = vadd.f32 %v528_v33, %v15511_v7  ;;  %v611_v35 = vmax.f32 %v537_v31, 0.0 }
 0x1d1   : > { %v13086_v36 = vpop.f32.mrf.mxu0 }
 0x1d2   : > { %v609_v38 = vmax.f32 %v529_v34, 0.0  ;;  %v631_v42 = vpack.c.bf16 %v611_v35, %v610_v39  ;;  %v550_v46 = vadd.f32 %v13086_v36, %v15511_v7 }
 0x1d3   : > { %v541_v40 = vpop.f32.mrf.mxu0 }
 0x1d4   : > { %v630_v41 = vpack.c.bf16 %v609_v38, %v608_v37  ;;  %v542_v44 = vadd.f32 %v541_v40, %v15511_v7  ;;  %v614_v53 = vmax.f32 %v550_v46, 0.0  ;;  %v13343_v46 = vld [vmem:[#allocation7 + $0x74] sm:$0xff]  }
 0x1d5   : > { %v13087_v43 = vpop.f32.mrf.mxu0 }
 0x1d6   : > { %v553_v45 = vadd.f32 %v13087_v43, %v15511_v7  ;;  %13120 = vmatprep.mubr.bf16.mxu1 %v630_v41  ;;  %v612_v51 = vmax.f32 %v542_v44, 0.0  ;;  %v13342_v44 = vld [vmem:[#allocation7 + $0x7c] sm:$0xff]  }
 0x1d7   : > { %v544_v47 = vpop.f32.mrf.mxu0  ;;  %13121 = vmatmul.mubr.bf16.gmra.mxu1 %v631_v42 }
 0x1d8   : > { %v545_v48 = vadd.f32 %v544_v47, %v15511_v7  ;;  %v615_v49 = vmax.f32 %v553_v45, 0.0  ;;  %v15202_v45 = vmov 0.0   ;;  %v13344_v47 = vld [vmem:[#allocation7 + $0x6c] sm:$0xff]  }
 0x1d9   : > { %v13090_v50 = vpop.f32.mrf.mxu0  ;;  %13140 = vmatprep.subr.bf16.mxu0 %v15202_v45  ;;  %13156 = vmatprep.mubr.msk.bf16.mxu0 %vm15203_vm7, %v15202_v45 }
 0x1da   : > { %v613_v52 = vmax.f32 %v545_v48, 0.0  ;;  %v566_v56 = vadd.f32 %v13090_v50, %v15511_v7  ;;  %v633_v57 = vpack.c.bf16 %v615_v49, %v614_v53  ;;  %13141 = vmatpush3.bf16.msra.mxu0 %v13342_v44  ;;  %v13346_v48 = vld [vmem:[#allocation7 + $0x5c] sm:$0xff]   ;;  %v13347_v49 = vld [vmem:[#allocation7 + $0x54] sm:$0xff]   ;;  %v13348_v50 = vld [vmem:[#allocation7 + $0x4c] sm:$0xff]   ;;  %v15204_v53 = vmov 1  }
 0x1db   : > { %v557_v54 = vpop.f32.mrf.mxu0  ;;  %13142 = vmatprep.subr.bf16.mxu0 %v15202_v45  ;;  %13332 = vset.pattern.permute.xlu0 %v15204_v53 }
 0x1dc   : > { %v632_v55 = vpack.c.bf16 %v613_v52, %v612_v51  ;;  %v558_v59 = vadd.f32 %v557_v54, %v15511_v7  ;;  %v618_v62 = vmax.f32 %v566_v56, 0.0  ;;  %v13349_v51 = vld [vmem:[#allocation7 + $0x44] sm:$0xff]   ;;  %v15205_v54 = vmov 2  }
 0x1dd   : > { %v13091_v58 = vpop.f32.mrf.mxu0  ;;  %v1024_v52 = vld [vmem:[%s17139_s2] sm:$0xff] }
 0x1de   : > { %v569_v60 = vadd.f32 %v13091_v58, %v15511_v7  ;;  %13124 = vmatprep.mubr.bf16.mxu1 %v632_v55  ;;  %v616_v6 = vmax.f32 %v558_v59, 0.0  ;;  %13143 = vmatpush3.bf16.msra.mxu0 %v13343_v46 }
 0x1df   : > { %v560_v61 = vpop.f32.mrf.mxu0  ;;  %13125 = vmatmul.mubr.bf16.gmra.mxu1 %v633_v57  ;;  %13144 = vmatprep.subr.bf16.mxu0 %v15202_v45 }
 0x1e0   : > { %v619_v63 = vmax.f32 %v569_v60, 0.0  ;;  %v561_v0 = vadd.f32 %v560_v61, %v15511_v7  ;;  %1026 = vperm.xlu0 %13332, %v1024_v52   ;;  %v15552_v60 = vsub.s32 1, %v15387_v3 }
 0x1e1   : > { %v13094_v1 = vpop.f32.mrf.mxu0 }
 0x1e2   : > { %v617_v10 = vmax.f32 %v561_v0, 0.0  ;;  %v582_v15 = vadd.f32 %v13094_v1, %v15511_v7  ;;  %v635_v16 = vpack.c.bf16 %v619_v63, %v618_v62  ;;  %13145 = vmatpush3.bf16.msra.mxu0 %v13344_v47  ;;  %v15557_v63 = vrot.slane %v429_v4, %v15552_v60 }
 0x1e3   : > { %v573_v11 = vpop.f32.mrf.mxu0  ;;  %13146 = vmatprep.subr.bf16.mxu0 %v15202_v45 }
 0x1e4   : > { %v634_v13 = vpack.c.bf16 %v617_v10, %v616_v6  ;;  %v574_v20 = vadd.f32 %v573_v11, %v15511_v7  ;;  %v622_v23 = vmax.f32 %v582_v15, 0.0  ;;  %13333 = vset.pattern.permute.xlu0 %v15205_v54 }
 0x1e5   : > { %v13095_v17 = vpop.f32.mrf.mxu0  ;;  %1033 = vperm.xlu0 %13333, %v1024_v52  }
 0x1e6   : > { %v585_v21 = vadd.f32 %v13095_v17, %v15511_v7  ;;  %13128 = vmatprep.mubr.bf16.mxu1 %v634_v13  ;;  %v620_v27 = vmax.f32 %v574_v20, 0.0 }
 0x1e7   : > { %v576_v22 = vpop.f32.mrf.mxu0  ;;  %13129 = vmatmul.mubr.bf16.gmra.mxu1 %v635_v16 }
 0x1e8   : > { %v623_v24 = vmax.f32 %v585_v21, 0.0  ;;  %v577_v25 = vadd.f32 %v576_v22, %v15511_v7 }
 0x1e9   : > { %v13098_v26 = vpop.f32.mrf.mxu0 }
 0x1ea   : > { %v621_v28 = vmax.f32 %v577_v25, 0.0  ;;  %v598_v31 = vadd.f32 %v13098_v26, %v15511_v7  ;;  %v637_v32 = vpack.c.bf16 %v623_v24, %v622_v23 }
 0x1eb   : > { %v589_v29 = vpop.f32.mrf.mxu0 }
 0x1ec   : > { %v636_v30 = vpack.c.bf16 %v621_v28, %v620_v27  ;;  %v590_v34 = vadd.f32 %v589_v29, %v15511_v7  ;;  %v626_v37 = vmax.f32 %v598_v31, 0.0 }
 0x1ed   : > { %v13099_v33 = vpop.f32.mrf.mxu0 }
 0x1ee   : > { %v601_v35 = vadd.f32 %v13099_v33, %v15511_v7  ;;  %13132 = vmatprep.mubr.bf16.mxu1 %v636_v30  ;;  %v624_v40 = vmax.f32 %v590_v34, 0.0 }
 0x1ef   : > { %v592_v36 = vpop.f32.mrf.mxu0  ;;  %13133 = vmatmul.mubr.bf16.gmra.mxu1 %v637_v32 }
 0x1f0   : > { %v627_v38 = vmax.f32 %v601_v35, 0.0  ;;  %v593_v39 = vadd.f32 %v592_v36, %v15511_v7  ;;  %v13345_v7 = vld [vmem:[#allocation7 + $0x64] sm:$0xff]  }
 0x1f1   : > { %13147 = vmatpush3.bf16.msra.mxu0 %v13345_v7 }
 0x1f2   : > { %v625_v41 = vmax.f32 %v593_v39, 0.0  ;;  %v639_v43 = vpack.c.bf16 %v627_v38, %v626_v37  ;;  %13148 = vmatprep.subr.bf16.mxu0 %v15202_v45 }
 0x1f4   : > { %v638_v42 = vpack.c.bf16 %v625_v41, %v624_v40 }
 0x1f5   : > { %13149 = vmatpush3.bf16.msra.mxu0 %v13346_v48 }
 0x1f6   : > { %13136 = vmatprep.mubr.bf16.mxu1 %v638_v42  ;;  %13150 = vmatprep.subr.bf16.mxu0 %v15202_v45 }
 0x1f7   : > { %13137 = vmatmul.mubr.bf16.gmra.mxu1 %v639_v43 }
 0x1f9   : > { %13151 = vmatpush3.bf16.msra.mxu0 %v13347_v49 }
 0x1fa   : > { %13152 = vmatprep.subr.bf16.mxu0 %v15202_v45 }
 0x1fd   : > { %13153 = vmatpush3.bf16.msra.mxu0 %v13348_v50 }
 0x1fe   : > { %13154 = vmatprep.subr.bf16.mxu0 %v15202_v45 }
 0x201   : > { %13155 = vmatpush3.bf16.msra.mxu0 %v13349_v51 }
 0x202   : > { %13160 = vmatprep.subr.mxu0 %v15202_v45 }
 0x28f   : > { %v13118_v55 = vpop.f32.mrf.mxu1 }
 0x290   : > { %v735_v23 = vadd.f32 %v13118_v55, %v15557_v63 }
 0x291   : > { %v726_v56 = vpop.f32.mrf.mxu1 }
 0x292   : > { %v727_v15 = vadd.f32 %v726_v56, %v15557_v63  ;;  %v823_v35 = vmax.f32 %v735_v23, 0.0 }
 0x293   : > { %v13119_v57 = vpop.f32.mrf.mxu1 }
 0x294   : > { %v821_v24 = vmax.f32 %v727_v15, 0.0  ;;  %v738_v36 = vadd.f32 %v13119_v57, %v15557_v63 }
 0x295   : > { %v729_v58 = vpop.f32.mrf.mxu1 }
 0x296   : > { %v730_v10 = vadd.f32 %v729_v58, %v15557_v63  ;;  %v824_v7 = vmax.f32 %v738_v36, 0.0 }
 0x297   : > { %v13122_v59 = vpop.f32.mrf.mxu1 }
 0x298   : > { %v822_v20 = vmax.f32 %v730_v10, 0.0  ;;  %v751_v2 = vadd.f32 %v13122_v59, %v15557_v63 }
 0x299   : > { %v742_v61 = vpop.f32.mrf.mxu1 }
 0x29a   : > { %v743_v11 = vadd.f32 %v742_v61, %v15557_v63  ;;  %v845_v29 = vmax.f32 %v821_v24, %v822_v20  ;;  %v827_v32 = vmax.f32 %v751_v2, 0.0 }
 0x29b   : > { %v13123_v62 = vpop.f32.mrf.mxu1 }
 0x29c   : > { %v825_v4 = vmax.f32 %v743_v11, 0.0  ;;  %v754_v33 = vadd.f32 %v13123_v62, %v15557_v63  ;;  %v846_v42 = vmax.f32 %v845_v29, %v823_v35 }
 0x29d   : > { %v745_v0 = vpop.f32.mrf.mxu1 }
 0x29e   : > { %v746_v1 = vadd.f32 %v745_v0, %v15557_v63  ;;  %v828_v43 = vmax.f32 %v754_v33, 0.0  ;;  %v847_v53 = vmax.f32 %v846_v42, %v824_v7 }
 0x29f   : > { %v13126_v6 = vpop.f32.mrf.mxu1 }
 0x2a0   : > { %v826_v16 = vmax.f32 %v746_v1, 0.0  ;;  %v767_v27 = vadd.f32 %v13126_v6, %v15557_v63  ;;  %v848_v6 = vrot.slane %v847_v53, 4 }
 0x2a1   : > { %v758_v13 = vpop.f32.mrf.mxu1 }
 0x2a2   : > { %v759_v21 = vadd.f32 %v758_v13, %v15557_v63  ;;  %v854_v26 = vmax.f32 %v825_v4, %v826_v16  ;;  %v831_v39 = vmax.f32 %v767_v27, 0.0  ;;  %v849_v24 = vmax.f32 %v847_v53, %v848_v6 }
 0x2a3   : > { %v13127_v17 = vpop.f32.mrf.mxu1 }
 0x2a4   : > { %v829_v30 = vmax.f32 %v759_v21, 0.0  ;;  %v855_v38 = vmax.f32 %v854_v26, %v827_v32  ;;  %v770_v40 = vadd.f32 %v13127_v17, %v15557_v63  ;;  %v850_v36 = vrot.slane %v849_v24, 2 }
 0x2a5   : > { %v761_v22 = vpop.f32.mrf.mxu1 }
 0x2a6   : > { %v762_v25 = vadd.f32 %v761_v22, %v15557_v63  ;;  %v856_v48 = vmax.f32 %v855_v38, %v828_v43  ;;  %v832_v49 = vmax.f32 %v770_v40, 0.0 }
 0x2a7   : > { %v13130_v28 = vpop.f32.mrf.mxu1 }
 0x2a8   : > { %v830_v31 = vmax.f32 %v762_v25, 0.0  ;;  %v783_v50 = vadd.f32 %v13130_v28, %v15557_v63  ;;  %v857_v59 = vrot.slane %v856_v48, 4 }
 0x2a9   : > { %v774_v34 = vpop.f32.mrf.mxu1 }
 0x2aa   : > { %v863_v37 = vmax.f32 %v829_v30, %v830_v31  ;;  %v775_v46 = vadd.f32 %v774_v34, %v15557_v63  ;;  %v835_v61 = vmax.f32 %v783_v50, 0.0  ;;  %v858_v20 = vmax.f32 %v856_v48, %v857_v59 }
 0x2ab   : > { %v13131_v41 = vpop.f32.mrf.mxu1  ;;  %v851_v48 = vmax.f32 %v849_v24, %v850_v36 }
 0x2ac   : > { %v864_v44 = vmax.f32 %v863_v37, %v831_v39  ;;  %v833_v55 = vmax.f32 %v775_v46, 0.0  ;;  %v786_v56 = vadd.f32 %v13131_v41, %v15557_v63  ;;  %v859_v30 = vrot.slane %v858_v20, 2 }
 0x2ad   : > { %v777_v47 = vpop.f32.mrf.mxu1  ;;  %v852_v59 = vrot.slane %v851_v48, 1 }
 0x2ae   : > { %v778_v51 = vadd.f32 %v777_v47, %v15557_v63  ;;  %v865_v54 = vmax.f32 %v864_v44, %v832_v49  ;;  %v836_v11 = vmax.f32 %v786_v56, 0.0  ;;  %v860_v43 = vmax.f32 %v858_v20, %v859_v30 }
 0x2af   : > { %v13134_v52 = vpop.f32.mrf.mxu1 }
 0x2b0   : > { %v834_v57 = vmax.f32 %v778_v51, 0.0  ;;  %v866_v10 = vrot.slane %v865_v54, 4  ;;  %v799_v16 = vadd.f32 %v13134_v52, %v15557_v63 }
 0x2b1   : > { %v790_v58 = vpop.f32.mrf.mxu1 }
 0x2b2   : > { %v872_v62 = vmax.f32 %v833_v55, %v834_v57  ;;  %v791_v1 = vadd.f32 %v790_v58, %v15557_v63  ;;  %v867_v25 = vmax.f32 %v865_v54, %v866_v10  ;;  %v839_v28 = vmax.f32 %v799_v16, 0.0 }
 0x2b3   : > { %v13135_v0 = vpop.f32.mrf.mxu1  ;;  %v861_v54 = vrot.slane %v860_v43, 1 }
 0x2b4   : > { %v873_v13 = vmax.f32 %v872_v62, %v835_v61  ;;  %v837_v4 = vmax.f32 %v791_v1, 0.0  ;;  %v802_v22 = vadd.f32 %v13135_v0, %v15557_v63  ;;  %v868_v37 = vrot.slane %v867_v25, 2 }
 0x2b5   : > { %v793_v15 = vpop.f32.mrf.mxu1  ;;  %v862_v1 = vmax.f32 %v860_v43, %v861_v54  ;;  %v13374_v54 = vld [vmem:[%s15381_s24 + $0xd8] ss:$36 sps:$4 sm:$0xff]  }
 0x2b6   : > { %v794_v17 = vadd.f32 %v793_v15, %v15557_v63  ;;  %v874_v21 = vmax.f32 %v873_v13, %v836_v11  ;;  %v840_v33 = vmax.f32 %v802_v22, 0.0  ;;  %v869_v49 = vmax.f32 %v867_v25, %v868_v37 }
 0x2b7   : > { %v13138_v2 = vpop.f32.mrf.mxu1  ;;  %v853_v11 = vmax.f32 %v851_v48, %v852_v59  ;;  %v13356_v48 = vld [vmem:[%s15381_s24 + $0x1b0] ss:$36 sps:$4 sm:$0xff]   ;;  %v13394_v59 = vld [vmem:[%s15381_s24 + $0x4] ss:$36 sps:$4 sm:$0xff]  }
 0x2b8   : > { %v838_v23 = vmax.f32 %v794_v17, 0.0  ;;  %v875_v26 = vrot.slane %v874_v21, 4  ;;  %v815_v41 = vadd.f32 %v13138_v2, %v15557_v63  ;;  %v870_v58 = vrot.slane %v869_v49, 1 }
 0x2b9   : > { %v806_v27 = vpop.f32.mrf.mxu1  ;;  %v900_v17 = vpack.c.bf16 %v862_v1, %v862_v1  ;;  %v899_v2 = vpack.c.bf16 %v853_v11, %v853_v11  ;;  %v13406_v1 = vld [vmem:[%s15381_s24 + $0x3f4] ss:$36 sps:$4 sm:$0xff]   ;;  %v13418_v11 = vld [vmem:[%s15381_s24 + $0x364] ss:$36 sps:$4 sm:$0xff]  }
 0x2ba   : > { %v881_v29 = vmax.f32 %v837_v4, %v838_v23  ;;  %v876_v31 = vmax.f32 %v874_v21, %v875_v26  ;;  %v807_v35 = vadd.f32 %v806_v27, %v15557_v63  ;;  %v843_v52 = vmax.f32 %v815_v41, 0.0 }
 0x2bb   : > { %v13139_v32 = vpop.f32.mrf.mxu1  ;;  %v917_v24 = vunpack.c.l.b16 %v900_v17  ;;  %v916_v27 = vunpack.c.l.b16 %v899_v2  ;;  %v11619_v41 = vadd.s32 4294967286, %v15406_v12  ;;  %v13430_v17 = vld [vmem:[%s15381_s24 + $0x2d4] ss:$36 sps:$4 sm:$0xff]   ;;  %v13434_v2 = vld [vmem:[%s15381_s24 + $0x288] ss:$36 sps:$4 sm:$0xff]  }
 0x2bc   : > { %v882_v34 = vmax.f32 %v881_v29, %v839_v28  ;;  %v877_v39 = vrot.slane %v876_v31, 2  ;;  %v841_v46 = vmax.f32 %v807_v35, 0.0  ;;  %v818_v47 = vadd.f32 %v13139_v32, %v15557_v63 }
 0x2bd   : > { %v809_v38 = vpop.f32.mrf.mxu1 }
 0x2be   : > { %v883_v40 = vmax.f32 %v882_v34, %v840_v33  ;;  %v810_v42 = vadd.f32 %v809_v38, %v15557_v63  ;;  %v878_v50 = vmax.f32 %v876_v31, %v877_v39  ;;  %v844_v56 = vmax.f32 %v818_v47, 0.0  ;;  %v1027_v38 = vpop.permute.xlu0 %1026  ;;  %v13352_v47 = vld [vmem:[%s15381_s24 + $0x1fc] ss:$36 sps:$4 sm:$0xff]  }
 0x2bf   : > { %v871_v63 = vmax.f32 %v869_v49, %v870_v58  ;;  %v923_v31 = vsel %vm922_vm8, %v917_v24, %v916_v27  ;;  %vm1028_vm14 = vcmp.eq.s32.totalorder %v15406_v12, %v1027_v38  ;;  %2778 = vmatprep.subr.bf16.mxu1 %v13352_v47  ;;  %v13364_v49 = vld [vmem:[%s15381_s24 + $0x16c] ss:$36 sps:$4 sm:$0xff]   ;;  %v13373_v38 = vld [vmem:[%s15381_s24 + $0x5a4] ss:$36 sps:$4 sm:$0xff]  }
 0x2c0   : > { %v884_v44 = vrot.slane %v883_v40, 4  ;;  %v842_v7 = vmax.f32 %v810_v42, 0.0  ;;  %v879_v61 = vrot.slane %v878_v50, 1  ;;  %v1040_v42 = vld [vmem:[#allocation4] sm:$0xff]  ;;  %vm1029_vm0 = vmand %vm1023_vm13, %vm1028_vm14 }
 0x2c1   : > { %v901_v21 = vpack.c.bf16 %v871_v63, %v871_v63  ;;  %v13386_v58 = vld [vmem:[%s15381_s24 + $0x48] ss:$36 sps:$4 sm:$0xff]   ;;  %v13395_v47 = vld [vmem:[%s15381_s24 + $0x480] ss:$36 sps:$4 sm:$0xff]  }
 0x2c2   : > { %v885_v51 = vmax.f32 %v883_v40, %v884_v44  ;;  %v890_v53 = vmax.f32 %v841_v46, %v842_v7  ;;  %v880_v13 = vmax.f32 %v878_v50, %v879_v61  ;;  %v1041_v40 = vld [vmem:[#allocation4 + $0x8] sm:$0xff]  ;;  %v1034_v43 = vpop.permute.xlu0 %1033  ;;  %v15595_v44 = vld [vmem:[%s17138_s1] sm:$0x3f]  ;;  %v13392_v61 = vld [vmem:[%s15381_s24] ss:$36 sps:$4 sm:$0xff]  }
 0x2c3   : > { %v918_v26 = vunpack.c.l.b16 %v901_v21  ;;  %vm1035_vm1 = vcmp.eq.s32.totalorder %v11619_v41, %v1034_v43  ;;  %v13350_v46 = vld [vmem:[%s15381_s24 + $0x1f8] ss:$36 sps:$4 sm:$0xff]   ;;  %v13362_v50 = vld [vmem:[%s15381_s24 + $0x168] ss:$36 sps:$4 sm:$0xff]   ;;  %v13383_v43 = vld [vmem:[%s15381_s24 + $0x510] ss:$36 sps:$4 sm:$0xff]  }
 0x2c4   : > { %v886_v55 = vrot.slane %v885_v51, 2  ;;  %v891_v57 = vmax.f32 %v890_v53, %v843_v52  ;;  %v902_v4 = vpack.c.bf16 %v880_v13, %v880_v13  ;;  %vm1036_vm2 = vmand %vm1030_vm15, %vm1035_vm1  ;;  %v13358_v7 = vld [vmem:[%s15381_s24 + $0x1b4] ss:$36 sps:$4 sm:$0xff]   ;;  %2779 = vmatpush1.bf16.msra.mxu1 %v13350_v46  ;;  %v13368_v52 = vld [vmem:[%s15381_s24 + $0x120] ss:$36 sps:$4 sm:$0xff]  }
 0x2c5   : > { %v925_v33 = vsel %vm924_vm9, %v918_v26, %v923_v31  ;;  %vm1037_vm3 = vmor %vm1029_vm0, %vm1036_vm2  ;;  %2780 = vmatprep.subr.bf16.mxu1 %v13358_v7  ;;  %v13376_v53 = vld [vmem:[%s15381_s24 + $0xdc] ss:$36 sps:$4 sm:$0xff]   ;;  %v13410_v63 = vld [vmem:[%s15381_s24 + $0x3a8] ss:$36 sps:$4 sm:$0xff]  }
 0x2c6   : > { %v887_v62 = vmax.f32 %v885_v51, %v886_v55  ;;  %v892_v0 = vmax.f32 %v891_v57, %v844_v56  ;;  %v919_v28 = vunpack.c.l.b16 %v902_v4  ;;  %v11620_v12 = vsel %vm1037_vm3, 1.0, %v15202_v45  ;;  %v13370_v51 = vld [vmem:[%s15381_s24 + $0x124] ss:$36 sps:$4 sm:$0xff]   ;;  %v13382_v55 = vld [vmem:[%s15381_s24 + $0x94] ss:$36 sps:$4 sm:$0xff]  }
 0x2c7   : > { %v13380_v56 = vld [vmem:[%s15381_s24 + $0x90] ss:$36 sps:$4 sm:$0xff]   ;;  %v13416_v13 = vld [vmem:[%s15381_s24 + $0x360] ss:$36 sps:$4 sm:$0xff]   ;;  %v13377_v41 = vld [vmem:[%s15381_s24 + $0x558] ss:$36 sps:$4 sm:$0xff]  }
 0x2c8   : > { %v888_v6 = vrot.slane %v887_v62, 1  ;;  %v893_v10 = vrot.slane %v892_v0, 4  ;;  %v927_v35 = vsel %vm926_vm10, %v919_v28, %v925_v33  ;;  %2781 = vmatpush1.bf16.msra.mxu1 %v13356_v48  ;;  %v13388_v57 = vld [vmem:[%s15381_s24 + $0x4c] ss:$36 sps:$4 sm:$0xff]   ;;  %v392_v4 = vld [vmem:[#allocation7 + $0x84] sm:$0x2] }
 0x2c9   : > { %2782 = vmatprep.subr.bf16.mxu1 %v13364_v49  ;;  %v13436_v21 = vld [vmem:[%s15381_s24 + $0x28c] ss:$36 sps:$4 sm:$0xff]   ;;  %v13355_v28 = vld [vmem:[%s15381_s24 + $0x67c] ss:$36 sps:$4 sm:$0xff]   ;;  %v13397_v46 = vld [vmem:[%s15381_s24 + $0x484] ss:$36 sps:$4 sm:$0xff]  }
 0x2ca   : > { %v894_v15 = vmax.f32 %v892_v0, %v893_v10  ;;  %v889_v16 = vmax.f32 %v887_v62, %v888_v6  ;;  %v13400_v62 = vld [vmem:[%s15381_s24 + $0x43c] ss:$36 sps:$4 sm:$0xff]   ;;  %v13404_v6 = vld [vmem:[%s15381_s24 + $0x3f0] ss:$36 sps:$4 sm:$0xff]  }
 0x2cb   : > { %v13398_v0 = vld [vmem:[%s15381_s24 + $0x438] ss:$36 sps:$4 sm:$0xff]   ;;  %v13412_v10 = vld [vmem:[%s15381_s24 + $0x3ac] ss:$36 sps:$4 sm:$0xff]  }
 0x2cc   : > { %v895_v20 = vrot.slane %v894_v15, 2  ;;  %v903_v23 = vpack.c.bf16 %v889_v16, %v889_v16  ;;  %2783 = vmatpush1.bf16.msra.mxu1 %v13362_v50  ;;  %v13422_v16 = vld [vmem:[%s15381_s24 + $0x318] ss:$36 sps:$4 sm:$0xff]   ;;  %v13407_v50 = vld [vmem:[%s15381_s24 + $0x870] ss:$36 sps:$4 sm:$0xff]  }
 0x2cd   : > { %2784 = vmatprep.subr.bf16.mxu1 %v13370_v51  ;;  %v13403_v7 = vld [vmem:[%s15381_s24 + $0x8bc] ss:$36 sps:$4 sm:$0xff]   ;;  %v13409_v49 = vld [vmem:[%s15381_s24 + $0x874] ss:$36 sps:$4 sm:$0xff]   ;;  %v13415_v51 = vld [vmem:[%s15381_s24 + $0x82c] ss:$36 sps:$4 sm:$0xff]  }
 0x2ce   : > { %v896_v22 = vmax.f32 %v894_v15, %v895_v20  ;;  %v920_v30 = vunpack.c.l.b16 %v903_v23  ;;  %v13424_v15 = vld [vmem:[%s15381_s24 + $0x31c] ss:$36 sps:$4 sm:$0xff]   ;;  %v13428_v20 = vld [vmem:[%s15381_s24 + $0x2d0] ss:$36 sps:$4 sm:$0xff]   ;;  %v908_v23 = vsub.s32 2, %v15387_v3 }
 0x2cf   : > { %v13401_v48 = vld [vmem:[%s15381_s24 + $0x8b8] ss:$36 sps:$4 sm:$0xff]  }
 0x2d0   : > { %v897_v25 = vrot.slane %v896_v22, 1  ;;  %v929_v36 = vsel %vm928_vm11, %v920_v30, %v927_v35  ;;  %2785 = vmatpush1.bf16.msra.mxu1 %v13368_v52  ;;  %v13353_v30 = vld [vmem:[%s15381_s24 + $0x678] ss:$36 sps:$4 sm:$0xff]   ;;  %v13367_v35 = vld [vmem:[%s15381_s24 + $0x5ec] ss:$36 sps:$4 sm:$0xff]  }
 0x2d1   : > { %2786 = vmatprep.subr.bf16.mxu1 %v13376_v53  ;;  %v13413_v52 = vld [vmem:[%s15381_s24 + $0x828] ss:$36 sps:$4 sm:$0xff]  }
 0x2d2   : > { %v898_v29 = vmax.f32 %v896_v22, %v897_v25  ;;  %v905_v22 = vunpack.c.l.bf16 %v392_v4  ;;  %v13421_v53 = vld [vmem:[%s15381_s24 + $0x7e4] ss:$36 sps:$4 sm:$0xff]  }
 0x2d3   : > { %v13449_v4 = vld [vmem:[%s15381_s24 + $0x680] ss:$36 sps:$4 sm:$0xff]  }
 0x2d4   : > { %v904_v32 = vpack.c.bf16 %v898_v29, %v898_v29  ;;  %2787 = vmatpush1.bf16.msra.mxu1 %v13374_v54  ;;  %v909_v24 = vrot.slane %v905_v22, %v908_v23  ;;  %v13419_v54 = vld [vmem:[%s15381_s24 + $0x7e0] ss:$36 sps:$4 sm:$0xff]  }
 0x2d5   : > { %2788 = vmatprep.subr.bf16.mxu1 %v13382_v55  ;;  %v13427_v55 = vld [vmem:[%s15381_s24 + $0x79c] ss:$36 sps:$4 sm:$0xff]  }
 0x2d6   : > { %v921_v34 = vunpack.c.l.b16 %v904_v32  ;;  %v13361_v32 = vld [vmem:[%s15381_s24 + $0x634] ss:$36 sps:$4 sm:$0xff]   ;;  %v13457_v23 = vld [vmem:[%s15381_s24 + $0x63c] ss:$36 sps:$4 sm:$0xff]  }
 0x2d8   : > { %v931_v37 = vsel %vm930_vm12, %v921_v34, %v929_v36  ;;  %2789 = vmatpush1.bf16.msra.mxu1 %v13380_v56  ;;  %v13359_v34 = vld [vmem:[%s15381_s24 + $0x630] ss:$36 sps:$4 sm:$0xff]   ;;  %v13425_v56 = vld [vmem:[%s15381_s24 + $0x798] ss:$36 sps:$4 sm:$0xff]  }
 0x2d9   : > { %v932_v39 = vpack.c.b16 %v931_v37, %v931_v37  ;;  %2790 = vmatprep.subr.bf16.mxu1 %v13388_v57  ;;  %v13365_v37 = vld [vmem:[%s15381_s24 + $0x5e8] ss:$36 sps:$4 sm:$0xff]   ;;  %v13433_v57 = vld [vmem:[%s15381_s24 + $0x754] ss:$36 sps:$4 sm:$0xff]  }
 0x2db   : > { %13157 = vmatmul.mubr.bf16.vlgmr.msra.gmra.mxu0 %v932_v39  ;;  %v13371_v39 = vld [vmem:[%s15381_s24 + $0x5a0] ss:$36 sps:$4 sm:$0xff]  }
 0x2dc   : > { %13161 = vmatpush3.msra.mxu0 %v1041_v40  ;;  %13164 = vmatprep.mubr.msk.f32.mxu0 %vm15203_vm7, %v15202_v45  ;;  %vm1797_vm7 = vcmask 48128   ;;  %v13379_v40 = vld [vmem:[%s15381_s24 + $0x55c] ss:$36 sps:$4 sm:$0xff]  }
 0x2dd   : > { %13162 = vmatprep.subr.mxu0 %v15202_v45  ;;  %2791 = vmatpush1.bf16.msra.mxu1 %v13386_v58  ;;  %v13431_v58 = vld [vmem:[%s15381_s24 + $0x750] ss:$36 sps:$4 sm:$0xff]  }
 0x2de   : > { %13163 = vmatpush3.msra.mxu0 %v1040_v42  ;;  %2792 = vmatprep.subr.bf16.mxu1 %v13394_v59  ;;  %v13385_v42 = vld [vmem:[%s15381_s24 + $0x514] ss:$36 sps:$4 sm:$0xff]   ;;  %v13439_v59 = vld [vmem:[%s15381_s24 + $0x70c] ss:$36 sps:$4 sm:$0xff]  }
 0x2df   : > { %11622 = vmatprep.subr.msk.mxu0 %vm1801_vm5, %v15595_v44 }
 0x2e1   : > { %2793 = vmatpush1.bf16.msra.mxu1 %v13392_v61  ;;  %v13437_v61 = vld [vmem:[%s15381_s24 + $0x708] ss:$36 sps:$4 sm:$0xff]  }
 0x2e2   : > { %2794 = vmatprep.subr.bf16.mxu1 %v13400_v62  ;;  %v13442_v62 = vld [vmem:[%s15381_s24 + $0x244] ss:$36 sps:$4 sm:$0xff]  }
 0x2e3   : > { %13165 = vmatmul.mubr.msk.f32.vlgmr.msra.gmra.mxu0 %vm1042_vm4, %v11620_v12  ;;  %v13391_v12 = vld [vmem:[%s15381_s24 + $0x4cc] ss:$36 sps:$4 sm:$0xff]  }
 0x2e4   : > { %1872 = vmatprep.mubr.f32.mxu0 %v15202_v45 }
 0x2e5   : > { %2795 = vmatpush2.bf16.msra.mxu1 %v13398_v0  ;;  %v13440_v0 = vld [vmem:[%s15381_s24 + $0x240] ss:$36 sps:$4 sm:$0xff]  }
 0x2e6   : > { %2796 = vmatprep.subr.bf16.mxu1 %v13406_v1  ;;  %v13445_v1 = vld [vmem:[%s15381_s24 + $0x6c4] ss:$36 sps:$4 sm:$0xff]  }
 0x2e9   : > { %2797 = vmatpush2.bf16.msra.mxu1 %v13404_v6  ;;  %v13443_v6 = vld [vmem:[%s15381_s24 + $0x6c0] ss:$36 sps:$4 sm:$0xff]  }
 0x2ea   : > { %2798 = vmatprep.subr.bf16.mxu1 %v13412_v10  ;;  %v13448_v10 = vld [vmem:[%s15381_s24 + $0xafc] ss:$36 sps:$4 sm:$0xff]  }
 0x2ed   : > { %2799 = vmatpush2.bf16.msra.mxu1 %v13410_v63  ;;  %v13451_v63 = vld [vmem:[%s15381_s24 + $0x684] ss:$36 sps:$4 sm:$0xff]  }
 0x2ee   : > { %2800 = vmatprep.subr.bf16.mxu1 %v13418_v11 }
 0x2f1   : > { %2801 = vmatpush2.bf16.msra.mxu1 %v13416_v13 }
 0x2f2   : > { %2802 = vmatprep.subr.bf16.mxu1 %v13424_v15 }
 0x2f5   : > { %2803 = vmatpush2.bf16.msra.mxu1 %v13422_v16  ;;  %v13446_v16 = vld [vmem:[%s15381_s24 + $0xaf8] ss:$36 sps:$4 sm:$0xff]  }
 0x2f6   : > { %2804 = vmatprep.subr.bf16.mxu1 %v13430_v17 }
 0x2f9   : > { %2805 = vmatpush2.bf16.msra.mxu1 %v13428_v20 }
 0x2fa   : > { %2806 = vmatprep.subr.bf16.mxu1 %v13436_v21  ;;  %v13454_v21 = vld [vmem:[%s15381_s24 + $0xab4] ss:$36 sps:$4 sm:$0xff]  }
 0x2fd   : > { %2807 = vmatpush2.bf16.msra.mxu1 %v13434_v2 }
 0x2fe   : > { %2808 = vmatprep.subr.bf16.mxu1 %v13442_v62  ;;  %v13511_v62 = vld [vmem:[%s15381_s24 + $0x834] ss:$36 sps:$4 sm:$0xff]  }
 0x301   : > { %2809 = vmatpush2.bf16.msra.mxu1 %v13440_v0  ;;  %v13506_v0 = vld [vmem:[%s15381_s24 + $0x170] ss:$36 sps:$4 sm:$0xff]  }
 0x302   : > { %2860 = vmatprep.subr.bf16.mxu1 %v13448_v10  ;;  %v13517_v10 = vld [vmem:[%s15381_s24 + $0x7ec] ss:$36 sps:$4 sm:$0xff]  }
 0x39b   : > { %v1016_v25 = vpop.f32.mrf.mxu0 }
 0x39c   : > { %v1017_v26 = vadd.f32 %v1016_v25, %v909_v24  ;;  %v13452_v24 = vld [vmem:[%s15381_s24 + $0xab0] ss:$36 sps:$4 sm:$0xff]  }
 0x39d   : > { %v13158_v27 = vpop.f32.mrf.mxu0  ;;  %v13460_v25 = vld [vmem:[%s15381_s24 + $0xa6c] ss:$36 sps:$4 sm:$0xff]  }
 0x39e   : > { %11623 = vmatpush1.msk.msra.mxu0 %vm1801_vm5, %v1017_v26  ;;  %v15206_v27 = vmov 0  }
 0x39f   : > { %v1019_v29 = vpop.f32.mrf.mxu0  ;;  %11624 = vmatmul.mubr.msk.f32.vlgmr.msra.gmra.mxu0 %vm1797_vm7, %v15412_v18  ;;  %11625 = vmatprep.subr.msk.mxu0 %vm1801_vm5, %v15595_v44  ;;  %v13389_v44 = vld [vmem:[%s15381_s24 + $0x4c8] ss:$36 sps:$4 sm:$0xff]  }
 0x3a0   : > { %11626 = vmatpush1.msk.msra.mxu0 %vm1801_vm5, %v1017_v26  ;;  %1946 = vmatprep.mubr.f32.mxu0 %v15202_v45  ;;  %v13455_v26 = vld [vmem:[%s15381_s24 + $0x638] ss:$36 sps:$4 sm:$0xff]   ;;  %v13458_v29 = vld [vmem:[%s15381_s24 + $0xa68] ss:$36 sps:$4 sm:$0xff]  }
 0x3a1   : > { %v13159_v31 = vpop.f32.mrf.mxu0  ;;  %2819 = vmatprep.subr.bf16.mxu0 %v13355_v28  ;;  %v13463_v28 = vld [vmem:[%s15381_s24 + $0x5f4] ss:$36 sps:$4 sm:$0xff]  }
 0x3a2   : > { %v13461_v31 = vld [vmem:[%s15381_s24 + $0x5f0] ss:$36 sps:$4 sm:$0xff]  }
 0x3a3   : > { %11627 = vmatmul.mubr.msk.f32.vlgmr.msra.gmra.mxu0 %vm1797_vm7, %v15409_v14  ;;  %v15640_v33 = vpop.f32.mrf.mxu0 }
 0x3a4   : > { %2820 = vmatpush1.bf16.msra.mxu0 %v13353_v30  ;;  %v15685_v22 = vpack.c.bf16 %v15640_v33, %v15640_v33  ;;  %v13466_v30 = vld [vmem:[%s15381_s24 + $0xa24] ss:$36 sps:$4 sm:$0xff]  }
 0x3a5   : > { %2821 = vmatprep.subr.bf16.mxu0 %v13361_v32  ;;  %v13166_v36 = vpop.f32.mrf.mxu0  ;;  %v13469_v32 = vld [vmem:[%s15381_s24 + $0x5ac] ss:$36 sps:$4 sm:$0xff]   ;;  %v13464_v33 = vld [vmem:[%s15381_s24 + $0xa20] ss:$36 sps:$4 sm:$0xff]  }
 0x3a6   : > { %v13475_v36 = vld [vmem:[%s15381_s24 + $0x564] ss:$36 sps:$4 sm:$0xff]  }
 0x3a8   : > { %2822 = vmatpush1.bf16.msra.mxu0 %v13359_v34  ;;  %v13472_v34 = vld [vmem:[%s15381_s24 + $0x9dc] ss:$36 sps:$4 sm:$0xff]  }
 0x3a9   : > { %2823 = vmatprep.subr.bf16.mxu0 %v13367_v35  ;;  %v13467_v35 = vld [vmem:[%s15381_s24 + $0x5a8] ss:$36 sps:$4 sm:$0xff]  }
 0x3ac   : > { %2824 = vmatpush1.bf16.msra.mxu0 %v13365_v37  ;;  %v13470_v37 = vld [vmem:[%s15381_s24 + $0x9d8] ss:$36 sps:$4 sm:$0xff]  }
 0x3ad   : > { %2825 = vmatprep.subr.bf16.mxu0 %v13373_v38  ;;  %v13478_v38 = vld [vmem:[%s15381_s24 + $0x994] ss:$36 sps:$4 sm:$0xff]  }
 0x3b0   : > { %2826 = vmatpush1.bf16.msra.mxu0 %v13371_v39  ;;  %v13473_v39 = vld [vmem:[%s15381_s24 + $0x560] ss:$36 sps:$4 sm:$0xff]  }
 0x3b1   : > { %2827 = vmatprep.subr.bf16.mxu0 %v13379_v40  ;;  %v13481_v40 = vld [vmem:[%s15381_s24 + $0x51c] ss:$36 sps:$4 sm:$0xff]  }
 0x3b4   : > { %2828 = vmatpush1.bf16.msra.mxu0 %v13377_v41  ;;  %v13476_v41 = vld [vmem:[%s15381_s24 + $0x990] ss:$36 sps:$4 sm:$0xff]  }
 0x3b5   : > { %2829 = vmatprep.subr.bf16.mxu0 %v13385_v42  ;;  %v13484_v42 = vld [vmem:[%s15381_s24 + $0x94c] ss:$36 sps:$4 sm:$0xff]  }
 0x3b8   : > { %2830 = vmatpush1.bf16.msra.mxu0 %v13383_v43  ;;  %v13479_v43 = vld [vmem:[%s15381_s24 + $0x518] ss:$36 sps:$4 sm:$0xff]  }
 0x3b9   : > { %2831 = vmatprep.subr.bf16.mxu0 %v13391_v12  ;;  %v13487_v12 = vld [vmem:[%s15381_s24 + $0x4d4] ss:$36 sps:$4 sm:$0xff]  }
 0x3bc   : > { %2832 = vmatpush1.bf16.msra.mxu0 %v13389_v44  ;;  %v13482_v44 = vld [vmem:[%s15381_s24 + $0x948] ss:$36 sps:$4 sm:$0xff]  }
 0x3bd   : > { %2833 = vmatprep.subr.bf16.mxu0 %v13397_v46  ;;  %v13490_v46 = vld [vmem:[%s15381_s24 + $0x904] ss:$36 sps:$4 sm:$0xff]  }
 0x3c0   : > { %2834 = vmatpush1.bf16.msra.mxu0 %v13395_v47  ;;  %v13485_v47 = vld [vmem:[%s15381_s24 + $0x4d0] ss:$36 sps:$4 sm:$0xff]  }
 0x3c1   : > { %2835 = vmatprep.subr.bf16.mxu0 %v13403_v7  ;;  %v13493_v7 = vld [vmem:[%s15381_s24 + $0x48c] ss:$36 sps:$4 sm:$0xff]  }
 0x3c4   : > { %2836 = vmatpush2.bf16.msra.mxu0 %v13401_v48 }
 0x3c5   : > { %2837 = vmatprep.subr.bf16.mxu0 %v13409_v49  ;;  %v13488_v49 = vld [vmem:[%s15381_s24 + $0x900] ss:$36 sps:$4 sm:$0xff]  }
 0x3c8   : > { %2838 = vmatpush2.bf16.msra.mxu0 %v13407_v50  ;;  %v13496_v50 = vld [vmem:[%s15381_s24 + $0x204] ss:$36 sps:$4 sm:$0xff]  }
 0x3c9   : > { %2839 = vmatprep.subr.bf16.mxu0 %v13415_v51  ;;  %v13491_v51 = vld [vmem:[%s15381_s24 + $0x488] ss:$36 sps:$4 sm:$0xff]  }
 0x3cc   : > { %2840 = vmatpush2.bf16.msra.mxu0 %v13413_v52 }
 0x3cd   : > { %2841 = vmatprep.subr.bf16.mxu0 %v13421_v53  ;;  %v13499_v53 = vld [vmem:[%s15381_s24 + $0x8c4] ss:$36 sps:$4 sm:$0xff]  }
 0x3d0   : > { %2842 = vmatpush2.bf16.msra.mxu0 %v13419_v54  ;;  %v13494_v54 = vld [vmem:[%s15381_s24 + $0x200] ss:$36 sps:$4 sm:$0xff]  }
 0x3d1   : > { %2843 = vmatprep.subr.bf16.mxu0 %v13427_v55  ;;  %v13502_v55 = vld [vmem:[%s15381_s24 + $0x1bc] ss:$36 sps:$4 sm:$0xff]  }
 0x3d4   : > { %2844 = vmatpush2.bf16.msra.mxu0 %v13425_v56  ;;  %v13497_v56 = vld [vmem:[%s15381_s24 + $0x8c0] ss:$36 sps:$4 sm:$0xff]  }
 0x3d5   : > { %2845 = vmatprep.subr.bf16.mxu0 %v13433_v57  ;;  %v13505_v57 = vld [vmem:[%s15381_s24 + $0x87c] ss:$36 sps:$4 sm:$0xff]  }
 0x3d8   : > { %2846 = vmatpush2.bf16.msra.mxu0 %v13431_v58  ;;  %v13500_v58 = vld [vmem:[%s15381_s24 + $0x1b8] ss:$36 sps:$4 sm:$0xff]  }
 0x3d9   : > { %2847 = vmatprep.subr.bf16.mxu0 %v13439_v59  ;;  %v13508_v59 = vld [vmem:[%s15381_s24 + $0x174] ss:$36 sps:$4 sm:$0xff]  }
 0x3dc   : > { %2848 = vmatpush2.bf16.msra.mxu0 %v13437_v61  ;;  %v13503_v61 = vld [vmem:[%s15381_s24 + $0x878] ss:$36 sps:$4 sm:$0xff]  }
 0x3dd   : > { %2849 = vmatprep.subr.bf16.mxu0 %v13445_v1  ;;  %v13514_v1 = vld [vmem:[%s15381_s24 + $0x12c] ss:$36 sps:$4 sm:$0xff]  }
 0x3e0   : > { %2850 = vmatpush2.bf16.msra.mxu0 %v13443_v6  ;;  %v13509_v6 = vld [vmem:[%s15381_s24 + $0x830] ss:$36 sps:$4 sm:$0xff]  }
 0x3e1   : > { %2942 = vmatprep.subr.bf16.mxu0 %v13451_v63  ;;  %v13512_v63 = vld [vmem:[%s15381_s24 + $0x128] ss:$36 sps:$4 sm:$0xff]  }
 0x45f   : > { %v1874_v11 = vpop.f32.mrf.mxu0 }
 0x460   : > { %v15678_v17 = vpack.c.bf16 %v1874_v11, %v1874_v11  ;;  %v13520_v11 = vld [vmem:[%s15381_s24 + $0xe4] ss:$36 sps:$4 sm:$0xff]  }
 0x461   : > { %v1876_v13 = vpop.f32.mrf.mxu0 }
 0x462   : > { %v15675_v15 = vpack.c.bf16 %v1876_v13, %v1876_v13  ;;  %v13515_v13 = vld [vmem:[%s15381_s24 + $0x7e8] ss:$36 sps:$4 sm:$0xff]  }
 0x463   : > { %v1948_v20 = vpop.f32.mrf.mxu0 }
 0x464   : > { %v1956_v2 = vpack.c.bf16 %v1948_v20, %v1948_v20  ;;  %2810 = vmatprep.mubr.bf16.mxu1 %v15675_v15  ;;  %v13526_v20 = vld [vmem:[%s15381_s24 + $0x9c] ss:$36 sps:$4 sm:$0xff]  }
 0x465   : > { %2811 = vmatmul.mubr.bf16.vlgmr.msra.gmra.mxu1 %v15678_v17  ;;  %v1950_v48 = vpop.f32.mrf.mxu0 }
 0x466   : > { %2861 = vmatpush1.bf16.msra.mxu1 %v13446_v16  ;;  %2851 = vmatprep.mubr.bf16.mxu0 %v1956_v2  ;;  %v15718_v52 = vpack.c.bf16 %v1950_v48, %v1950_v48  ;;  %v13518_v16 = vld [vmem:[%s15381_s24 + $0xe0] ss:$36 sps:$4 sm:$0xff]  }
 0x467   : > { %2852 = vmatmul.mubr.bf16.vlgmr.msra.gmra.mxu0 %v15685_v22  ;;  %2862 = vmatprep.subr.bf16.mxu1 %v13454_v21  ;;  %v13521_v21 = vld [vmem:[%s15381_s24 + $0x7a0] ss:$36 sps:$4 sm:$0xff]  }
 0x468   : > { %2943 = vmatpush1.bf16.msra.mxu0 %v13449_v4  ;;  %2892 = vmatprep.mubr.bf16.mxu1 %v15206_v27  ;;  %v13524_v4 = vld [vmem:[%s15381_s24 + $0x98] ss:$36 sps:$4 sm:$0xff]  }
 0x469   : > { %2944 = vmatprep.subr.bf16.mxu0 %v13457_v23  ;;  %2974 = vmatprep.mubr.bf16.mxu0 %v1956_v2  ;;  %v13529_v2 = vld [vmem:[%s15381_s24 + $0x75c] ss:$36 sps:$4 sm:$0xff]   ;;  %v13532_v23 = vld [vmem:[%s15381_s24 + $0x54] ss:$36 sps:$4 sm:$0xff]  }
 0x46a   : > { %2863 = vmatpush1.bf16.msra.mxu1 %v13452_v24  ;;  %v13527_v24 = vld [vmem:[%s15381_s24 + $0x758] ss:$36 sps:$4 sm:$0xff]  }
 0x46b   : > { %2864 = vmatprep.subr.bf16.mxu1 %v13460_v25  ;;  %v13535_v25 = vld [vmem:[%s15381_s24 + $0x714] ss:$36 sps:$4 sm:$0xff]   ;;  %v13604_v48 = vld [vmem:[%s15381_s24 + $0xc1c] ss:$36 sps:$4 sm:$0xff]  }
 0x46c   : > { %2945 = vmatpush1.bf16.msra.mxu0 %v13455_v26  ;;  %v13530_v26 = vld [vmem:[%s15381_s24 + $0x50] ss:$36 sps:$4 sm:$0xff]  }
 0x46d   : > { %2946 = vmatprep.subr.bf16.mxu0 %v13463_v28  ;;  %v13538_v28 = vld [vmem:[%s15381_s24 + $0xc] ss:$36 sps:$4 sm:$0xff]  }
 0x46e   : > { %2865 = vmatpush1.bf16.msra.mxu1 %v13458_v29  ;;  %v13533_v29 = vld [vmem:[%s15381_s24 + $0x710] ss:$36 sps:$4 sm:$0xff]  }
 0x46f   : > { %2866 = vmatprep.subr.bf16.mxu1 %v13466_v30  ;;  %v13541_v30 = vld [vmem:[%s15381_s24 + $0x6cc] ss:$36 sps:$4 sm:$0xff]  }
 0x470   : > { %2947 = vmatpush1.bf16.msra.mxu0 %v13461_v31  ;;  %v13536_v31 = vld [vmem:[%s15381_s24 + $0x8] ss:$36 sps:$4 sm:$0xff]  }
 0x471   : > { %2948 = vmatprep.subr.bf16.mxu0 %v13469_v32  ;;  %v13544_v32 = vld [vmem:[%s15381_s24 + $0x444] ss:$36 sps:$4 sm:$0xff]  }
 0x472   : > { %2867 = vmatpush1.bf16.msra.mxu1 %v13464_v33  ;;  %v13539_v33 = vld [vmem:[%s15381_s24 + $0x6c8] ss:$36 sps:$4 sm:$0xff]  }
 0x473   : > { %2868 = vmatprep.subr.bf16.mxu1 %v13472_v34  ;;  %v13592_v34 = vld [vmem:[%s15381_s24 + $0xd3c] ss:$36 sps:$4 sm:$0xff]  }
 0x474   : > { %2949 = vmatpush1.bf16.msra.mxu0 %v13467_v35  ;;  %v13542_v35 = vld [vmem:[%s15381_s24 + $0x440] ss:$36 sps:$4 sm:$0xff]  }
 0x475   : > { %2950 = vmatprep.subr.bf16.mxu0 %v13475_v36  ;;  %v13547_v36 = vld [vmem:[%s15381_s24 + $0x3fc] ss:$36 sps:$4 sm:$0xff]  }
 0x476   : > { %2869 = vmatpush1.bf16.msra.mxu1 %v13470_v37  ;;  %v13590_v37 = vld [vmem:[%s15381_s24 + $0xd38] ss:$36 sps:$4 sm:$0xff]  }
 0x477   : > { %2870 = vmatprep.subr.bf16.mxu1 %v13478_v38  ;;  %v13595_v38 = vld [vmem:[%s15381_s24 + $0xcf4] ss:$36 sps:$4 sm:$0xff]  }
 0x478   : > { %2951 = vmatpush1.bf16.msra.mxu0 %v13473_v39  ;;  %v13545_v39 = vld [vmem:[%s15381_s24 + $0x3f8] ss:$36 sps:$4 sm:$0xff]  }
 0x479   : > { %2952 = vmatprep.subr.bf16.mxu0 %v13481_v40  ;;  %v13550_v40 = vld [vmem:[%s15381_s24 + $0x3b4] ss:$36 sps:$4 sm:$0xff]  }
 0x47a   : > { %2871 = vmatpush1.bf16.msra.mxu1 %v13476_v41  ;;  %v13593_v41 = vld [vmem:[%s15381_s24 + $0xcf0] ss:$36 sps:$4 sm:$0xff]  }
 0x47b   : > { %2872 = vmatprep.subr.bf16.mxu1 %v13484_v42  ;;  %v13598_v42 = vld [vmem:[%s15381_s24 + $0xcac] ss:$36 sps:$4 sm:$0xff]  }
 0x47c   : > { %2953 = vmatpush1.bf16.msra.mxu0 %v13479_v43  ;;  %v13548_v43 = vld [vmem:[%s15381_s24 + $0x3b0] ss:$36 sps:$4 sm:$0xff]  }
 0x47d   : > { %2954 = vmatprep.subr.bf16.mxu0 %v13487_v12  ;;  %v13553_v12 = vld [vmem:[%s15381_s24 + $0x36c] ss:$36 sps:$4 sm:$0xff]  }
 0x47e   : > { %2873 = vmatpush1.bf16.msra.mxu1 %v13482_v44  ;;  %v13596_v44 = vld [vmem:[%s15381_s24 + $0xca8] ss:$36 sps:$4 sm:$0xff]  }
 0x47f   : > { %2874 = vmatprep.subr.bf16.mxu1 %v13490_v46  ;;  %v13551_v46 = vld [vmem:[%s15381_s24 + $0x368] ss:$36 sps:$4 sm:$0xff]  }
 0x480   : > { %2955 = vmatpush1.bf16.msra.mxu0 %v13485_v47  ;;  %v13556_v47 = vld [vmem:[%s15381_s24 + $0x324] ss:$36 sps:$4 sm:$0xff]  }
 0x481   : > { %2956 = vmatprep.subr.bf16.mxu0 %v13493_v7  ;;  %v13599_v7 = vld [vmem:[%s15381_s24 + $0xc60] ss:$36 sps:$4 sm:$0xff]  }
 0x482   : > { %2875 = vmatpush1.bf16.msra.mxu1 %v13488_v49  ;;  %v13554_v49 = vld [vmem:[%s15381_s24 + $0x320] ss:$36 sps:$4 sm:$0xff]  }
 0x483   : > { %2901 = vmatprep.subr.bf16.mxu1 %v13496_v50  ;;  %v13559_v50 = vld [vmem:[%s15381_s24 + $0x2dc] ss:$36 sps:$4 sm:$0xff]  }
 0x484   : > { %2957 = vmatpush1.bf16.msra.mxu0 %v13491_v51  ;;  %v13602_v51 = vld [vmem:[%s15381_s24 + $0xc18] ss:$36 sps:$4 sm:$0xff]  }
 0x485   : > { %2893 = vmatmul.mubr.bf16.vlgmr.msra.gmra.mxu1 %v15718_v52  ;;  %2958 = vmatprep.subr.bf16.mxu0 %v13499_v53  ;;  %v13607_v53 = vld [vmem:[%s15381_s24 + $0xbd4] ss:$36 sps:$4 sm:$0xff]  }
 0x486   : > { %2902 = vmatpush1.bf16.msra.mxu1 %v13494_v54  ;;  %2933 = vmatprep.mubr.bf16.mxu1 %v15675_v15  ;;  %v13523_v15 = vld [vmem:[%s15381_s24 + $0x7a4] ss:$36 sps:$4 sm:$0xff]   ;;  %v13557_v54 = vld [vmem:[%s15381_s24 + $0x2d8] ss:$36 sps:$4 sm:$0xff]  }
 0x487   : > { %2903 = vmatprep.subr.bf16.mxu1 %v13502_v55  ;;  %v13562_v55 = vld [vmem:[%s15381_s24 + $0x294] ss:$36 sps:$4 sm:$0xff]  }
 0x488   : > { %2959 = vmatpush2.bf16.msra.mxu0 %v13497_v56  ;;  %v13605_v56 = vld [vmem:[%s15381_s24 + $0xbd0] ss:$36 sps:$4 sm:$0xff]  }
 0x489   : > { %2960 = vmatprep.subr.bf16.mxu0 %v13505_v57  ;;  %v13610_v57 = vld [vmem:[%s15381_s24 + $0xb8c] ss:$36 sps:$4 sm:$0xff]  }
 0x48a   : > { %2904 = vmatpush1.bf16.msra.mxu1 %v13500_v58  ;;  %v13560_v58 = vld [vmem:[%s15381_s24 + $0x290] ss:$36 sps:$4 sm:$0xff]  }
 0x48b   : > { %2905 = vmatprep.subr.bf16.mxu1 %v13508_v59  ;;  %v13565_v59 = vld [vmem:[%s15381_s24 + $0x24c] ss:$36 sps:$4 sm:$0xff]  }
 0x48c   : > { %2961 = vmatpush2.bf16.msra.mxu0 %v13503_v61  ;;  %v13608_v61 = vld [vmem:[%s15381_s24 + $0xb88] ss:$36 sps:$4 sm:$0xff]  }
 0x48d   : > { %2962 = vmatprep.subr.bf16.mxu0 %v13511_v62  ;;  %v13613_v62 = vld [vmem:[%s15381_s24 + $0xb44] ss:$36 sps:$4 sm:$0xff]  }
 0x48e   : > { %2906 = vmatpush1.bf16.msra.mxu1 %v13506_v0  ;;  %v13563_v0 = vld [vmem:[%s15381_s24 + $0x248] ss:$36 sps:$4 sm:$0xff]  }
 0x48f   : > { %2907 = vmatprep.subr.bf16.mxu1 %v13514_v1  ;;  %v13568_v1 = vld [vmem:[%s15381_s24 + $0xb04] ss:$36 sps:$4 sm:$0xff]  }
 0x490   : > { %2963 = vmatpush2.bf16.msra.mxu0 %v13509_v6  ;;  %v13611_v6 = vld [vmem:[%s15381_s24 + $0xb40] ss:$36 sps:$4 sm:$0xff]  }
 0x491   : > { %2964 = vmatprep.subr.bf16.mxu0 %v13517_v10  ;;  %v13616_v10 = vld [vmem:[%s15381_s24 + $0xf7c] ss:$36 sps:$4 sm:$0xff]  }
 0x492   : > { %2908 = vmatpush1.bf16.msra.mxu1 %v13512_v63  ;;  %v13566_v63 = vld [vmem:[%s15381_s24 + $0xb00] ss:$36 sps:$4 sm:$0xff]  }
 0x493   : > { %2909 = vmatprep.subr.bf16.mxu1 %v13520_v11  ;;  %v13571_v11 = vld [vmem:[%s15381_s24 + $0xabc] ss:$36 sps:$4 sm:$0xff]  }
 0x494   : > { %2965 = vmatpush2.bf16.msra.mxu0 %v13515_v13  ;;  %v13614_v13 = vld [vmem:[%s15381_s24 + $0xf78] ss:$36 sps:$4 sm:$0xff]  }
 0x495   : > { %2966 = vmatprep.subr.bf16.mxu0 %v13523_v15  ;;  %v13619_v15 = vld [vmem:[%s15381_s24 + $0xf34] ss:$36 sps:$4 sm:$0xff]  }
 0x496   : > { %2910 = vmatpush1.bf16.msra.mxu1 %v13518_v16  ;;  %v13569_v16 = vld [vmem:[%s15381_s24 + $0xab8] ss:$36 sps:$4 sm:$0xff]  }
 0x497   : > { %2911 = vmatprep.subr.bf16.mxu1 %v13526_v20  ;;  %v13574_v20 = vld [vmem:[%s15381_s24 + $0xa74] ss:$36 sps:$4 sm:$0xff]  }
 0x498   : > { %2967 = vmatpush2.bf16.msra.mxu0 %v13521_v21  ;;  %v13617_v21 = vld [vmem:[%s15381_s24 + $0xf30] ss:$36 sps:$4 sm:$0xff]  }
 0x499   : > { %2968 = vmatprep.subr.bf16.mxu0 %v13529_v2  ;;  %v13622_v2 = vld [vmem:[%s15381_s24 + $0xeec] ss:$36 sps:$4 sm:$0xff]  }
 0x49a   : > { %2912 = vmatpush1.bf16.msra.mxu1 %v13524_v4  ;;  %v13577_v4 = vld [vmem:[%s15381_s24 + $0xa2c] ss:$36 sps:$4 sm:$0xff]  }
 0x49b   : > { %2913 = vmatprep.subr.bf16.mxu1 %v13532_v23  ;;  %v13620_v23 = vld [vmem:[%s15381_s24 + $0xee8] ss:$36 sps:$4 sm:$0xff]  }
 0x49c   : > { %2969 = vmatpush2.bf16.msra.mxu0 %v13527_v24  ;;  %v13575_v24 = vld [vmem:[%s15381_s24 + $0xa28] ss:$36 sps:$4 sm:$0xff]  }
 0x49d   : > { %2970 = vmatprep.subr.bf16.mxu0 %v13535_v25  ;;  %v13580_v25 = vld [vmem:[%s15381_s24 + $0x9e4] ss:$36 sps:$4 sm:$0xff]  }
 0x49e   : > { %2914 = vmatpush1.bf16.msra.mxu1 %v13530_v26  ;;  %v13623_v26 = vld [vmem:[%s15381_s24 + $0xea0] ss:$36 sps:$4 sm:$0xff]  }
 0x49f   : > { %2915 = vmatprep.subr.bf16.mxu1 %v13538_v28  ;;  %v13628_v28 = vld [vmem:[%s15381_s24 + $0xe5c] ss:$36 sps:$4 sm:$0xff]  }
 0x4a0   : > { %2971 = vmatpush2.bf16.msra.mxu0 %v13533_v29  ;;  %v13578_v29 = vld [vmem:[%s15381_s24 + $0x9e0] ss:$36 sps:$4 sm:$0xff]  }
 0x4a1   : > { %2972 = vmatprep.subr.bf16.mxu0 %v13541_v30  ;;  %v13583_v30 = vld [vmem:[%s15381_s24 + $0x99c] ss:$36 sps:$4 sm:$0xff]  }
 0x4a2   : > { %2916 = vmatpush1.bf16.msra.mxu1 %v13536_v31  ;;  %v13626_v31 = vld [vmem:[%s15381_s24 + $0xe58] ss:$36 sps:$4 sm:$0xff]  }
 0x4a3   : > { %2917 = vmatprep.subr.bf16.mxu1 %v13544_v32  ;;  %v13631_v32 = vld [vmem:[%s15381_s24 + $0xe14] ss:$36 sps:$4 sm:$0xff]  }
 0x4a4   : > { %2973 = vmatpush2.bf16.msra.mxu0 %v13539_v33  ;;  %v13581_v33 = vld [vmem:[%s15381_s24 + $0x998] ss:$36 sps:$4 sm:$0xff]  }
 0x4a5   : > { %4549 = vmatprep.subr.bf16.mxu0 %v13592_v34  ;;  %v13586_v34 = vld [vmem:[%s15381_s24 + $0x954] ss:$36 sps:$4 sm:$0xff]  }
 0x4a6   : > { %2918 = vmatpush2.bf16.msra.mxu1 %v13542_v35  ;;  %v13629_v35 = vld [vmem:[%s15381_s24 + $0xe10] ss:$36 sps:$4 sm:$0xff]  }
 0x4a7   : > { %2975 = vmatmul.mubr.bf16.vlgmr.msra.gmra.mxu0 %v15685_v22  ;;  %2919 = vmatprep.subr.bf16.mxu1 %v13547_v36  ;;  %v13601_v22 = vld [vmem:[%s15381_s24 + $0xc64] ss:$36 sps:$4 sm:$0xff]   ;;  %v13634_v36 = vld [vmem:[%s15381_s24 + $0xdcc] ss:$36 sps:$4 sm:$0xff]  }
 0x4a8   : > { %4550 = vmatpush1.bf16.msra.mxu0 %v13590_v37  ;;  %v13584_v37 = vld [vmem:[%s15381_s24 + $0x950] ss:$36 sps:$4 sm:$0xff]  }
 0x4a9   : > { %4551 = vmatprep.subr.bf16.mxu0 %v13595_v38  ;;  %v13589_v38 = vld [vmem:[%s15381_s24 + $0x90c] ss:$36 sps:$4 sm:$0xff]  }
 0x4aa   : > { %2920 = vmatpush2.bf16.msra.mxu1 %v13545_v39  ;;  %v13632_v39 = vld [vmem:[%s15381_s24 + $0xdc8] ss:$36 sps:$4 sm:$0xff]  }
 0x4ab   : > { %2921 = vmatprep.subr.bf16.mxu1 %v13550_v40  ;;  %v13637_v40 = vld [vmem:[%s15381_s24 + $0xd84] ss:$36 sps:$4 sm:$0xff]  }
 0x4ac   : > { %4552 = vmatpush1.bf16.msra.mxu0 %v13593_v41  ;;  %v13587_v41 = vld [vmem:[%s15381_s24 + $0x908] ss:$36 sps:$4 sm:$0xff]  }
 0x4ad   : > { %4553 = vmatprep.subr.bf16.mxu0 %v13598_v42  ;;  %v13635_v42 = vld [vmem:[%s15381_s24 + $0xd80] ss:$36 sps:$4 sm:$0xff]  }
 0x4ae   : > { %2922 = vmatpush2.bf16.msra.mxu1 %v13548_v43  ;;  %v13640_v43 = vld [vmem:[%s15381_s24 + $0xd44] ss:$36 sps:$4 sm:$0xff]  }
 0x4af   : > { %2923 = vmatprep.subr.bf16.mxu1 %v13553_v12  ;;  %v13662_v12 = vld [vmem:[%s15381_s24 + $0x11b8] ss:$36 sps:$4 sm:$0xff]  }
 0x4b0   : > { %4554 = vmatpush1.bf16.msra.mxu0 %v13596_v44  ;;  %v13664_v44 = vld [vmem:[%s15381_s24 + $0x11bc] ss:$36 sps:$4 sm:$0xff]  }
 0x4b1   : > { %4555 = vmatprep.subr.bf16.mxu0 %v13601_v22  ;;  %v13668_v22 = vld [vmem:[%s15381_s24 + $0x1170] ss:$36 sps:$4 sm:$0xff]  }
 0x4b2   : > { %2924 = vmatpush2.bf16.msra.mxu1 %v13551_v46  ;;  %v13670_v46 = vld [vmem:[%s15381_s24 + $0x1174] ss:$36 sps:$4 sm:$0xff]  }
 0x4b3   : > { %2925 = vmatprep.subr.bf16.mxu1 %v13556_v47  ;;  %v13674_v47 = vld [vmem:[%s15381_s24 + $0x1128] ss:$36 sps:$4 sm:$0xff]  }
 0x4b4   : > { %4556 = vmatpush1.bf16.msra.mxu0 %v13599_v7  ;;  %v13676_v7 = vld [vmem:[%s15381_s24 + $0x112c] ss:$36 sps:$4 sm:$0xff]  }
 0x4b5   : > { %4557 = vmatprep.subr.bf16.mxu0 %v13604_v48  ;;  %v13682_v48 = vld [vmem:[%s15381_s24 + $0x10e4] ss:$36 sps:$4 sm:$0xff]  }
 0x4b6   : > { %2926 = vmatpush2.bf16.msra.mxu1 %v13554_v49  ;;  %v13686_v49 = vld [vmem:[%s15381_s24 + $0x1098] ss:$36 sps:$4 sm:$0xff]  }
 0x4b7   : > { %2927 = vmatprep.subr.bf16.mxu1 %v13559_v50  ;;  %v13688_v50 = vld [vmem:[%s15381_s24 + $0x109c] ss:$36 sps:$4 sm:$0xff]  }
 0x4b8   : > { %4558 = vmatpush1.bf16.msra.mxu0 %v13602_v51  ;;  %v13692_v51 = vld [vmem:[%s15381_s24 + $0x1050] ss:$36 sps:$4 sm:$0xff]  }
 0x4b9   : > { %4559 = vmatprep.subr.bf16.mxu0 %v13607_v53  ;;  %v13694_v53 = vld [vmem:[%s15381_s24 + $0x1054] ss:$36 sps:$4 sm:$0xff]  }
 0x4ba   : > { %2928 = vmatpush2.bf16.msra.mxu1 %v13557_v54  ;;  %v13700_v54 = vld [vmem:[%s15381_s24 + $0x100c] ss:$36 sps:$4 sm:$0xff]  }
 0x4bb   : > { %2929 = vmatprep.subr.bf16.mxu1 %v13562_v55  ;;  %v13698_v55 = vld [vmem:[%s15381_s24 + $0x1008] ss:$36 sps:$4 sm:$0xff]  }
 0x4bc   : > { %4560 = vmatpush1.bf16.msra.mxu0 %v13605_v56  ;;  %v13704_v56 = vld [vmem:[%s15381_s24 + $0xfc0] ss:$36 sps:$4 sm:$0xff]  }
 0x4bd   : > { %4561 = vmatprep.subr.bf16.mxu0 %v13610_v57  ;;  %v13706_v57 = vld [vmem:[%s15381_s24 + $0xfc4] ss:$36 sps:$4 sm:$0xff]  }
 0x4be   : > { %2930 = vmatpush2.bf16.msra.mxu1 %v13560_v58  ;;  %v13710_v58 = vld [vmem:[%s15381_s24 + $0x13f8] ss:$36 sps:$4 sm:$0xff]  }
 0x4bf   : > { %2931 = vmatprep.subr.bf16.mxu1 %v13565_v59  ;;  %v13712_v59 = vld [vmem:[%s15381_s24 + $0x13fc] ss:$36 sps:$4 sm:$0xff]  }
 0x4c0   : > { %4562 = vmatpush1.bf16.msra.mxu0 %v13608_v61  ;;  %v13716_v61 = vld [vmem:[%s15381_s24 + $0x13b0] ss:$36 sps:$4 sm:$0xff]  }
 0x4c1   : > { %4563 = vmatprep.subr.bf16.mxu0 %v13613_v62  ;;  %v13718_v62 = vld [vmem:[%s15381_s24 + $0x13b4] ss:$36 sps:$4 sm:$0xff]  }
 0x4c2   : > { %2932 = vmatpush2.bf16.msra.mxu1 %v13563_v0  ;;  %v13722_v0 = vld [vmem:[%s15381_s24 + $0x1368] ss:$36 sps:$4 sm:$0xff]  }
 0x4c3   : > { %2983 = vmatprep.subr.bf16.mxu1 %v13568_v1  ;;  %v13724_v1 = vld [vmem:[%s15381_s24 + $0x136c] ss:$36 sps:$4 sm:$0xff]  }
 0x4c4   : > { %4564 = vmatpush1.bf16.msra.mxu0 %v13611_v6  ;;  %v13728_v6 = vld [vmem:[%s15381_s24 + $0x1320] ss:$36 sps:$4 sm:$0xff]  }
 0x4c5   : > { %2934 = vmatmul.mubr.bf16.vlgmr.msra.gmra.mxu1 %v15678_v17  ;;  %4565 = vmatprep.subr.bf16.mxu0 %v13616_v10  ;;  %v13572_v17 = vld [vmem:[%s15381_s24 + $0xa70] ss:$36 sps:$4 sm:$0xff]   ;;  %v13730_v10 = vld [vmem:[%s15381_s24 + $0x1324] ss:$36 sps:$4 sm:$0xff]  }
 0x4c6   : > { %2984 = vmatpush1.bf16.msra.mxu1 %v13566_v63  ;;  %3015 = vmatprep.mubr.bf16.mxu1 %v15206_v27  ;;  %v13625_v27 = vld [vmem:[%s15381_s24 + $0xea4] ss:$36 sps:$4 sm:$0xff]   ;;  %v13734_v63 = vld [vmem:[%s15381_s24 + $0x12d8] ss:$36 sps:$4 sm:$0xff]  }
 0x4c7   : > { %2985 = vmatprep.subr.bf16.mxu1 %v13571_v11  ;;  %v13736_v11 = vld [vmem:[%s15381_s24 + $0x12dc] ss:$36 sps:$4 sm:$0xff]  }
 0x4c8   : > { %4566 = vmatpush2.bf16.msra.mxu0 %v13614_v13  ;;  %v13740_v13 = vld [vmem:[%s15381_s24 + $0x1290] ss:$36 sps:$4 sm:$0xff]  }
 0x4c9   : > { %4567 = vmatprep.subr.bf16.mxu0 %v13619_v15  ;;  %v13742_v15 = vld [vmem:[%s15381_s24 + $0x1294] ss:$36 sps:$4 sm:$0xff]  }
 0x4ca   : > { %2986 = vmatpush1.bf16.msra.mxu1 %v13569_v16 }
 0x4cb   : > { %2987 = vmatprep.subr.bf16.mxu1 %v13574_v20  ;;  %v13748_v20 = vld [vmem:[%s15381_s24 + $0x124c] ss:$36 sps:$4 sm:$0xff]  }
 0x4cc   : > { %4568 = vmatpush2.bf16.msra.mxu0 %v13617_v21  ;;  %v13746_v21 = vld [vmem:[%s15381_s24 + $0x1248] ss:$36 sps:$4 sm:$0xff]  }
 0x4cd   : > { %4569 = vmatprep.subr.bf16.mxu0 %v13622_v2 }
 0x4ce   : > { %2988 = vmatpush1.bf16.msra.mxu1 %v13572_v17 }
 0x4cf   : > { %2989 = vmatprep.subr.bf16.mxu1 %v13577_v4 }
 0x4d0   : > { %4570 = vmatpush2.bf16.msra.mxu0 %v13620_v23 }
 0x4d1   : > { %4571 = vmatprep.subr.bf16.mxu0 %v13625_v27  ;;  %v13754_v27 = vld [vmem:[%s15381_s24 + $0x1204] ss:$36 sps:$4 sm:$0xff]  }
 0x4d2   : > { %2990 = vmatpush1.bf16.msra.mxu1 %v13575_v24  ;;  %v13752_v24 = vld [vmem:[%s15381_s24 + $0x1200] ss:$36 sps:$4 sm:$0xff]  }
 0x4d3   : > { %2991 = vmatprep.subr.bf16.mxu1 %v13580_v25 }
 0x4d4   : > { %4572 = vmatpush2.bf16.msra.mxu0 %v13623_v26 }
 0x4d5   : > { %4573 = vmatprep.subr.bf16.mxu0 %v13628_v28 }
 0x4d6   : > { %2992 = vmatpush1.bf16.msra.mxu1 %v13578_v29  ;;  %v13760_v29 = vld [vmem:[%s15381_s24 + $0x11c4] ss:$36 sps:$4 sm:$0xff]  }
 0x4d7   : > { %2993 = vmatprep.subr.bf16.mxu1 %v13583_v30  ;;  %v1788_v30 = vld [vmem:[%s15381_s24 + $0x1440] sm:$0x11] }
 0x4d8   : > { %4574 = vmatpush2.bf16.msra.mxu0 %v13626_v31  ;;  %v1958_v31 = vunpack.c.l.bf16 %v1788_v30 }
 0x4d9   : > { %4575 = vmatprep.subr.bf16.mxu0 %v13631_v32  ;;  %v1959_v32 = vunpack.c.h.bf16 %v1788_v30  ;;  %v13707_v30 = vld [vmem:[%s15381_s24 + $0xd88] ss:$36 sps:$4 sm:$0xff]  }
 0x4da   : > { %2994 = vmatpush1.bf16.msra.mxu1 %v13581_v33  ;;  %v1965_v33 = vrot.slane %v1958_v31, %v15506_v5 }
 0x4db   : > { %2995 = vmatprep.subr.bf16.mxu1 %v13586_v34  ;;  %v1969_v34 = vrot.slane %v1959_v32, %v15506_v5  ;;  %v13715_v32 = vld [vmem:[%s15381_s24 + $0xd4c] ss:$36 sps:$4 sm:$0xff]  }
 0x4dc   : > { %4576 = vmatpush2.bf16.msra.mxu0 %v13629_v35 }
 0x4dd   : > { %4577 = vmatprep.subr.bf16.mxu0 %v13634_v36 }
 0x4de   : > { %2996 = vmatpush1.bf16.msra.mxu1 %v13584_v37 }
 0x4df   : > { %2997 = vmatprep.subr.bf16.mxu1 %v13589_v38 }
 0x4e0   : > { %4578 = vmatpush2.bf16.msra.mxu0 %v13632_v39 }
 0x4e1   : > { %4579 = vmatprep.subr.bf16.mxu0 %v13637_v40 }
 0x4e2   : > { %2998 = vmatpush1.bf16.msra.mxu1 %v13587_v41 }
 0x4e3   : > { %4590 = vmatprep.subr.bf16.mxu1 %v13664_v44 }
 0x4e4   : > { %4580 = vmatpush2.bf16.msra.mxu0 %v13635_v42 }
 0x4e5   : > { %3016 = vmatmul.mubr.bf16.vlgmr.msra.gmra.mxu1 %v15718_v52  ;;  %4631 = vmatprep.subr.bf16.mxu0 %v13640_v43  ;;  %v13680_v52 = vld [vmem:[%s15381_s24 + $0x10e0] ss:$36 sps:$4 sm:$0xff]  }
 0x4e6   : > { %4591 = vmatpush1.bf16.msra.mxu1 %v13662_v12 }
 0x4e7   : > { %4592 = vmatprep.subr.bf16.mxu1 %v13670_v46 }
 0x4ea   : > { %4593 = vmatpush1.bf16.msra.mxu1 %v13668_v22 }
 0x4eb   : > { %4594 = vmatprep.subr.bf16.mxu1 %v13676_v7 }
 0x4ee   : > { %4595 = vmatpush1.bf16.msra.mxu1 %v13674_v47  ;;  %v13638_v47 = vld [vmem:[%s15381_s24 + $0xd40] ss:$36 sps:$4 sm:$0xff]  }
 0x4ef   : > { %4596 = vmatprep.subr.bf16.mxu1 %v13682_v48  ;;  %v13641_v48 = vld [vmem:[%s15381_s24 + $0xcf8] ss:$36 sps:$4 sm:$0xff]  }
 0x4f2   : > { %4597 = vmatpush1.bf16.msra.mxu1 %v13680_v52  ;;  %v13643_v52 = vld [vmem:[%s15381_s24 + $0xcfc] ss:$36 sps:$4 sm:$0xff]  }
 0x4f3   : > { %4598 = vmatprep.subr.bf16.mxu1 %v13688_v50  ;;  %v13644_v50 = vld [vmem:[%s15381_s24 + $0xcb0] ss:$36 sps:$4 sm:$0xff]  }
 0x4f6   : > { %4599 = vmatpush1.bf16.msra.mxu1 %v13686_v49  ;;  %v13646_v49 = vld [vmem:[%s15381_s24 + $0xcb4] ss:$36 sps:$4 sm:$0xff]  }
 0x4f7   : > { %4600 = vmatprep.subr.bf16.mxu1 %v13694_v53  ;;  %v13647_v53 = vld [vmem:[%s15381_s24 + $0xc68] ss:$36 sps:$4 sm:$0xff]  }
 0x4fa   : > { %4601 = vmatpush1.bf16.msra.mxu1 %v13692_v51  ;;  %v13649_v51 = vld [vmem:[%s15381_s24 + $0xc6c] ss:$36 sps:$4 sm:$0xff]  }
 0x4fb   : > { %4602 = vmatprep.subr.bf16.mxu1 %v13700_v54  ;;  %v13652_v54 = vld [vmem:[%s15381_s24 + $0xc24] ss:$36 sps:$4 sm:$0xff]  }
 0x4fe   : > { %4603 = vmatpush1.bf16.msra.mxu1 %v13698_v55  ;;  %v13650_v55 = vld [vmem:[%s15381_s24 + $0xc20] ss:$36 sps:$4 sm:$0xff]  }
 0x4ff   : > { %4604 = vmatprep.subr.bf16.mxu1 %v13706_v57  ;;  %v13653_v57 = vld [vmem:[%s15381_s24 + $0xbd8] ss:$36 sps:$4 sm:$0xff]  }
 0x502   : > { %4605 = vmatpush1.bf16.msra.mxu1 %v13704_v56  ;;  %v13655_v56 = vld [vmem:[%s15381_s24 + $0xbdc] ss:$36 sps:$4 sm:$0xff]  }
 0x503   : > { %4606 = vmatprep.subr.bf16.mxu1 %v13712_v59  ;;  %v13656_v59 = vld [vmem:[%s15381_s24 + $0xb90] ss:$36 sps:$4 sm:$0xff]  }
 0x506   : > { %4607 = vmatpush2.bf16.msra.mxu1 %v13710_v58  ;;  %v13658_v58 = vld [vmem:[%s15381_s24 + $0xb94] ss:$36 sps:$4 sm:$0xff]  }
 0x507   : > { %4608 = vmatprep.subr.bf16.mxu1 %v13718_v62 }
 0x50a   : > { %4609 = vmatpush2.bf16.msra.mxu1 %v13716_v61  ;;  %v13661_v61 = vld [vmem:[%s15381_s24 + $0xb4c] ss:$36 sps:$4 sm:$0xff]  }
 0x50b   : > { %4610 = vmatprep.subr.bf16.mxu1 %v13724_v1 }
 0x50e   : > { %4611 = vmatpush2.bf16.msra.mxu1 %v13722_v0  ;;  %v13659_v0 = vld [vmem:[%s15381_s24 + $0xb48] ss:$36 sps:$4 sm:$0xff]  }
 0x50f   : > { %4612 = vmatprep.subr.bf16.mxu1 %v13730_v10 }
 0x512   : > { %4613 = vmatpush2.bf16.msra.mxu1 %v13728_v6  ;;  %v13667_v6 = vld [vmem:[%s15381_s24 + $0xf84] ss:$36 sps:$4 sm:$0xff]  }
 0x513   : > { %4614 = vmatprep.subr.bf16.mxu1 %v13736_v11 }
 0x516   : > { %4615 = vmatpush2.bf16.msra.mxu1 %v13734_v63  ;;  %v13665_v63 = vld [vmem:[%s15381_s24 + $0xf80] ss:$36 sps:$4 sm:$0xff]  }
 0x517   : > { %4616 = vmatprep.subr.bf16.mxu1 %v13742_v15  ;;  %v13671_v15 = vld [vmem:[%s15381_s24 + $0xf38] ss:$36 sps:$4 sm:$0xff]  }
 0x51a   : > { %4617 = vmatpush2.bf16.msra.mxu1 %v13740_v13  ;;  %v13673_v13 = vld [vmem:[%s15381_s24 + $0xf3c] ss:$36 sps:$4 sm:$0xff]  }
 0x51b   : > { %4618 = vmatprep.subr.bf16.mxu1 %v13748_v20  ;;  %v13677_v20 = vld [vmem:[%s15381_s24 + $0xef0] ss:$36 sps:$4 sm:$0xff]  }
 0x51e   : > { %4619 = vmatpush2.bf16.msra.mxu1 %v13746_v21  ;;  %v13685_v21 = vld [vmem:[%s15381_s24 + $0xeac] ss:$36 sps:$4 sm:$0xff]  }
 0x51f   : > { %4620 = vmatprep.subr.bf16.mxu1 %v13754_v27  ;;  %v13695_v27 = vld [vmem:[%s15381_s24 + $0xe18] ss:$36 sps:$4 sm:$0xff]  }
 0x522   : > { %4621 = vmatpush2.bf16.msra.mxu1 %v13752_v24  ;;  %v13703_v24 = vld [vmem:[%s15381_s24 + $0xdd4] ss:$36 sps:$4 sm:$0xff]  }
 0x523   : > { %4672 = vmatprep.subr.bf16.mxu1 %v13760_v29 }
 0x525   : > { %v2812_v16 = vpop.f32.mrf.mxu1 }
 0x526   : > { %v2813_v35 = vadd.f32 %v2812_v16, %v1965_v33  ;;  %v13679_v16 = vld [vmem:[%s15381_s24 + $0xef4] ss:$36 sps:$4 sm:$0xff]  }
 0x527   : > { %v2814_v2 = vpop.f32.mrf.mxu1  ;;  %v2853_v17 = vpop.f32.mrf.mxu0 }
 0x528   : > { %v2815_v36 = vadd.f32 %v2814_v2, %v1969_v34  ;;  %v2854_v37 = vadd.f32 %v2853_v17, %v2813_v35  ;;  %v13683_v2 = vld [vmem:[%s15381_s24 + $0xea8] ss:$36 sps:$4 sm:$0xff]  }
 0x529   : > { %v2816_v4 = vpop.f32.mrf.mxu1  ;;  %v2855_v23 = vpop.f32.mrf.mxu0  ;;  %v13691_v17 = vld [vmem:[%s15381_s24 + $0xe64] ss:$36 sps:$4 sm:$0xff]  }
 0x52a   : > { %v2856_v39 = vadd.f32 %v2855_v23, %v2815_v36  ;;  %v13689_v4 = vld [vmem:[%s15381_s24 + $0xe60] ss:$36 sps:$4 sm:$0xff]   ;;  %v13713_v34 = vld [vmem:[%s15381_s24 + $0xd48] ss:$36 sps:$4 sm:$0xff]  }
 0x52b   : > { %v2817_v25 = vpop.f32.mrf.mxu1  ;;  %v2857_v26 = vpop.f32.mrf.mxu0  ;;  %v13697_v23 = vld [vmem:[%s15381_s24 + $0xe1c] ss:$36 sps:$4 sm:$0xff]   ;;  %v13721_v35 = vld [vmem:[%s15381_s24 + $0xd04] ss:$36 sps:$4 sm:$0xff]  }
 0x52c   : > { %v13701_v25 = vld [vmem:[%s15381_s24 + $0xdd0] ss:$36 sps:$4 sm:$0xff]   ;;  %v13719_v36 = vld [vmem:[%s15381_s24 + $0xd00] ss:$36 sps:$4 sm:$0xff]  }
 0x52d   : > { %v2858_v28 = vpop.f32.mrf.mxu0 }
 0x52e   : > { %v13709_v28 = vld [vmem:[%s15381_s24 + $0xd8c] ss:$36 sps:$4 sm:$0xff]  }
 0x545   : > { %v2894_v38 = vpop.f32.mrf.mxu1 }
 0x546   : > { %v2895_v40 = vadd.f32 %v2894_v38, %v2854_v37  ;;  %v13727_v37 = vld [vmem:[%s15381_s24 + $0xcbc] ss:$36 sps:$4 sm:$0xff]  }
 0x547   : > { %v2896_v41 = vpop.f32.mrf.mxu1  ;;  %v13725_v38 = vld [vmem:[%s15381_s24 + $0xcb8] ss:$36 sps:$4 sm:$0xff]  }
 0x548   : > { %v2897_v42 = vadd.f32 %v2896_v41, %v2856_v39  ;;  %v3024_v43 = vmax.f32 %v2895_v40, 0.0  ;;  %v1789_v39 = vld [vmem:[%s15381_s24 + $0x1448] sm:$0x11]  ;;  %v13733_v40 = vld [vmem:[%s15381_s24 + $0xc74] ss:$36 sps:$4 sm:$0xff]  }
 0x549   : > { %v2898_v12 = vpop.f32.mrf.mxu1  ;;  %v1960_v41 = vunpack.c.l.bf16 %v1789_v39 }
 0x54a   : > { %v3025_v44 = vmax.f32 %v2897_v42, 0.0  ;;  %v15861_v7 = vpack.c.bf16 %v3024_v43, %v3024_v43  ;;  %v13731_v42 = vld [vmem:[%s15381_s24 + $0xc70] ss:$36 sps:$4 sm:$0xff]   ;;  %v1961_v12 = vunpack.c.h.bf16 %v1789_v39  ;;  %v13799_v39 = vld [vmem:[%s15381_s24 + $0xddc] ss:$36 sps:$4 sm:$0xff]  }
 0x54b   : > { %v2899_v22 = vpop.f32.mrf.mxu1  ;;  %v13739_v43 = vld [vmem:[%s15381_s24 + $0xc2c] ss:$36 sps:$4 sm:$0xff]  }
 0x54c   : > { %v15858_v46 = vpack.c.bf16 %v3025_v44, %v3025_v44  ;;  %v1973_v44 = vrot.slane %v1960_v41, %v15506_v5  ;;  %v13737_v22 = vld [vmem:[%s15381_s24 + $0xc28] ss:$36 sps:$4 sm:$0xff]   ;;  %v13797_v41 = vld [vmem:[%s15381_s24 + $0xdd8] ss:$36 sps:$4 sm:$0xff]  }
 0x54e   : > { %4581 = vmatprep.mubr.bf16.mxu0 %v15858_v46 }
 0x54f   : > { %4582 = vmatmul.mubr.bf16.vlgmr.msra.gmra.mxu0 %v15861_v7 }
 0x550   : > { %4632 = vmatpush1.bf16.msra.mxu0 %v13638_v47  ;;  %4663 = vmatprep.mubr.bf16.mxu0 %v15858_v46  ;;  %v13745_v47 = vld [vmem:[%s15381_s24 + $0xbe4] ss:$36 sps:$4 sm:$0xff]  }
 0x551   : > { %4633 = vmatprep.subr.bf16.mxu0 %v13643_v52  ;;  %v1977_v52 = vrot.slane %v1961_v12, %v15506_v5  ;;  %v13800_v12 = vld [vmem:[%s15381_s24 + $0xfc8] ss:$36 sps:$4 sm:$0xff]  }
 0x554   : > { %4634 = vmatpush1.bf16.msra.mxu0 %v13641_v48 }
 0x555   : > { %4635 = vmatprep.subr.bf16.mxu0 %v13646_v49  ;;  %v13743_v49 = vld [vmem:[%s15381_s24 + $0xbe0] ss:$36 sps:$4 sm:$0xff]  }
 0x558   : > { %4636 = vmatpush1.bf16.msra.mxu0 %v13644_v50  ;;  %v13751_v50 = vld [vmem:[%s15381_s24 + $0xb9c] ss:$36 sps:$4 sm:$0xff]  }
 0x559   : > { %4637 = vmatprep.subr.bf16.mxu0 %v13649_v51 }
 0x55c   : > { %4638 = vmatpush1.bf16.msra.mxu0 %v13647_v53 }
 0x55d   : > { %4639 = vmatprep.subr.bf16.mxu0 %v13652_v54  ;;  %v13749_v54 = vld [vmem:[%s15381_s24 + $0xb98] ss:$36 sps:$4 sm:$0xff]  }
 0x560   : > { %4640 = vmatpush1.bf16.msra.mxu0 %v13650_v55 }
 0x561   : > { %4641 = vmatprep.subr.bf16.mxu0 %v13655_v56  ;;  %v13757_v56 = vld [vmem:[%s15381_s24 + $0xb54] ss:$36 sps:$4 sm:$0xff]  }
 0x564   : > { %4642 = vmatpush1.bf16.msra.mxu0 %v13653_v57 }
 0x565   : > { %4643 = vmatprep.subr.bf16.mxu0 %v13658_v58 }
 0x567   : > { %v15879_v62 = vpop.f32.mrf.mxu0 }
 0x568   : > { %4644 = vmatpush1.bf16.msra.mxu0 %v13656_v59 }
 0x569   : > { %v15882_v1 = vpop.f32.mrf.mxu0  ;;  %4645 = vmatprep.subr.bf16.mxu0 %v13661_v61 }
 0x56b   : > { %v2980_v10 = vpop.f32.mrf.mxu0 }
 0x56c   : > { %4646 = vmatpush1.bf16.msra.mxu0 %v13659_v0  ;;  %v13755_v0 = vld [vmem:[%s15381_s24 + $0xb50] ss:$36 sps:$4 sm:$0xff]  }
 0x56d   : > { %v2981_v11 = vpop.f32.mrf.mxu0  ;;  %4647 = vmatprep.subr.bf16.mxu0 %v13667_v6 }
 0x570   : > { %4648 = vmatpush2.bf16.msra.mxu0 %v13665_v63 }
 0x571   : > { %4649 = vmatprep.subr.bf16.mxu0 %v13673_v13 }
 0x574   : > { %4650 = vmatpush2.bf16.msra.mxu0 %v13671_v15  ;;  %v13761_v15 = vld [vmem:[%s15381_s24 + $0xf88] ss:$36 sps:$4 sm:$0xff]  }
 0x575   : > { %4651 = vmatprep.subr.bf16.mxu0 %v13679_v16 }
 0x578   : > { %4652 = vmatpush2.bf16.msra.mxu0 %v13677_v20  ;;  %v13766_v20 = vld [vmem:[%s15381_s24 + $0x117c] ss:$36 sps:$4 sm:$0xff]  }
 0x579   : > { %4653 = vmatprep.subr.bf16.mxu0 %v13685_v21  ;;  %v13769_v21 = vld [vmem:[%s15381_s24 + $0xf44] ss:$36 sps:$4 sm:$0xff]  }
 0x57c   : > { %4654 = vmatpush2.bf16.msra.mxu0 %v13683_v2  ;;  %v13764_v2 = vld [vmem:[%s15381_s24 + $0x1178] ss:$36 sps:$4 sm:$0xff]  }
 0x57d   : > { %4655 = vmatprep.subr.bf16.mxu0 %v13691_v17  ;;  %v13767_v17 = vld [vmem:[%s15381_s24 + $0xf40] ss:$36 sps:$4 sm:$0xff]  }
 0x580   : > { %4656 = vmatpush2.bf16.msra.mxu0 %v13689_v4  ;;  %v13772_v4 = vld [vmem:[%s15381_s24 + $0x1134] ss:$36 sps:$4 sm:$0xff]  }
 0x581   : > { %4657 = vmatprep.subr.bf16.mxu0 %v13697_v23  ;;  %v13775_v23 = vld [vmem:[%s15381_s24 + $0xefc] ss:$36 sps:$4 sm:$0xff]  }
 0x584   : > { %4658 = vmatpush2.bf16.msra.mxu0 %v13695_v27  ;;  %v13770_v27 = vld [vmem:[%s15381_s24 + $0x1130] ss:$36 sps:$4 sm:$0xff]  }
 0x585   : > { %v2935_v26 = vpop.f32.mrf.mxu1  ;;  %4659 = vmatprep.subr.bf16.mxu0 %v13703_v24  ;;  %v13773_v24 = vld [vmem:[%s15381_s24 + $0xef8] ss:$36 sps:$4 sm:$0xff]  }
 0x586   : > { %v2936_v48 = vadd.f32 %v2935_v26, %v1973_v44  ;;  %v13781_v26 = vld [vmem:[%s15381_s24 + $0xeb4] ss:$36 sps:$4 sm:$0xff]  }
 0x587   : > { %v2937_v29 = vpop.f32.mrf.mxu1  ;;  %v13803_v44 = vld [vmem:[%s15381_s24 + $0xd90] ss:$36 sps:$4 sm:$0xff]  }
 0x588   : > { %4660 = vmatpush2.bf16.msra.mxu0 %v13701_v25  ;;  %v2938_v51 = vadd.f32 %v2937_v29, %v1977_v52  ;;  %v2977_v53 = vadd.f32 %v15879_v62, %v2936_v48  ;;  %v13763_v62 = vld [vmem:[%s15381_s24 + $0xf8c] ss:$36 sps:$4 sm:$0xff]   ;;  %v13806_v52 = vld [vmem:[%s15381_s24 + $0x1400] ss:$36 sps:$4 sm:$0xff]  }
 0x589   : > { %v2939_v31 = vpop.f32.mrf.mxu1  ;;  %4661 = vmatprep.subr.bf16.mxu0 %v13709_v28  ;;  %v13778_v25 = vld [vmem:[%s15381_s24 + $0x10ec] ss:$36 sps:$4 sm:$0xff]  }
 0x58a   : > { %v2979_v58 = vadd.f32 %v15882_v1, %v2938_v51  ;;  %v13758_v1 = vld [vmem:[%s15381_s24 + $0x11c0] ss:$36 sps:$4 sm:$0xff]   ;;  %v13776_v28 = vld [vmem:[%s15381_s24 + $0x10e8] ss:$36 sps:$4 sm:$0xff]   ;;  %v13779_v29 = vld [vmem:[%s15381_s24 + $0xeb0] ss:$36 sps:$4 sm:$0xff]  }
 0x58b   : > { %v2940_v33 = vpop.f32.mrf.mxu1  ;;  %v13787_v31 = vld [vmem:[%s15381_s24 + $0xe6c] ss:$36 sps:$4 sm:$0xff]   ;;  %v13812_v51 = vld [vmem:[%s15381_s24 + $0x13b8] ss:$36 sps:$4 sm:$0xff]  }
 0x58c   : > { %4662 = vmatpush2.bf16.msra.mxu0 %v13707_v30  ;;  %v13784_v30 = vld [vmem:[%s15381_s24 + $0x10a4] ss:$36 sps:$4 sm:$0xff]   ;;  %v13809_v48 = vld [vmem:[%s15381_s24 + $0xd50] ss:$36 sps:$4 sm:$0xff]  }
 0x58d   : > { %4713 = vmatprep.subr.bf16.mxu0 %v13715_v32  ;;  %v13782_v32 = vld [vmem:[%s15381_s24 + $0x10a0] ss:$36 sps:$4 sm:$0xff]   ;;  %v13785_v33 = vld [vmem:[%s15381_s24 + $0xe68] ss:$36 sps:$4 sm:$0xff]  }
 0x58f   : > { %4664 = vmatmul.mubr.bf16.vlgmr.msra.gmra.mxu0 %v15861_v7 }
 0x590   : > { %4714 = vmatpush1.bf16.msra.mxu0 %v13713_v34  ;;  %4745 = vmatprep.mubr.bf16.mxu0 %v15858_v46  ;;  %v13790_v34 = vld [vmem:[%s15381_s24 + $0x105c] ss:$36 sps:$4 sm:$0xff]  }
 0x591   : > { %4715 = vmatprep.subr.bf16.mxu0 %v13721_v35  ;;  %v13793_v35 = vld [vmem:[%s15381_s24 + $0xe24] ss:$36 sps:$4 sm:$0xff]  }
 0x594   : > { %4716 = vmatpush1.bf16.msra.mxu0 %v13719_v36  ;;  %v13788_v36 = vld [vmem:[%s15381_s24 + $0x1058] ss:$36 sps:$4 sm:$0xff]  }
 0x595   : > { %4717 = vmatprep.subr.bf16.mxu0 %v13727_v37  ;;  %v13791_v37 = vld [vmem:[%s15381_s24 + $0xe20] ss:$36 sps:$4 sm:$0xff]  }
 0x598   : > { %4718 = vmatpush1.bf16.msra.mxu0 %v13725_v38  ;;  %v13796_v38 = vld [vmem:[%s15381_s24 + $0x1014] ss:$36 sps:$4 sm:$0xff]  }
 0x599   : > { %4719 = vmatprep.subr.bf16.mxu0 %v13733_v40  ;;  %v13794_v40 = vld [vmem:[%s15381_s24 + $0x1010] ss:$36 sps:$4 sm:$0xff]  }
 0x59c   : > { %4720 = vmatpush1.bf16.msra.mxu0 %v13731_v42  ;;  %v13802_v42 = vld [vmem:[%s15381_s24 + $0xfcc] ss:$36 sps:$4 sm:$0xff]  }
 0x59d   : > { %4721 = vmatprep.subr.bf16.mxu0 %v13739_v43  ;;  %v13805_v43 = vld [vmem:[%s15381_s24 + $0xd94] ss:$36 sps:$4 sm:$0xff]  }
 0x5a0   : > { %4722 = vmatpush1.bf16.msra.mxu0 %v13737_v22  ;;  %v13808_v22 = vld [vmem:[%s15381_s24 + $0x1404] ss:$36 sps:$4 sm:$0xff]  }
 0x5a1   : > { %4723 = vmatprep.subr.bf16.mxu0 %v13745_v47  ;;  %v13811_v47 = vld [vmem:[%s15381_s24 + $0xd54] ss:$36 sps:$4 sm:$0xff]  }
 0x5a4   : > { %4724 = vmatpush1.bf16.msra.mxu0 %v13743_v49  ;;  %v13814_v49 = vld [vmem:[%s15381_s24 + $0x13bc] ss:$36 sps:$4 sm:$0xff]  }
 0x5a5   : > { %v3017_v55 = vpop.f32.mrf.mxu1  ;;  %4725 = vmatprep.subr.bf16.mxu0 %v13751_v50  ;;  %v13817_v50 = vld [vmem:[%s15381_s24 + $0xd0c] ss:$36 sps:$4 sm:$0xff]  }
 0x5a6   : > { %v3018_v57 = vadd.f32 %v3017_v55, %v2977_v53  ;;  %v13815_v53 = vld [vmem:[%s15381_s24 + $0xd08] ss:$36 sps:$4 sm:$0xff]  }
 0x5a7   : > { %v3019_v59 = vpop.f32.mrf.mxu1  ;;  %v13823_v55 = vld [vmem:[%s15381_s24 + $0xcc4] ss:$36 sps:$4 sm:$0xff]  }
 0x5a8   : > { %v3020_v61 = vadd.f32 %v3019_v59, %v2979_v58  ;;  %4726 = vmatpush1.bf16.msra.mxu0 %v13749_v54  ;;  %v3026_v6 = vmax.f32 %v3018_v57, 0.0  ;;  %v13820_v54 = vld [vmem:[%s15381_s24 + $0x1374] ss:$36 sps:$4 sm:$0xff]   ;;  %v13821_v57 = vld [vmem:[%s15381_s24 + $0xcc0] ss:$36 sps:$4 sm:$0xff]  }
 0x5a9   : > { %v3021_v10 = vpop.f32.mrf.mxu1  ;;  %4727 = vmatprep.subr.bf16.mxu0 %v13757_v56  ;;  %v13818_v56 = vld [vmem:[%s15381_s24 + $0x1370] ss:$36 sps:$4 sm:$0xff]   ;;  %v13829_v59 = vld [vmem:[%s15381_s24 + $0xc7c] ss:$36 sps:$4 sm:$0xff]  }
 0x5aa   : > { %v3027_v63 = vmax.f32 %v3020_v61, 0.0  ;;  %v15928_v16 = vpack.c.bf16 %v3026_v6, %v3026_v6  ;;  %v13826_v58 = vld [vmem:[%s15381_s24 + $0x132c] ss:$36 sps:$4 sm:$0xff]   ;;  %v13832_v6 = vld [vmem:[%s15381_s24 + $0x12e4] ss:$36 sps:$4 sm:$0xff]  }
 0x5ab   : > { %v3022_v11 = vpop.f32.mrf.mxu1  ;;  %v13824_v61 = vld [vmem:[%s15381_s24 + $0x1328] ss:$36 sps:$4 sm:$0xff]   ;;  %v13835_v10 = vld [vmem:[%s15381_s24 + $0xc34] ss:$36 sps:$4 sm:$0xff]  }
 0x5ac   : > { %v15924_v13 = vpack.c.bf16 %v3027_v63, %v3027_v63  ;;  %4728 = vmatpush1.bf16.msra.mxu0 %v13755_v0  ;;  %v13827_v0 = vld [vmem:[%s15381_s24 + $0xc78] ss:$36 sps:$4 sm:$0xff]   ;;  %v13833_v63 = vld [vmem:[%s15381_s24 + $0xc30] ss:$36 sps:$4 sm:$0xff]  }
 0x5ad   : > { %4729 = vmatprep.subr.bf16.mxu0 %v13763_v62  ;;  %v13830_v62 = vld [vmem:[%s15381_s24 + $0x12e0] ss:$36 sps:$4 sm:$0xff]  }
 0x5ae   : > { %4622 = vmatprep.mubr.bf16.mxu1 %v15924_v13  ;;  %v13838_v11 = vld [vmem:[%s15381_s24 + $0x129c] ss:$36 sps:$4 sm:$0xff]  }
 0x5af   : > { %4623 = vmatmul.mubr.bf16.vlgmr.msra.gmra.mxu1 %v15928_v16 }
 0x5b0   : > { %4673 = vmatpush1.bf16.msra.mxu1 %v13758_v1  ;;  %4730 = vmatpush2.bf16.msra.mxu0 %v13761_v15  ;;  %v13841_v1 = vld [vmem:[%s15381_s24 + $0xbec] ss:$36 sps:$4 sm:$0xff]   ;;  %v13836_v15 = vld [vmem:[%s15381_s24 + $0x1298] ss:$36 sps:$4 sm:$0xff]  }
 0x5b1   : > { %4704 = vmatprep.mubr.bf16.mxu1 %v15924_v13  ;;  %4674 = vmatprep.subr.bf16.mxu1 %v13766_v20  ;;  %v13839_v20 = vld [vmem:[%s15381_s24 + $0xbe8] ss:$36 sps:$4 sm:$0xff]  }
 0x5b2   : > { %4731 = vmatprep.subr.bf16.mxu0 %v13769_v21  ;;  %v13844_v21 = vld [vmem:[%s15381_s24 + $0x1254] ss:$36 sps:$4 sm:$0xff]  }
 0x5b4   : > { %4675 = vmatpush1.bf16.msra.mxu1 %v13764_v2  ;;  %4732 = vmatpush2.bf16.msra.mxu0 %v13767_v17  ;;  %v13847_v2 = vld [vmem:[%s15381_s24 + $0xba4] ss:$36 sps:$4 sm:$0xff]   ;;  %v13842_v17 = vld [vmem:[%s15381_s24 + $0x1250] ss:$36 sps:$4 sm:$0xff]  }
 0x5b5   : > { %4676 = vmatprep.subr.bf16.mxu1 %v13772_v4  ;;  %4733 = vmatprep.subr.bf16.mxu0 %v13775_v23  ;;  %v13845_v4 = vld [vmem:[%s15381_s24 + $0xba0] ss:$36 sps:$4 sm:$0xff]   ;;  %v13850_v23 = vld [vmem:[%s15381_s24 + $0x120c] ss:$36 sps:$4 sm:$0xff]  }
 0x5b8   : > { %4677 = vmatpush1.bf16.msra.mxu1 %v13770_v27  ;;  %4734 = vmatpush2.bf16.msra.mxu0 %v13773_v24  ;;  %v13853_v27 = vld [vmem:[%s15381_s24 + $0xb5c] ss:$36 sps:$4 sm:$0xff]   ;;  %v13848_v24 = vld [vmem:[%s15381_s24 + $0x1208] ss:$36 sps:$4 sm:$0xff]  }
 0x5b9   : > { %4678 = vmatprep.subr.bf16.mxu1 %v13778_v25  ;;  %4735 = vmatprep.subr.bf16.mxu0 %v13781_v26  ;;  %v13851_v25 = vld [vmem:[%s15381_s24 + $0xb58] ss:$36 sps:$4 sm:$0xff]   ;;  %v13856_v26 = vld [vmem:[%s15381_s24 + $0x11cc] ss:$36 sps:$4 sm:$0xff]  }
 0x5bc   : > { %4679 = vmatpush1.bf16.msra.mxu1 %v13776_v28  ;;  %4736 = vmatpush2.bf16.msra.mxu0 %v13779_v29  ;;  %v13859_v28 = vld [vmem:[%s15381_s24 + $0xf94] ss:$36 sps:$4 sm:$0xff]   ;;  %v13854_v29 = vld [vmem:[%s15381_s24 + $0x11c8] ss:$36 sps:$4 sm:$0xff]  }
 0x5bd   : > { %4680 = vmatprep.subr.bf16.mxu1 %v13784_v30  ;;  %4737 = vmatprep.subr.bf16.mxu0 %v13787_v31  ;;  %v13857_v30 = vld [vmem:[%s15381_s24 + $0xf90] ss:$36 sps:$4 sm:$0xff]   ;;  %v13862_v31 = vld [vmem:[%s15381_s24 + $0x1184] ss:$36 sps:$4 sm:$0xff]  }
 0x5c0   : > { %4681 = vmatpush1.bf16.msra.mxu1 %v13782_v32  ;;  %4738 = vmatpush2.bf16.msra.mxu0 %v13785_v33  ;;  %v13865_v32 = vld [vmem:[%s15381_s24 + $0xf4c] ss:$36 sps:$4 sm:$0xff]   ;;  %v13860_v33 = vld [vmem:[%s15381_s24 + $0x1180] ss:$36 sps:$4 sm:$0xff]  }
 0x5c1   : > { %4682 = vmatprep.subr.bf16.mxu1 %v13790_v34  ;;  %4739 = vmatprep.subr.bf16.mxu0 %v13793_v35  ;;  %v13863_v34 = vld [vmem:[%s15381_s24 + $0xf48] ss:$36 sps:$4 sm:$0xff]   ;;  %v13868_v35 = vld [vmem:[%s15381_s24 + $0x113c] ss:$36 sps:$4 sm:$0xff]  }
 0x5c4   : > { %4683 = vmatpush1.bf16.msra.mxu1 %v13788_v36  ;;  %4740 = vmatpush2.bf16.msra.mxu0 %v13791_v37  ;;  %v13871_v36 = vld [vmem:[%s15381_s24 + $0xf04] ss:$36 sps:$4 sm:$0xff]   ;;  %v13866_v37 = vld [vmem:[%s15381_s24 + $0x1138] ss:$36 sps:$4 sm:$0xff]  }
 0x5c5   : > { %4684 = vmatprep.subr.bf16.mxu1 %v13796_v38  ;;  %4741 = vmatprep.subr.bf16.mxu0 %v13799_v39  ;;  %v13869_v38 = vld [vmem:[%s15381_s24 + $0xf00] ss:$36 sps:$4 sm:$0xff]   ;;  %v13874_v39 = vld [vmem:[%s15381_s24 + $0x10f4] ss:$36 sps:$4 sm:$0xff]  }
 0x5c8   : > { %4685 = vmatpush1.bf16.msra.mxu1 %v13794_v40  ;;  %4742 = vmatpush2.bf16.msra.mxu0 %v13797_v41  ;;  %v13877_v40 = vld [vmem:[%s15381_s24 + $0xebc] ss:$36 sps:$4 sm:$0xff]   ;;  %v13872_v41 = vld [vmem:[%s15381_s24 + $0x10f0] ss:$36 sps:$4 sm:$0xff]  }
 0x5c9   : > { %4686 = vmatprep.subr.bf16.mxu1 %v13802_v42  ;;  %4743 = vmatprep.subr.bf16.mxu0 %v13805_v43  ;;  %v13875_v42 = vld [vmem:[%s15381_s24 + $0xeb8] ss:$36 sps:$4 sm:$0xff]   ;;  %v13880_v43 = vld [vmem:[%s15381_s24 + $0x10ac] ss:$36 sps:$4 sm:$0xff]  }
 0x5cc   : > { %4687 = vmatpush1.bf16.msra.mxu1 %v13800_v12  ;;  %4744 = vmatpush2.bf16.msra.mxu0 %v13803_v44  ;;  %v13883_v12 = vld [vmem:[%s15381_s24 + $0xe74] ss:$36 sps:$4 sm:$0xff]   ;;  %v13878_v44 = vld [vmem:[%s15381_s24 + $0x10a8] ss:$36 sps:$4 sm:$0xff]  }
 0x5cd   : > { %4688 = vmatprep.subr.bf16.mxu1 %v13808_v22  ;;  %4795 = vmatprep.subr.bf16.mxu0 %v13811_v47  ;;  %v13881_v22 = vld [vmem:[%s15381_s24 + $0xe70] ss:$36 sps:$4 sm:$0xff]   ;;  %v13886_v47 = vld [vmem:[%s15381_s24 + $0x1064] ss:$36 sps:$4 sm:$0xff]  }
 0x5cf   : > { %4746 = vmatmul.mubr.bf16.vlgmr.msra.gmra.mxu0 %v15861_v7 }
 0x5d0   : > { %4689 = vmatpush2.bf16.msra.mxu1 %v13806_v52  ;;  %4796 = vmatpush1.bf16.msra.mxu0 %v13809_v48  ;;  %v13889_v52 = vld [vmem:[%s15381_s24 + $0xe2c] ss:$36 sps:$4 sm:$0xff]   ;;  %v13884_v48 = vld [vmem:[%s15381_s24 + $0x1060] ss:$36 sps:$4 sm:$0xff]  }
 0x5d1   : > { %4827 = vmatprep.mubr.bf16.mxu0 %v15858_v46  ;;  %4690 = vmatprep.subr.bf16.mxu1 %v13814_v49  ;;  %v13887_v49 = vld [vmem:[%s15381_s24 + $0xe28] ss:$36 sps:$4 sm:$0xff]  }
 0x5d2   : > { %4797 = vmatprep.subr.bf16.mxu0 %v13817_v50  ;;  %v13892_v50 = vld [vmem:[%s15381_s24 + $0x101c] ss:$36 sps:$4 sm:$0xff]  }
 0x5d4   : > { %4691 = vmatpush2.bf16.msra.mxu1 %v13812_v51  ;;  %4798 = vmatpush1.bf16.msra.mxu0 %v13815_v53  ;;  %v13895_v51 = vld [vmem:[%s15381_s24 + $0xde4] ss:$36 sps:$4 sm:$0xff]   ;;  %v13890_v53 = vld [vmem:[%s15381_s24 + $0x1018] ss:$36 sps:$4 sm:$0xff]  }
 0x5d5   : > { %4692 = vmatprep.subr.bf16.mxu1 %v13820_v54  ;;  %4799 = vmatprep.subr.bf16.mxu0 %v13823_v55  ;;  %v13893_v54 = vld [vmem:[%s15381_s24 + $0xde0] ss:$36 sps:$4 sm:$0xff]   ;;  %v13898_v55 = vld [vmem:[%s15381_s24 + $0xfd4] ss:$36 sps:$4 sm:$0xff]  }
 0x5d8   : > { %4693 = vmatpush2.bf16.msra.mxu1 %v13818_v56  ;;  %4800 = vmatpush1.bf16.msra.mxu0 %v13821_v57  ;;  %v13901_v56 = vld [vmem:[%s15381_s24 + $0xd9c] ss:$36 sps:$4 sm:$0xff]   ;;  %v13896_v57 = vld [vmem:[%s15381_s24 + $0xfd0] ss:$36 sps:$4 sm:$0xff]  }
 0x5d9   : > { %4694 = vmatprep.subr.bf16.mxu1 %v13826_v58  ;;  %4801 = vmatprep.subr.bf16.mxu0 %v13829_v59  ;;  %v13899_v58 = vld [vmem:[%s15381_s24 + $0xd98] ss:$36 sps:$4 sm:$0xff]   ;;  %v13904_v59 = vld [vmem:[%s15381_s24 + $0x140c] ss:$36 sps:$4 sm:$0xff]  }
 0x5dc   : > { %4695 = vmatpush2.bf16.msra.mxu1 %v13824_v61  ;;  %4802 = vmatpush1.bf16.msra.mxu0 %v13827_v0  ;;  %v13905_v61 = vld [vmem:[%s15381_s24 + $0xf98] ss:$36 sps:$4 sm:$0xff]   ;;  %v13902_v0 = vld [vmem:[%s15381_s24 + $0x1408] ss:$36 sps:$4 sm:$0xff]  }
 0x5dd   : > { %4696 = vmatprep.subr.bf16.mxu1 %v13832_v6  ;;  %4803 = vmatprep.subr.bf16.mxu0 %v13835_v10  ;;  %v13906_v6 = vld [vmem:[%s15381_s24 + $0xd58] ss:$36 sps:$4 sm:$0xff]   ;;  %v13909_v10 = vld [vmem:[%s15381_s24 + $0x13c4] ss:$36 sps:$4 sm:$0xff]  }
 0x5e0   : > { %4697 = vmatpush2.bf16.msra.mxu1 %v13830_v62  ;;  %4804 = vmatpush1.bf16.msra.mxu0 %v13833_v63  ;;  %v13910_v62 = vld [vmem:[%s15381_s24 + $0xf50] ss:$36 sps:$4 sm:$0xff]  }
 0x5e1   : > { %4698 = vmatprep.subr.bf16.mxu1 %v13838_v11  ;;  %4805 = vmatprep.subr.bf16.mxu0 %v13841_v1  ;;  %v13907_v11 = vld [vmem:[%s15381_s24 + $0x13c0] ss:$36 sps:$4 sm:$0xff]  }
 0x5e4   : > { %4699 = vmatpush2.bf16.msra.mxu1 %v13836_v15  ;;  %4806 = vmatpush1.bf16.msra.mxu0 %v13839_v20  ;;  %v13911_v15 = vld [vmem:[%s15381_s24 + $0xd10] ss:$36 sps:$4 sm:$0xff]   ;;  %v13914_v20 = vld [vmem:[%s15381_s24 + $0x137c] ss:$36 sps:$4 sm:$0xff]  }
 0x5e5   : > { %4700 = vmatprep.subr.bf16.mxu1 %v13844_v21  ;;  %4807 = vmatprep.subr.bf16.mxu0 %v13847_v2  ;;  %v13915_v21 = vld [vmem:[%s15381_s24 + $0xf08] ss:$36 sps:$4 sm:$0xff]  }
 0x5e8   : > { %4701 = vmatpush2.bf16.msra.mxu1 %v13842_v17  ;;  %4808 = vmatpush1.bf16.msra.mxu0 %v13845_v4  ;;  %v13912_v17 = vld [vmem:[%s15381_s24 + $0x1378] ss:$36 sps:$4 sm:$0xff]  }
 0x5e9   : > { %4702 = vmatprep.subr.bf16.mxu1 %v13850_v23  ;;  %4809 = vmatprep.subr.bf16.mxu0 %v13853_v27  ;;  %v13919_v23 = vld [vmem:[%s15381_s24 + $0x1334] ss:$36 sps:$4 sm:$0xff]   ;;  %v13920_v27 = vld [vmem:[%s15381_s24 + $0xec0] ss:$36 sps:$4 sm:$0xff]  }
 0x5ec   : > { %4703 = vmatpush2.bf16.msra.mxu1 %v13848_v24  ;;  %4810 = vmatpush1.bf16.msra.mxu0 %v13851_v25  ;;  %v13917_v24 = vld [vmem:[%s15381_s24 + $0x1330] ss:$36 sps:$4 sm:$0xff]   ;;  %v13921_v25 = vld [vmem:[%s15381_s24 + $0xc80] ss:$36 sps:$4 sm:$0xff]  }
 0x5ed   : > { %4754 = vmatprep.subr.bf16.mxu1 %v13856_v26  ;;  %4811 = vmatprep.subr.bf16.mxu0 %v13859_v28  ;;  %v13924_v26 = vld [vmem:[%s15381_s24 + $0x12ec] ss:$36 sps:$4 sm:$0xff]   ;;  %v13925_v28 = vld [vmem:[%s15381_s24 + $0xe78] ss:$36 sps:$4 sm:$0xff]  }
 0x5ef   : > { %4705 = vmatmul.mubr.bf16.vlgmr.msra.gmra.mxu1 %v15928_v16 }
 0x5f0   : > { %4755 = vmatpush1.bf16.msra.mxu1 %v13854_v29  ;;  %4786 = vmatprep.mubr.bf16.mxu1 %v15924_v13  ;;  %v13922_v29 = vld [vmem:[%s15381_s24 + $0x12e8] ss:$36 sps:$4 sm:$0xff]  }
 0x5f1   : > { %4812 = vmatpush2.bf16.msra.mxu0 %v13857_v30  ;;  %4756 = vmatprep.subr.bf16.mxu1 %v13862_v31  ;;  %v13926_v30 = vld [vmem:[%s15381_s24 + $0xc38] ss:$36 sps:$4 sm:$0xff]   ;;  %v13929_v31 = vld [vmem:[%s15381_s24 + $0x12a4] ss:$36 sps:$4 sm:$0xff]  }
 0x5f2   : > { %4813 = vmatprep.subr.bf16.mxu0 %v13865_v32  ;;  %v13930_v32 = vld [vmem:[%s15381_s24 + $0xe30] ss:$36 sps:$4 sm:$0xff]  }
 0x5f4   : > { %4757 = vmatpush1.bf16.msra.mxu1 %v13860_v33  ;;  %v13927_v33 = vld [vmem:[%s15381_s24 + $0x12a0] ss:$36 sps:$4 sm:$0xff]  }
 0x5f5   : > { %4814 = vmatpush2.bf16.msra.mxu0 %v13863_v34  ;;  %4758 = vmatprep.subr.bf16.mxu1 %v13868_v35  ;;  %v13931_v34 = vld [vmem:[%s15381_s24 + $0xbf0] ss:$36 sps:$4 sm:$0xff]   ;;  %v13934_v35 = vld [vmem:[%s15381_s24 + $0x125c] ss:$36 sps:$4 sm:$0xff]  }
 0x5f6   : > { %4815 = vmatprep.subr.bf16.mxu0 %v13871_v36  ;;  %v13935_v36 = vld [vmem:[%s15381_s24 + $0xde8] ss:$36 sps:$4 sm:$0xff]  }
 0x5f8   : > { %4759 = vmatpush1.bf16.msra.mxu1 %v13866_v37  ;;  %v13932_v37 = vld [vmem:[%s15381_s24 + $0x1258] ss:$36 sps:$4 sm:$0xff]  }
 0x5f9   : > { %4816 = vmatpush2.bf16.msra.mxu0 %v13869_v38  ;;  %4760 = vmatprep.subr.bf16.mxu1 %v13874_v39  ;;  %v13936_v38 = vld [vmem:[%s15381_s24 + $0xba8] ss:$36 sps:$4 sm:$0xff]   ;;  %v13939_v39 = vld [vmem:[%s15381_s24 + $0x1214] ss:$36 sps:$4 sm:$0xff]  }
 0x5fa   : > { %4817 = vmatprep.subr.bf16.mxu0 %v13877_v40  ;;  %v13940_v40 = vld [vmem:[%s15381_s24 + $0xda0] ss:$36 sps:$4 sm:$0xff]  }
 0x5fc   : > { %4761 = vmatpush1.bf16.msra.mxu1 %v13872_v41  ;;  %v13937_v41 = vld [vmem:[%s15381_s24 + $0x1210] ss:$36 sps:$4 sm:$0xff]  }
 0x5fd   : > { %4818 = vmatpush2.bf16.msra.mxu0 %v13875_v42  ;;  %4762 = vmatprep.subr.bf16.mxu1 %v13880_v43  ;;  %v13941_v42 = vld [vmem:[%s15381_s24 + $0xb60] ss:$36 sps:$4 sm:$0xff]   ;;  %v13944_v43 = vld [vmem:[%s15381_s24 + $0x11d4] ss:$36 sps:$4 sm:$0xff]  }
 0x5fe   : > { %4819 = vmatprep.subr.bf16.mxu0 %v13883_v12  ;;  %v13942_v12 = vld [vmem:[%s15381_s24 + $0x11d0] ss:$36 sps:$4 sm:$0xff]  }
 0x600   : > { %4763 = vmatpush1.bf16.msra.mxu1 %v13878_v44  ;;  %v13947_v44 = vld [vmem:[%s15381_s24 + $0x118c] ss:$36 sps:$4 sm:$0xff]  }
 0x601   : > { %4820 = vmatpush2.bf16.msra.mxu0 %v13881_v22  ;;  %4764 = vmatprep.subr.bf16.mxu1 %v13886_v47  ;;  %v13945_v22 = vld [vmem:[%s15381_s24 + $0x1188] ss:$36 sps:$4 sm:$0xff]  }
 0x602   : > { %4821 = vmatprep.subr.bf16.mxu0 %v13889_v52  ;;  %v13950_v47 = vld [vmem:[%s15381_s24 + $0x1144] ss:$36 sps:$4 sm:$0xff]  }
 0x603   : > { %v13948_v52 = vld [vmem:[%s15381_s24 + $0x1140] ss:$36 sps:$4 sm:$0xff]  }
 0x604   : > { %4765 = vmatpush1.bf16.msra.mxu1 %v13884_v48  ;;  %v13953_v48 = vld [vmem:[%s15381_s24 + $0x10fc] ss:$36 sps:$4 sm:$0xff]  }
 0x605   : > { %4822 = vmatpush2.bf16.msra.mxu0 %v13887_v49  ;;  %4766 = vmatprep.subr.bf16.mxu1 %v13892_v50  ;;  %v13956_v49 = vld [vmem:[%s15381_s24 + $0x10b4] ss:$36 sps:$4 sm:$0xff]  }
 0x606   : > { %4823 = vmatprep.subr.bf16.mxu0 %v13895_v51  ;;  %v13954_v50 = vld [vmem:[%s15381_s24 + $0x10b0] ss:$36 sps:$4 sm:$0xff]  }
 0x607   : > { %v13959_v51 = vld [vmem:[%s15381_s24 + $0x106c] ss:$36 sps:$4 sm:$0xff]  }
 0x608   : > { %4767 = vmatpush1.bf16.msra.mxu1 %v13890_v53  ;;  %v13957_v53 = vld [vmem:[%s15381_s24 + $0x1068] ss:$36 sps:$4 sm:$0xff]  }
 0x609   : > { %4824 = vmatpush2.bf16.msra.mxu0 %v13893_v54  ;;  %4768 = vmatprep.subr.bf16.mxu1 %v13898_v55  ;;  %v13962_v54 = vld [vmem:[%s15381_s24 + $0x1024] ss:$36 sps:$4 sm:$0xff]  }
 0x60a   : > { %4825 = vmatprep.subr.bf16.mxu0 %v13901_v56  ;;  %v13960_v55 = vld [vmem:[%s15381_s24 + $0x1020] ss:$36 sps:$4 sm:$0xff]  }
 0x60b   : > { %v13965_v56 = vld [vmem:[%s15381_s24 + $0xfdc] ss:$36 sps:$4 sm:$0xff]  }
 0x60c   : > { %4769 = vmatpush1.bf16.msra.mxu1 %v13896_v57  ;;  %v13963_v57 = vld [vmem:[%s15381_s24 + $0xfd8] ss:$36 sps:$4 sm:$0xff]  }
 0x60d   : > { %4826 = vmatpush2.bf16.msra.mxu0 %v13899_v58  ;;  %4770 = vmatprep.subr.bf16.mxu1 %v13904_v59  ;;  %v13968_v58 = vld [vmem:[%s15381_s24 + $0x1414] ss:$36 sps:$4 sm:$0xff]  }
 0x60e   : > { %12867 = vmatprep.subr.bf16.mxu0 %v13905_v61  ;;  %v13966_v59 = vld [vmem:[%s15381_s24 + $0x1410] ss:$36 sps:$4 sm:$0xff]  }
 0x60f   : > { %v16035_v63 = vpop.f32.mrf.mxu0  ;;  %v13971_v61 = vld [vmem:[%s15381_s24 + $0x13cc] ss:$36 sps:$4 sm:$0xff]  }
 0x610   : > { %4828 = vmatmul.mubr.bf16.vlgmr.msra.gmra.mxu0 %v15861_v7  ;;  %4771 = vmatpush2.bf16.msra.mxu1 %v13902_v0 }
 0x611   : > { %12868 = vmatpush3.bf16.msra.mxu0 %v13906_v6  ;;  %4909 = vmatprep.mubr.bf16.mxu0 %v15858_v46  ;;  %v16040_v1 = vpop.f32.mrf.mxu0  ;;  %v13916_v46 = vld [vmem:[%s15381_s24 + $0xcc8] ss:$36 sps:$4 sm:$0xff]  }
 0x612   : > { %4772 = vmatprep.subr.bf16.mxu1 %v13909_v10  ;;  %12869 = vmatprep.subr.bf16.mxu0 %v13910_v62  ;;  %v13969_v6 = vld [vmem:[%s15381_s24 + $0x13c8] ss:$36 sps:$4 sm:$0xff]  }
 0x613   : > { %v4587_v2 = vpop.f32.mrf.mxu0  ;;  %v13974_v62 = vld [vmem:[%s15381_s24 + $0x1384] ss:$36 sps:$4 sm:$0xff]  }
 0x614   : > { %4773 = vmatpush2.bf16.msra.mxu1 %v13907_v11  ;;  %v13975_v2 = vld [vmem:[%s15381_s24 + $0x1338] ss:$36 sps:$4 sm:$0xff]  }
 0x615   : > { %12870 = vmatpush3.bf16.msra.mxu0 %v13911_v15  ;;  %v4588_v4 = vpop.f32.mrf.mxu0  ;;  %4774 = vmatprep.subr.bf16.mxu1 %v13914_v20  ;;  %v13972_v15 = vld [vmem:[%s15381_s24 + $0x1380] ss:$36 sps:$4 sm:$0xff]  }
 0x616   : > { %12871 = vmatprep.subr.bf16.mxu0 %v13915_v21  ;;  %v13977_v21 = vld [vmem:[%s15381_s24 + $0x133c] ss:$36 sps:$4 sm:$0xff]   ;;  %v13978_v4 = vld [vmem:[%s15381_s24 + $0x12f0] ss:$36 sps:$4 sm:$0xff]  }
 0x618   : > { %4775 = vmatpush2.bf16.msra.mxu1 %v13912_v17  ;;  %v13980_v17 = vld [vmem:[%s15381_s24 + $0x12f4] ss:$36 sps:$4 sm:$0xff]  }
 0x619   : > { %12872 = vmatpush3.bf16.msra.mxu0 %v13916_v46  ;;  %4776 = vmatprep.subr.bf16.mxu1 %v13919_v23  ;;  %v13983_v46 = vld [vmem:[%s15381_s24 + $0x12ac] ss:$36 sps:$4 sm:$0xff]  }
 0x61a   : > { %12873 = vmatprep.subr.bf16.mxu0 %v13920_v27  ;;  %v13981_v23 = vld [vmem:[%s15381_s24 + $0x12a8] ss:$36 sps:$4 sm:$0xff]  }
 0x61b   : > { %v13986_v27 = vld [vmem:[%s15381_s24 + $0x1264] ss:$36 sps:$4 sm:$0xff]  }
 0x61c   : > { %4777 = vmatpush2.bf16.msra.mxu1 %v13917_v24  ;;  %v1793_v24 = vld [vmem:[%s15381_s24 + $0x1440] sm:$0x11] }
 0x61d   : > { %12874 = vmatpush3.bf16.msra.mxu0 %v13921_v25  ;;  %4778 = vmatprep.subr.bf16.mxu1 %v13924_v26  ;;  %v13984_v25 = vld [vmem:[%s15381_s24 + $0x1260] ss:$36 sps:$4 sm:$0xff]  }
 0x61e   : > { %12875 = vmatprep.subr.bf16.mxu0 %v13925_v28  ;;  %v13989_v26 = vld [vmem:[%s15381_s24 + $0x121c] ss:$36 sps:$4 sm:$0xff]   ;;  %v3032_v28 = vunpack.c.l.bf16 %v1793_v24 }
 0x620   : > { %4779 = vmatpush2.bf16.msra.mxu1 %v13922_v29  ;;  %v3033_v29 = vunpack.c.h.bf16 %v1793_v24 }
 0x621   : > { %12876 = vmatpush3.bf16.msra.mxu0 %v13926_v30  ;;  %4780 = vmatprep.subr.bf16.mxu1 %v13929_v31  ;;  %v13987_v30 = vld [vmem:[%s15381_s24 + $0x1218] ss:$36 sps:$4 sm:$0xff]  }
 0x622   : > { %12877 = vmatprep.subr.bf16.mxu0 %v13930_v32  ;;  %v13990_v31 = vld [vmem:[%s15381_s24 + $0x1418] ss:$36 sps:$4 sm:$0xff]   ;;  %v3044_v32 = vrot.slane %v3032_v28, %v15552_v60  ;;  %v14012_v28 = vld [vmem:[%s15381_s24 + $0x688] ss:$36 sps:$4 sm:$0xff]  }
 0x624   : > { %4781 = vmatpush2.bf16.msra.mxu1 %v13927_v33  ;;  %v3048_v33 = vrot.slane %v3033_v29, %v15552_v60  ;;  %v14014_v29 = vld [vmem:[%s15381_s24 + $0x68c] ss:$36 sps:$4 sm:$0xff]  }
 0x625   : > { %12878 = vmatpush3.bf16.msra.mxu0 %v13931_v34  ;;  %4782 = vmatprep.subr.bf16.mxu1 %v13934_v35  ;;  %v13991_v34 = vld [vmem:[%s15381_s24 + $0x11d8] ss:$36 sps:$4 sm:$0xff]   ;;  %v13992_v35 = vld [vmem:[%s15381_s24 + $0x13d0] ss:$36 sps:$4 sm:$0xff]  }
 0x626   : > { %12879 = vmatprep.subr.bf16.mxu0 %v13935_v36  ;;  %v4584_v36 = vadd.f32 %v16035_v63, %v3044_v32 }
 0x628   : > { %4783 = vmatpush2.bf16.msra.mxu1 %v13932_v37 }
 0x629   : > { %12880 = vmatpush3.bf16.msra.mxu0 %v13936_v38  ;;  %4784 = vmatprep.subr.bf16.mxu1 %v13939_v39  ;;  %v4586_v38 = vadd.f32 %v16040_v1, %v3048_v33  ;;  %v13995_v1 = vld [vmem:[%s15381_s24 + $0x1148] ss:$36 sps:$4 sm:$0xff]   ;;  %v14024_v33 = vld [vmem:[%s15381_s24 + $0x5f8] ss:$36 sps:$4 sm:$0xff]  }
 0x62a   : > { %12881 = vmatprep.subr.bf16.mxu0 %v13940_v40  ;;  %v13993_v40 = vld [vmem:[%s15381_s24 + $0x1190] ss:$36 sps:$4 sm:$0xff]  }
 0x62c   : > { %4785 = vmatpush2.bf16.msra.mxu1 %v13937_v41 }
 0x62d   : > { %12882 = vmatpush3.bf16.msra.mxu0 %v13941_v42  ;;  %4836 = vmatprep.subr.bf16.mxu1 %v13944_v43  ;;  %v13994_v42 = vld [vmem:[%s15381_s24 + $0x1388] ss:$36 sps:$4 sm:$0xff]  }
 0x62f   : > { %4787 = vmatmul.mubr.bf16.vlgmr.msra.gmra.mxu1 %v15928_v16 }
 0x630   : > { %4910 = vmatmul.mubr.bf16.vlgmr.msra.gmra.mxu0 %v15861_v7  ;;  %4837 = vmatpush1.bf16.msra.mxu1 %v13942_v12  ;;  %v13951_v7 = vld [vmem:[%s15381_s24 + $0x10f8] ss:$36 sps:$4 sm:$0xff]  }
 0x631   : > { %4868 = vmatprep.mubr.bf16.mxu1 %v15924_v13  ;;  %4838 = vmatprep.subr.bf16.mxu1 %v13947_v44  ;;  %v13996_v44 = vld [vmem:[%s15381_s24 + $0x1340] ss:$36 sps:$4 sm:$0xff]  }
 0x632   : > { %5033 = vmatprep.mubr.f32.mxu0 %v15202_v45 }
 0x634   : > { %4839 = vmatpush1.bf16.msra.mxu1 %v13945_v22  ;;  %v13998_v22 = vld [vmem:[%s15381_s24 + $0x12f8] ss:$36 sps:$4 sm:$0xff]  }
 0x635   : > { %4840 = vmatprep.subr.bf16.mxu1 %v13950_v47  ;;  %v13999_v47 = vld [vmem:[%s15381_s24 + $0x10b8] ss:$36 sps:$4 sm:$0xff]  }
 0x638   : > { %4841 = vmatpush1.bf16.msra.mxu1 %v13948_v52  ;;  %v14000_v52 = vld [vmem:[%s15381_s24 + $0x12b0] ss:$36 sps:$4 sm:$0xff]  }
 0x639   : > { %4842 = vmatprep.subr.bf16.mxu1 %v13953_v48  ;;  %v14001_v48 = vld [vmem:[%s15381_s24 + $0x1070] ss:$36 sps:$4 sm:$0xff]  }
 0x63c   : > { %4843 = vmatpush1.bf16.msra.mxu1 %v13951_v7  ;;  %v14002_v7 = vld [vmem:[%s15381_s24 + $0x1268] ss:$36 sps:$4 sm:$0xff]  }
 0x63d   : > { %4844 = vmatprep.subr.bf16.mxu1 %v13956_v49  ;;  %v14003_v49 = vld [vmem:[%s15381_s24 + $0x1028] ss:$36 sps:$4 sm:$0xff]  }
 0x640   : > { %4845 = vmatpush1.bf16.msra.mxu1 %v13954_v50  ;;  %v14004_v50 = vld [vmem:[%s15381_s24 + $0x1220] ss:$36 sps:$4 sm:$0xff]  }
 0x641   : > { %4846 = vmatprep.subr.bf16.mxu1 %v13959_v51  ;;  %v14005_v51 = vld [vmem:[%s15381_s24 + $0xfe0] ss:$36 sps:$4 sm:$0xff]  }
 0x644   : > { %4847 = vmatpush1.bf16.msra.mxu1 %v13957_v53  ;;  %v1795_v53 = vld [vmem:[%s15381_s24 + $0x1450] sm:$0x11] }
 0x645   : > { %4848 = vmatprep.subr.bf16.mxu1 %v13962_v54  ;;  %v3037_v54 = vunpack.c.h.bf16 %v1795_v53 }
 0x648   : > { %4849 = vmatpush1.bf16.msra.mxu1 %v13960_v55  ;;  %v3064_v55 = vrot.slane %v3037_v54, %v15552_v60  ;;  %v14056_v54 = vld [vmem:[%s15381_s24 + $0x494] ss:$36 sps:$4 sm:$0xff]  }
 0x649   : > { %4850 = vmatprep.subr.bf16.mxu1 %v13965_v56 }
 0x64c   : > { %4851 = vmatpush1.bf16.msra.mxu1 %v13963_v57 }
 0x64d   : > { %4852 = vmatprep.subr.bf16.mxu1 %v13968_v58 }
 0x64f   : > { %v16090_v0 = vpop.f32.mrf.mxu0 }
 0x650   : > { %4853 = vmatpush2.bf16.msra.mxu1 %v13966_v59 }
 0x651   : > { %v16093_v10 = vpop.f32.mrf.mxu0  ;;  %4854 = vmatprep.subr.bf16.mxu1 %v13971_v61 }
 0x653   : > { %v4669_v11 = vpop.f32.mrf.mxu0 }
 0x654   : > { %4855 = vmatpush2.bf16.msra.mxu1 %v13969_v6  ;;  %v1794_v6 = vld [vmem:[%s15381_s24 + $0x1448] sm:$0x11] }
 0x655   : > { %v4670_v20 = vpop.f32.mrf.mxu0  ;;  %4856 = vmatprep.subr.bf16.mxu1 %v13974_v62  ;;  %v3034_v62 = vunpack.c.l.bf16 %v1794_v6  ;;  %v3035_v11 = vunpack.c.h.bf16 %v1794_v6  ;;  %v14074_v6 = vld [vmem:[%s15381_s24 + $0x83c] ss:$36 sps:$4 sm:$0xff]  }
 0x657   : > { %v3056_v20 = vrot.slane %v3035_v11, %v15552_v60 }
 0x658   : > { %4857 = vmatpush2.bf16.msra.mxu1 %v13972_v15  ;;  %v3052_v15 = vrot.slane %v3034_v62, %v15552_v60  ;;  %v1796_v62 = vld [vmem:[%s15381_s24 + $0x1458] sm:$0x11] }
 0x659   : > { %4858 = vmatprep.subr.bf16.mxu1 %v13977_v21  ;;  %v3038_v11 = vunpack.c.l.bf16 %v1796_v62 }
 0x65a   : > { %v4666_v21 = vadd.f32 %v16090_v0, %v3052_v15 }
 0x65b   : > { %v3068_v15 = vrot.slane %v3038_v11, %v15552_v60  ;;  %v14077_v11 = vld [vmem:[%s15381_s24 + $0x32c] ss:$36 sps:$4 sm:$0xff]  }
 0x65c   : > { %4859 = vmatpush2.bf16.msra.mxu1 %v13975_v2 }
 0x65d   : > { %4860 = vmatprep.subr.bf16.mxu1 %v13980_v17 }
 0x660   : > { %4861 = vmatpush2.bf16.msra.mxu1 %v13978_v4 }
 0x661   : > { %4862 = vmatprep.subr.bf16.mxu1 %v13983_v46 }
 0x664   : > { %4863 = vmatpush2.bf16.msra.mxu1 %v13981_v23 }
 0x665   : > { %4864 = vmatprep.subr.bf16.mxu1 %v13986_v27 }
 0x668   : > { %4865 = vmatpush2.bf16.msra.mxu1 %v13984_v25 }
 0x669   : > { %4866 = vmatprep.subr.bf16.mxu1 %v13989_v26 }
 0x66c   : > { %4867 = vmatpush2.bf16.msra.mxu1 %v13987_v30  ;;  %v3036_v30 = vunpack.c.l.bf16 %v1795_v53  ;;  %v14054_v53 = vld [vmem:[%s15381_s24 + $0x490] ss:$36 sps:$4 sm:$0xff]  }
 0x66d   : > { %12889 = vmatprep.subr.bf16.mxu1 %v13990_v31  ;;  %v14020_v31 = vld [vmem:[%s15381_s24 + $0x644] ss:$36 sps:$4 sm:$0xff]  }
 0x66e   : > { %v3060_v32 = vrot.slane %v3036_v30, %v15552_v60 }
 0x66f   : > { %4869 = vmatmul.mubr.bf16.vlgmr.msra.gmra.mxu1 %v15928_v16  ;;  %v4624_v37 = vpop.f32.mrf.mxu1 }
 0x670   : > { %v16116_v39 = vadd.f32 %v4624_v37, %v4584_v36  ;;  %12890 = vmatpush3.bf16.msra.mxu1 %v13991_v34  ;;  %4949 = vmatprep.mubr.bf16.mxu1 %v15924_v13  ;;  %v13997_v13 = vld [vmem:[%s15381_s24 + $0x1100] ss:$36 sps:$4 sm:$0xff]  }
 0x671   : > { %v4626_v41 = vpop.f32.mrf.mxu1  ;;  %12891 = vmatprep.subr.bf16.mxu1 %v13992_v35  ;;  %v14026_v34 = vld [vmem:[%s15381_s24 + $0x5fc] ss:$36 sps:$4 sm:$0xff]  }
 0x672   : > { %v16121_v63 = vadd.f32 %v4626_v41, %v4586_v38  ;;  %v14032_v41 = vld [vmem:[%s15381_s24 + $0x5b4] ss:$36 sps:$4 sm:$0xff]  }
 0x673   : > { %v4628_v43 = vpop.f32.mrf.mxu1 }
 0x674   : > { %12892 = vmatpush3.bf16.msra.mxu1 %v13993_v40  ;;  %v14030_v40 = vld [vmem:[%s15381_s24 + $0x5b0] ss:$36 sps:$4 sm:$0xff]  }
 0x675   : > { %v4629_v12 = vpop.f32.mrf.mxu1  ;;  %12893 = vmatprep.subr.bf16.mxu1 %v13994_v42 }
 0x678   : > { %12894 = vmatpush3.bf16.msra.mxu1 %v13995_v1 }
 0x679   : > { %12895 = vmatprep.subr.bf16.mxu1 %v13996_v44 }
 0x67c   : > { %12896 = vmatpush3.bf16.msra.mxu1 %v13997_v13 }
 0x67d   : > { %12897 = vmatprep.subr.bf16.mxu1 %v13998_v22  ;;  %v14036_v22 = vld [vmem:[%s15381_s24 + $0x568] ss:$36 sps:$4 sm:$0xff]  }
 0x680   : > { %12898 = vmatpush3.bf16.msra.mxu1 %v13999_v47  ;;  %v14038_v47 = vld [vmem:[%s15381_s24 + $0x56c] ss:$36 sps:$4 sm:$0xff]  }
 0x681   : > { %12899 = vmatprep.subr.bf16.mxu1 %v14000_v52 }
 0x684   : > { %12900 = vmatpush3.bf16.msra.mxu1 %v14001_v48 }
 0x685   : > { %12901 = vmatprep.subr.bf16.mxu1 %v14002_v7  ;;  %v14042_v7 = vld [vmem:[%s15381_s24 + $0x520] ss:$36 sps:$4 sm:$0xff]  }
 0x688   : > { %12902 = vmatpush3.bf16.msra.mxu1 %v14003_v49  ;;  %v14044_v49 = vld [vmem:[%s15381_s24 + $0x524] ss:$36 sps:$4 sm:$0xff]  }
 0x689   : > { %12903 = vmatprep.subr.bf16.mxu1 %v14004_v50  ;;  %v14048_v50 = vld [vmem:[%s15381_s24 + $0x4d8] ss:$36 sps:$4 sm:$0xff]  }
 0x68c   : > { %12904 = vmatpush3.bf16.msra.mxu1 %v14005_v51  ;;  %v14050_v51 = vld [vmem:[%s15381_s24 + $0x4dc] ss:$36 sps:$4 sm:$0xff]  }
 0x68d   : > { %5965 = vmatprep.subr.bf16.mxu1 %v14014_v29  ;;  %v3039_v29 = vunpack.c.h.bf16 %v1796_v62  ;;  %v14069_v62 = vld [vmem:[%s15381_s24 + $0x370] ss:$36 sps:$4 sm:$0xff]  }
 0x68f   : > { %v4747_v56 = vpop.f32.mrf.mxu0  ;;  %4950 = vmatmul.mubr.bf16.vlgmr.msra.gmra.mxu1 %v15928_v16  ;;  %v4668_v16 = vadd.f32 %v16093_v10, %v3056_v20  ;;  %v14018_v10 = vld [vmem:[%s15381_s24 + $0x640] ss:$36 sps:$4 sm:$0xff]  }
 0x690   : > { %5966 = vmatpush1.bf16.msra.mxu1 %v14012_v28  ;;  %v4748_v35 = vadd.f32 %v4747_v56, %v3060_v32  ;;  %v14062_v56 = vld [vmem:[%s15381_s24 + $0x8cc] ss:$36 sps:$4 sm:$0xff]   ;;  %v16183_v28 = vld [vmem:[%s15381_s24 + $0x1460] sm:$0x1] }
 0x691   : > { %v4749_v57 = vpop.f32.mrf.mxu0  ;;  %5967 = vmatprep.subr.bf16.mxu1 %v14020_v31 }
 0x692   : > { %v16137_v58 = vadd.f32 %v4749_v57, %v3064_v55  ;;  %v14060_v55 = vld [vmem:[%s15381_s24 + $0x8c8] ss:$36 sps:$4 sm:$0xff]   ;;  %v14066_v57 = vld [vmem:[%s15381_s24 + $0x880] ss:$36 sps:$4 sm:$0xff]  }
 0x693   : > { %v4751_v59 = vpop.f32.mrf.mxu0 }
 0x694   : > { %5968 = vmatpush1.bf16.msra.mxu1 %v14018_v10  ;;  %v14068_v59 = vld [vmem:[%s15381_s24 + $0x884] ss:$36 sps:$4 sm:$0xff]  }
 0x695   : > { %v4752_v61 = vpop.f32.mrf.mxu0  ;;  %5969 = vmatprep.subr.bf16.mxu1 %v14026_v34 }
 0x696   : > { %v14072_v61 = vld [vmem:[%s15381_s24 + $0x838] ss:$36 sps:$4 sm:$0xff]  }
 0x698   : > { %5970 = vmatpush1.bf16.msra.mxu1 %v14024_v33 }
 0x699   : > { %5971 = vmatprep.subr.bf16.mxu1 %v14032_v41 }
 0x69c   : > { %5972 = vmatpush1.bf16.msra.mxu1 %v14030_v40 }
 0x69d   : > { %5973 = vmatprep.subr.bf16.mxu1 %v14038_v47  ;;  %v14035_v47 = vld [vmem:[%s15381_s24 + $0xa4] ss:$36 sps:$4 sm:$0xff]  }
 0x6a0   : > { %5974 = vmatpush1.bf16.msra.mxu1 %v14036_v22  ;;  %v14027_v22 = vld [vmem:[%s15381_s24 + $0xe8] ss:$36 sps:$4 sm:$0xff]  }
 0x6a1   : > { %5975 = vmatprep.subr.bf16.mxu1 %v14044_v49  ;;  %v14039_v49 = vld [vmem:[%s15381_s24 + $0x58] ss:$36 sps:$4 sm:$0xff]  }
 0x6a4   : > { %5976 = vmatpush1.bf16.msra.mxu1 %v14042_v7  ;;  %v14078_v7 = vld [vmem:[%s15381_s24 + $0x7f0] ss:$36 sps:$4 sm:$0xff]  }
 0x6a5   : > { %5977 = vmatprep.subr.bf16.mxu1 %v14050_v51  ;;  %v14047_v51 = vld [vmem:[%s15381_s24 + $0x14] ss:$36 sps:$4 sm:$0xff]  }
 0x6a8   : > { %5978 = vmatpush1.bf16.msra.mxu1 %v14048_v50  ;;  %v14080_v50 = vld [vmem:[%s15381_s24 + $0x7f4] ss:$36 sps:$4 sm:$0xff]  }
 0x6a9   : > { %5979 = vmatprep.subr.bf16.mxu1 %v14056_v54  ;;  %v14053_v54 = vld [vmem:[%s15381_s24 + $0x44c] ss:$36 sps:$4 sm:$0xff]  }
 0x6ac   : > { %5980 = vmatpush1.bf16.msra.mxu1 %v14054_v53  ;;  %v14045_v53 = vld [vmem:[%s15381_s24 + $0x10] ss:$36 sps:$4 sm:$0xff]  }
 0x6ad   : > { %5981 = vmatprep.subr.bf16.mxu1 %v14062_v56  ;;  %v14059_v56 = vld [vmem:[%s15381_s24 + $0x404] ss:$36 sps:$4 sm:$0xff]  }
 0x6af   : > { %v4706_v2 = vpop.f32.mrf.mxu1 }
 0x6b0   : > { %v16144_v17 = vadd.f32 %v4706_v2, %v4666_v21  ;;  %5982 = vmatpush2.bf16.msra.mxu1 %v14060_v55  ;;  %v14051_v55 = vld [vmem:[%s15381_s24 + $0x448] ss:$36 sps:$4 sm:$0xff]  }
 0x6b1   : > { %v4708_v4 = vpop.f32.mrf.mxu1  ;;  %5983 = vmatprep.subr.bf16.mxu1 %v14068_v59  ;;  %v14065_v59 = vld [vmem:[%s15381_s24 + $0x3bc] ss:$36 sps:$4 sm:$0xff]  }
 0x6b2   : > { %v16146_v46 = vadd.f32 %v4708_v4, %v4668_v16 }
 0x6b3   : > { %v4710_v23 = vpop.f32.mrf.mxu1 }
 0x6b4   : > { %5984 = vmatpush2.bf16.msra.mxu1 %v14066_v57  ;;  %v14057_v57 = vld [vmem:[%s15381_s24 + $0x400] ss:$36 sps:$4 sm:$0xff]  }
 0x6b5   : > { %v4711_v27 = vpop.f32.mrf.mxu1  ;;  %5985 = vmatprep.subr.bf16.mxu1 %v14074_v6  ;;  %v14071_v6 = vld [vmem:[%s15381_s24 + $0x374] ss:$36 sps:$4 sm:$0xff]  }
 0x6b8   : > { %5986 = vmatpush2.bf16.msra.mxu1 %v14072_v61  ;;  %v14063_v61 = vld [vmem:[%s15381_s24 + $0x3b8] ss:$36 sps:$4 sm:$0xff]  }
 0x6b9   : > { %5987 = vmatprep.subr.bf16.mxu1 %v14080_v50  ;;  %v14111_v50 = vld [vmem:[%s15381_s24 + $0x180] ss:$36 sps:$4 sm:$0xff]  }
 0x6bc   : > { %5988 = vmatpush2.bf16.msra.mxu1 %v14078_v7  ;;  %v14113_v7 = vld [vmem:[%s15381_s24 + $0x184] ss:$36 sps:$4 sm:$0xff]  }
 0x6d0   : > { %v16148_v24 = vpop.f32.mrf.mxu0 }
 0x6d1   : > { %v4830_v20 = vadd.f32 %v16148_v24, %v3068_v15  ;;  %v3040_v24 = vunpack.c.l.bf16 %v16183_v28  ;;  %v14075_v15 = vld [vmem:[%s15381_s24 + $0x328] ss:$36 sps:$4 sm:$0xff]  }
 0x6d2   : > { %v16150_v25 = vpop.f32.mrf.mxu0 }
 0x6d3   : > { %v3076_v30 = vrot.slane %v3040_v24, %v15552_v60 }
 0x6d4   : > { %v4833_v26 = vpop.f32.mrf.mxu0 }
 0x6d6   : > { %v4834_v0 = vpop.f32.mrf.mxu0 }
 0x6ef   : > { %v4788_v36 = vpop.f32.mrf.mxu1 }
 0x6f0   : > { %v4789_v37 = vadd.f32 %v4788_v36, %v4748_v35  ;;  %v12883_v38 = vpop.f32.mrf.mxu0 }
 0x6f1   : > { %v4790_v42 = vpop.f32.mrf.mxu1 }
 0x6f2   : > { %v4961_v43 = vmax.f32 %v4789_v37, 0.0  ;;  %v12884_v1 = vpop.f32.mrf.mxu0  ;;  %v4791_v21 = vadd.f32 %v4790_v42, %v16137_v58  ;;  %v3072_v58 = vrot.slane %v3039_v29, %v15552_v60  ;;  %v4958_v42 = vmax.f32 %v16121_v63, 0.0  ;;  %v14098_v29 = vld [vmem:[%s15381_s24 + $0x71c] ss:$36 sps:$4 sm:$0xff]  }
 0x6f3   : > { %v12885_v12 = vadd.f32 %v12884_v1, %v12883_v38  ;;  %v4792_v44 = vpop.f32.mrf.mxu1  ;;  %v4957_v60 = vmax.f32 %v16116_v39, 0.0  ;;  %v4959_v63 = vmax.f32 %v16144_v17, 0.0  ;;  %v14006_v39 = vld [vmem:[%s15381_s24 + $0x208] ss:$36 sps:$4 sm:$0xff]   ;;  %v14009_v1 = vld [vmem:[%s15381_s24 + $0x1c0] ss:$36 sps:$4 sm:$0xff]  }
 0x6f4   : > { %6374 = vst [vmem:[#allocation3] sm:$0xff] %v4961_v43  ;;  %v12886_v13 = vpop.f32.mrf.mxu0  ;;  %v4962_v27 = vmax.f32 %v4791_v21, 0.0  ;;  %v4832_v31 = vadd.f32 %v16150_v25, %v3072_v58  ;;  %v4960_v25 = vmax.f32 %v16146_v46, 0.0  ;;  %v14008_v43 = vld [vmem:[%s15381_s24 + $0x20c] ss:$36 sps:$4 sm:$0xff]  }
 0x6f5   : > { %v4793_v52 = vpop.f32.mrf.mxu1  ;;  %v4912_v33 = vadd.f32 %v12885_v12, %v3076_v30  ;;  %v14011_v46 = vld [vmem:[%s15381_s24 + $0x1c4] ss:$36 sps:$4 sm:$0xff]   ;;  %v14017_v17 = vld [vmem:[%s15381_s24 + $0x17c] ss:$36 sps:$4 sm:$0xff]   ;;  %v14021_v44 = vld [vmem:[%s15381_s24 + $0x130] ss:$36 sps:$4 sm:$0xff]  }
 0x6f6   : > { %v12887_v48 = vpop.f32.mrf.mxu0  ;;  %v14015_v12 = vld [vmem:[%s15381_s24 + $0x178] ss:$36 sps:$4 sm:$0xff]   ;;  %v14029_v13 = vld [vmem:[%s15381_s24 + $0xec] ss:$36 sps:$4 sm:$0xff]   ;;  %v14033_v52 = vld [vmem:[%s15381_s24 + $0xa0] ss:$36 sps:$4 sm:$0xff]  }
 0x6f7   : > { %v14041_v48 = vld [vmem:[%s15381_s24 + $0x5c] ss:$36 sps:$4 sm:$0xff]   ;;  %v14083_v21 = vld [vmem:[%s15381_s24 + $0x2e4] ss:$36 sps:$4 sm:$0xff]   ;;  %v14093_v58 = vld [vmem:[%s15381_s24 + $0x250] ss:$36 sps:$4 sm:$0xff]  }
 0x6f8   : > { %v14096_v30 = vld [vmem:[%s15381_s24 + $0x718] ss:$36 sps:$4 sm:$0xff]  }
 0x72f   : > { %v4870_v2 = vpop.f32.mrf.mxu1 }
 0x730   : > { %v4871_v16 = vadd.f32 %v4870_v2, %v4830_v20  ;;  %v14081_v20 = vld [vmem:[%s15381_s24 + $0x2e0] ss:$36 sps:$4 sm:$0xff]   ;;  %v14084_v2 = vld [vmem:[%s15381_s24 + $0x7a8] ss:$36 sps:$4 sm:$0xff]  }
 0x731   : > { %v4872_v4 = vpop.f32.mrf.mxu1 }
 0x732   : > { %v4963_v23 = vmax.f32 %v4871_v16, 0.0  ;;  %v4873_v35 = vadd.f32 %v4872_v4, %v4832_v31  ;;  %v14086_v16 = vld [vmem:[%s15381_s24 + $0x7ac] ss:$36 sps:$4 sm:$0xff]   ;;  %v14089_v4 = vld [vmem:[%s15381_s24 + $0x29c] ss:$36 sps:$4 sm:$0xff]  }
 0x733   : > { %v4874_v26 = vpop.f32.mrf.mxu1  ;;  %5989 = vmatprep.subr.bf16.mxu1 %v14086_v16  ;;  %v14104_v31 = vld [vmem:[%s15381_s24 + $0x214] ss:$36 sps:$4 sm:$0xff]   ;;  %v14135_v16 = vld [vmem:[%s15381_s24 + $0x60] ss:$36 sps:$4 sm:$0xff]  }
 0x734   : > { %4999 = vmatprep.subr.mxu0 %v4963_v23  ;;  %v4964_v41 = vmax.f32 %v4873_v35, 0.0  ;;  %5990 = vmatpush2.bf16.msra.mxu1 %v14084_v2  ;;  %v14092_v23 = vld [vmem:[%s15381_s24 + $0x764] ss:$36 sps:$4 sm:$0xff]   ;;  %v14140_v2 = vld [vmem:[%s15381_s24 + $0x52c] ss:$36 sps:$4 sm:$0xff]  }
 0x735   : > { %v4875_v0 = vpop.f32.mrf.mxu1  ;;  %5000 = vmatpush1.msra.mxu0 %v4962_v27  ;;  %v14087_v27 = vld [vmem:[%s15381_s24 + $0x298] ss:$36 sps:$4 sm:$0xff]   ;;  %v14090_v26 = vld [vmem:[%s15381_s24 + $0x760] ss:$36 sps:$4 sm:$0xff]   ;;  %5991 = vmatprep.subr.bf16.mxu1 %v14092_v23 }
 0x736   : > { %12076 = vmatmul.mubr.msk.f32.vlgmr.msra.gmra.mxu0 %vm434_vm6, %v15402_v9  ;;  %v14095_v0 = vld [vmem:[%s15381_s24 + $0x254] ss:$36 sps:$4 sm:$0xff]   ;;  %v14143_v23 = vld [vmem:[%s15381_s24 + $0x1c] ss:$36 sps:$4 sm:$0xff]  }
 0x737   : > { %5104 = vmatprep.mubr.f32.mxu0 %v15202_v45 }
 0x738   : > { %5992 = vmatpush2.bf16.msra.mxu1 %v14090_v26  ;;  %v14141_v26 = vld [vmem:[%s15381_s24 + $0x18] ss:$36 sps:$4 sm:$0xff]  }
 0x739   : > { %5993 = vmatprep.subr.bf16.mxu1 %v14098_v29  ;;  %v14149_v29 = vld [vmem:[%s15381_s24 + $0x454] ss:$36 sps:$4 sm:$0xff]  }
 0x73c   : > { %5994 = vmatpush2.bf16.msra.mxu1 %v14096_v30  ;;  %v14147_v30 = vld [vmem:[%s15381_s24 + $0x450] ss:$36 sps:$4 sm:$0xff]  }
 0x74f   : > { %v12905_v10 = vpop.f32.mrf.mxu1 }
 0x751   : > { %v12906_v32 = vpop.f32.mrf.mxu1 }
 0x752   : > { %v12907_v34 = vadd.f32 %v12906_v32, %v12905_v10  ;;  %v14101_v10 = vld [vmem:[%s15381_s24 + $0x6d4] ss:$36 sps:$4 sm:$0xff]  }
 0x753   : > { %v12908_v36 = vpop.f32.mrf.mxu1  ;;  %v14099_v32 = vld [vmem:[%s15381_s24 + $0x6d0] ss:$36 sps:$4 sm:$0xff]   ;;  %5995 = vmatprep.subr.bf16.mxu1 %v14101_v10  ;;  %v14150_v10 = vld [vmem:[%s15381_s24 + $0x498] ss:$36 sps:$4 sm:$0xff]  }
 0x754   : > { %v4952_v37 = vadd.f32 %v12907_v34, %v4912_v33  ;;  %5996 = vmatpush2.bf16.msra.mxu1 %v14099_v32  ;;  %v14110_v33 = vld [vmem:[%s15381_s24 + $0x694] ss:$36 sps:$4 sm:$0xff]  }
 0x755   : > { %v12909_v38 = vpop.f32.mrf.mxu1  ;;  %6047 = vmatprep.subr.bf16.mxu1 %v14110_v33  ;;  %v14158_v32 = vld [vmem:[%s15381_s24 + $0x8d4] ss:$36 sps:$4 sm:$0xff]   ;;  %v14153_v33 = vld [vmem:[%s15381_s24 + $0x408] ss:$36 sps:$4 sm:$0xff]  }
 0x756   : > { %v4965_v40 = vmax.f32 %v4952_v37, 0.0 }
 0x758   : > { %5070 = vmatprep.subr.mxu0 %v4965_v40 }
 0x759   : > { %5071 = vmatpush1.msra.mxu0 %v4964_v41 }
 0x75a   : > { %12077 = vmatmul.mubr.msk.f32.vlgmr.msra.gmra.mxu0 %vm434_vm6, %v15402_v9  ;;  %5144 = vmatprep.subr.mxu0 %v4958_v42 }
 0x75b   : > { %5145 = vmatpush1.msra.mxu0 %v4957_v60  ;;  %5178 = vmatprep.mubr.f32.mxu0 %v15202_v45 }
 0x75c   : > { %5215 = vmatprep.subr.mxu0 %v4960_v25 }
 0x75e   : > { %12078 = vmatmul.mubr.msk.f32.vlgmr.msra.gmra.mxu0 %vm434_vm6, %v15400_v8 }
 0x75f   : > { %5216 = vmatpush1.msra.mxu0 %v4959_v63  ;;  %5249 = vmatprep.mubr.f32.mxu0 %v15202_v45  ;;  %v14023_v45 = vld [vmem:[%s15381_s24 + $0x134] ss:$36 sps:$4 sm:$0xff]  }
 0x760   : > { %5924 = vmatprep.subr.bf16.mxu0 %v14008_v43 }
 0x762   : > { %12079 = vmatmul.mubr.msk.f32.vlgmr.msra.gmra.mxu0 %vm434_vm6, %v15400_v8 }
 0x763   : > { %5925 = vmatpush1.bf16.msra.mxu0 %v14006_v39 }
 0x764   : > { %5926 = vmatprep.subr.bf16.mxu0 %v14011_v46 }
 0x767   : > { %5927 = vmatpush1.bf16.msra.mxu0 %v14009_v1 }
 0x768   : > { %5928 = vmatprep.subr.bf16.mxu0 %v14017_v17  ;;  %v14102_v17 = vld [vmem:[%s15381_s24 + $0x210] ss:$36 sps:$4 sm:$0xff]  }
 0x76b   : > { %5929 = vmatpush1.bf16.msra.mxu0 %v14015_v12 }
 0x76c   : > { %5930 = vmatprep.subr.bf16.mxu0 %v14023_v45 }
 0x76f   : > { %5931 = vmatpush1.bf16.msra.mxu0 %v14021_v44  ;;  %v14107_v44 = vld [vmem:[%s15381_s24 + $0x1cc] ss:$36 sps:$4 sm:$0xff]  }
 0x770   : > { %5932 = vmatprep.subr.bf16.mxu0 %v14029_v13 }
 0x773   : > { %5933 = vmatpush1.bf16.msra.mxu0 %v14027_v22 }
 0x774   : > { %5934 = vmatprep.subr.bf16.mxu0 %v14035_v47  ;;  %v14105_v47 = vld [vmem:[%s15381_s24 + $0x1c8] ss:$36 sps:$4 sm:$0xff]  }
 0x777   : > { %5935 = vmatpush1.bf16.msra.mxu0 %v14033_v52  ;;  %v14108_v52 = vld [vmem:[%s15381_s24 + $0x690] ss:$36 sps:$4 sm:$0xff]  }
 0x778   : > { %5936 = vmatprep.subr.bf16.mxu0 %v14041_v48 }
 0x77b   : > { %5937 = vmatpush1.bf16.msra.mxu0 %v14039_v49  ;;  %v14116_v49 = vld [vmem:[%s15381_s24 + $0x64c] ss:$36 sps:$4 sm:$0xff]  }
 0x77c   : > { %5938 = vmatprep.subr.bf16.mxu0 %v14047_v51  ;;  %v14114_v51 = vld [vmem:[%s15381_s24 + $0x648] ss:$36 sps:$4 sm:$0xff]  }
 0x77f   : > { %5939 = vmatpush1.bf16.msra.mxu0 %v14045_v53  ;;  %v14119_v53 = vld [vmem:[%s15381_s24 + $0x13c] ss:$36 sps:$4 sm:$0xff]  }
 0x780   : > { %5940 = vmatprep.subr.bf16.mxu0 %v14053_v54  ;;  %v14122_v54 = vld [vmem:[%s15381_s24 + $0x604] ss:$36 sps:$4 sm:$0xff]  }
 0x783   : > { %5941 = vmatpush2.bf16.msra.mxu0 %v14051_v55  ;;  %v14117_v55 = vld [vmem:[%s15381_s24 + $0x138] ss:$36 sps:$4 sm:$0xff]  }
 0x784   : > { %5942 = vmatprep.subr.bf16.mxu0 %v14059_v56  ;;  %v14120_v56 = vld [vmem:[%s15381_s24 + $0x600] ss:$36 sps:$4 sm:$0xff]  }
 0x787   : > { %5943 = vmatpush2.bf16.msra.mxu0 %v14057_v57  ;;  %v14125_v57 = vld [vmem:[%s15381_s24 + $0xf4] ss:$36 sps:$4 sm:$0xff]  }
 0x788   : > { %5944 = vmatprep.subr.bf16.mxu0 %v14065_v59  ;;  %v14128_v59 = vld [vmem:[%s15381_s24 + $0x5bc] ss:$36 sps:$4 sm:$0xff]  }
 0x78b   : > { %5945 = vmatpush2.bf16.msra.mxu0 %v14063_v61  ;;  %v14123_v61 = vld [vmem:[%s15381_s24 + $0xf0] ss:$36 sps:$4 sm:$0xff]  }
 0x78c   : > { %5946 = vmatprep.subr.bf16.mxu0 %v14071_v6  ;;  %v14126_v6 = vld [vmem:[%s15381_s24 + $0x5b8] ss:$36 sps:$4 sm:$0xff]  }
 0x78f   : > { %5947 = vmatpush2.bf16.msra.mxu0 %v14069_v62  ;;  %v14131_v62 = vld [vmem:[%s15381_s24 + $0xac] ss:$36 sps:$4 sm:$0xff]  }
 0x790   : > { %5948 = vmatprep.subr.bf16.mxu0 %v14077_v11  ;;  %v14134_v11 = vld [vmem:[%s15381_s24 + $0x574] ss:$36 sps:$4 sm:$0xff]  }
 0x793   : > { %5949 = vmatpush2.bf16.msra.mxu0 %v14075_v15  ;;  %v14129_v15 = vld [vmem:[%s15381_s24 + $0xa8] ss:$36 sps:$4 sm:$0xff]  }
 0x794   : > { %5950 = vmatprep.subr.bf16.mxu0 %v14083_v21  ;;  %v14137_v21 = vld [vmem:[%s15381_s24 + $0x64] ss:$36 sps:$4 sm:$0xff]  }
 0x797   : > { %5951 = vmatpush2.bf16.msra.mxu0 %v14081_v20  ;;  %v14132_v20 = vld [vmem:[%s15381_s24 + $0x570] ss:$36 sps:$4 sm:$0xff]  }
 0x798   : > { %5952 = vmatprep.subr.bf16.mxu0 %v14089_v4  ;;  %v14138_v4 = vld [vmem:[%s15381_s24 + $0x528] ss:$36 sps:$4 sm:$0xff]  }
 0x79b   : > { %5953 = vmatpush2.bf16.msra.mxu0 %v14087_v27  ;;  %v14146_v27 = vld [vmem:[%s15381_s24 + $0x4e4] ss:$36 sps:$4 sm:$0xff]  }
 0x79c   : > { %5954 = vmatprep.subr.bf16.mxu0 %v14095_v0  ;;  %v14144_v0 = vld [vmem:[%s15381_s24 + $0x4e0] ss:$36 sps:$4 sm:$0xff]  }
 0x79f   : > { %5955 = vmatpush2.bf16.msra.mxu0 %v14093_v58  ;;  %v14152_v58 = vld [vmem:[%s15381_s24 + $0x49c] ss:$36 sps:$4 sm:$0xff]  }
 0x7a0   : > { %6006 = vmatprep.subr.bf16.mxu0 %v14104_v31  ;;  %v14155_v31 = vld [vmem:[%s15381_s24 + $0x40c] ss:$36 sps:$4 sm:$0xff]  }
 0x7f6   : > { %v5035_v34 = vpop.f32.mrf.mxu0 }
 0x7f8   : > { %v5037_v35 = vpop.f32.mrf.mxu0 }
 0x81a   : > { %v5106_v36 = vpop.f32.mrf.mxu0 }
 0x81c   : > { %v5108_v37 = vpop.f32.mrf.mxu0 }
 0x81e   : > { %v5180_v38 = vpop.f32.mrf.mxu0 }
 0x81f   : > { %v5181_v40 = vadd.f32 %v5180_v38, %v5035_v34  ;;  %v14156_v34 = vld [vmem:[%s15381_s24 + $0x8d0] ss:$36 sps:$4 sm:$0xff]   ;;  %v14162_v38 = vld [vmem:[%s15381_s24 + $0x888] ss:$36 sps:$4 sm:$0xff]  }
 0x820   : > { %v5182_v41 = vpop.f32.mrf.mxu0 }
 0x821   : > { %v5183_v42 = vadd.f32 %v5182_v41, %v5037_v35  ;;  %v5256_v60 = vmul.f32 %v15414_v19, %v5181_v40  ;;  %v14161_v35 = vld [vmem:[%s15381_s24 + $0x3c4] ss:$36 sps:$4 sm:$0xff]   ;;  %v14167_v40 = vld [vmem:[%s15381_s24 + $0x37c] ss:$36 sps:$4 sm:$0xff]  }
 0x822   : > { %v5251_v25 = vpop.f32.mrf.mxu0  ;;  %v14170_v41 = vld [vmem:[%s15381_s24 + $0x844] ss:$36 sps:$4 sm:$0xff]  }
 0x823   : > { %v5257_v43 = vmul.f32 %v15414_v19, %v5183_v42  ;;  %v5252_v63 = vadd.f32 %v5251_v25, %v5106_v36  ;;  %v16250_v12 = vpack.c.bf16 %v5256_v60, %v5256_v60  ;;  %v14164_v36 = vld [vmem:[%s15381_s24 + $0x88c] ss:$36 sps:$4 sm:$0xff]   ;;  %v14165_v42 = vld [vmem:[%s15381_s24 + $0x378] ss:$36 sps:$4 sm:$0xff]   ;;  %v14168_v60 = vld [vmem:[%s15381_s24 + $0x840] ss:$36 sps:$4 sm:$0xff]  }
 0x824   : > { %v5253_v39 = vpop.f32.mrf.mxu0  ;;  %v14173_v25 = vld [vmem:[%s15381_s24 + $0x334] ss:$36 sps:$4 sm:$0xff]  }
 0x825   : > { %v5261_v46 = vpack.c.bf16 %v5257_v43, %v5257_v43  ;;  %v5254_v1 = vadd.f32 %v5253_v39, %v5108_v37  ;;  %v5258_v45 = vmul.f32 %v15414_v19, %v5252_v63  ;;  %v14159_v37 = vld [vmem:[%s15381_s24 + $0x3c0] ss:$36 sps:$4 sm:$0xff]   ;;  %v14171_v63 = vld [vmem:[%s15381_s24 + $0x330] ss:$36 sps:$4 sm:$0xff]   ;;  %v14174_v39 = vld [vmem:[%s15381_s24 + $0x7f8] ss:$36 sps:$4 sm:$0xff]  }
 0x826   : > { %v14176_v43 = vld [vmem:[%s15381_s24 + $0x7fc] ss:$36 sps:$4 sm:$0xff]  }
 0x827   : > { %v5259_v13 = vmul.f32 %v15414_v19, %v5254_v1  ;;  %5956 = vmatprep.mubr.bf16.mxu0 %v5261_v46  ;;  %v16258_v48 = vpack.c.bf16 %v5258_v45, %v5258_v45  ;;  %v14182_v1 = vld [vmem:[%s15381_s24 + $0x7b4] ss:$36 sps:$4 sm:$0xff]  }
 0x828   : > { %5957 = vmatmul.mubr.bf16.vlgmr.msra.gmra.mxu0 %v16250_v12  ;;  %v14180_v45 = vld [vmem:[%s15381_s24 + $0x7b0] ss:$36 sps:$4 sm:$0xff]  }
 0x829   : > { %v5263_v22 = vpack.c.bf16 %v5259_v13, %v5259_v13  ;;  %6007 = vmatpush1.bf16.msra.mxu0 %v14102_v17  ;;  %6038 = vmatprep.mubr.bf16.mxu0 %v5261_v46  ;;  %v14179_v46 = vld [vmem:[%s15381_s24 + $0x2ec] ss:$36 sps:$4 sm:$0xff]  }
 0x82a   : > { %6008 = vmatprep.subr.bf16.mxu0 %v14107_v44  ;;  %v14177_v17 = vld [vmem:[%s15381_s24 + $0x2e8] ss:$36 sps:$4 sm:$0xff]  }
 0x82b   : > { %5997 = vmatprep.mubr.bf16.mxu1 %v5263_v22  ;;  %v14185_v44 = vld [vmem:[%s15381_s24 + $0x2a4] ss:$36 sps:$4 sm:$0xff]   ;;  %v14188_v13 = vld [vmem:[%s15381_s24 + $0x76c] ss:$36 sps:$4 sm:$0xff]  }
 0x82c   : > { %5998 = vmatmul.mubr.bf16.vlgmr.msra.gmra.mxu1 %v16258_v48 }
 0x82d   : > { %6009 = vmatpush1.bf16.msra.mxu0 %v14105_v47  ;;  %6048 = vmatpush1.bf16.msra.mxu1 %v14108_v52  ;;  %v14186_v47 = vld [vmem:[%s15381_s24 + $0x768] ss:$36 sps:$4 sm:$0xff]   ;;  %v14191_v52 = vld [vmem:[%s15381_s24 + $0x25c] ss:$36 sps:$4 sm:$0xff]  }
 0x82e   : > { %6079 = vmatprep.mubr.bf16.mxu1 %v5263_v22  ;;  %6010 = vmatprep.subr.bf16.mxu0 %v14113_v7  ;;  %v14183_v22 = vld [vmem:[%s15381_s24 + $0x2a0] ss:$36 sps:$4 sm:$0xff]  }
 0x82f   : > { %6049 = vmatprep.subr.bf16.mxu1 %v14116_v49  ;;  %v14194_v7 = vld [vmem:[%s15381_s24 + $0x724] ss:$36 sps:$4 sm:$0xff]   ;;  %v14189_v49 = vld [vmem:[%s15381_s24 + $0x258] ss:$36 sps:$4 sm:$0xff]  }
 0x831   : > { %6011 = vmatpush1.bf16.msra.mxu0 %v14111_v50  ;;  %6050 = vmatpush1.bf16.msra.mxu1 %v14114_v51  ;;  %v14192_v50 = vld [vmem:[%s15381_s24 + $0x720] ss:$36 sps:$4 sm:$0xff]  }
 0x832   : > { %6012 = vmatprep.subr.bf16.mxu0 %v14119_v53  ;;  %6051 = vmatprep.subr.bf16.mxu1 %v14122_v54  ;;  %v14197_v51 = vld [vmem:[%s15381_s24 + $0x6dc] ss:$36 sps:$4 sm:$0xff]  }
 0x833   : > { %v14198_v53 = vld [vmem:[%s15381_s24 + $0x458] ss:$36 sps:$4 sm:$0xff]  }
 0x834   : > { %v14195_v54 = vld [vmem:[%s15381_s24 + $0x6d8] ss:$36 sps:$4 sm:$0xff]  }
 0x835   : > { %6013 = vmatpush1.bf16.msra.mxu0 %v14117_v55  ;;  %6052 = vmatpush1.bf16.msra.mxu1 %v14120_v56  ;;  %v14199_v55 = vld [vmem:[%s15381_s24 + $0x218] ss:$36 sps:$4 sm:$0xff]   ;;  %v14200_v56 = vld [vmem:[%s15381_s24 + $0x410] ss:$36 sps:$4 sm:$0xff]  }
 0x836   : > { %6014 = vmatprep.subr.bf16.mxu0 %v14125_v57  ;;  %6053 = vmatprep.subr.bf16.mxu1 %v14128_v59  ;;  %v14201_v57 = vld [vmem:[%s15381_s24 + $0x1d0] ss:$36 sps:$4 sm:$0xff]   ;;  %v14202_v59 = vld [vmem:[%s15381_s24 + $0x3c8] ss:$36 sps:$4 sm:$0xff]  }
 0x839   : > { %6015 = vmatpush1.bf16.msra.mxu0 %v14123_v61  ;;  %6054 = vmatpush1.bf16.msra.mxu1 %v14126_v6  ;;  %v14203_v61 = vld [vmem:[%s15381_s24 + $0x188] ss:$36 sps:$4 sm:$0xff]   ;;  %v14204_v6 = vld [vmem:[%s15381_s24 + $0x380] ss:$36 sps:$4 sm:$0xff]  }
 0x83a   : > { %6016 = vmatprep.subr.bf16.mxu0 %v14131_v62  ;;  %6055 = vmatprep.subr.bf16.mxu1 %v14134_v11  ;;  %v14206_v62 = vld [vmem:[%s15381_s24 + $0x338] ss:$36 sps:$4 sm:$0xff]  }
 0x83b   : > { %v14207_v11 = vld [vmem:[%s15381_s24 + $0xf8] ss:$36 sps:$4 sm:$0xff]  }
 0x83d   : > { %6017 = vmatpush1.bf16.msra.mxu0 %v14129_v15  ;;  %6056 = vmatpush1.bf16.msra.mxu1 %v14132_v20  ;;  %v14208_v15 = vld [vmem:[%s15381_s24 + $0x2f0] ss:$36 sps:$4 sm:$0xff]   ;;  %v14214_v20 = vld [vmem:[%s15381_s24 + $0x8d8] ss:$36 sps:$4 sm:$0xff]  }
 0x83e   : > { %6018 = vmatprep.subr.bf16.mxu0 %v14137_v21  ;;  %6057 = vmatprep.subr.bf16.mxu1 %v14140_v2  ;;  %v14216_v21 = vld [vmem:[%s15381_s24 + $0x890] ss:$36 sps:$4 sm:$0xff]  }
 0x83f   : > { %v14209_v2 = vld [vmem:[%s15381_s24 + $0xb0] ss:$36 sps:$4 sm:$0xff]  }
 0x841   : > { %6019 = vmatpush1.bf16.msra.mxu0 %v14135_v16  ;;  %6058 = vmatpush1.bf16.msra.mxu1 %v14138_v4  ;;  %v14217_v16 = vld [vmem:[%s15381_s24 + $0x650] ss:$36 sps:$4 sm:$0xff]   ;;  %v14210_v4 = vld [vmem:[%s15381_s24 + $0x2a8] ss:$36 sps:$4 sm:$0xff]  }
 0x842   : > { %6020 = vmatprep.subr.bf16.mxu0 %v14143_v23  ;;  %6059 = vmatprep.subr.bf16.mxu1 %v14146_v27  ;;  %v14218_v23 = vld [vmem:[%s15381_s24 + $0x848] ss:$36 sps:$4 sm:$0xff]  }
 0x843   : > { %v14211_v27 = vld [vmem:[%s15381_s24 + $0x68] ss:$36 sps:$4 sm:$0xff]  }
 0x845   : > { %6021 = vmatpush1.bf16.msra.mxu0 %v14141_v26  ;;  %6060 = vmatpush1.bf16.msra.mxu1 %v14144_v0  ;;  %v14219_v26 = vld [vmem:[%s15381_s24 + $0x608] ss:$36 sps:$4 sm:$0xff]   ;;  %v14212_v0 = vld [vmem:[%s15381_s24 + $0x260] ss:$36 sps:$4 sm:$0xff]  }
 0x846   : > { %6022 = vmatprep.subr.bf16.mxu0 %v14149_v29  ;;  %6061 = vmatprep.subr.bf16.mxu1 %v14152_v58  ;;  %v14220_v29 = vld [vmem:[%s15381_s24 + $0x800] ss:$36 sps:$4 sm:$0xff]  }
 0x847   : > { %v14213_v58 = vld [vmem:[%s15381_s24 + $0x20] ss:$36 sps:$4 sm:$0xff]  }
 0x849   : > { %6023 = vmatpush2.bf16.msra.mxu0 %v14147_v30  ;;  %6062 = vmatpush1.bf16.msra.mxu1 %v14150_v10  ;;  %v14221_v30 = vld [vmem:[%s15381_s24 + $0x5c0] ss:$36 sps:$4 sm:$0xff]   ;;  %v14222_v10 = vld [vmem:[%s15381_s24 + $0x7b8] ss:$36 sps:$4 sm:$0xff]  }
 0x84a   : > { %6024 = vmatprep.subr.bf16.mxu0 %v14155_v31  ;;  %6063 = vmatprep.subr.bf16.mxu1 %v14158_v32  ;;  %v14223_v31 = vld [vmem:[%s15381_s24 + $0x578] ss:$36 sps:$4 sm:$0xff]   ;;  %v14224_v32 = vld [vmem:[%s15381_s24 + $0x770] ss:$36 sps:$4 sm:$0xff]  }
 0x84d   : > { %6025 = vmatpush2.bf16.msra.mxu0 %v14153_v33  ;;  %6064 = vmatpush2.bf16.msra.mxu1 %v14156_v34  ;;  %v14225_v33 = vld [vmem:[%s15381_s24 + $0x530] ss:$36 sps:$4 sm:$0xff]   ;;  %v14226_v34 = vld [vmem:[%s15381_s24 + $0x728] ss:$36 sps:$4 sm:$0xff]  }
 0x84e   : > { %6026 = vmatprep.subr.bf16.mxu0 %v14161_v35  ;;  %6065 = vmatprep.subr.bf16.mxu1 %v14164_v36  ;;  %v14227_v35 = vld [vmem:[%s15381_s24 + $0x4e8] ss:$36 sps:$4 sm:$0xff]   ;;  %v14228_v36 = vld [vmem:[%s15381_s24 + $0x6e0] ss:$36 sps:$4 sm:$0xff]  }
 0x851   : > { %6027 = vmatpush2.bf16.msra.mxu0 %v14159_v37  ;;  %6066 = vmatpush2.bf16.msra.mxu1 %v14162_v38  ;;  %v14229_v37 = vld [vmem:[%s15381_s24 + $0x4a0] ss:$36 sps:$4 sm:$0xff]   ;;  %v1790_v38 = vld [vmem:[%s15381_s24 + $0x1450] sm:$0x11] }
 0x852   : > { %6028 = vmatprep.subr.bf16.mxu0 %v14167_v40  ;;  %6067 = vmatprep.subr.bf16.mxu1 %v14170_v41  ;;  %v5264_v40 = vunpack.c.l.bf16 %v1790_v38  ;;  %v5265_v41 = vunpack.c.h.bf16 %v1790_v38 }
 0x855   : > { %6029 = vmatpush2.bf16.msra.mxu0 %v14165_v42  ;;  %6068 = vmatpush2.bf16.msra.mxu1 %v14168_v60  ;;  %v5271_v42 = vrot.slane %v5264_v40, %v15506_v5 }
 0x856   : > { %6030 = vmatprep.subr.bf16.mxu0 %v14173_v25  ;;  %6069 = vmatprep.subr.bf16.mxu1 %v14176_v43  ;;  %v5275_v25 = vrot.slane %v5265_v41, %v15506_v5 }
 0x859   : > { %6031 = vmatpush2.bf16.msra.mxu0 %v14171_v63  ;;  %6070 = vmatpush2.bf16.msra.mxu1 %v14174_v39 }
 0x85a   : > { %6032 = vmatprep.subr.bf16.mxu0 %v14179_v46  ;;  %6071 = vmatprep.subr.bf16.mxu1 %v14182_v1 }
 0x85d   : > { %6033 = vmatpush2.bf16.msra.mxu0 %v14177_v17  ;;  %6072 = vmatpush2.bf16.msra.mxu1 %v14180_v45 }
 0x85e   : > { %6034 = vmatprep.subr.bf16.mxu0 %v14185_v44  ;;  %6073 = vmatprep.subr.bf16.mxu1 %v14188_v13 }
 0x861   : > { %6035 = vmatpush2.bf16.msra.mxu0 %v14183_v22  ;;  %6074 = vmatpush2.bf16.msra.mxu1 %v14186_v47 }
 0x862   : > { %6036 = vmatprep.subr.bf16.mxu0 %v14191_v52  ;;  %6075 = vmatprep.subr.bf16.mxu1 %v14194_v7 }
 0x865   : > { %6037 = vmatpush2.bf16.msra.mxu0 %v14189_v49  ;;  %6076 = vmatpush2.bf16.msra.mxu1 %v14192_v50 }
 0x866   : > { %6077 = vmatprep.subr.bf16.mxu1 %v14197_v51  ;;  %12911 = vmatprep.subr.bf16.mxu0 %v14198_v53  ;;  %v1791_v51 = vld [vmem:[%s15381_s24 + $0x1458] sm:$0x11] }
 0x867   : > { %v5266_v53 = vunpack.c.l.bf16 %v1791_v51 }
 0x868   : > { %6039 = vmatmul.mubr.bf16.vlgmr.msra.gmra.mxu0 %v16250_v12  ;;  %v14205_v12 = vld [vmem:[%s15381_s24 + $0x140] ss:$36 sps:$4 sm:$0xff]  }
 0x869   : > { %6078 = vmatpush2.bf16.msra.mxu1 %v14195_v54  ;;  %12912 = vmatpush3.bf16.msra.mxu0 %v14199_v55  ;;  %v5267_v54 = vunpack.c.h.bf16 %v1791_v51  ;;  %v5279_v55 = vrot.slane %v5266_v53, %v15506_v5 }
 0x86a   : > { %12913 = vmatprep.subr.bf16.mxu0 %v14200_v56  ;;  %12933 = vmatprep.subr.bf16.mxu1 %v14214_v20 }
 0x86c   : > { %6080 = vmatmul.mubr.bf16.vlgmr.msra.gmra.mxu1 %v16258_v48  ;;  %v14215_v48 = vld [vmem:[%s15381_s24 + $0x698] ss:$36 sps:$4 sm:$0xff]  }
 0x86d   : > { %12914 = vmatpush3.bf16.msra.mxu0 %v14201_v57  ;;  %12934 = vmatpush3.bf16.msra.mxu1 %v14215_v48  ;;  %v5283_v57 = vrot.slane %v5267_v54, %v15506_v5 }
 0x86e   : > { %12915 = vmatprep.subr.bf16.mxu0 %v14202_v59  ;;  %12935 = vmatprep.subr.bf16.mxu1 %v14216_v21 }
 0x871   : > { %12916 = vmatpush3.bf16.msra.mxu0 %v14203_v61  ;;  %12936 = vmatpush3.bf16.msra.mxu1 %v14217_v16 }
 0x872   : > { %12917 = vmatprep.subr.bf16.mxu0 %v14204_v6  ;;  %12937 = vmatprep.subr.bf16.mxu1 %v14218_v23 }
 0x875   : > { %12918 = vmatpush3.bf16.msra.mxu0 %v14205_v12  ;;  %12938 = vmatpush3.bf16.msra.mxu1 %v14219_v26 }
 0x876   : > { %12919 = vmatprep.subr.bf16.mxu0 %v14206_v62  ;;  %12939 = vmatprep.subr.bf16.mxu1 %v14220_v29 }
 0x879   : > { %12920 = vmatpush3.bf16.msra.mxu0 %v14207_v11  ;;  %12940 = vmatpush3.bf16.msra.mxu1 %v14221_v30  ;;  %v6099_v30 = vrot.slane %v3040_v24, %v15506_v5 }
 0x87a   : > { %12921 = vmatprep.subr.bf16.mxu0 %v14208_v15  ;;  %12941 = vmatprep.subr.bf16.mxu1 %v14222_v10 }
 0x87d   : > { %12922 = vmatpush3.bf16.msra.mxu0 %v14209_v2  ;;  %12942 = vmatpush3.bf16.msra.mxu1 %v14223_v31 }
 0x87e   : > { %12923 = vmatprep.subr.bf16.mxu0 %v14210_v4  ;;  %12943 = vmatprep.subr.bf16.mxu1 %v14224_v32 }
 0x881   : > { %12924 = vmatpush3.bf16.msra.mxu0 %v14211_v27  ;;  %12944 = vmatpush3.bf16.msra.mxu1 %v14225_v33 }
 0x882   : > { %12925 = vmatprep.subr.bf16.mxu0 %v14212_v0  ;;  %12945 = vmatprep.subr.bf16.mxu1 %v14226_v34 }
 0x885   : > { %12926 = vmatpush3.bf16.msra.mxu0 %v14213_v58  ;;  %12946 = vmatpush3.bf16.msra.mxu1 %v14227_v35 }
 0x886   : > { %12947 = vmatprep.subr.bf16.mxu1 %v14228_v36 }
 0x889   : > { %12948 = vmatpush3.bf16.msra.mxu1 %v14229_v37 }
 0x8e8   : > { %v5958_v60 = vpop.f32.mrf.mxu0 }
 0x8e9   : > { %v5959_v63 = vadd.f32 %v5958_v60, %v5271_v42 }
 0x8ea   : > { %v5960_v43 = vpop.f32.mrf.mxu0 }
 0x8eb   : > { %v5961_v1 = vadd.f32 %v5960_v43, %v5275_v25 }
 0x8ec   : > { %v5962_v39 = vpop.f32.mrf.mxu0  ;;  %v5999_v46 = vpop.f32.mrf.mxu1 }
 0x8ed   : > { %v6000_v17 = vadd.f32 %v5999_v46, %v5959_v63 }
 0x8ee   : > { %v5963_v45 = vpop.f32.mrf.mxu0  ;;  %v6001_v44 = vpop.f32.mrf.mxu1 }
 0x8ef   : > { %v6002_v13 = vadd.f32 %v6001_v44, %v5961_v1  ;;  %v6088_v22 = vmax.f32 %v6000_v17, 0.0 }
 0x8f0   : > { %v6003_v47 = vpop.f32.mrf.mxu1 }
 0x8f1   : > { %v6089_v52 = vmax.f32 %v6002_v13, 0.0  ;;  %v6092_v50 = vpack.c.bf16 %v6088_v22, %v6088_v22 }
 0x8f2   : > { %v6004_v7 = vpop.f32.mrf.mxu1 }
 0x8f3   : > { %v6093_v49 = vpack.c.bf16 %v6089_v52, %v6089_v52 }
 0x8f5   : > { %6324 = vmatprep.mubr.bf16.mxu0 %v6093_v49 }
 0x8f6   : > { %6325 = vmatmul.mubr.bf16.vlgmr.msra.gmra.mxu0 %v6092_v50 }
 0x928   : > { %v6040_v56 = vpop.f32.mrf.mxu0 }
 0x929   : > { %v6041_v61 = vadd.f32 %v6040_v56, %v5279_v55 }
 0x92a   : > { %v6042_v59 = vpop.f32.mrf.mxu0 }
 0x92b   : > { %v6043_v62 = vadd.f32 %v6042_v59, %v5283_v57 }
 0x92c   : > { %v6044_v6 = vpop.f32.mrf.mxu0  ;;  %v6081_v12 = vpop.f32.mrf.mxu1 }
 0x92d   : > { %v6082_v11 = vadd.f32 %v6081_v12, %v6041_v61 }
 0x92e   : > { %v6045_v15 = vpop.f32.mrf.mxu0  ;;  %v6083_v20 = vpop.f32.mrf.mxu1 }
 0x92f   : > { %v6084_v48 = vadd.f32 %v6083_v20, %v6043_v62  ;;  %v6090_v21 = vmax.f32 %v6082_v11, 0.0 }
 0x930   : > { %v6085_v2 = vpop.f32.mrf.mxu1 }
 0x931   : > { %v6091_v16 = vmax.f32 %v6084_v48, 0.0  ;;  %v6094_v27 = vpack.c.bf16 %v6090_v21, %v6090_v21 }
 0x932   : > { %v6086_v4 = vpop.f32.mrf.mxu1 }
 0x933   : > { %v6095_v23 = vpack.c.bf16 %v6091_v16, %v6091_v16 }
 0x935   : > { %6364 = vmatprep.mubr.bf16.mxu1 %v6095_v23 }
 0x936   : > { %6365 = vmatmul.mubr.bf16.vlgmr.msra.gmra.mxu1 %v6094_v27 }
 0x9b6   : > { %v12927_v26 = vpop.f32.mrf.mxu0 }
 0x9b8   : > { %v12928_v0 = vpop.f32.mrf.mxu0 }
 0x9b9   : > { %v12929_v10 = vadd.f32 %v12928_v0, %v12927_v26 }
 0x9ba   : > { %v12930_v29 = vpop.f32.mrf.mxu0 }
 0x9bb   : > { %v6327_v33 = vadd.f32 %v12929_v10, %v6099_v30 }
 0x9bc   : > { %v12931_v58 = vpop.f32.mrf.mxu0 }
 0x9f6   : > { %v12949_v31 = vpop.f32.mrf.mxu1 }
 0x9f8   : > { %v12950_v32 = vpop.f32.mrf.mxu1 }
 0x9f9   : > { %v12951_v34 = vadd.f32 %v12950_v32, %v12949_v31 }
 0x9fa   : > { %v12952_v35 = vpop.f32.mrf.mxu1 }
 0x9fb   : > { %v6367_v36 = vadd.f32 %v12951_v34, %v6327_v33 }
 0x9fc   : > { %v12953_v37 = vpop.f32.mrf.mxu1 }
 0x9fd   : > { %v6372_v38 = vmax.f32 %v6367_v36, 0.0 }
 0x9ff   : > { %6373 = vst [vmem:[#allocation2] sm:$0x3f] %v6372_v38 }
 0xa00 PF: > { %p12240_p2 = scmp.le.s32.totalorder %s15272_s28, 0 }
 0xa02   : > { %6378 = sbr.rel (%p12240_p2) target bundleno = 4135 (0x1027), region = 68 }
 0xa07   : > { %v6379_v40 = vld [vmem:[#allocation2] sm:$0x3f]  ;;  %vm6998_vm6 = vcmask 1045504   ;;  %v15207_v5 = vmov 0.0   ;;  %vm6994_vm8 = vcmask 48128   ;;  %vm15208_vm9 = vmmov 0  }
 0xa08   : > { %13167 = vmatprep.subr.mxu0 %v15207_v5  ;;  %13172 = vmatprep.subr.mxu1 %v15207_v5  ;;  %v14230_v28 = vld [vmem:[%s15381_s24 + $0x1f8] ss:$36 sps:$4 sm:$0xff]   ;;  %v14233_v42 = vld [vmem:[%s15381_s24 + $0x1b0] ss:$36 sps:$4 sm:$0xff]   ;;  %v14236_v25 = vld [vmem:[%s15381_s24 + $0x168] ss:$36 sps:$4 sm:$0xff]  }
 0xa09   : > { %13168 = vmatpush3.msk.msra.mxu0 %vm6998_vm6, %v6379_v40  ;;  %13169 = vmatprep.mubr.msk.f32.mxu0 %vm15208_vm9, %v15207_v5  ;;  %v14232_v24 = vld [vmem:[%s15381_s24 + $0x1fc] ss:$36 sps:$4 sm:$0xff]   ;;  %v14235_v41 = vld [vmem:[%s15381_s24 + $0x1b4] ss:$36 sps:$4 sm:$0xff]   ;;  %v14238_v60 = vld [vmem:[%s15381_s24 + $0x16c] ss:$36 sps:$4 sm:$0xff]  }
 0xa0a   : > { %13173 = vmatpush3.msk.msra.mxu1 %vm6998_vm6, %v6379_v40  ;;  %13174 = vmatprep.mubr.msk.f32.mxu1 %vm15208_vm9, %v15207_v5  ;;  %v14241_v43 = vld [vmem:[%s15381_s24 + $0x124] ss:$36 sps:$4 sm:$0xff]   ;;  %v14244_v39 = vld [vmem:[%s15381_s24 + $0xdc] ss:$36 sps:$4 sm:$0xff]   ;;  %v14265_v46 = vld [vmem:[%s15381_s24 + $0x634] ss:$36 sps:$4 sm:$0xff]  }
 0xa0b   : > { %13170 = vmatmul.mubr.msk.f32.vlgmr.msra.gmra.mxu0 %vm6994_vm8, %v15412_v18  ;;  %13175 = vmatmul.mubr.msk.f32.vlgmr.msra.gmra.mxu1 %vm6994_vm8, %v15409_v14  ;;  %v14239_v63 = vld [vmem:[%s15381_s24 + $0x120] ss:$36 sps:$4 sm:$0xff]   ;;  %v14257_v18 = vld [vmem:[%s15381_s24 + $0x678] ss:$36 sps:$4 sm:$0xff]   ;;  %v14263_v1 = vld [vmem:[%s15381_s24 + $0x630] ss:$36 sps:$4 sm:$0xff]  }
 0xa0c   : > { %7648 = vmatprep.subr.bf16.mxu0 %v14232_v24  ;;  %v14259_v14 = vld [vmem:[%s15381_s24 + $0x67c] ss:$36 sps:$4 sm:$0xff]   ;;  %v14247_v45 = vld [vmem:[%s15381_s24 + $0x94] ss:$36 sps:$4 sm:$0xff]   ;;  %v14271_v44 = vld [vmem:[%s15381_s24 + $0x5ec] ss:$36 sps:$4 sm:$0xff]  }
 0xa0d   : > { %7649 = vmatpush1.bf16.msra.mxu0 %v14230_v28  ;;  %7689 = vmatprep.subr.bf16.mxu1 %v14259_v14  ;;  %v14242_v17 = vld [vmem:[%s15381_s24 + $0xd8] ss:$36 sps:$4 sm:$0xff]   ;;  %v14245_v13 = vld [vmem:[%s15381_s24 + $0x90] ss:$36 sps:$4 sm:$0xff]   ;;  %v14269_v22 = vld [vmem:[%s15381_s24 + $0x5e8] ss:$36 sps:$4 sm:$0xff]  }
 0xa0e   : > { %7650 = vmatprep.subr.bf16.mxu0 %v14235_v41  ;;  %7690 = vmatpush1.bf16.msra.mxu1 %v14257_v18  ;;  %v14277_v47 = vld [vmem:[%s15381_s24 + $0x5a4] ss:$36 sps:$4 sm:$0xff]   ;;  %v14250_v52 = vld [vmem:[%s15381_s24 + $0x4c] ss:$36 sps:$4 sm:$0xff]   ;;  %v14283_v50 = vld [vmem:[%s15381_s24 + $0x55c] ss:$36 sps:$4 sm:$0xff]  }
 0xa0f   : > { %7691 = vmatprep.subr.bf16.mxu1 %v14265_v46  ;;  %v14248_v7 = vld [vmem:[%s15381_s24 + $0x48] ss:$36 sps:$4 sm:$0xff]   ;;  %v14275_v49 = vld [vmem:[%s15381_s24 + $0x5a0] ss:$36 sps:$4 sm:$0xff]   ;;  %v14281_v54 = vld [vmem:[%s15381_s24 + $0x558] ss:$36 sps:$4 sm:$0xff]  }
 0xa10   : > { %v14253_v51 = vld [vmem:[%s15381_s24 + $0x4] ss:$36 sps:$4 sm:$0xff]   ;;  %v14289_v55 = vld [vmem:[%s15381_s24 + $0x514] ss:$36 sps:$4 sm:$0xff]   ;;  %v14256_v56 = vld [vmem:[%s15381_s24 + $0x43c] ss:$36 sps:$4 sm:$0xff]  }
 0xa11   : > { %7651 = vmatpush1.bf16.msra.mxu0 %v14233_v42  ;;  %v14251_v53 = vld [vmem:[%s15381_s24] ss:$36 sps:$4 sm:$0xff]   ;;  %v14254_v57 = vld [vmem:[%s15381_s24 + $0x438] ss:$36 sps:$4 sm:$0xff]   ;;  %v14287_v59 = vld [vmem:[%s15381_s24 + $0x510] ss:$36 sps:$4 sm:$0xff]  }
 0xa12   : > { %7652 = vmatprep.subr.bf16.mxu0 %v14238_v60  ;;  %7692 = vmatpush1.bf16.msra.mxu1 %v14263_v1  ;;  %v14295_v61 = vld [vmem:[%s15381_s24 + $0x4cc] ss:$36 sps:$4 sm:$0xff]   ;;  %v14262_v6 = vld [vmem:[%s15381_s24 + $0x3f4] ss:$36 sps:$4 sm:$0xff]   ;;  %v14301_v11 = vld [vmem:[%s15381_s24 + $0x484] ss:$36 sps:$4 sm:$0xff]  }
 0xa13   : > { %7693 = vmatprep.subr.bf16.mxu1 %v14271_v44  ;;  %v14293_v12 = vld [vmem:[%s15381_s24 + $0x4c8] ss:$36 sps:$4 sm:$0xff]   ;;  %v14260_v62 = vld [vmem:[%s15381_s24 + $0x3f0] ss:$36 sps:$4 sm:$0xff]   ;;  %v14299_v20 = vld [vmem:[%s15381_s24 + $0x480] ss:$36 sps:$4 sm:$0xff]  }
 0xa14   : > { %v14268_v15 = vld [vmem:[%s15381_s24 + $0x3ac] ss:$36 sps:$4 sm:$0xff]   ;;  %v14274_v21 = vld [vmem:[%s15381_s24 + $0x364] ss:$36 sps:$4 sm:$0xff]   ;;  %v14280_v16 = vld [vmem:[%s15381_s24 + $0x31c] ss:$36 sps:$4 sm:$0xff]  }
 0xa15   : > { %7653 = vmatpush1.bf16.msra.mxu0 %v14236_v25  ;;  %v14266_v48 = vld [vmem:[%s15381_s24 + $0x3a8] ss:$36 sps:$4 sm:$0xff]   ;;  %v14272_v2 = vld [vmem:[%s15381_s24 + $0x360] ss:$36 sps:$4 sm:$0xff]   ;;  %v14278_v4 = vld [vmem:[%s15381_s24 + $0x318] ss:$36 sps:$4 sm:$0xff]  }
 0xa16   : > { %7654 = vmatprep.subr.bf16.mxu0 %v14241_v43  ;;  %7694 = vmatpush1.bf16.msra.mxu1 %v14269_v22  ;;  %v14286_v23 = vld [vmem:[%s15381_s24 + $0x2d4] ss:$36 sps:$4 sm:$0xff]   ;;  %v14292_v26 = vld [vmem:[%s15381_s24 + $0x28c] ss:$36 sps:$4 sm:$0xff]   ;;  %v14298_v29 = vld [vmem:[%s15381_s24 + $0x244] ss:$36 sps:$4 sm:$0xff]  }
 0xa17   : > { %7695 = vmatprep.subr.bf16.mxu1 %v14277_v47  ;;  %v14284_v27 = vld [vmem:[%s15381_s24 + $0x2d0] ss:$36 sps:$4 sm:$0xff]   ;;  %v14290_v0 = vld [vmem:[%s15381_s24 + $0x288] ss:$36 sps:$4 sm:$0xff]   ;;  %v14296_v58 = vld [vmem:[%s15381_s24 + $0x240] ss:$36 sps:$4 sm:$0xff]  }
 0xa18   : > { %v6380_v30 = vld [vmem:[#allocation3] sm:$0xff]  ;;  %v14304_v31 = vld [vmem:[%s15381_s24 + $0x204] ss:$36 sps:$4 sm:$0xff]   ;;  %v15209_v33 = vmov 0   ;;  %v14314_v18 = vld [vmem:[%s15381_s24 + $0x170] ss:$36 sps:$4 sm:$0xff]  }
 0xa19   : > { %7655 = vmatpush1.bf16.msra.mxu0 %v14239_v63  ;;  %v7146_v10 = vpack.c.bf16 %v6380_v30, %v6380_v30  ;;  %v14307_v32 = vld [vmem:[%s15381_s24 + $0x684] ss:$36 sps:$4 sm:$0xff]   ;;  %7721 = vmatprep.mubr.bf16.mxu1 %v15209_v33  ;;  %v14310_v36 = vld [vmem:[%s15381_s24 + $0x1bc] ss:$36 sps:$4 sm:$0xff]   ;;  %v14316_v43 = vld [vmem:[%s15381_s24 + $0x174] ss:$36 sps:$4 sm:$0xff]  }
 0xa1a   : > { %7656 = vmatprep.subr.bf16.mxu0 %v14244_v39  ;;  %7696 = vmatpush1.bf16.msra.mxu1 %v14275_v49  ;;  %v14302_v34 = vld [vmem:[%s15381_s24 + $0x200] ss:$36 sps:$4 sm:$0xff]   ;;  %v14308_v42 = vld [vmem:[%s15381_s24 + $0x1b8] ss:$36 sps:$4 sm:$0xff]   ;;  %v14317_v14 = vld [vmem:[%s15381_s24 + $0x5f0] ss:$36 sps:$4 sm:$0xff]  }
 0xa1b   : > { %7697 = vmatprep.subr.bf16.mxu1 %v14283_v50  ;;  %7680 = vmatprep.mubr.bf16.mxu0 %v7146_v10  ;;  %v14305_v35 = vld [vmem:[%s15381_s24 + $0x680] ss:$36 sps:$4 sm:$0xff]   ;;  %v14311_v60 = vld [vmem:[%s15381_s24 + $0x638] ss:$36 sps:$4 sm:$0xff]   ;;  %v14322_v39 = vld [vmem:[%s15381_s24 + $0x12c] ss:$36 sps:$4 sm:$0xff]  }
 0xa1c   : > { %v14313_v37 = vld [vmem:[%s15381_s24 + $0x63c] ss:$36 sps:$4 sm:$0xff]   ;;  %v14319_v63 = vld [vmem:[%s15381_s24 + $0x5f4] ss:$36 sps:$4 sm:$0xff]   ;;  %v14325_v46 = vld [vmem:[%s15381_s24 + $0x5ac] ss:$36 sps:$4 sm:$0xff]  }
 0xa1d   : > { %7657 = vmatpush1.bf16.msra.mxu0 %v14242_v17  ;;  %v14320_v1 = vld [vmem:[%s15381_s24 + $0x128] ss:$36 sps:$4 sm:$0xff]   ;;  %v14329_v22 = vld [vmem:[%s15381_s24 + $0x560] ss:$36 sps:$4 sm:$0xff]   ;;  %v14335_v49 = vld [vmem:[%s15381_s24 + $0x518] ss:$36 sps:$4 sm:$0xff]  }
 0xa1e   : > { %7658 = vmatprep.subr.bf16.mxu0 %v14247_v45  ;;  %7698 = vmatpush1.bf16.msra.mxu1 %v14281_v54  ;;  %v14323_v17 = vld [vmem:[%s15381_s24 + $0x5a8] ss:$36 sps:$4 sm:$0xff]   ;;  %v14334_v47 = vld [vmem:[%s15381_s24 + $0x9c] ss:$36 sps:$4 sm:$0xff]   ;;  %v14340_v50 = vld [vmem:[%s15381_s24 + $0x54] ss:$36 sps:$4 sm:$0xff]  }
 0xa1f   : > { %7699 = vmatprep.subr.bf16.mxu1 %v14289_v55  ;;  %v14328_v45 = vld [vmem:[%s15381_s24 + $0xe4] ss:$36 sps:$4 sm:$0xff]   ;;  %v14341_v54 = vld [vmem:[%s15381_s24 + $0x4d0] ss:$36 sps:$4 sm:$0xff]   ;;  %vm9750_vm10 = vcmask 64512  }
 0xa20   : > { %v14331_v44 = vld [vmem:[%s15381_s24 + $0x564] ss:$36 sps:$4 sm:$0xff]   ;;  %v14346_v55 = vld [vmem:[%s15381_s24 + $0xc] ss:$36 sps:$4 sm:$0xff]  }
 0xa21   : > { %7659 = vmatpush1.bf16.msra.mxu0 %v14245_v13  ;;  %v14326_v13 = vld [vmem:[%s15381_s24 + $0xe0] ss:$36 sps:$4 sm:$0xff]  }
 0xa22   : > { %7660 = vmatprep.subr.bf16.mxu0 %v14250_v52  ;;  %7700 = vmatpush1.bf16.msra.mxu1 %v14287_v59  ;;  %v14337_v52 = vld [vmem:[%s15381_s24 + $0x51c] ss:$36 sps:$4 sm:$0xff]   ;;  %v14347_v59 = vld [vmem:[%s15381_s24 + $0x488] ss:$36 sps:$4 sm:$0xff]  }
 0xa23   : > { %7701 = vmatprep.subr.bf16.mxu1 %v14295_v61  ;;  %v14352_v61 = vld [vmem:[%s15381_s24 + $0x444] ss:$36 sps:$4 sm:$0xff]  }
 0xa24   : > { %v14362_v30 = vld [vmem:[%s15381_s24 + $0x320] ss:$36 sps:$4 sm:$0xff]  }
 0xa25   : > { %7661 = vmatpush1.bf16.msra.mxu0 %v14248_v7  ;;  %v14332_v7 = vld [vmem:[%s15381_s24 + $0x98] ss:$36 sps:$4 sm:$0xff]  }
 0xa26   : > { %7662 = vmatprep.subr.bf16.mxu0 %v14253_v51  ;;  %7702 = vmatpush1.bf16.msra.mxu1 %v14293_v12  ;;  %v14343_v51 = vld [vmem:[%s15381_s24 + $0x4d4] ss:$36 sps:$4 sm:$0xff]   ;;  %v14350_v12 = vld [vmem:[%s15381_s24 + $0x440] ss:$36 sps:$4 sm:$0xff]  }
 0xa27   : > { %7703 = vmatprep.subr.bf16.mxu1 %v14301_v11  ;;  %v14355_v11 = vld [vmem:[%s15381_s24 + $0x3fc] ss:$36 sps:$4 sm:$0xff]  }
 0xa29   : > { %7663 = vmatpush1.bf16.msra.mxu0 %v14251_v53  ;;  %v14338_v53 = vld [vmem:[%s15381_s24 + $0x50] ss:$36 sps:$4 sm:$0xff]  }
 0xa2a   : > { %7664 = vmatprep.subr.bf16.mxu0 %v14256_v56  ;;  %7704 = vmatpush1.bf16.msra.mxu1 %v14299_v20  ;;  %v14349_v56 = vld [vmem:[%s15381_s24 + $0x48c] ss:$36 sps:$4 sm:$0xff]   ;;  %v14353_v20 = vld [vmem:[%s15381_s24 + $0x3f8] ss:$36 sps:$4 sm:$0xff]  }
 0xa2b   : > { %7730 = vmatprep.subr.bf16.mxu1 %v14304_v31  ;;  %v14367_v31 = vld [vmem:[%s15381_s24 + $0x2dc] ss:$36 sps:$4 sm:$0xff]  }
 0xa2d   : > { %7665 = vmatpush2.bf16.msra.mxu0 %v14254_v57  ;;  %v14344_v57 = vld [vmem:[%s15381_s24 + $0x8] ss:$36 sps:$4 sm:$0xff]  }
 0xa2e   : > { %7666 = vmatprep.subr.bf16.mxu0 %v14262_v6  ;;  %v14376_v6 = vld [vmem:[%s15381_s24 + $0xafc] ss:$36 sps:$4 sm:$0xff]  }
 0xa31   : > { %7667 = vmatpush2.bf16.msra.mxu0 %v14260_v62  ;;  %v14374_v62 = vld [vmem:[%s15381_s24 + $0xaf8] ss:$36 sps:$4 sm:$0xff]  }
 0xa32   : > { %7668 = vmatprep.subr.bf16.mxu0 %v14268_v15  ;;  %v14379_v15 = vld [vmem:[%s15381_s24 + $0xab4] ss:$36 sps:$4 sm:$0xff]  }
 0xa35   : > { %7669 = vmatpush2.bf16.msra.mxu0 %v14266_v48  ;;  %v14377_v48 = vld [vmem:[%s15381_s24 + $0xab0] ss:$36 sps:$4 sm:$0xff]  }
 0xa36   : > { %7670 = vmatprep.subr.bf16.mxu0 %v14274_v21  ;;  %v14358_v21 = vld [vmem:[%s15381_s24 + $0x3b4] ss:$36 sps:$4 sm:$0xff]  }
 0xa39   : > { %7671 = vmatpush2.bf16.msra.mxu0 %v14272_v2  ;;  %v14382_v2 = vld [vmem:[%s15381_s24 + $0xa6c] ss:$36 sps:$4 sm:$0xff]  }
 0xa3a   : > { %7672 = vmatprep.subr.bf16.mxu0 %v14280_v16  ;;  %v14356_v16 = vld [vmem:[%s15381_s24 + $0x3b0] ss:$36 sps:$4 sm:$0xff]  }
 0xa3d   : > { %7673 = vmatpush2.bf16.msra.mxu0 %v14278_v4  ;;  %v14380_v4 = vld [vmem:[%s15381_s24 + $0xa68] ss:$36 sps:$4 sm:$0xff]  }
 0xa3e   : > { %7674 = vmatprep.subr.bf16.mxu0 %v14286_v23  ;;  %v14361_v23 = vld [vmem:[%s15381_s24 + $0x36c] ss:$36 sps:$4 sm:$0xff]  }
 0xa41   : > { %7675 = vmatpush2.bf16.msra.mxu0 %v14284_v27  ;;  %v14385_v27 = vld [vmem:[%s15381_s24 + $0xa24] ss:$36 sps:$4 sm:$0xff]  }
 0xa42   : > { %7676 = vmatprep.subr.bf16.mxu0 %v14292_v26  ;;  %v14359_v26 = vld [vmem:[%s15381_s24 + $0x368] ss:$36 sps:$4 sm:$0xff]  }
 0xa45   : > { %7677 = vmatpush2.bf16.msra.mxu0 %v14290_v0  ;;  %v14383_v0 = vld [vmem:[%s15381_s24 + $0xa20] ss:$36 sps:$4 sm:$0xff]  }
 0xa46   : > { %7678 = vmatprep.subr.bf16.mxu0 %v14298_v29  ;;  %v14364_v29 = vld [vmem:[%s15381_s24 + $0x324] ss:$36 sps:$4 sm:$0xff]  }
 0xa49   : > { %7679 = vmatpush2.bf16.msra.mxu0 %v14296_v58  ;;  %v14388_v58 = vld [vmem:[%s15381_s24 + $0x9dc] ss:$36 sps:$4 sm:$0xff]  }
 0xa4a   : > { %7771 = vmatprep.subr.bf16.mxu0 %v14307_v32  ;;  %v14391_v32 = vld [vmem:[%s15381_s24 + $0x994] ss:$36 sps:$4 sm:$0xff]  }
 0xacb   : > { %v7068_v38 = vpop.f32.mrf.mxu0  ;;  %v7141_v40 = vpop.f32.mrf.mxu1 }
 0xacc   : > { %v16423_v28 = vpack.c.bf16 %v7068_v38, %v7068_v38  ;;  %v16425_v24 = vpack.c.bf16 %v7141_v40, %v7141_v40  ;;  %v14392_v38 = vld [vmem:[%s15381_s24 + $0x948] ss:$36 sps:$4 sm:$0xff]  }
 0xacd   : > { %v13176_v41 = vpop.f32.mrf.mxu1  ;;  %v13171_v25 = vpop.f32.mrf.mxu0  ;;  %v14373_v40 = vld [vmem:[%s15381_s24 + $0x24c] ss:$36 sps:$4 sm:$0xff]  }
 0xace   : > { %7681 = vmatmul.mubr.bf16.vlgmr.msra.gmra.mxu0 %v16423_v28  ;;  %7722 = vmatmul.mubr.bf16.vlgmr.msra.gmra.mxu1 %v16425_v24  ;;  %v14371_v41 = vld [vmem:[%s15381_s24 + $0x248] ss:$36 sps:$4 sm:$0xff]   ;;  %v14398_v25 = vld [vmem:[%s15381_s24 + $0xd38] ss:$36 sps:$4 sm:$0xff]  }
 0xacf   : > { %7731 = vmatpush1.bf16.msra.mxu1 %v14302_v34  ;;  %7772 = vmatpush1.bf16.msra.mxu0 %v14305_v35  ;;  %v14389_v34 = vld [vmem:[%s15381_s24 + $0x990] ss:$36 sps:$4 sm:$0xff]  }
 0xad0   : > { %7732 = vmatprep.subr.bf16.mxu1 %v14310_v36  ;;  %7773 = vmatprep.subr.bf16.mxu0 %v14313_v37  ;;  %v14370_v35 = vld [vmem:[%s15381_s24 + $0x294] ss:$36 sps:$4 sm:$0xff]   ;;  %v14394_v36 = vld [vmem:[%s15381_s24 + $0x94c] ss:$36 sps:$4 sm:$0xff]  }
 0xad1   : > { %7803 = vmatprep.mubr.bf16.mxu0 %v15209_v33  ;;  %7762 = vmatprep.mubr.bf16.mxu1 %v7146_v10  ;;  %v14386_v10 = vld [vmem:[%s15381_s24 + $0x9d8] ss:$36 sps:$4 sm:$0xff]   ;;  %v14368_v37 = vld [vmem:[%s15381_s24 + $0x290] ss:$36 sps:$4 sm:$0xff]  }
 0xad2   : > { %v14365_v33 = vld [vmem:[%s15381_s24 + $0x2d8] ss:$36 sps:$4 sm:$0xff]  }
 0xad3   : > { %7733 = vmatpush1.bf16.msra.mxu1 %v14308_v42  ;;  %7774 = vmatpush1.bf16.msra.mxu0 %v14311_v60  ;;  %v14395_v42 = vld [vmem:[%s15381_s24 + $0x900] ss:$36 sps:$4 sm:$0xff]  }
 0xad4   : > { %7734 = vmatprep.subr.bf16.mxu1 %v14316_v43  ;;  %7775 = vmatprep.subr.bf16.mxu0 %v14319_v63  ;;  %v14400_v60 = vld [vmem:[%s15381_s24 + $0xd3c] ss:$36 sps:$4 sm:$0xff]   ;;  %v14403_v43 = vld [vmem:[%s15381_s24 + $0xcf4] ss:$36 sps:$4 sm:$0xff]  }
 0xad5   : > { %v14401_v63 = vld [vmem:[%s15381_s24 + $0xcf0] ss:$36 sps:$4 sm:$0xff]  }
 0xad7   : > { %7735 = vmatpush1.bf16.msra.mxu1 %v14314_v18  ;;  %7776 = vmatpush1.bf16.msra.mxu0 %v14317_v14  ;;  %v14406_v18 = vld [vmem:[%s15381_s24 + $0xcac] ss:$36 sps:$4 sm:$0xff]  }
 0xad8   : > { %7736 = vmatprep.subr.bf16.mxu1 %v14322_v39  ;;  %7777 = vmatprep.subr.bf16.mxu0 %v14325_v46  ;;  %v14404_v14 = vld [vmem:[%s15381_s24 + $0xca8] ss:$36 sps:$4 sm:$0xff]   ;;  %v14407_v46 = vld [vmem:[%s15381_s24 + $0xc60] ss:$36 sps:$4 sm:$0xff]  }
 0xad9   : > { %v14409_v39 = vld [vmem:[%s15381_s24 + $0xc64] ss:$36 sps:$4 sm:$0xff]  }
 0xadb   : > { %7737 = vmatpush1.bf16.msra.mxu1 %v14320_v1  ;;  %7778 = vmatpush1.bf16.msra.mxu0 %v14323_v17  ;;  %v14422_v1 = vld [vmem:[%s15381_s24 + $0xf78] ss:$36 sps:$4 sm:$0xff]  }
 0xadc   : > { %7738 = vmatprep.subr.bf16.mxu1 %v14328_v45  ;;  %7779 = vmatprep.subr.bf16.mxu0 %v14331_v44  ;;  %v14424_v17 = vld [vmem:[%s15381_s24 + $0xf7c] ss:$36 sps:$4 sm:$0xff]   ;;  %v14428_v44 = vld [vmem:[%s15381_s24 + $0xf30] ss:$36 sps:$4 sm:$0xff]  }
 0xadd   : > { %v14410_v45 = vld [vmem:[%s15381_s24 + $0xc18] ss:$36 sps:$4 sm:$0xff]  }
 0xadf   : > { %7739 = vmatpush1.bf16.msra.mxu1 %v14326_v13  ;;  %7780 = vmatpush1.bf16.msra.mxu0 %v14329_v22  ;;  %v14430_v13 = vld [vmem:[%s15381_s24 + $0xf34] ss:$36 sps:$4 sm:$0xff]  }
 0xae0   : > { %7740 = vmatprep.subr.bf16.mxu1 %v14334_v47  ;;  %7781 = vmatprep.subr.bf16.mxu0 %v14337_v52  ;;  %v14415_v22 = vld [vmem:[%s15381_s24 + $0xbd4] ss:$36 sps:$4 sm:$0xff]   ;;  %v14434_v52 = vld [vmem:[%s15381_s24 + $0xee8] ss:$36 sps:$4 sm:$0xff]  }
 0xae1   : > { %v14413_v47 = vld [vmem:[%s15381_s24 + $0xbd0] ss:$36 sps:$4 sm:$0xff]  }
 0xae3   : > { %7741 = vmatpush1.bf16.msra.mxu1 %v14332_v7  ;;  %7782 = vmatpush1.bf16.msra.mxu0 %v14335_v49  ;;  %v14436_v7 = vld [vmem:[%s15381_s24 + $0xeec] ss:$36 sps:$4 sm:$0xff]  }
 0xae4   : > { %7742 = vmatprep.subr.bf16.mxu1 %v14340_v50  ;;  %7783 = vmatprep.subr.bf16.mxu0 %v14343_v51  ;;  %v14418_v49 = vld [vmem:[%s15381_s24 + $0xb8c] ss:$36 sps:$4 sm:$0xff]   ;;  %v14440_v51 = vld [vmem:[%s15381_s24 + $0xea0] ss:$36 sps:$4 sm:$0xff]  }
 0xae5   : > { %v14416_v50 = vld [vmem:[%s15381_s24 + $0xb88] ss:$36 sps:$4 sm:$0xff]  }
 0xae7   : > { %7743 = vmatpush1.bf16.msra.mxu1 %v14338_v53  ;;  %7784 = vmatpush1.bf16.msra.mxu0 %v14341_v54  ;;  %v14442_v53 = vld [vmem:[%s15381_s24 + $0xea4] ss:$36 sps:$4 sm:$0xff]  }
 0xae8   : > { %7744 = vmatprep.subr.bf16.mxu1 %v14346_v55  ;;  %7785 = vmatprep.subr.bf16.mxu0 %v14349_v56  ;;  %v14421_v54 = vld [vmem:[%s15381_s24 + $0xb44] ss:$36 sps:$4 sm:$0xff]   ;;  %v14446_v56 = vld [vmem:[%s15381_s24 + $0xe58] ss:$36 sps:$4 sm:$0xff]  }
 0xae9   : > { %v14419_v55 = vld [vmem:[%s15381_s24 + $0xb40] ss:$36 sps:$4 sm:$0xff]  }
 0xaeb   : > { %7745 = vmatpush1.bf16.msra.mxu1 %v14344_v57  ;;  %7786 = vmatpush1.bf16.msra.mxu0 %v14347_v59  ;;  %v14448_v57 = vld [vmem:[%s15381_s24 + $0xe5c] ss:$36 sps:$4 sm:$0xff]   ;;  %v14427_v59 = vld [vmem:[%s15381_s24 + $0xb04] ss:$36 sps:$4 sm:$0xff]  }
 0xaec   : > { %7746 = vmatprep.subr.bf16.mxu1 %v14352_v61  ;;  %9333 = vmatprep.subr.bf16.mxu0 %v14376_v6  ;;  %v14452_v61 = vld [vmem:[%s15381_s24 + $0xe10] ss:$36 sps:$4 sm:$0xff]  }
 0xaed   : > { %v14454_v6 = vld [vmem:[%s15381_s24 + $0xe14] ss:$36 sps:$4 sm:$0xff]  }
 0xaee   : > { %7804 = vmatmul.mubr.bf16.vlgmr.msra.gmra.mxu0 %v16425_v24  ;;  %v14397_v24 = vld [vmem:[%s15381_s24 + $0x904] ss:$36 sps:$4 sm:$0xff]  }
 0xaef   : > { %7747 = vmatpush2.bf16.msra.mxu1 %v14350_v12  ;;  %9334 = vmatpush1.bf16.msra.mxu0 %v14374_v62  ;;  %v14460_v12 = vld [vmem:[%s15381_s24 + $0xdcc] ss:$36 sps:$4 sm:$0xff]  }
 0xaf0   : > { %7748 = vmatprep.subr.bf16.mxu1 %v14355_v11  ;;  %9335 = vmatprep.subr.bf16.mxu0 %v14379_v15  ;;  %v14458_v62 = vld [vmem:[%s15381_s24 + $0xdc8] ss:$36 sps:$4 sm:$0xff]   ;;  %v14464_v15 = vld [vmem:[%s15381_s24 + $0xd80] ss:$36 sps:$4 sm:$0xff]  }
 0xaf1   : > { %v14466_v11 = vld [vmem:[%s15381_s24 + $0xd84] ss:$36 sps:$4 sm:$0xff]  }
 0xaf3   : > { %7749 = vmatpush2.bf16.msra.mxu1 %v14353_v20  ;;  %9336 = vmatpush1.bf16.msra.mxu0 %v14377_v48  ;;  %v14470_v20 = vld [vmem:[%s15381_s24 + $0x11b8] ss:$36 sps:$4 sm:$0xff]  }
 0xaf4   : > { %7750 = vmatprep.subr.bf16.mxu1 %v14358_v21  ;;  %9337 = vmatprep.subr.bf16.mxu0 %v14382_v2  ;;  %v14472_v48 = vld [vmem:[%s15381_s24 + $0x11bc] ss:$36 sps:$4 sm:$0xff]   ;;  %v14476_v21 = vld [vmem:[%s15381_s24 + $0x1170] ss:$36 sps:$4 sm:$0xff]  }
 0xaf5   : > { %v14478_v2 = vld [vmem:[%s15381_s24 + $0x1174] ss:$36 sps:$4 sm:$0xff]  }
 0xaf7   : > { %7751 = vmatpush2.bf16.msra.mxu1 %v14356_v16  ;;  %9338 = vmatpush1.bf16.msra.mxu0 %v14380_v4  ;;  %v14482_v16 = vld [vmem:[%s15381_s24 + $0x1128] ss:$36 sps:$4 sm:$0xff]  }
 0xaf8   : > { %7752 = vmatprep.subr.bf16.mxu1 %v14361_v23  ;;  %9339 = vmatprep.subr.bf16.mxu0 %v14385_v27  ;;  %v14484_v4 = vld [vmem:[%s15381_s24 + $0x112c] ss:$36 sps:$4 sm:$0xff]   ;;  %v14488_v23 = vld [vmem:[%s15381_s24 + $0x10e0] ss:$36 sps:$4 sm:$0xff]  }
 0xaf9   : > { %v14490_v27 = vld [vmem:[%s15381_s24 + $0x10e4] ss:$36 sps:$4 sm:$0xff]  }
 0xafb   : > { %7753 = vmatpush2.bf16.msra.mxu1 %v14359_v26  ;;  %9340 = vmatpush1.bf16.msra.mxu0 %v14383_v0  ;;  %v14494_v26 = vld [vmem:[%s15381_s24 + $0x1098] ss:$36 sps:$4 sm:$0xff]  }
 0xafc   : > { %7754 = vmatprep.subr.bf16.mxu1 %v14364_v29  ;;  %9341 = vmatprep.subr.bf16.mxu0 %v14388_v58  ;;  %v14496_v0 = vld [vmem:[%s15381_s24 + $0x109c] ss:$36 sps:$4 sm:$0xff]   ;;  %v14500_v29 = vld [vmem:[%s15381_s24 + $0x1050] ss:$36 sps:$4 sm:$0xff]  }
 0xafd   : > { %v14502_v58 = vld [vmem:[%s15381_s24 + $0x1054] ss:$36 sps:$4 sm:$0xff]  }
 0xaff   : > { %7755 = vmatpush2.bf16.msra.mxu1 %v14362_v30  ;;  %9342 = vmatpush1.bf16.msra.mxu0 %v14386_v10  ;;  %v14508_v30 = vld [vmem:[%s15381_s24 + $0x100c] ss:$36 sps:$4 sm:$0xff]  }
 0xb00   : > { %7756 = vmatprep.subr.bf16.mxu1 %v14367_v31  ;;  %9343 = vmatprep.subr.bf16.mxu0 %v14391_v32  ;;  %v14506_v10 = vld [vmem:[%s15381_s24 + $0x1008] ss:$36 sps:$4 sm:$0xff]   ;;  %v14512_v32 = vld [vmem:[%s15381_s24 + $0xfc0] ss:$36 sps:$4 sm:$0xff]  }
 0xb01   : > { %v14514_v31 = vld [vmem:[%s15381_s24 + $0xfc4] ss:$36 sps:$4 sm:$0xff]  }
 0xb03   : > { %7757 = vmatpush2.bf16.msra.mxu1 %v14365_v33  ;;  %9344 = vmatpush1.bf16.msra.mxu0 %v14389_v34  ;;  %v14520_v33 = vld [vmem:[%s15381_s24 + $0xf84] ss:$36 sps:$4 sm:$0xff]  }
 0xb04   : > { %7758 = vmatprep.subr.bf16.mxu1 %v14370_v35  ;;  %9345 = vmatprep.subr.bf16.mxu0 %v14394_v36  ;;  %v16540_v34 = vld [vmem:[%s15381_s24 + $0x1200] sm:$0x11]  ;;  %v16544_v36 = vsub.s32 0, %v15387_v3 }
 0xb05   : > { %v7148_v35 = vunpack.c.l.bf16 %v16540_v34 }
 0xb07   : > { %7759 = vmatpush2.bf16.msra.mxu1 %v14368_v37  ;;  %9346 = vmatpush1.bf16.msra.mxu0 %v14392_v38  ;;  %v7149_v37 = vunpack.c.h.bf16 %v16540_v34  ;;  %v7155_v38 = vrot.slane %v7148_v35, %v16544_v36  ;;  %v14777_v34 = vld [vmem:[%s15381_s24 + $0xf50] ss:$36 sps:$4 sm:$0xff]  }
 0xb08   : > { %7760 = vmatprep.subr.bf16.mxu1 %v14373_v40  ;;  %9347 = vmatprep.subr.bf16.mxu0 %v14397_v24 }
 0xb09   : > { %v7159_v40 = vrot.slane %v7149_v37, %v16544_v36 }
 0xb0b   : > { %7761 = vmatpush2.bf16.msra.mxu1 %v14371_v41  ;;  %9348 = vmatpush1.bf16.msra.mxu0 %v14395_v42 }
 0xb0c   : > { %9349 = vmatprep.subr.bf16.mxu0 %v14400_v60  ;;  %9374 = vmatprep.subr.bf16.mxu1 %v14424_v17 }
 0xb0e   : > { %7763 = vmatmul.mubr.bf16.vlgmr.msra.gmra.mxu1 %v16423_v28  ;;  %v14412_v28 = vld [vmem:[%s15381_s24 + $0xc1c] ss:$36 sps:$4 sm:$0xff]  }
 0xb0f   : > { %9350 = vmatpush2.bf16.msra.mxu0 %v14398_v25  ;;  %9375 = vmatpush1.bf16.msra.mxu1 %v14422_v1 }
 0xb10   : > { %9351 = vmatprep.subr.bf16.mxu0 %v14403_v43  ;;  %9376 = vmatprep.subr.bf16.mxu1 %v14430_v13 }
 0xb13   : > { %9352 = vmatpush2.bf16.msra.mxu0 %v14401_v63  ;;  %9377 = vmatpush1.bf16.msra.mxu1 %v14428_v44  ;;  %v14425_v44 = vld [vmem:[%s15381_s24 + $0xb00] ss:$36 sps:$4 sm:$0xff]  }
 0xb14   : > { %9353 = vmatprep.subr.bf16.mxu0 %v14406_v18  ;;  %9378 = vmatprep.subr.bf16.mxu1 %v14436_v7  ;;  %v14437_v7 = vld [vmem:[%s15381_s24 + $0xa70] ss:$36 sps:$4 sm:$0xff]  }
 0xb17   : > { %9354 = vmatpush2.bf16.msra.mxu0 %v14404_v14  ;;  %9379 = vmatpush1.bf16.msra.mxu1 %v14434_v52  ;;  %v14439_v52 = vld [vmem:[%s15381_s24 + $0xa74] ss:$36 sps:$4 sm:$0xff]  }
 0xb18   : > { %9355 = vmatprep.subr.bf16.mxu0 %v14409_v39  ;;  %9380 = vmatprep.subr.bf16.mxu1 %v14442_v53  ;;  %v14449_v53 = vld [vmem:[%s15381_s24 + $0x9e0] ss:$36 sps:$4 sm:$0xff]  }
 0xb1b   : > { %9356 = vmatpush2.bf16.msra.mxu0 %v14407_v46  ;;  %9381 = vmatpush1.bf16.msra.mxu1 %v14440_v51  ;;  %v14451_v51 = vld [vmem:[%s15381_s24 + $0x9e4] ss:$36 sps:$4 sm:$0xff]  }
 0xb1c   : > { %9357 = vmatprep.subr.bf16.mxu0 %v14412_v28  ;;  %9382 = vmatprep.subr.bf16.mxu1 %v14448_v57 }
 0xb1f   : > { %9358 = vmatpush2.bf16.msra.mxu0 %v14410_v45  ;;  %9383 = vmatpush1.bf16.msra.mxu1 %v14446_v56  ;;  %v14463_v56 = vld [vmem:[%s15381_s24 + $0x954] ss:$36 sps:$4 sm:$0xff]  }
 0xb20   : > { %9359 = vmatprep.subr.bf16.mxu0 %v14415_v22  ;;  %9384 = vmatprep.subr.bf16.mxu1 %v14454_v6  ;;  %v14433_v22 = vld [vmem:[%s15381_s24 + $0xabc] ss:$36 sps:$4 sm:$0xff]   ;;  %v14469_v6 = vld [vmem:[%s15381_s24 + $0x90c] ss:$36 sps:$4 sm:$0xff]  }
 0xb23   : > { %9360 = vmatpush2.bf16.msra.mxu0 %v14413_v47  ;;  %9385 = vmatpush1.bf16.msra.mxu1 %v14452_v61  ;;  %v14431_v47 = vld [vmem:[%s15381_s24 + $0xab8] ss:$36 sps:$4 sm:$0xff]  }
 0xb24   : > { %9361 = vmatprep.subr.bf16.mxu0 %v14418_v49  ;;  %9386 = vmatprep.subr.bf16.mxu1 %v14460_v12  ;;  %v14445_v49 = vld [vmem:[%s15381_s24 + $0xa2c] ss:$36 sps:$4 sm:$0xff]  }
 0xb27   : > { %9362 = vmatpush2.bf16.msra.mxu0 %v14416_v50  ;;  %9387 = vmatpush1.bf16.msra.mxu1 %v14458_v62  ;;  %v14443_v50 = vld [vmem:[%s15381_s24 + $0xa28] ss:$36 sps:$4 sm:$0xff]  }
 0xb28   : > { %9363 = vmatprep.subr.bf16.mxu0 %v14421_v54  ;;  %9388 = vmatprep.subr.bf16.mxu1 %v14466_v11  ;;  %v14457_v54 = vld [vmem:[%s15381_s24 + $0x99c] ss:$36 sps:$4 sm:$0xff]   ;;  %v14467_v62 = vld [vmem:[%s15381_s24 + $0x908] ss:$36 sps:$4 sm:$0xff]  }
 0xb2b   : > { %9364 = vmatpush2.bf16.msra.mxu0 %v14419_v55  ;;  %9389 = vmatpush1.bf16.msra.mxu1 %v14464_v15  ;;  %v14455_v55 = vld [vmem:[%s15381_s24 + $0x998] ss:$36 sps:$4 sm:$0xff]   ;;  %v14475_v15 = vld [vmem:[%s15381_s24 + $0xd44] ss:$36 sps:$4 sm:$0xff]  }
 0xb2c   : > { %9415 = vmatprep.subr.bf16.mxu0 %v14427_v59  ;;  %9390 = vmatprep.subr.bf16.mxu1 %v14472_v48  ;;  %v14461_v59 = vld [vmem:[%s15381_s24 + $0x950] ss:$36 sps:$4 sm:$0xff]   ;;  %v14481_v48 = vld [vmem:[%s15381_s24 + $0xcfc] ss:$36 sps:$4 sm:$0xff]  }
 0xb2f   : > { %9391 = vmatpush2.bf16.msra.mxu1 %v14470_v20  ;;  %v14473_v20 = vld [vmem:[%s15381_s24 + $0xd40] ss:$36 sps:$4 sm:$0xff]  }
 0xb30   : > { %9392 = vmatprep.subr.bf16.mxu1 %v14478_v2  ;;  %v14487_v2 = vld [vmem:[%s15381_s24 + $0xcb4] ss:$36 sps:$4 sm:$0xff]  }
 0xb33   : > { %9393 = vmatpush2.bf16.msra.mxu1 %v14476_v21  ;;  %v14479_v21 = vld [vmem:[%s15381_s24 + $0xcf8] ss:$36 sps:$4 sm:$0xff]  }
 0xb34   : > { %9394 = vmatprep.subr.bf16.mxu1 %v14484_v4  ;;  %v14493_v4 = vld [vmem:[%s15381_s24 + $0xc6c] ss:$36 sps:$4 sm:$0xff]  }
 0xb37   : > { %9395 = vmatpush2.bf16.msra.mxu1 %v14482_v16  ;;  %v14485_v16 = vld [vmem:[%s15381_s24 + $0xcb0] ss:$36 sps:$4 sm:$0xff]  }
 0xb38   : > { %9396 = vmatprep.subr.bf16.mxu1 %v14490_v27  ;;  %v14499_v27 = vld [vmem:[%s15381_s24 + $0xc24] ss:$36 sps:$4 sm:$0xff]  }
 0xb3b   : > { %9397 = vmatpush2.bf16.msra.mxu1 %v14488_v23  ;;  %v14491_v23 = vld [vmem:[%s15381_s24 + $0xc68] ss:$36 sps:$4 sm:$0xff]  }
 0xb3c   : > { %9398 = vmatprep.subr.bf16.mxu1 %v14496_v0  ;;  %v14497_v0 = vld [vmem:[%s15381_s24 + $0xc20] ss:$36 sps:$4 sm:$0xff]  }
 0xb3f   : > { %9399 = vmatpush2.bf16.msra.mxu1 %v14494_v26  ;;  %v16585_v26 = vld [vmem:[%s15381_s24 + $0x1208] sm:$0x11] }
 0xb40   : > { %9400 = vmatprep.subr.bf16.mxu1 %v14502_v58  ;;  %v14505_v58 = vld [vmem:[%s15381_s24 + $0xbdc] ss:$36 sps:$4 sm:$0xff]  }
 0xb43   : > { %9401 = vmatpush2.bf16.msra.mxu1 %v14500_v29  ;;  %v7150_v29 = vunpack.c.l.bf16 %v16585_v26 }
 0xb44   : > { %9402 = vmatprep.subr.bf16.mxu1 %v14508_v30  ;;  %v7151_v30 = vunpack.c.h.bf16 %v16585_v26 }
 0xb47   : > { %9403 = vmatpush2.bf16.msra.mxu1 %v14506_v10  ;;  %v7163_v10 = vrot.slane %v7150_v29, %v16544_v36 }
 0xb48   : > { %9404 = vmatprep.subr.bf16.mxu1 %v14514_v31  ;;  %v14503_v31 = vld [vmem:[%s15381_s24 + $0xbd8] ss:$36 sps:$4 sm:$0xff]  }
 0xb4b   : > { %9405 = vmatpush2.bf16.msra.mxu1 %v14512_v32  ;;  %v14511_v32 = vld [vmem:[%s15381_s24 + $0xb94] ss:$36 sps:$4 sm:$0xff]  }
 0xb4c   : > { %9456 = vmatprep.subr.bf16.mxu1 %v14520_v33  ;;  %v7167_v33 = vrot.slane %v7151_v30, %v16544_v36 }
 0xb8e   : > { %v7682_v24 = vpop.f32.mrf.mxu0  ;;  %v7723_v41 = vpop.f32.mrf.mxu1 }
 0xb8f   : > { %v7683_v42 = vadd.f32 %v7682_v24, %v7155_v38  ;;  %v14509_v24 = vld [vmem:[%s15381_s24 + $0xb90] ss:$36 sps:$4 sm:$0xff]  }
 0xb90   : > { %v7684_v60 = vpop.f32.mrf.mxu0  ;;  %v7725_v25 = vpop.f32.mrf.mxu1 }
 0xb91   : > { %v7724_v43 = vadd.f32 %v7723_v41, %v7683_v42  ;;  %v7685_v63 = vadd.f32 %v7684_v60, %v7159_v40  ;;  %v14517_v42 = vld [vmem:[%s15381_s24 + $0xb4c] ss:$36 sps:$4 sm:$0xff]  }
 0xb92   : > { %v7727_v18 = vpop.f32.mrf.mxu1  ;;  %v7686_v14 = vpop.f32.mrf.mxu0 }
 0xb93   : > { %v7726_v39 = vadd.f32 %v7725_v25, %v7685_v63  ;;  %v7812_v46 = vmax.f32 %v7724_v43, 0.0  ;;  %v14515_v18 = vld [vmem:[%s15381_s24 + $0xb48] ss:$36 sps:$4 sm:$0xff]  }
 0xb94   : > { %v7728_v1 = vpop.f32.mrf.mxu1  ;;  %v7687_v17 = vpop.f32.mrf.mxu0 }
 0xb95   : > { %v7813_v28 = vmax.f32 %v7726_v39, 0.0  ;;  %v16556_v13 = vpack.c.bf16 %v7812_v46, %v7812_v46  ;;  %v14523_v46 = vld [vmem:[%s15381_s24 + $0xb0c] ss:$36 sps:$4 sm:$0xff]  }
 0xb97   : > { %v16553_v45 = vpack.c.bf16 %v7813_v28, %v7813_v28  ;;  %v14518_v28 = vld [vmem:[%s15381_s24 + $0xf80] ss:$36 sps:$4 sm:$0xff]  }
 0xb99   : > { %9365 = vmatprep.mubr.bf16.mxu0 %v16553_v45 }
 0xb9a   : > { %9366 = vmatmul.mubr.bf16.vlgmr.msra.gmra.mxu0 %v16556_v13 }
 0xb9b   : > { %9416 = vmatpush1.bf16.msra.mxu0 %v14425_v44  ;;  %9447 = vmatprep.mubr.bf16.mxu0 %v16553_v45 }
 0xb9c   : > { %9417 = vmatprep.subr.bf16.mxu0 %v14433_v22  ;;  %v14521_v22 = vld [vmem:[%s15381_s24 + $0xb08] ss:$36 sps:$4 sm:$0xff]  }
 0xb9f   : > { %9418 = vmatpush1.bf16.msra.mxu0 %v14431_v47  ;;  %v14526_v47 = vld [vmem:[%s15381_s24 + $0xf3c] ss:$36 sps:$4 sm:$0xff]  }
 0xba0   : > { %9419 = vmatprep.subr.bf16.mxu0 %v14439_v52  ;;  %v14529_v52 = vld [vmem:[%s15381_s24 + $0xac4] ss:$36 sps:$4 sm:$0xff]  }
 0xba3   : > { %9420 = vmatpush1.bf16.msra.mxu0 %v14437_v7  ;;  %v14524_v7 = vld [vmem:[%s15381_s24 + $0xf38] ss:$36 sps:$4 sm:$0xff]  }
 0xba4   : > { %9421 = vmatprep.subr.bf16.mxu0 %v14445_v49  ;;  %v14527_v49 = vld [vmem:[%s15381_s24 + $0xac0] ss:$36 sps:$4 sm:$0xff]  }
 0xba7   : > { %9422 = vmatpush1.bf16.msra.mxu0 %v14443_v50  ;;  %v14532_v50 = vld [vmem:[%s15381_s24 + $0xef4] ss:$36 sps:$4 sm:$0xff]  }
 0xba8   : > { %9423 = vmatprep.subr.bf16.mxu0 %v14451_v51  ;;  %v14535_v51 = vld [vmem:[%s15381_s24 + $0xa7c] ss:$36 sps:$4 sm:$0xff]  }
 0xbab   : > { %9424 = vmatpush1.bf16.msra.mxu0 %v14449_v53  ;;  %v14530_v53 = vld [vmem:[%s15381_s24 + $0xef0] ss:$36 sps:$4 sm:$0xff]  }
 0xbac   : > { %9425 = vmatprep.subr.bf16.mxu0 %v14457_v54  ;;  %v14533_v54 = vld [vmem:[%s15381_s24 + $0xa78] ss:$36 sps:$4 sm:$0xff]  }
 0xbae   : > { %v7805_v57 = vpop.f32.mrf.mxu0 }
 0xbaf   : > { %9426 = vmatpush1.bf16.msra.mxu0 %v14455_v55  ;;  %v14538_v55 = vld [vmem:[%s15381_s24 + $0xeac] ss:$36 sps:$4 sm:$0xff]  }
 0xbb0   : > { %v7807_v61 = vpop.f32.mrf.mxu0  ;;  %9427 = vmatprep.subr.bf16.mxu0 %v14463_v56  ;;  %v14541_v56 = vld [vmem:[%s15381_s24 + $0xa34] ss:$36 sps:$4 sm:$0xff]  }
 0xbb2   : > { %v7809_v12 = vpop.f32.mrf.mxu0 }
 0xbb3   : > { %9428 = vmatpush1.bf16.msra.mxu0 %v14461_v59  ;;  %v14539_v59 = vld [vmem:[%s15381_s24 + $0xa30] ss:$36 sps:$4 sm:$0xff]   ;;  %v14542_v12 = vld [vmem:[%s15381_s24 + $0xe60] ss:$36 sps:$4 sm:$0xff]  }
 0xbb4   : > { %v7810_v11 = vpop.f32.mrf.mxu0  ;;  %9429 = vmatprep.subr.bf16.mxu0 %v14469_v6  ;;  %v14547_v6 = vld [vmem:[%s15381_s24 + $0x9ec] ss:$36 sps:$4 sm:$0xff]  }
 0xbb5   : > { %v14550_v11 = vld [vmem:[%s15381_s24 + $0xe1c] ss:$36 sps:$4 sm:$0xff]  }
 0xbb7   : > { %9430 = vmatpush1.bf16.msra.mxu0 %v14467_v62  ;;  %v14545_v62 = vld [vmem:[%s15381_s24 + $0x9e8] ss:$36 sps:$4 sm:$0xff]  }
 0xbb8   : > { %9431 = vmatprep.subr.bf16.mxu0 %v14475_v15  ;;  %v14553_v15 = vld [vmem:[%s15381_s24 + $0x9a4] ss:$36 sps:$4 sm:$0xff]  }
 0xbbb   : > { %9432 = vmatpush2.bf16.msra.mxu0 %v14473_v20  ;;  %v14548_v20 = vld [vmem:[%s15381_s24 + $0xe18] ss:$36 sps:$4 sm:$0xff]  }
 0xbbc   : > { %9433 = vmatprep.subr.bf16.mxu0 %v14481_v48  ;;  %v14551_v48 = vld [vmem:[%s15381_s24 + $0x9a0] ss:$36 sps:$4 sm:$0xff]  }
 0xbbf   : > { %9434 = vmatpush2.bf16.msra.mxu0 %v14479_v21  ;;  %v14556_v21 = vld [vmem:[%s15381_s24 + $0xdd4] ss:$36 sps:$4 sm:$0xff]  }
 0xbc0   : > { %9435 = vmatprep.subr.bf16.mxu0 %v14487_v2  ;;  %v14559_v2 = vld [vmem:[%s15381_s24 + $0x95c] ss:$36 sps:$4 sm:$0xff]  }
 0xbc3   : > { %9436 = vmatpush2.bf16.msra.mxu0 %v14485_v16  ;;  %v14554_v16 = vld [vmem:[%s15381_s24 + $0xdd0] ss:$36 sps:$4 sm:$0xff]  }
 0xbc4   : > { %9437 = vmatprep.subr.bf16.mxu0 %v14493_v4  ;;  %v14557_v4 = vld [vmem:[%s15381_s24 + $0x958] ss:$36 sps:$4 sm:$0xff]  }
 0xbc7   : > { %9438 = vmatpush2.bf16.msra.mxu0 %v14491_v23  ;;  %v14562_v23 = vld [vmem:[%s15381_s24 + $0xd8c] ss:$36 sps:$4 sm:$0xff]  }
 0xbc8   : > { %9439 = vmatprep.subr.bf16.mxu0 %v14499_v27  ;;  %v14565_v27 = vld [vmem:[%s15381_s24 + $0x914] ss:$36 sps:$4 sm:$0xff]  }
 0xbcb   : > { %9440 = vmatpush2.bf16.msra.mxu0 %v14497_v0  ;;  %v14560_v0 = vld [vmem:[%s15381_s24 + $0xd88] ss:$36 sps:$4 sm:$0xff]  }
 0xbcc   : > { %9441 = vmatprep.subr.bf16.mxu0 %v14505_v58  ;;  %v14563_v58 = vld [vmem:[%s15381_s24 + $0x910] ss:$36 sps:$4 sm:$0xff]  }
 0xbce   : > { %v7764_v38 = vpop.f32.mrf.mxu1 }
 0xbcf   : > { %v7765_v40 = vadd.f32 %v7764_v38, %v7163_v10  ;;  %9442 = vmatpush2.bf16.msra.mxu0 %v14503_v31  ;;  %v14568_v10 = vld [vmem:[%s15381_s24 + $0x11c4] ss:$36 sps:$4 sm:$0xff]   ;;  %v14571_v31 = vld [vmem:[%s15381_s24 + $0xd4c] ss:$36 sps:$4 sm:$0xff]   ;;  %v14574_v38 = vld [vmem:[%s15381_s24 + $0x117c] ss:$36 sps:$4 sm:$0xff]  }
 0xbd0   : > { %v7766_v41 = vpop.f32.mrf.mxu1  ;;  %9443 = vmatprep.subr.bf16.mxu0 %v14511_v32  ;;  %v14566_v32 = vld [vmem:[%s15381_s24 + $0x11c0] ss:$36 sps:$4 sm:$0xff]  }
 0xbd1   : > { %v7806_v60 = vadd.f32 %v7805_v57, %v7765_v40  ;;  %v7767_v25 = vadd.f32 %v7766_v41, %v7167_v33  ;;  %v14536_v57 = vld [vmem:[%s15381_s24 + $0xea8] ss:$36 sps:$4 sm:$0xff]   ;;  %v14575_v41 = vld [vmem:[%s15381_s24 + $0xd00] ss:$36 sps:$4 sm:$0xff]  }
 0xbd2   : > { %v7768_v43 = vpop.f32.mrf.mxu1  ;;  %v14569_v33 = vld [vmem:[%s15381_s24 + $0xd48] ss:$36 sps:$4 sm:$0xff]  }
 0xbd3   : > { %v7808_v63 = vadd.f32 %v7807_v61, %v7767_v25  ;;  %9444 = vmatpush2.bf16.msra.mxu0 %v14509_v24  ;;  %v7814_v14 = vmax.f32 %v7806_v60, 0.0  ;;  %v14544_v61 = vld [vmem:[%s15381_s24 + $0xe64] ss:$36 sps:$4 sm:$0xff]   ;;  %v14572_v24 = vld [vmem:[%s15381_s24 + $0x1178] ss:$36 sps:$4 sm:$0xff]  }
 0xbd4   : > { %v7769_v39 = vpop.f32.mrf.mxu1  ;;  %9445 = vmatprep.subr.bf16.mxu0 %v14517_v42  ;;  %v14577_v40 = vld [vmem:[%s15381_s24 + $0xd04] ss:$36 sps:$4 sm:$0xff]   ;;  %v14580_v42 = vld [vmem:[%s15381_s24 + $0x1134] ss:$36 sps:$4 sm:$0xff]   ;;  %v14583_v60 = vld [vmem:[%s15381_s24 + $0xcbc] ss:$36 sps:$4 sm:$0xff]  }
 0xbd5   : > { %v7815_v1 = vmax.f32 %v7808_v63, 0.0  ;;  %v16606_v44 = vpack.c.bf16 %v7814_v14, %v7814_v14  ;;  %v14578_v25 = vld [vmem:[%s15381_s24 + $0x1130] ss:$36 sps:$4 sm:$0xff]   ;;  %v14581_v43 = vld [vmem:[%s15381_s24 + $0xcb8] ss:$36 sps:$4 sm:$0xff]  }
 0xbd6   : > { %v14586_v63 = vld [vmem:[%s15381_s24 + $0x10ec] ss:$36 sps:$4 sm:$0xff]  }
 0xbd7   : > { %v16603_v17 = vpack.c.bf16 %v7815_v1, %v7815_v1  ;;  %9446 = vmatpush2.bf16.msra.mxu0 %v14515_v18  ;;  %v14589_v18 = vld [vmem:[%s15381_s24 + $0xc74] ss:$36 sps:$4 sm:$0xff]   ;;  %v14584_v14 = vld [vmem:[%s15381_s24 + $0x10e8] ss:$36 sps:$4 sm:$0xff]  }
 0xbd8   : > { %9497 = vmatprep.subr.bf16.mxu0 %v14523_v46  ;;  %v14587_v39 = vld [vmem:[%s15381_s24 + $0xc70] ss:$36 sps:$4 sm:$0xff]   ;;  %v14592_v46 = vld [vmem:[%s15381_s24 + $0x10a4] ss:$36 sps:$4 sm:$0xff]  }
 0xbd9   : > { %9406 = vmatprep.mubr.bf16.mxu1 %v16603_v17  ;;  %v14595_v1 = vld [vmem:[%s15381_s24 + $0xc2c] ss:$36 sps:$4 sm:$0xff]  }
 0xbda   : > { %9407 = vmatmul.mubr.bf16.vlgmr.msra.gmra.mxu1 %v16606_v44  ;;  %9448 = vmatmul.mubr.bf16.vlgmr.msra.gmra.mxu0 %v16556_v13 }
 0xbdb   : > { %9457 = vmatpush1.bf16.msra.mxu1 %v14518_v28  ;;  %9488 = vmatprep.mubr.bf16.mxu1 %v16603_v17  ;;  %v14590_v28 = vld [vmem:[%s15381_s24 + $0x10a0] ss:$36 sps:$4 sm:$0xff]  }
 0xbdc   : > { %9498 = vmatpush1.bf16.msra.mxu0 %v14521_v22  ;;  %9529 = vmatprep.mubr.bf16.mxu0 %v16553_v45  ;;  %v14593_v22 = vld [vmem:[%s15381_s24 + $0xc28] ss:$36 sps:$4 sm:$0xff]  }
 0xbdd   : > { %9458 = vmatprep.subr.bf16.mxu1 %v14526_v47  ;;  %9499 = vmatprep.subr.bf16.mxu0 %v14529_v52  ;;  %v14598_v47 = vld [vmem:[%s15381_s24 + $0x105c] ss:$36 sps:$4 sm:$0xff]   ;;  %v14601_v52 = vld [vmem:[%s15381_s24 + $0xbe4] ss:$36 sps:$4 sm:$0xff]  }
 0xbdf   : > { %9459 = vmatpush1.bf16.msra.mxu1 %v14524_v7  ;;  %v14596_v7 = vld [vmem:[%s15381_s24 + $0x1058] ss:$36 sps:$4 sm:$0xff]  }
 0xbe0   : > { %9500 = vmatpush1.bf16.msra.mxu0 %v14527_v49  ;;  %9460 = vmatprep.subr.bf16.mxu1 %v14532_v50  ;;  %v14599_v49 = vld [vmem:[%s15381_s24 + $0xbe0] ss:$36 sps:$4 sm:$0xff]   ;;  %v14604_v50 = vld [vmem:[%s15381_s24 + $0x1014] ss:$36 sps:$4 sm:$0xff]  }
 0xbe1   : > { %9501 = vmatprep.subr.bf16.mxu0 %v14535_v51  ;;  %v14607_v51 = vld [vmem:[%s15381_s24 + $0xb9c] ss:$36 sps:$4 sm:$0xff]  }
 0xbe3   : > { %9461 = vmatpush1.bf16.msra.mxu1 %v14530_v53  ;;  %v14602_v53 = vld [vmem:[%s15381_s24 + $0x1010] ss:$36 sps:$4 sm:$0xff]  }
 0xbe4   : > { %9502 = vmatpush1.bf16.msra.mxu0 %v14533_v54  ;;  %9462 = vmatprep.subr.bf16.mxu1 %v14538_v55  ;;  %v14605_v54 = vld [vmem:[%s15381_s24 + $0xb98] ss:$36 sps:$4 sm:$0xff]   ;;  %v14610_v55 = vld [vmem:[%s15381_s24 + $0xfcc] ss:$36 sps:$4 sm:$0xff]  }
 0xbe5   : > { %9503 = vmatprep.subr.bf16.mxu0 %v14541_v56  ;;  %v14613_v56 = vld [vmem:[%s15381_s24 + $0xb54] ss:$36 sps:$4 sm:$0xff]  }
 0xbe7   : > { %9463 = vmatpush1.bf16.msra.mxu1 %v14536_v57  ;;  %v14608_v57 = vld [vmem:[%s15381_s24 + $0xfc8] ss:$36 sps:$4 sm:$0xff]  }
 0xbe8   : > { %9504 = vmatpush1.bf16.msra.mxu0 %v14539_v59  ;;  %9464 = vmatprep.subr.bf16.mxu1 %v14544_v61  ;;  %v14611_v59 = vld [vmem:[%s15381_s24 + $0xb50] ss:$36 sps:$4 sm:$0xff]  }
 0xbe9   : > { %9505 = vmatprep.subr.bf16.mxu0 %v14547_v6  ;;  %v14616_v61 = vld [vmem:[%s15381_s24 + $0xf8c] ss:$36 sps:$4 sm:$0xff]   ;;  %v14619_v6 = vld [vmem:[%s15381_s24 + $0xb14] ss:$36 sps:$4 sm:$0xff]  }
 0xbeb   : > { %9465 = vmatpush1.bf16.msra.mxu1 %v14542_v12  ;;  %v14614_v12 = vld [vmem:[%s15381_s24 + $0xf88] ss:$36 sps:$4 sm:$0xff]  }
 0xbec   : > { %9506 = vmatpush1.bf16.msra.mxu0 %v14545_v62  ;;  %9466 = vmatprep.subr.bf16.mxu1 %v14550_v11  ;;  %v14617_v62 = vld [vmem:[%s15381_s24 + $0xb10] ss:$36 sps:$4 sm:$0xff]   ;;  %v14622_v11 = vld [vmem:[%s15381_s24 + $0xf44] ss:$36 sps:$4 sm:$0xff]  }
 0xbed   : > { %9507 = vmatprep.subr.bf16.mxu0 %v14553_v15  ;;  %v14625_v15 = vld [vmem:[%s15381_s24 + $0xacc] ss:$36 sps:$4 sm:$0xff]  }
 0xbef   : > { %9467 = vmatpush1.bf16.msra.mxu1 %v14548_v20  ;;  %v14620_v20 = vld [vmem:[%s15381_s24 + $0xf40] ss:$36 sps:$4 sm:$0xff]  }
 0xbf0   : > { %9508 = vmatpush1.bf16.msra.mxu0 %v14551_v48  ;;  %9468 = vmatprep.subr.bf16.mxu1 %v14556_v21  ;;  %v14623_v48 = vld [vmem:[%s15381_s24 + $0xac8] ss:$36 sps:$4 sm:$0xff]   ;;  %v14628_v21 = vld [vmem:[%s15381_s24 + $0xefc] ss:$36 sps:$4 sm:$0xff]  }
 0xbf1   : > { %9509 = vmatprep.subr.bf16.mxu0 %v14559_v2  ;;  %v14631_v2 = vld [vmem:[%s15381_s24 + $0xa84] ss:$36 sps:$4 sm:$0xff]  }
 0xbf3   : > { %9469 = vmatpush1.bf16.msra.mxu1 %v14554_v16  ;;  %v14626_v16 = vld [vmem:[%s15381_s24 + $0xef8] ss:$36 sps:$4 sm:$0xff]  }
 0xbf4   : > { %9510 = vmatpush1.bf16.msra.mxu0 %v14557_v4  ;;  %9470 = vmatprep.subr.bf16.mxu1 %v14562_v23  ;;  %v14629_v4 = vld [vmem:[%s15381_s24 + $0xa80] ss:$36 sps:$4 sm:$0xff]   ;;  %v14634_v23 = vld [vmem:[%s15381_s24 + $0xeb4] ss:$36 sps:$4 sm:$0xff]  }
 0xbf5   : > { %9511 = vmatprep.subr.bf16.mxu0 %v14565_v27  ;;  %v14637_v27 = vld [vmem:[%s15381_s24 + $0xa3c] ss:$36 sps:$4 sm:$0xff]  }
 0xbf7   : > { %9471 = vmatpush1.bf16.msra.mxu1 %v14560_v0  ;;  %v14632_v0 = vld [vmem:[%s15381_s24 + $0xeb0] ss:$36 sps:$4 sm:$0xff]  }
 0xbf8   : > { %9512 = vmatpush1.bf16.msra.mxu0 %v14563_v58  ;;  %9472 = vmatprep.subr.bf16.mxu1 %v14568_v10  ;;  %v14635_v58 = vld [vmem:[%s15381_s24 + $0xa38] ss:$36 sps:$4 sm:$0xff]   ;;  %v14640_v10 = vld [vmem:[%s15381_s24 + $0xe6c] ss:$36 sps:$4 sm:$0xff]  }
 0xbf9   : > { %9513 = vmatprep.subr.bf16.mxu0 %v14571_v31  ;;  %v14643_v31 = vld [vmem:[%s15381_s24 + $0x9f4] ss:$36 sps:$4 sm:$0xff]  }
 0xbfb   : > { %9473 = vmatpush2.bf16.msra.mxu1 %v14566_v32  ;;  %v14638_v32 = vld [vmem:[%s15381_s24 + $0xe68] ss:$36 sps:$4 sm:$0xff]  }
 0xbfc   : > { %9514 = vmatpush2.bf16.msra.mxu0 %v14569_v33  ;;  %9474 = vmatprep.subr.bf16.mxu1 %v14574_v38  ;;  %v14641_v33 = vld [vmem:[%s15381_s24 + $0x9f0] ss:$36 sps:$4 sm:$0xff]   ;;  %v14646_v38 = vld [vmem:[%s15381_s24 + $0xe24] ss:$36 sps:$4 sm:$0xff]  }
 0xbfd   : > { %9515 = vmatprep.subr.bf16.mxu0 %v14577_v40  ;;  %v14649_v40 = vld [vmem:[%s15381_s24 + $0x9ac] ss:$36 sps:$4 sm:$0xff]  }
 0xbff   : > { %9475 = vmatpush2.bf16.msra.mxu1 %v14572_v24  ;;  %v14644_v24 = vld [vmem:[%s15381_s24 + $0xe20] ss:$36 sps:$4 sm:$0xff]  }
 0xc00   : > { %9516 = vmatpush2.bf16.msra.mxu0 %v14575_v41  ;;  %9476 = vmatprep.subr.bf16.mxu1 %v14580_v42  ;;  %v14647_v41 = vld [vmem:[%s15381_s24 + $0x9a8] ss:$36 sps:$4 sm:$0xff]   ;;  %v14652_v42 = vld [vmem:[%s15381_s24 + $0xddc] ss:$36 sps:$4 sm:$0xff]  }
 0xc01   : > { %9517 = vmatprep.subr.bf16.mxu0 %v14583_v60  ;;  %v14655_v60 = vld [vmem:[%s15381_s24 + $0x964] ss:$36 sps:$4 sm:$0xff]  }
 0xc03   : > { %9477 = vmatpush2.bf16.msra.mxu1 %v14578_v25  ;;  %v14650_v25 = vld [vmem:[%s15381_s24 + $0xdd8] ss:$36 sps:$4 sm:$0xff]  }
 0xc04   : > { %9518 = vmatpush2.bf16.msra.mxu0 %v14581_v43  ;;  %9478 = vmatprep.subr.bf16.mxu1 %v14586_v63  ;;  %v14653_v43 = vld [vmem:[%s15381_s24 + $0x960] ss:$36 sps:$4 sm:$0xff]   ;;  %v14658_v63 = vld [vmem:[%s15381_s24 + $0xd94] ss:$36 sps:$4 sm:$0xff]  }
 0xc05   : > { %9519 = vmatprep.subr.bf16.mxu0 %v14589_v18  ;;  %v14661_v18 = vld [vmem:[%s15381_s24 + $0x91c] ss:$36 sps:$4 sm:$0xff]  }
 0xc07   : > { %9479 = vmatpush2.bf16.msra.mxu1 %v14584_v14  ;;  %v14656_v14 = vld [vmem:[%s15381_s24 + $0xd90] ss:$36 sps:$4 sm:$0xff]  }
 0xc08   : > { %9520 = vmatpush2.bf16.msra.mxu0 %v14587_v39  ;;  %9480 = vmatprep.subr.bf16.mxu1 %v14592_v46  ;;  %v14659_v39 = vld [vmem:[%s15381_s24 + $0x918] ss:$36 sps:$4 sm:$0xff]   ;;  %v14664_v46 = vld [vmem:[%s15381_s24 + $0x11cc] ss:$36 sps:$4 sm:$0xff]  }
 0xc09   : > { %9521 = vmatprep.subr.bf16.mxu0 %v14595_v1  ;;  %v14667_v1 = vld [vmem:[%s15381_s24 + $0xd54] ss:$36 sps:$4 sm:$0xff]  }
 0xc0b   : > { %9481 = vmatpush2.bf16.msra.mxu1 %v14590_v28  ;;  %v14662_v28 = vld [vmem:[%s15381_s24 + $0x11c8] ss:$36 sps:$4 sm:$0xff]  }
 0xc0c   : > { %9522 = vmatpush2.bf16.msra.mxu0 %v14593_v22  ;;  %9482 = vmatprep.subr.bf16.mxu1 %v14598_v47  ;;  %v14665_v22 = vld [vmem:[%s15381_s24 + $0xd50] ss:$36 sps:$4 sm:$0xff]   ;;  %v14670_v47 = vld [vmem:[%s15381_s24 + $0x1184] ss:$36 sps:$4 sm:$0xff]  }
 0xc0d   : > { %9523 = vmatprep.subr.bf16.mxu0 %v14601_v52  ;;  %v14673_v52 = vld [vmem:[%s15381_s24 + $0xd0c] ss:$36 sps:$4 sm:$0xff]  }
 0xc0f   : > { %9483 = vmatpush2.bf16.msra.mxu1 %v14596_v7  ;;  %v14668_v7 = vld [vmem:[%s15381_s24 + $0x1180] ss:$36 sps:$4 sm:$0xff]  }
 0xc10   : > { %9524 = vmatpush2.bf16.msra.mxu0 %v14599_v49  ;;  %9484 = vmatprep.subr.bf16.mxu1 %v14604_v50  ;;  %v14671_v49 = vld [vmem:[%s15381_s24 + $0xd08] ss:$36 sps:$4 sm:$0xff]   ;;  %v14676_v50 = vld [vmem:[%s15381_s24 + $0x113c] ss:$36 sps:$4 sm:$0xff]  }
 0xc11   : > { %9525 = vmatprep.subr.bf16.mxu0 %v14607_v51  ;;  %v14679_v51 = vld [vmem:[%s15381_s24 + $0xcc4] ss:$36 sps:$4 sm:$0xff]  }
 0xc13   : > { %9485 = vmatpush2.bf16.msra.mxu1 %v14602_v53  ;;  %v14674_v53 = vld [vmem:[%s15381_s24 + $0x1138] ss:$36 sps:$4 sm:$0xff]  }
 0xc14   : > { %9526 = vmatpush2.bf16.msra.mxu0 %v14605_v54  ;;  %9486 = vmatprep.subr.bf16.mxu1 %v14610_v55  ;;  %v14677_v54 = vld [vmem:[%s15381_s24 + $0xcc0] ss:$36 sps:$4 sm:$0xff]   ;;  %v14682_v55 = vld [vmem:[%s15381_s24 + $0x10f4] ss:$36 sps:$4 sm:$0xff]  }
 0xc15   : > { %9527 = vmatprep.subr.bf16.mxu0 %v14613_v56  ;;  %v14685_v56 = vld [vmem:[%s15381_s24 + $0xc7c] ss:$36 sps:$4 sm:$0xff]  }
 0xc17   : > { %9487 = vmatpush2.bf16.msra.mxu1 %v14608_v57  ;;  %v14680_v57 = vld [vmem:[%s15381_s24 + $0x10f0] ss:$36 sps:$4 sm:$0xff]  }
 0xc18   : > { %9528 = vmatpush2.bf16.msra.mxu0 %v14611_v59  ;;  %9538 = vmatprep.subr.bf16.mxu1 %v14616_v61  ;;  %v14683_v59 = vld [vmem:[%s15381_s24 + $0xc78] ss:$36 sps:$4 sm:$0xff]   ;;  %v14688_v61 = vld [vmem:[%s15381_s24 + $0x10ac] ss:$36 sps:$4 sm:$0xff]  }
 0xc19   : > { %9579 = vmatprep.subr.bf16.mxu0 %v14619_v6  ;;  %v14691_v6 = vld [vmem:[%s15381_s24 + $0xc34] ss:$36 sps:$4 sm:$0xff]  }
 0xc1a   : > { %9489 = vmatmul.mubr.bf16.vlgmr.msra.gmra.mxu1 %v16606_v44 }
 0xc1b   : > { %9530 = vmatmul.mubr.bf16.vlgmr.msra.gmra.mxu0 %v16556_v13  ;;  %9539 = vmatpush1.bf16.msra.mxu1 %v14614_v12  ;;  %v14686_v12 = vld [vmem:[%s15381_s24 + $0x10a8] ss:$36 sps:$4 sm:$0xff]  }
 0xc1c   : > { %9570 = vmatprep.mubr.bf16.mxu1 %v16603_v17  ;;  %9580 = vmatpush1.bf16.msra.mxu0 %v14617_v62  ;;  %v14689_v62 = vld [vmem:[%s15381_s24 + $0xc30] ss:$36 sps:$4 sm:$0xff]  }
 0xc1d   : > { %9611 = vmatprep.mubr.bf16.mxu0 %v16553_v45  ;;  %9540 = vmatprep.subr.bf16.mxu1 %v14622_v11  ;;  %v14694_v11 = vld [vmem:[%s15381_s24 + $0x1064] ss:$36 sps:$4 sm:$0xff]  }
 0xc1e   : > { %9581 = vmatprep.subr.bf16.mxu0 %v14625_v15  ;;  %v14697_v15 = vld [vmem:[%s15381_s24 + $0xbec] ss:$36 sps:$4 sm:$0xff]  }
 0xc1f   : > { %9541 = vmatpush1.bf16.msra.mxu1 %v14620_v20  ;;  %v14692_v20 = vld [vmem:[%s15381_s24 + $0x1060] ss:$36 sps:$4 sm:$0xff]  }
 0xc20   : > { %9582 = vmatpush1.bf16.msra.mxu0 %v14623_v48  ;;  %9542 = vmatprep.subr.bf16.mxu1 %v14628_v21  ;;  %v14695_v48 = vld [vmem:[%s15381_s24 + $0xbe8] ss:$36 sps:$4 sm:$0xff]   ;;  %v14700_v21 = vld [vmem:[%s15381_s24 + $0x101c] ss:$36 sps:$4 sm:$0xff]  }
 0xc21   : > { %9583 = vmatprep.subr.bf16.mxu0 %v14631_v2  ;;  %v14703_v2 = vld [vmem:[%s15381_s24 + $0xba4] ss:$36 sps:$4 sm:$0xff]  }
 0xc23   : > { %9543 = vmatpush1.bf16.msra.mxu1 %v14626_v16  ;;  %v14698_v16 = vld [vmem:[%s15381_s24 + $0x1018] ss:$36 sps:$4 sm:$0xff]  }
 0xc24   : > { %9584 = vmatpush1.bf16.msra.mxu0 %v14629_v4  ;;  %9544 = vmatprep.subr.bf16.mxu1 %v14634_v23  ;;  %v14701_v4 = vld [vmem:[%s15381_s24 + $0xba0] ss:$36 sps:$4 sm:$0xff]   ;;  %v14706_v23 = vld [vmem:[%s15381_s24 + $0xfd4] ss:$36 sps:$4 sm:$0xff]  }
 0xc25   : > { %9585 = vmatprep.subr.bf16.mxu0 %v14637_v27  ;;  %v14709_v27 = vld [vmem:[%s15381_s24 + $0xb5c] ss:$36 sps:$4 sm:$0xff]  }
 0xc27   : > { %9545 = vmatpush1.bf16.msra.mxu1 %v14632_v0  ;;  %v14704_v0 = vld [vmem:[%s15381_s24 + $0xfd0] ss:$36 sps:$4 sm:$0xff]  }
 0xc28   : > { %9586 = vmatpush1.bf16.msra.mxu0 %v14635_v58  ;;  %9546 = vmatprep.subr.bf16.mxu1 %v14640_v10  ;;  %v14707_v58 = vld [vmem:[%s15381_s24 + $0xb58] ss:$36 sps:$4 sm:$0xff]  }
 0xc29   : > { %9587 = vmatprep.subr.bf16.mxu0 %v14643_v31  ;;  %v14712_v10 = vld [vmem:[%s15381_s24 + $0xf94] ss:$36 sps:$4 sm:$0xff]  }
 0xc2a   : > { %v14713_v31 = vld [vmem:[%s15381_s24 + $0xd58] ss:$36 sps:$4 sm:$0xff]  }
 0xc2b   : > { %9547 = vmatpush1.bf16.msra.mxu1 %v14638_v32  ;;  %v14710_v32 = vld [vmem:[%s15381_s24 + $0xf90] ss:$36 sps:$4 sm:$0xff]  }
 0xc2c   : > { %9588 = vmatpush1.bf16.msra.mxu0 %v14641_v33  ;;  %9548 = vmatprep.subr.bf16.mxu1 %v14646_v38  ;;  %v14714_v33 = vld [vmem:[%s15381_s24 + $0xb18] ss:$36 sps:$4 sm:$0xff]   ;;  %v14717_v38 = vld [vmem:[%s15381_s24 + $0xf4c] ss:$36 sps:$4 sm:$0xff]  }
 0xc2d   : > { %9589 = vmatprep.subr.bf16.mxu0 %v14649_v40 }
 0xc2f   : > { %9549 = vmatpush1.bf16.msra.mxu1 %v14644_v24  ;;  %v14718_v24 = vld [vmem:[%s15381_s24 + $0xd10] ss:$36 sps:$4 sm:$0xff]  }
 0xc30   : > { %9590 = vmatpush1.bf16.msra.mxu0 %v14647_v41  ;;  %9550 = vmatprep.subr.bf16.mxu1 %v14652_v42  ;;  %v14715_v41 = vld [vmem:[%s15381_s24 + $0xf48] ss:$36 sps:$4 sm:$0xff]  }
 0xc31   : > { %9591 = vmatprep.subr.bf16.mxu0 %v14655_v60  ;;  %v14719_v60 = vld [vmem:[%s15381_s24 + $0xad0] ss:$36 sps:$4 sm:$0xff]  }
 0xc33   : > { %9551 = vmatpush1.bf16.msra.mxu1 %v14650_v25  ;;  %v14722_v25 = vld [vmem:[%s15381_s24 + $0xf04] ss:$36 sps:$4 sm:$0xff]  }
 0xc34   : > { %9592 = vmatpush1.bf16.msra.mxu0 %v14653_v43  ;;  %9552 = vmatprep.subr.bf16.mxu1 %v14658_v63  ;;  %v14723_v43 = vld [vmem:[%s15381_s24 + $0xcc8] ss:$36 sps:$4 sm:$0xff]  }
 0xc35   : > { %9593 = vmatprep.subr.bf16.mxu0 %v14661_v18  ;;  %v14720_v18 = vld [vmem:[%s15381_s24 + $0xf00] ss:$36 sps:$4 sm:$0xff]  }
 0xc37   : > { %9553 = vmatpush1.bf16.msra.mxu1 %v14656_v14 }
 0xc38   : > { %9594 = vmatpush1.bf16.msra.mxu0 %v14659_v39  ;;  %9554 = vmatprep.subr.bf16.mxu1 %v14664_v46  ;;  %v14724_v39 = vld [vmem:[%s15381_s24 + $0xa88] ss:$36 sps:$4 sm:$0xff]   ;;  %v14727_v46 = vld [vmem:[%s15381_s24 + $0xebc] ss:$36 sps:$4 sm:$0xff]  }
 0xc39   : > { %9595 = vmatprep.subr.bf16.mxu0 %v14667_v1  ;;  %v14728_v1 = vld [vmem:[%s15381_s24 + $0xc80] ss:$36 sps:$4 sm:$0xff]  }
 0xc3b   : > { %9555 = vmatpush2.bf16.msra.mxu1 %v14662_v28  ;;  %v14729_v28 = vld [vmem:[%s15381_s24 + $0xa40] ss:$36 sps:$4 sm:$0xff]  }
 0xc3c   : > { %9596 = vmatpush2.bf16.msra.mxu0 %v14665_v22  ;;  %9556 = vmatprep.subr.bf16.mxu1 %v14670_v47  ;;  %v14732_v22 = vld [vmem:[%s15381_s24 + $0xe74] ss:$36 sps:$4 sm:$0xff]  }
 0xc3d   : > { %9597 = vmatprep.subr.bf16.mxu0 %v14673_v52  ;;  %v14733_v47 = vld [vmem:[%s15381_s24 + $0xc38] ss:$36 sps:$4 sm:$0xff]   ;;  %v14730_v52 = vld [vmem:[%s15381_s24 + $0xe70] ss:$36 sps:$4 sm:$0xff]  }
 0xc3f   : > { %9557 = vmatpush2.bf16.msra.mxu1 %v14668_v7  ;;  %v14734_v7 = vld [vmem:[%s15381_s24 + $0x9f8] ss:$36 sps:$4 sm:$0xff]  }
 0xc40   : > { %9598 = vmatpush2.bf16.msra.mxu0 %v14671_v49  ;;  %9558 = vmatprep.subr.bf16.mxu1 %v14676_v50  ;;  %v14737_v49 = vld [vmem:[%s15381_s24 + $0xe2c] ss:$36 sps:$4 sm:$0xff]  }
 0xc41   : > { %9599 = vmatprep.subr.bf16.mxu0 %v14679_v51  ;;  %v14738_v50 = vld [vmem:[%s15381_s24 + $0xbf0] ss:$36 sps:$4 sm:$0xff]   ;;  %v14735_v51 = vld [vmem:[%s15381_s24 + $0xe28] ss:$36 sps:$4 sm:$0xff]  }
 0xc43   : > { %9559 = vmatpush2.bf16.msra.mxu1 %v14674_v53  ;;  %v14739_v53 = vld [vmem:[%s15381_s24 + $0x9b0] ss:$36 sps:$4 sm:$0xff]  }
 0xc44   : > { %9600 = vmatpush2.bf16.msra.mxu0 %v14677_v54  ;;  %9560 = vmatprep.subr.bf16.mxu1 %v14682_v55  ;;  %v14742_v54 = vld [vmem:[%s15381_s24 + $0xde4] ss:$36 sps:$4 sm:$0xff]  }
 0xc45   : > { %9601 = vmatprep.subr.bf16.mxu0 %v14685_v56  ;;  %v14743_v55 = vld [vmem:[%s15381_s24 + $0xba8] ss:$36 sps:$4 sm:$0xff]   ;;  %v14740_v56 = vld [vmem:[%s15381_s24 + $0xde0] ss:$36 sps:$4 sm:$0xff]  }
 0xc47   : > { %9561 = vmatpush2.bf16.msra.mxu1 %v14680_v57  ;;  %v14744_v57 = vld [vmem:[%s15381_s24 + $0x968] ss:$36 sps:$4 sm:$0xff]  }
 0xc48   : > { %9602 = vmatpush2.bf16.msra.mxu0 %v14683_v59  ;;  %9562 = vmatprep.subr.bf16.mxu1 %v14688_v61  ;;  %v14747_v59 = vld [vmem:[%s15381_s24 + $0xd9c] ss:$36 sps:$4 sm:$0xff]  }
 0xc49   : > { %9603 = vmatprep.subr.bf16.mxu0 %v14691_v6  ;;  %v14748_v61 = vld [vmem:[%s15381_s24 + $0xb60] ss:$36 sps:$4 sm:$0xff]   ;;  %v14745_v6 = vld [vmem:[%s15381_s24 + $0xd98] ss:$36 sps:$4 sm:$0xff]  }
 0xc4b   : > { %9563 = vmatpush2.bf16.msra.mxu1 %v14686_v12  ;;  %v14749_v12 = vld [vmem:[%s15381_s24 + $0x920] ss:$36 sps:$4 sm:$0xff]  }
 0xc4c   : > { %9604 = vmatpush2.bf16.msra.mxu0 %v14689_v62  ;;  %9564 = vmatprep.subr.bf16.mxu1 %v14694_v11  ;;  %v14752_v62 = vld [vmem:[%s15381_s24 + $0x11d4] ss:$36 sps:$4 sm:$0xff]  }
 0xc4d   : > { %9605 = vmatprep.subr.bf16.mxu0 %v14697_v15  ;;  %v14750_v11 = vld [vmem:[%s15381_s24 + $0x11d0] ss:$36 sps:$4 sm:$0xff]  }
 0xc4e   : > { %v14755_v15 = vld [vmem:[%s15381_s24 + $0x118c] ss:$36 sps:$4 sm:$0xff]  }
 0xc4f   : > { %9565 = vmatpush2.bf16.msra.mxu1 %v14692_v20  ;;  %v14753_v20 = vld [vmem:[%s15381_s24 + $0x1188] ss:$36 sps:$4 sm:$0xff]  }
 0xc50   : > { %9606 = vmatpush2.bf16.msra.mxu0 %v14695_v48  ;;  %9566 = vmatprep.subr.bf16.mxu1 %v14700_v21  ;;  %v14758_v48 = vld [vmem:[%s15381_s24 + $0x1144] ss:$36 sps:$4 sm:$0xff]  }
 0xc51   : > { %9607 = vmatprep.subr.bf16.mxu0 %v14703_v2  ;;  %v14756_v21 = vld [vmem:[%s15381_s24 + $0x1140] ss:$36 sps:$4 sm:$0xff]  }
 0xc52   : > { %v14761_v2 = vld [vmem:[%s15381_s24 + $0x10fc] ss:$36 sps:$4 sm:$0xff]  }
 0xc53   : > { %9567 = vmatpush2.bf16.msra.mxu1 %v14698_v16  ;;  %v14759_v16 = vld [vmem:[%s15381_s24 + $0x10f8] ss:$36 sps:$4 sm:$0xff]  }
 0xc54   : > { %9608 = vmatpush2.bf16.msra.mxu0 %v14701_v4  ;;  %9568 = vmatprep.subr.bf16.mxu1 %v14706_v23  ;;  %v14764_v4 = vld [vmem:[%s15381_s24 + $0x10b4] ss:$36 sps:$4 sm:$0xff]   ;;  %v14767_v23 = vld [vmem:[%s15381_s24 + $0x106c] ss:$36 sps:$4 sm:$0xff]  }
 0xc55   : > { %9609 = vmatprep.subr.bf16.mxu0 %v14709_v27  ;;  %v14765_v27 = vld [vmem:[%s15381_s24 + $0x1068] ss:$36 sps:$4 sm:$0xff]  }
 0xc57   : > { %9569 = vmatpush2.bf16.msra.mxu1 %v14704_v0  ;;  %v14770_v0 = vld [vmem:[%s15381_s24 + $0x1024] ss:$36 sps:$4 sm:$0xff]  }
 0xc58   : > { %9610 = vmatpush2.bf16.msra.mxu0 %v14707_v58  ;;  %9620 = vmatprep.subr.bf16.mxu1 %v14712_v10  ;;  %v14768_v58 = vld [vmem:[%s15381_s24 + $0x1020] ss:$36 sps:$4 sm:$0xff]  }
 0xc59   : > { %12959 = vmatprep.subr.bf16.mxu0 %v14713_v31  ;;  %v14773_v10 = vld [vmem:[%s15381_s24 + $0xfdc] ss:$36 sps:$4 sm:$0xff]   ;;  %v16800_v31 = vsub.s32 1, %v15387_v3 }
 0xc5a   : > { %9571 = vmatmul.mubr.bf16.vlgmr.msra.gmra.mxu1 %v16606_v44  ;;  %v16748_v40 = vpop.f32.mrf.mxu0 }
 0xc5b   : > { %9612 = vmatmul.mubr.bf16.vlgmr.msra.gmra.mxu0 %v16556_v13  ;;  %9621 = vmatpush1.bf16.msra.mxu1 %v14710_v32  ;;  %v14771_v32 = vld [vmem:[%s15381_s24 + $0xfd8] ss:$36 sps:$4 sm:$0xff]  }
 0xc5c   : > { %9652 = vmatprep.mubr.bf16.mxu1 %v16603_v17  ;;  %12960 = vmatpush3.bf16.msra.mxu0 %v14714_v33  ;;  %v16754_v42 = vpop.f32.mrf.mxu0  ;;  %v14774_v33 = vld [vmem:[%s15381_s24 + $0x11d8] ss:$36 sps:$4 sm:$0xff]  }
 0xc5d   : > { %9693 = vmatprep.mubr.bf16.mxu0 %v16553_v45  ;;  %9622 = vmatprep.subr.bf16.mxu1 %v14717_v38  ;;  %v14725_v45 = vld [vmem:[%s15381_s24 + $0xeb8] ss:$36 sps:$4 sm:$0xff]   ;;  %v7828_v38 = vrot.slane %v7148_v35, %v16800_v31 }
 0xc5e   : > { %12961 = vmatprep.subr.bf16.mxu0 %v14718_v24  ;;  %v9371_v63 = vpop.f32.mrf.mxu0  ;;  %v7832_v24 = vrot.slane %v7149_v37, %v16800_v31 }
 0xc5f   : > { %9623 = vmatpush1.bf16.msra.mxu1 %v14715_v41  ;;  %v14775_v41 = vld [vmem:[%s15381_s24 + $0xf98] ss:$36 sps:$4 sm:$0xff]  }
 0xc60   : > { %12962 = vmatpush3.bf16.msra.mxu0 %v14719_v60  ;;  %v9372_v14 = vpop.f32.mrf.mxu0  ;;  %9624 = vmatprep.subr.bf16.mxu1 %v14722_v25  ;;  %v14776_v60 = vld [vmem:[%s15381_s24 + $0x1190] ss:$36 sps:$4 sm:$0xff]   ;;  %v9368_v25 = vadd.f32 %v16748_v40, %v7828_v38  ;;  %v14778_v40 = vld [vmem:[%s15381_s24 + $0x1148] ss:$36 sps:$4 sm:$0xff]  }
 0xc61   : > { %12963 = vmatprep.subr.bf16.mxu0 %v14723_v43 }
 0xc63   : > { %9625 = vmatpush1.bf16.msra.mxu1 %v14720_v18  ;;  %v9370_v18 = vadd.f32 %v16754_v42, %v7832_v24  ;;  %v14779_v42 = vld [vmem:[%s15381_s24 + $0xf08] ss:$36 sps:$4 sm:$0xff]  }
 0xc64   : > { %12964 = vmatpush3.bf16.msra.mxu0 %v14724_v39  ;;  %9626 = vmatprep.subr.bf16.mxu1 %v14727_v46 }
 0xc65   : > { %12965 = vmatprep.subr.bf16.mxu0 %v14728_v1 }
 0xc67   : > { %9627 = vmatpush1.bf16.msra.mxu1 %v14725_v45 }
 0xc68   : > { %12966 = vmatpush3.bf16.msra.mxu0 %v14729_v28  ;;  %9628 = vmatprep.subr.bf16.mxu1 %v14732_v22  ;;  %v14781_v22 = vld [vmem:[%s15381_s24 + $0xec0] ss:$36 sps:$4 sm:$0xff]  }
 0xc69   : > { %12967 = vmatprep.subr.bf16.mxu0 %v14733_v47  ;;  %v14782_v47 = vld [vmem:[%s15381_s24 + $0x10b8] ss:$36 sps:$4 sm:$0xff]  }
 0xc6b   : > { %9629 = vmatpush1.bf16.msra.mxu1 %v14730_v52  ;;  %v14783_v52 = vld [vmem:[%s15381_s24 + $0xe78] ss:$36 sps:$4 sm:$0xff]  }
 0xc6c   : > { %12968 = vmatpush3.bf16.msra.mxu0 %v14734_v7  ;;  %9630 = vmatprep.subr.bf16.mxu1 %v14737_v49  ;;  %v14784_v7 = vld [vmem:[%s15381_s24 + $0x1070] ss:$36 sps:$4 sm:$0xff]  }
 0xc6d   : > { %12969 = vmatprep.subr.bf16.mxu0 %v14738_v50  ;;  %v14785_v49 = vld [vmem:[%s15381_s24 + $0xe30] ss:$36 sps:$4 sm:$0xff]   ;;  %v14786_v50 = vld [vmem:[%s15381_s24 + $0x1028] ss:$36 sps:$4 sm:$0xff]  }
 0xc6f   : > { %9631 = vmatpush1.bf16.msra.mxu1 %v14735_v51  ;;  %v14787_v51 = vld [vmem:[%s15381_s24 + $0xde8] ss:$36 sps:$4 sm:$0xff]  }
 0xc70   : > { %12970 = vmatpush3.bf16.msra.mxu0 %v14739_v53  ;;  %9632 = vmatprep.subr.bf16.mxu1 %v14742_v54  ;;  %v14788_v53 = vld [vmem:[%s15381_s24 + $0xfe0] ss:$36 sps:$4 sm:$0xff]  }
 0xc71   : > { %12971 = vmatprep.subr.bf16.mxu0 %v14743_v55  ;;  %v14789_v54 = vld [vmem:[%s15381_s24 + $0xda0] ss:$36 sps:$4 sm:$0xff]   ;;  %v7836_v55 = vrot.slane %v7150_v29, %v16800_v31 }
 0xc73   : > { %9633 = vmatpush1.bf16.msra.mxu1 %v14740_v56  ;;  %v7840_v56 = vrot.slane %v7151_v30, %v16800_v31 }
 0xc74   : > { %12972 = vmatpush3.bf16.msra.mxu0 %v14744_v57  ;;  %9634 = vmatprep.subr.bf16.mxu1 %v14747_v59 }
 0xc75   : > { %12973 = vmatprep.subr.bf16.mxu0 %v14748_v61 }
 0xc77   : > { %9635 = vmatpush1.bf16.msra.mxu1 %v14745_v6 }
 0xc78   : > { %12974 = vmatpush3.bf16.msra.mxu0 %v14749_v12  ;;  %9636 = vmatprep.subr.bf16.mxu1 %v14752_v62 }
 0xc7b   : > { %9637 = vmatpush2.bf16.msra.mxu1 %v14750_v11  ;;  %9694 = vmatmul.mubr.bf16.vlgmr.msra.gmra.mxu0 %v16556_v13  ;;  %v14762_v13 = vld [vmem:[%s15381_s24 + $0x10b0] ss:$36 sps:$4 sm:$0xff]  }
 0xc7c   : > { %9638 = vmatprep.subr.bf16.mxu1 %v14755_v15  ;;  %9818 = vmatprep.mubr.f32.mxu0 %v15207_v5 }
 0xc7f   : > { %9639 = vmatpush2.bf16.msra.mxu1 %v14753_v20 }
 0xc80   : > { %9640 = vmatprep.subr.bf16.mxu1 %v14758_v48 }
 0xc83   : > { %9641 = vmatpush2.bf16.msra.mxu1 %v14756_v21 }
 0xc84   : > { %9642 = vmatprep.subr.bf16.mxu1 %v14761_v2  ;;  %v16846_v2 = vld [vmem:[%s15381_s24 + $0x1210] sm:$0x11] }
 0xc85   : > { %v7820_v29 = vunpack.c.l.bf16 %v16846_v2 }
 0xc87   : > { %9643 = vmatpush2.bf16.msra.mxu1 %v14759_v16  ;;  %v7844_v26 = vrot.slane %v7820_v29, %v16800_v31 }
 0xc88   : > { %9644 = vmatprep.subr.bf16.mxu1 %v14764_v4 }
 0xc8b   : > { %9645 = vmatpush2.bf16.msra.mxu1 %v14762_v13 }
 0xc8c   : > { %9646 = vmatprep.subr.bf16.mxu1 %v14767_v23 }
 0xc8f   : > { %9647 = vmatpush2.bf16.msra.mxu1 %v14765_v27 }
 0xc90   : > { %9648 = vmatprep.subr.bf16.mxu1 %v14770_v0 }
 0xc93   : > { %9649 = vmatpush2.bf16.msra.mxu1 %v14768_v58 }
 0xc94   : > { %9650 = vmatprep.subr.bf16.mxu1 %v14773_v10 }
 0xc97   : > { %9651 = vmatpush2.bf16.msra.mxu1 %v14771_v32 }
 0xc98   : > { %12981 = vmatprep.subr.bf16.mxu1 %v14774_v33 }
 0xc9a   : > { %9653 = vmatmul.mubr.bf16.vlgmr.msra.gmra.mxu1 %v16606_v44  ;;  %v9408_v43 = vpop.f32.mrf.mxu1  ;;  %v9449_v63 = vpop.f32.mrf.mxu0 }
 0xc9b   : > { %v16815_v14 = vadd.f32 %v9408_v43, %v9368_v25  ;;  %12982 = vmatpush3.bf16.msra.mxu1 %v14775_v41  ;;  %9733 = vmatprep.mubr.bf16.mxu1 %v16603_v17  ;;  %v14780_v17 = vld [vmem:[%s15381_s24 + $0x1100] ss:$36 sps:$4 sm:$0xff]   ;;  %v9450_v57 = vadd.f32 %v9449_v63, %v7836_v55  ;;  %v16855_v25 = vld [vmem:[%s15381_s24 + $0x1218] sm:$0x11]  ;;  %v7821_v43 = vunpack.c.h.bf16 %v16846_v2  ;;  %v14804_v55 = vld [vmem:[%s15381_s24 + $0xec] ss:$36 sps:$4 sm:$0xff]  }
 0xc9c   : > { %v9410_v35 = vpop.f32.mrf.mxu1  ;;  %v9451_v37 = vpop.f32.mrf.mxu0  ;;  %12983 = vmatprep.subr.bf16.mxu1 %v14776_v60  ;;  %v7822_v63 = vunpack.c.l.bf16 %v16855_v25 }
 0xc9d   : > { %v16820_v39 = vadd.f32 %v9410_v35, %v9370_v18  ;;  %v9452_v61 = vadd.f32 %v9451_v37, %v7840_v56  ;;  %v7848_v18 = vrot.slane %v7821_v43, %v16800_v31  ;;  %v16882_v56 = vld [vmem:[%s15381_s24 + $0x1220] sm:$0x1] }
 0xc9e   : > { %v9412_v46 = vpop.f32.mrf.mxu1  ;;  %v9453_v1 = vpop.f32.mrf.mxu0  ;;  %v10060_v2 = vrot.slane %v7822_v63, %v16544_v36 }
 0xc9f   : > { %12984 = vmatpush3.bf16.msra.mxu1 %v14777_v34  ;;  %v7852_v34 = vrot.slane %v7822_v63, %v16800_v31 }
 0xca0   : > { %v9413_v45 = vpop.f32.mrf.mxu1  ;;  %v9454_v28 = vpop.f32.mrf.mxu0  ;;  %12985 = vmatprep.subr.bf16.mxu1 %v14778_v40 }
 0xca3   : > { %12986 = vmatpush3.bf16.msra.mxu1 %v14779_v42 }
 0xca4   : > { %12987 = vmatprep.subr.bf16.mxu1 %v14780_v17 }
 0xca7   : > { %12988 = vmatpush3.bf16.msra.mxu1 %v14781_v22  ;;  %v9742_v22 = vmax.f32 %v16820_v39, 0.0  ;;  %v14795_v39 = vld [vmem:[%s15381_s24 + $0x1c4] ss:$36 sps:$4 sm:$0xff]  }
 0xca8   : > { %12989 = vmatprep.subr.bf16.mxu1 %v14782_v47  ;;  %v14792_v47 = vld [vmem:[%s15381_s24 + $0x20c] ss:$36 sps:$4 sm:$0xff]  }
 0xcab   : > { %12990 = vmatpush3.bf16.msra.mxu1 %v14783_v52  ;;  %v9741_v52 = vmax.f32 %v16815_v14, 0.0  ;;  %v14793_v14 = vld [vmem:[%s15381_s24 + $0x1c0] ss:$36 sps:$4 sm:$0xff]  }
 0xcac   : > { %12991 = vmatprep.subr.bf16.mxu1 %v14784_v7 }
 0xcaf   : > { %12992 = vmatpush3.bf16.msra.mxu1 %v14785_v49  ;;  %v14790_v49 = vld [vmem:[%s15381_s24 + $0x208] ss:$36 sps:$4 sm:$0xff]  }
 0xcb0   : > { %12993 = vmatprep.subr.bf16.mxu1 %v14786_v50  ;;  %v14798_v50 = vld [vmem:[%s15381_s24 + $0x17c] ss:$36 sps:$4 sm:$0xff]  }
 0xcb3   : > { %12994 = vmatpush3.bf16.msra.mxu1 %v14787_v51  ;;  %v14796_v51 = vld [vmem:[%s15381_s24 + $0x178] ss:$36 sps:$4 sm:$0xff]  }
 0xcb4   : > { %12995 = vmatprep.subr.bf16.mxu1 %v14788_v53  ;;  %v14801_v53 = vld [vmem:[%s15381_s24 + $0x134] ss:$36 sps:$4 sm:$0xff]  }
 0xcb7   : > { %12996 = vmatpush3.bf16.msra.mxu1 %v14789_v54  ;;  %v14799_v54 = vld [vmem:[%s15381_s24 + $0x130] ss:$36 sps:$4 sm:$0xff]  }
 0xcba   : > { %9734 = vmatmul.mubr.bf16.vlgmr.msra.gmra.mxu1 %v16606_v44 }
 0xcbb   : > { %9889 = vmatprep.mubr.f32.mxu1 %v15207_v5 }
 0xcda   : > { %v9490_v59 = vpop.f32.mrf.mxu1 }
 0xcdb   : > { %v16841_v6 = vadd.f32 %v9490_v59, %v9450_v57  ;;  %v9531_v12 = vpop.f32.mrf.mxu0  ;;  %v14802_v57 = vld [vmem:[%s15381_s24 + $0xe8] ss:$36 sps:$4 sm:$0xff]  }
 0xcdc   : > { %v9492_v62 = vpop.f32.mrf.mxu1  ;;  %v9532_v30 = vadd.f32 %v9531_v12, %v7844_v26  ;;  %v14807_v59 = vld [vmem:[%s15381_s24 + $0xa4] ss:$36 sps:$4 sm:$0xff]   ;;  %v7824_v12 = vunpack.c.l.bf16 %v16882_v56  ;;  %v14808_v26 = vld [vmem:[%s15381_s24 + $0x58] ss:$36 sps:$4 sm:$0xff]  }
 0xcdd   : > { %v16843_v11 = vadd.f32 %v9492_v62, %v9452_v61  ;;  %v9533_v44 = vpop.f32.mrf.mxu0  ;;  %v7823_v61 = vunpack.c.h.bf16 %v16855_v25  ;;  %v14805_v62 = vld [vmem:[%s15381_s24 + $0xa0] ss:$36 sps:$4 sm:$0xff]  }
 0xcde   : > { %v9494_v15 = vpop.f32.mrf.mxu1  ;;  %v9534_v35 = vadd.f32 %v9533_v44, %v7848_v18  ;;  %v14810_v44 = vld [vmem:[%s15381_s24 + $0x5c] ss:$36 sps:$4 sm:$0xff]   ;;  %v9743_v18 = vmax.f32 %v16841_v6, 0.0  ;;  %v14828_v6 = vld [vmem:[%s15381_s24 + $0x644] ss:$36 sps:$4 sm:$0xff]   ;;  %v10880_v25 = vrot.slane %v7824_v12, %v16544_v36 }
 0xcdf   : > { %v9535_v20 = vpop.f32.mrf.mxu0  ;;  %v7856_v15 = vrot.slane %v7823_v61, %v16800_v31 }
 0xce0   : > { %v9495_v48 = vpop.f32.mrf.mxu1  ;;  %v7860_v20 = vrot.slane %v7824_v12, %v16800_v31 }
 0xce1   : > { %v9536_v21 = vpop.f32.mrf.mxu0 }
 0xd1a   : > { %v9572_v16 = vpop.f32.mrf.mxu1 }
 0xd1b   : > { %v9573_v4 = vadd.f32 %v9572_v16, %v9532_v30  ;;  %v9613_v13 = vpop.f32.mrf.mxu0  ;;  %v14813_v30 = vld [vmem:[%s15381_s24 + $0x14] ss:$36 sps:$4 sm:$0xff]  }
 0xd1c   : > { %v9574_v23 = vpop.f32.mrf.mxu1  ;;  %v9614_v37 = vadd.f32 %v9613_v13, %v7852_v34  ;;  %v14819_v34 = vld [vmem:[%s15381_s24 + $0x404] ss:$36 sps:$4 sm:$0xff]  }
 0xd1d   : > { %v9745_v27 = vmax.f32 %v9573_v4, 0.0  ;;  %v16852_v0 = vpop.f32.mrf.mxu0  ;;  %v9575_v40 = vadd.f32 %v9574_v23, %v9534_v35  ;;  %v14817_v35 = vld [vmem:[%s15381_s24 + $0x400] ss:$36 sps:$4 sm:$0xff]  }
 0xd1e   : > { %v9576_v58 = vpop.f32.mrf.mxu1  ;;  %v9616_v16 = vadd.f32 %v16852_v0, %v7856_v15  ;;  %v9744_v0 = vmax.f32 %v16843_v11, 0.0  ;;  %v14820_v11 = vld [vmem:[%s15381_s24 + $0x688] ss:$36 sps:$4 sm:$0xff]  }
 0xd1f   : > { %11155 = vst [vmem:[#allocation3] sm:$0xff] %v9745_v27  ;;  %v9617_v10 = vpop.f32.mrf.mxu0  ;;  %v9746_v28 = vmax.f32 %v9575_v40, 0.0  ;;  %v14834_v40 = vld [vmem:[%s15381_s24 + $0x5fc] ss:$36 sps:$4 sm:$0xff]   ;;  %v14865_v15 = vld [vmem:[%s15381_s24 + $0x8c8] ss:$36 sps:$4 sm:$0xff]  }
 0xd20   : > { %v9577_v32 = vpop.f32.mrf.mxu1  ;;  %v14811_v10 = vld [vmem:[%s15381_s24 + $0x10] ss:$36 sps:$4 sm:$0xff]  }
 0xd21   : > { %v9618_v33 = vpop.f32.mrf.mxu0  ;;  %v14816_v32 = vld [vmem:[%s15381_s24 + $0x44c] ss:$36 sps:$4 sm:$0xff]  }
 0xd3b   : > { %v12975_v38 = vpop.f32.mrf.mxu0 }
 0xd3d   : > { %v12976_v24 = vpop.f32.mrf.mxu0 }
 0xd3e   : > { %v12977_v48 = vadd.f32 %v12976_v24, %v12975_v38 }
 0xd3f   : > { %v12978_v41 = vpop.f32.mrf.mxu0 }
 0xd40   : > { %v9696_v13 = vadd.f32 %v12977_v48, %v7860_v20  ;;  %v14814_v41 = vld [vmem:[%s15381_s24 + $0x448] ss:$36 sps:$4 sm:$0xff]   ;;  %v14871_v48 = vld [vmem:[%s15381_s24 + $0x880] ss:$36 sps:$4 sm:$0xff]  }
 0xd41   : > { %v12979_v60 = vpop.f32.mrf.mxu0  ;;  %v14873_v20 = vld [vmem:[%s15381_s24 + $0x884] ss:$36 sps:$4 sm:$0xff]  }
 0xd42   : > { %v14822_v60 = vld [vmem:[%s15381_s24 + $0x68c] ss:$36 sps:$4 sm:$0xff]  }
 0xd5a   : > { %v9654_v46 = vpop.f32.mrf.mxu1 }
 0xd5b   : > { %v9655_v1 = vadd.f32 %v9654_v46, %v9614_v37  ;;  %v14825_v37 = vld [vmem:[%s15381_s24 + $0x3bc] ss:$36 sps:$4 sm:$0xff]   ;;  %v14831_v46 = vld [vmem:[%s15381_s24 + $0x374] ss:$36 sps:$4 sm:$0xff]  }
 0xd5c   : > { %v9656_v42 = vpop.f32.mrf.mxu1 }
 0xd5d   : > { %v9747_v45 = vmax.f32 %v9655_v1, 0.0  ;;  %v9657_v27 = vadd.f32 %v9656_v42, %v9616_v16  ;;  %v14832_v1 = vld [vmem:[%s15381_s24 + $0x5f8] ss:$36 sps:$4 sm:$0xff]   ;;  %v14829_v42 = vld [vmem:[%s15381_s24 + $0x370] ss:$36 sps:$4 sm:$0xff]  }
 0xd5e   : > { %v9658_v17 = vpop.f32.mrf.mxu1  ;;  %v14883_v16 = vld [vmem:[%s15381_s24 + $0x7f0] ss:$36 sps:$4 sm:$0xff]  }
 0xd5f   : > { %9784 = vmatprep.subr.mxu0 %v9747_v45  ;;  %v9748_v24 = vmax.f32 %v9657_v27, 0.0  ;;  %v14837_v45 = vld [vmem:[%s15381_s24 + $0x32c] ss:$36 sps:$4 sm:$0xff]   ;;  %v14897_v27 = vld [vmem:[%s15381_s24 + $0x764] ss:$36 sps:$4 sm:$0xff]  }
 0xd60   : > { %v9659_v7 = vpop.f32.mrf.mxu1  ;;  %9785 = vmatpush1.msra.mxu0 %v9746_v28  ;;  %v14838_v28 = vld [vmem:[%s15381_s24 + $0x5b0] ss:$36 sps:$4 sm:$0xff]   ;;  %v14835_v17 = vld [vmem:[%s15381_s24 + $0x328] ss:$36 sps:$4 sm:$0xff]  }
 0xd61   : > { %12629 = vmatmul.mubr.msk.f32.vlgmr.msra.gmra.mxu0 %vm9750_vm10, %v15402_v9  ;;  %9929 = vmatprep.subr.mxu0 %v9742_v22  ;;  %v14841_v22 = vld [vmem:[%s15381_s24 + $0x2e0] ss:$36 sps:$4 sm:$0xff]   ;;  %v14846_v7 = vld [vmem:[%s15381_s24 + $0x56c] ss:$36 sps:$4 sm:$0xff]  }
 0xd62   : > { %9930 = vmatpush1.msra.mxu0 %v9741_v52  ;;  %9963 = vmatprep.mubr.f32.mxu0 %v15207_v5  ;;  %v14844_v52 = vld [vmem:[%s15381_s24 + $0x568] ss:$36 sps:$4 sm:$0xff]  }
 0xd63   : > { %10705 = vmatprep.subr.bf16.mxu0 %v14792_v47  ;;  %v14843_v47 = vld [vmem:[%s15381_s24 + $0x2e4] ss:$36 sps:$4 sm:$0xff]  }
 0xd65   : > { %12631 = vmatmul.mubr.msk.f32.vlgmr.msra.gmra.mxu0 %vm9750_vm10, %v15400_v8 }
 0xd66   : > { %10706 = vmatpush1.bf16.msra.mxu0 %v14790_v49  ;;  %v14849_v49 = vld [vmem:[%s15381_s24 + $0x29c] ss:$36 sps:$4 sm:$0xff]  }
 0xd67   : > { %10707 = vmatprep.subr.bf16.mxu0 %v14795_v39  ;;  %v14852_v39 = vld [vmem:[%s15381_s24 + $0x524] ss:$36 sps:$4 sm:$0xff]  }
 0xd6a   : > { %10708 = vmatpush1.bf16.msra.mxu0 %v14793_v14  ;;  %v14847_v14 = vld [vmem:[%s15381_s24 + $0x298] ss:$36 sps:$4 sm:$0xff]  }
 0xd6b   : > { %10709 = vmatprep.subr.bf16.mxu0 %v14798_v50  ;;  %v14850_v50 = vld [vmem:[%s15381_s24 + $0x520] ss:$36 sps:$4 sm:$0xff]  }
 0xd6e   : > { %10710 = vmatpush1.bf16.msra.mxu0 %v14796_v51  ;;  %v14855_v51 = vld [vmem:[%s15381_s24 + $0x254] ss:$36 sps:$4 sm:$0xff]  }
 0xd6f   : > { %10711 = vmatprep.subr.bf16.mxu0 %v14801_v53  ;;  %v14858_v53 = vld [vmem:[%s15381_s24 + $0x4dc] ss:$36 sps:$4 sm:$0xff]  }
 0xd72   : > { %10712 = vmatpush1.bf16.msra.mxu0 %v14799_v54  ;;  %v14853_v54 = vld [vmem:[%s15381_s24 + $0x250] ss:$36 sps:$4 sm:$0xff]  }
 0xd73   : > { %10713 = vmatprep.subr.bf16.mxu0 %v14804_v55  ;;  %v14856_v55 = vld [vmem:[%s15381_s24 + $0x4d8] ss:$36 sps:$4 sm:$0xff]  }
 0xd76   : > { %10714 = vmatpush1.bf16.msra.mxu0 %v14802_v57  ;;  %v14861_v57 = vld [vmem:[%s15381_s24 + $0x494] ss:$36 sps:$4 sm:$0xff]  }
 0xd77   : > { %10715 = vmatprep.subr.bf16.mxu0 %v14807_v59  ;;  %v14864_v59 = vld [vmem:[%s15381_s24 + $0x214] ss:$36 sps:$4 sm:$0xff]  }
 0xd7a   : > { %v12997_v21 = vpop.f32.mrf.mxu1  ;;  %10716 = vmatpush1.bf16.msra.mxu0 %v14805_v62  ;;  %v14859_v62 = vld [vmem:[%s15381_s24 + $0x490] ss:$36 sps:$4 sm:$0xff]  }
 0xd7b   : > { %10717 = vmatprep.subr.bf16.mxu0 %v14810_v44  ;;  %v14867_v44 = vld [vmem:[%s15381_s24 + $0x8cc] ss:$36 sps:$4 sm:$0xff]  }
 0xd7c   : > { %v12998_v4 = vpop.f32.mrf.mxu1 }
 0xd7d   : > { %v12999_v23 = vadd.f32 %v12998_v4, %v12997_v21  ;;  %v14879_v21 = vld [vmem:[%s15381_s24 + $0x83c] ss:$36 sps:$4 sm:$0xff]   ;;  %v14891_v4 = vld [vmem:[%s15381_s24 + $0x7ac] ss:$36 sps:$4 sm:$0xff]  }
 0xd7e   : > { %v13000_v58 = vpop.f32.mrf.mxu1  ;;  %10718 = vmatpush1.bf16.msra.mxu0 %v14808_v26  ;;  %v14877_v26 = vld [vmem:[%s15381_s24 + $0x838] ss:$36 sps:$4 sm:$0xff]  }
 0xd7f   : > { %v9736_v31 = vadd.f32 %v12999_v23, %v9696_v13  ;;  %10719 = vmatprep.subr.bf16.mxu0 %v14813_v30  ;;  %v14885_v30 = vld [vmem:[%s15381_s24 + $0x7f4] ss:$36 sps:$4 sm:$0xff]   ;;  %v14889_v13 = vld [vmem:[%s15381_s24 + $0x7a8] ss:$36 sps:$4 sm:$0xff]   ;;  %v14895_v23 = vld [vmem:[%s15381_s24 + $0x760] ss:$36 sps:$4 sm:$0xff]  }
 0xd80   : > { %v13001_v33 = vpop.f32.mrf.mxu1  ;;  %v14903_v58 = vld [vmem:[%s15381_s24 + $0x71c] ss:$36 sps:$4 sm:$0xff]  }
 0xd81   : > { %v9749_v38 = vmax.f32 %v9736_v31, 0.0  ;;  %v14909_v31 = vld [vmem:[%s15381_s24 + $0x6d4] ss:$36 sps:$4 sm:$0xff]  }
 0xd82   : > { %10720 = vmatpush1.bf16.msra.mxu0 %v14811_v10  ;;  %v14901_v10 = vld [vmem:[%s15381_s24 + $0x718] ss:$36 sps:$4 sm:$0xff]  }
 0xd83   : > { %9855 = vmatprep.subr.mxu1 %v9749_v38  ;;  %10721 = vmatprep.subr.bf16.mxu0 %v14816_v32  ;;  %v14907_v32 = vld [vmem:[%s15381_s24 + $0x6d0] ss:$36 sps:$4 sm:$0xff]  }
 0xd84   : > { %9856 = vmatpush1.msra.mxu1 %v9748_v24  ;;  %v14918_v33 = vld [vmem:[%s15381_s24 + $0x694] ss:$36 sps:$4 sm:$0xff]  }
 0xd85   : > { %12630 = vmatmul.mubr.msk.f32.vlgmr.msra.gmra.mxu1 %vm9750_vm10, %v15402_v9  ;;  %10000 = vmatprep.subr.mxu1 %v9744_v0  ;;  %v14826_v9 = vld [vmem:[%s15381_s24 + $0x640] ss:$36 sps:$4 sm:$0xff]  }
 0xd86   : > { %10001 = vmatpush1.msra.mxu1 %v9743_v18  ;;  %10034 = vmatprep.mubr.f32.mxu1 %v15207_v5  ;;  %v14823_v5 = vld [vmem:[%s15381_s24 + $0x3b8] ss:$36 sps:$4 sm:$0xff]  }
 0xd87   : > { %10722 = vmatpush2.bf16.msra.mxu0 %v14814_v41  ;;  %10746 = vmatprep.subr.bf16.mxu1 %v14822_v60 }
 0xd88   : > { %10723 = vmatprep.subr.bf16.mxu0 %v14819_v34 }
 0xd89   : > { %12632 = vmatmul.mubr.msk.f32.vlgmr.msra.gmra.mxu1 %vm9750_vm10, %v15400_v8  ;;  %v14840_v8 = vld [vmem:[%s15381_s24 + $0x5b4] ss:$36 sps:$4 sm:$0xff]  }
 0xd8a   : > { %10747 = vmatpush1.bf16.msra.mxu1 %v14820_v11 }
 0xd8b   : > { %10724 = vmatpush2.bf16.msra.mxu0 %v14817_v35  ;;  %10748 = vmatprep.subr.bf16.mxu1 %v14828_v6 }
 0xd8c   : > { %10725 = vmatprep.subr.bf16.mxu0 %v14825_v37  ;;  %v14862_v37 = vld [vmem:[%s15381_s24 + $0x210] ss:$36 sps:$4 sm:$0xff]  }
 0xd8e   : > { %10749 = vmatpush1.bf16.msra.mxu1 %v14826_v9  ;;  %v14870_v9 = vld [vmem:[%s15381_s24 + $0x1cc] ss:$36 sps:$4 sm:$0xff]  }
 0xd8f   : > { %10726 = vmatpush2.bf16.msra.mxu0 %v14823_v5  ;;  %10750 = vmatprep.subr.bf16.mxu1 %v14834_v40  ;;  %v14868_v5 = vld [vmem:[%s15381_s24 + $0x1c8] ss:$36 sps:$4 sm:$0xff]  }
 0xd90   : > { %10727 = vmatprep.subr.bf16.mxu0 %v14831_v46  ;;  %v14876_v40 = vld [vmem:[%s15381_s24 + $0x184] ss:$36 sps:$4 sm:$0xff]  }
 0xd91   : > { %v14874_v46 = vld [vmem:[%s15381_s24 + $0x180] ss:$36 sps:$4 sm:$0xff]  }
 0xd92   : > { %10751 = vmatpush1.bf16.msra.mxu1 %v14832_v1  ;;  %v14882_v1 = vld [vmem:[%s15381_s24 + $0x13c] ss:$36 sps:$4 sm:$0xff]  }
 0xd93   : > { %10728 = vmatpush2.bf16.msra.mxu0 %v14829_v42  ;;  %10752 = vmatprep.subr.bf16.mxu1 %v14840_v8  ;;  %v14880_v42 = vld [vmem:[%s15381_s24 + $0x138] ss:$36 sps:$4 sm:$0xff]  }
 0xd94   : > { %10729 = vmatprep.subr.bf16.mxu0 %v14837_v45  ;;  %v14888_v8 = vld [vmem:[%s15381_s24 + $0xf4] ss:$36 sps:$4 sm:$0xff]  }
 0xd95   : > { %v14886_v45 = vld [vmem:[%s15381_s24 + $0xf0] ss:$36 sps:$4 sm:$0xff]  }
 0xd96   : > { %10753 = vmatpush1.bf16.msra.mxu1 %v14838_v28  ;;  %v14894_v28 = vld [vmem:[%s15381_s24 + $0xac] ss:$36 sps:$4 sm:$0xff]  }
 0xd97   : > { %10730 = vmatpush2.bf16.msra.mxu0 %v14835_v17  ;;  %10754 = vmatprep.subr.bf16.mxu1 %v14846_v7  ;;  %v14892_v17 = vld [vmem:[%s15381_s24 + $0xa8] ss:$36 sps:$4 sm:$0xff]   ;;  %v14906_v7 = vld [vmem:[%s15381_s24 + $0x1c] ss:$36 sps:$4 sm:$0xff]  }
 0xd98   : > { %10731 = vmatprep.subr.bf16.mxu0 %v14843_v47  ;;  %v14898_v47 = vld [vmem:[%s15381_s24 + $0x60] ss:$36 sps:$4 sm:$0xff]  }
 0xd9a   : > { %10755 = vmatpush1.bf16.msra.mxu1 %v14844_v52 }
 0xd9b   : > { %10732 = vmatpush2.bf16.msra.mxu0 %v14841_v22  ;;  %10756 = vmatprep.subr.bf16.mxu1 %v14852_v39  ;;  %v14900_v22 = vld [vmem:[%s15381_s24 + $0x64] ss:$36 sps:$4 sm:$0xff]   ;;  %v14904_v39 = vld [vmem:[%s15381_s24 + $0x18] ss:$36 sps:$4 sm:$0xff]  }
 0xd9c   : > { %10733 = vmatprep.subr.bf16.mxu0 %v14849_v49 }
 0xd9e   : > { %10757 = vmatpush1.bf16.msra.mxu1 %v14850_v50  ;;  %v14912_v50 = vld [vmem:[%s15381_s24 + $0x454] ss:$36 sps:$4 sm:$0xff]  }
 0xd9f   : > { %10734 = vmatpush2.bf16.msra.mxu0 %v14847_v14  ;;  %10758 = vmatprep.subr.bf16.mxu1 %v14858_v53 }
 0xda0   : > { %10735 = vmatprep.subr.bf16.mxu0 %v14855_v51 }
 0xda2   : > { %10759 = vmatpush1.bf16.msra.mxu1 %v14856_v55  ;;  %v14910_v55 = vld [vmem:[%s15381_s24 + $0x450] ss:$36 sps:$4 sm:$0xff]  }
 0xda3   : > { %10736 = vmatpush2.bf16.msra.mxu0 %v14853_v54  ;;  %10760 = vmatprep.subr.bf16.mxu1 %v14861_v57 }
 0xda4   : > { %10787 = vmatprep.subr.bf16.mxu0 %v14864_v59  ;;  %v14915_v59 = vld [vmem:[%s15381_s24 + $0x40c] ss:$36 sps:$4 sm:$0xff]  }
 0xda6   : > { %10761 = vmatpush1.bf16.msra.mxu1 %v14859_v62 }
 0xda7   : > { %10762 = vmatprep.subr.bf16.mxu1 %v14867_v44 }
 0xdaa   : > { %10763 = vmatpush2.bf16.msra.mxu1 %v14865_v15  ;;  %v14913_v15 = vld [vmem:[%s15381_s24 + $0x408] ss:$36 sps:$4 sm:$0xff]  }
 0xdab   : > { %10764 = vmatprep.subr.bf16.mxu1 %v14873_v20  ;;  %v14916_v20 = vld [vmem:[%s15381_s24 + $0x690] ss:$36 sps:$4 sm:$0xff]  }
 0xdae   : > { %10765 = vmatpush2.bf16.msra.mxu1 %v14871_v48 }
 0xdaf   : > { %10766 = vmatprep.subr.bf16.mxu1 %v14879_v21  ;;  %v14921_v21 = vld [vmem:[%s15381_s24 + $0x3c4] ss:$36 sps:$4 sm:$0xff]  }
 0xdb2   : > { %10767 = vmatpush2.bf16.msra.mxu1 %v14877_v26  ;;  %v14924_v26 = vld [vmem:[%s15381_s24 + $0x64c] ss:$36 sps:$4 sm:$0xff]  }
 0xdb3   : > { %10768 = vmatprep.subr.bf16.mxu1 %v14885_v30  ;;  %v14922_v30 = vld [vmem:[%s15381_s24 + $0x648] ss:$36 sps:$4 sm:$0xff]  }
 0xdb6   : > { %10769 = vmatpush2.bf16.msra.mxu1 %v14883_v16  ;;  %v14927_v16 = vld [vmem:[%s15381_s24 + $0x37c] ss:$36 sps:$4 sm:$0xff]  }
 0xdb7   : > { %10770 = vmatprep.subr.bf16.mxu1 %v14891_v4  ;;  %v14930_v4 = vld [vmem:[%s15381_s24 + $0x604] ss:$36 sps:$4 sm:$0xff]  }
 0xdba   : > { %10771 = vmatpush2.bf16.msra.mxu1 %v14889_v13  ;;  %v14925_v13 = vld [vmem:[%s15381_s24 + $0x378] ss:$36 sps:$4 sm:$0xff]  }
 0xdbb   : > { %10772 = vmatprep.subr.bf16.mxu1 %v14897_v27  ;;  %v14933_v27 = vld [vmem:[%s15381_s24 + $0x334] ss:$36 sps:$4 sm:$0xff]  }
 0xdbe   : > { %10773 = vmatpush2.bf16.msra.mxu1 %v14895_v23  ;;  %v14928_v23 = vld [vmem:[%s15381_s24 + $0x600] ss:$36 sps:$4 sm:$0xff]  }
 0xdbf   : > { %10774 = vmatprep.subr.bf16.mxu1 %v14903_v58  ;;  %v14936_v58 = vld [vmem:[%s15381_s24 + $0x5bc] ss:$36 sps:$4 sm:$0xff]  }
 0xdc2   : > { %10775 = vmatpush2.bf16.msra.mxu1 %v14901_v10  ;;  %v14931_v10 = vld [vmem:[%s15381_s24 + $0x330] ss:$36 sps:$4 sm:$0xff]  }
 0xdc3   : > { %10776 = vmatprep.subr.bf16.mxu1 %v14909_v31  ;;  %v14934_v31 = vld [vmem:[%s15381_s24 + $0x5b8] ss:$36 sps:$4 sm:$0xff]  }
 0xdc6   : > { %10777 = vmatpush2.bf16.msra.mxu1 %v14907_v32  ;;  %v14939_v32 = vld [vmem:[%s15381_s24 + $0x2ec] ss:$36 sps:$4 sm:$0xff]  }
 0xdc7   : > { %10828 = vmatprep.subr.bf16.mxu1 %v14918_v33  ;;  %v14942_v33 = vld [vmem:[%s15381_s24 + $0x574] ss:$36 sps:$4 sm:$0xff]  }
 0xe21   : > { %v9820_v38 = vpop.f32.mrf.mxu0 }
 0xe23   : > { %v9822_v24 = vpop.f32.mrf.mxu0 }
 0xe25   : > { %v9965_v0 = vpop.f32.mrf.mxu0 }
 0xe26   : > { %v9966_v41 = vadd.f32 %v9965_v0, %v9820_v38  ;;  %v14937_v38 = vld [vmem:[%s15381_s24 + $0x2e8] ss:$36 sps:$4 sm:$0xff]  }
 0xe27   : > { %v9967_v60 = vpop.f32.mrf.mxu0  ;;  %v14945_v0 = vld [vmem:[%s15381_s24 + $0x2a4] ss:$36 sps:$4 sm:$0xff]  }
 0xe28   : > { %v10041_v18 = vmul.f32 %v15414_v19, %v9966_v41  ;;  %v9968_v34 = vadd.f32 %v9967_v60, %v9822_v24  ;;  %v14940_v24 = vld [vmem:[%s15381_s24 + $0x570] ss:$36 sps:$4 sm:$0xff]   ;;  %v14943_v60 = vld [vmem:[%s15381_s24 + $0x2a0] ss:$36 sps:$4 sm:$0xff]  }
 0xe29   : > { %v14948_v41 = vld [vmem:[%s15381_s24 + $0x52c] ss:$36 sps:$4 sm:$0xff]  }
 0xe2a   : > { %v10042_v11 = vmul.f32 %v15414_v19, %v9968_v34  ;;  %v16959_v35 = vpack.c.bf16 %v10041_v18, %v10041_v18  ;;  %v14946_v18 = vld [vmem:[%s15381_s24 + $0x528] ss:$36 sps:$4 sm:$0xff]   ;;  %v14951_v34 = vld [vmem:[%s15381_s24 + $0x25c] ss:$36 sps:$4 sm:$0xff]  }
 0xe2c   : > { %v10046_v6 = vpack.c.bf16 %v10042_v11, %v10042_v11  ;;  %v14954_v11 = vld [vmem:[%s15381_s24 + $0x4e4] ss:$36 sps:$4 sm:$0xff]  }
 0xe2e   : > { %10737 = vmatprep.mubr.bf16.mxu0 %v10046_v6 }
 0xe2f   : > { %10738 = vmatmul.mubr.bf16.vlgmr.msra.gmra.mxu0 %v16959_v35 }
 0xe30   : > { %10788 = vmatpush1.bf16.msra.mxu0 %v14862_v37  ;;  %10819 = vmatprep.mubr.bf16.mxu0 %v10046_v6  ;;  %v14949_v6 = vld [vmem:[%s15381_s24 + $0x258] ss:$36 sps:$4 sm:$0xff]   ;;  %v14952_v37 = vld [vmem:[%s15381_s24 + $0x4e0] ss:$36 sps:$4 sm:$0xff]  }
 0xe31   : > { %10789 = vmatprep.subr.bf16.mxu0 %v14870_v9  ;;  %v14957_v9 = vld [vmem:[%s15381_s24 + $0x49c] ss:$36 sps:$4 sm:$0xff]  }
 0xe34   : > { %10790 = vmatpush1.bf16.msra.mxu0 %v14868_v5  ;;  %v14982_v5 = vld [vmem:[%s15381_s24 + $0x458] ss:$36 sps:$4 sm:$0xff]  }
 0xe35   : > { %10791 = vmatprep.subr.bf16.mxu0 %v14876_v40  ;;  %v14955_v40 = vld [vmem:[%s15381_s24 + $0x498] ss:$36 sps:$4 sm:$0xff]  }
 0xe38   : > { %10792 = vmatpush1.bf16.msra.mxu0 %v14874_v46  ;;  %v14983_v46 = vld [vmem:[%s15381_s24 + $0x218] ss:$36 sps:$4 sm:$0xff]  }
 0xe39   : > { %10793 = vmatprep.subr.bf16.mxu0 %v14882_v1  ;;  %v14960_v1 = vld [vmem:[%s15381_s24 + $0x8d4] ss:$36 sps:$4 sm:$0xff]  }
 0xe3c   : > { %10794 = vmatpush1.bf16.msra.mxu0 %v14880_v42  ;;  %v14984_v42 = vld [vmem:[%s15381_s24 + $0x410] ss:$36 sps:$4 sm:$0xff]  }
 0xe3d   : > { %10795 = vmatprep.subr.bf16.mxu0 %v14888_v8  ;;  %v14958_v8 = vld [vmem:[%s15381_s24 + $0x8d0] ss:$36 sps:$4 sm:$0xff]  }
 0xe40   : > { %10796 = vmatpush1.bf16.msra.mxu0 %v14886_v45  ;;  %v14985_v45 = vld [vmem:[%s15381_s24 + $0x1d0] ss:$36 sps:$4 sm:$0xff]  }
 0xe41   : > { %10797 = vmatprep.subr.bf16.mxu0 %v14894_v28  ;;  %v14963_v28 = vld [vmem:[%s15381_s24 + $0x88c] ss:$36 sps:$4 sm:$0xff]  }
 0xe44   : > { %10798 = vmatpush1.bf16.msra.mxu0 %v14892_v17  ;;  %v14986_v17 = vld [vmem:[%s15381_s24 + $0x3c8] ss:$36 sps:$4 sm:$0xff]  }
 0xe45   : > { %v9891_v52 = vpop.f32.mrf.mxu1  ;;  %10799 = vmatprep.subr.bf16.mxu0 %v14900_v22  ;;  %v14961_v22 = vld [vmem:[%s15381_s24 + $0x888] ss:$36 sps:$4 sm:$0xff]  }
 0xe47   : > { %v9893_v49 = vpop.f32.mrf.mxu1 }
 0xe48   : > { %10800 = vmatpush1.bf16.msra.mxu0 %v14898_v47  ;;  %v14987_v47 = vld [vmem:[%s15381_s24 + $0x188] ss:$36 sps:$4 sm:$0xff]  }
 0xe49   : > { %v10036_v14 = vpop.f32.mrf.mxu1  ;;  %10801 = vmatprep.subr.bf16.mxu0 %v14906_v7  ;;  %v14964_v7 = vld [vmem:[%s15381_s24 + $0x840] ss:$36 sps:$4 sm:$0xff]  }
 0xe4a   : > { %v10037_v51 = vadd.f32 %v10036_v14, %v9891_v52  ;;  %v14988_v52 = vld [vmem:[%s15381_s24 + $0x380] ss:$36 sps:$4 sm:$0xff]   ;;  %v14990_v14 = vld [vmem:[%s15381_s24 + $0x338] ss:$36 sps:$4 sm:$0xff]  }
 0xe4b   : > { %v10038_v53 = vpop.f32.mrf.mxu1 }
 0xe4c   : > { %v10039_v54 = vadd.f32 %v10038_v53, %v9893_v49  ;;  %10802 = vmatpush1.bf16.msra.mxu0 %v14904_v39  ;;  %v10043_v57 = vmul.f32 %v15414_v19, %v10037_v51  ;;  %v14989_v49 = vld [vmem:[%s15381_s24 + $0x140] ss:$36 sps:$4 sm:$0xff]   ;;  %v14991_v51 = vld [vmem:[%s15381_s24 + $0xf8] ss:$36 sps:$4 sm:$0xff]  }
 0xe4d   : > { %10803 = vmatprep.subr.bf16.mxu0 %v14912_v50  ;;  %v14969_v39 = vld [vmem:[%s15381_s24 + $0x7fc] ss:$36 sps:$4 sm:$0xff]   ;;  %v14972_v53 = vld [vmem:[%s15381_s24 + $0x7b4] ss:$36 sps:$4 sm:$0xff]  }
 0xe4e   : > { %v10044_v62 = vmul.f32 %v15414_v19, %v10039_v54  ;;  %v16984_v48 = vpack.c.bf16 %v10043_v57, %v10043_v57  ;;  %v14919_v19 = vld [vmem:[%s15381_s24 + $0x3c0] ss:$36 sps:$4 sm:$0xff]   ;;  %v14967_v50 = vld [vmem:[%s15381_s24 + $0x7f8] ss:$36 sps:$4 sm:$0xff]   ;;  %v14992_v54 = vld [vmem:[%s15381_s24 + $0x2f0] ss:$36 sps:$4 sm:$0xff]  }
 0xe4f   : > { %v14993_v57 = vld [vmem:[%s15381_s24 + $0xb0] ss:$36 sps:$4 sm:$0xff]  }
 0xe50   : > { %v10048_v44 = vpack.c.bf16 %v10044_v62, %v10044_v62  ;;  %10804 = vmatpush2.bf16.msra.mxu0 %v14910_v55  ;;  %v14970_v55 = vld [vmem:[%s15381_s24 + $0x7b0] ss:$36 sps:$4 sm:$0xff]   ;;  %v14973_v62 = vld [vmem:[%s15381_s24 + $0x768] ss:$36 sps:$4 sm:$0xff]  }
 0xe51   : > { %10805 = vmatprep.subr.bf16.mxu0 %v14915_v59  ;;  %v14975_v59 = vld [vmem:[%s15381_s24 + $0x76c] ss:$36 sps:$4 sm:$0xff]  }
 0xe52   : > { %10778 = vmatprep.mubr.bf16.mxu1 %v10048_v44 }
 0xe53   : > { %10779 = vmatmul.mubr.bf16.vlgmr.msra.gmra.mxu1 %v16984_v48 }
 0xe54   : > { %10806 = vmatpush2.bf16.msra.mxu0 %v14913_v15  ;;  %10829 = vmatpush1.bf16.msra.mxu1 %v14916_v20  ;;  %v14976_v15 = vld [vmem:[%s15381_s24 + $0x720] ss:$36 sps:$4 sm:$0xff]  }
 0xe55   : > { %10860 = vmatprep.mubr.bf16.mxu1 %v10048_v44  ;;  %10807 = vmatprep.subr.bf16.mxu0 %v14921_v21  ;;  %v14978_v44 = vld [vmem:[%s15381_s24 + $0x724] ss:$36 sps:$4 sm:$0xff]   ;;  %v14981_v20 = vld [vmem:[%s15381_s24 + $0x6dc] ss:$36 sps:$4 sm:$0xff]  }
 0xe56   : > { %10830 = vmatprep.subr.bf16.mxu1 %v14924_v26  ;;  %v14979_v21 = vld [vmem:[%s15381_s24 + $0x6d8] ss:$36 sps:$4 sm:$0xff]   ;;  %v14994_v26 = vld [vmem:[%s15381_s24 + $0x2a8] ss:$36 sps:$4 sm:$0xff]  }
 0xe58   : > { %10808 = vmatpush2.bf16.msra.mxu0 %v14919_v19  ;;  %10831 = vmatpush1.bf16.msra.mxu1 %v14922_v30  ;;  %v14995_v19 = vld [vmem:[%s15381_s24 + $0x68] ss:$36 sps:$4 sm:$0xff]   ;;  %v14996_v30 = vld [vmem:[%s15381_s24 + $0x260] ss:$36 sps:$4 sm:$0xff]  }
 0xe59   : > { %10809 = vmatprep.subr.bf16.mxu0 %v14927_v16  ;;  %10832 = vmatprep.subr.bf16.mxu1 %v14930_v4  ;;  %v14997_v16 = vld [vmem:[%s15381_s24 + $0x20] ss:$36 sps:$4 sm:$0xff]   ;;  %v14998_v4 = vld [vmem:[%s15381_s24 + $0x8d8] ss:$36 sps:$4 sm:$0xff]  }
 0xe5c   : > { %10810 = vmatpush2.bf16.msra.mxu0 %v14925_v13  ;;  %10833 = vmatpush1.bf16.msra.mxu1 %v14928_v23  ;;  %v14999_v13 = vld [vmem:[%s15381_s24 + $0x698] ss:$36 sps:$4 sm:$0xff]   ;;  %v15000_v23 = vld [vmem:[%s15381_s24 + $0x890] ss:$36 sps:$4 sm:$0xff]  }
 0xe5d   : > { %10811 = vmatprep.subr.bf16.mxu0 %v14933_v27  ;;  %10834 = vmatprep.subr.bf16.mxu1 %v14936_v58  ;;  %v15002_v27 = vld [vmem:[%s15381_s24 + $0x848] ss:$36 sps:$4 sm:$0xff]  }
 0xe5e   : > { %v15003_v58 = vld [vmem:[%s15381_s24 + $0x608] ss:$36 sps:$4 sm:$0xff]  }
 0xe60   : > { %10812 = vmatpush2.bf16.msra.mxu0 %v14931_v10  ;;  %10835 = vmatpush1.bf16.msra.mxu1 %v14934_v31  ;;  %v15004_v10 = vld [vmem:[%s15381_s24 + $0x800] ss:$36 sps:$4 sm:$0xff]  }
 0xe61   : > { %10813 = vmatprep.subr.bf16.mxu0 %v14939_v32  ;;  %10836 = vmatprep.subr.bf16.mxu1 %v14942_v33  ;;  %v15005_v31 = vld [vmem:[%s15381_s24 + $0x5c0] ss:$36 sps:$4 sm:$0xff]   ;;  %v15006_v32 = vld [vmem:[%s15381_s24 + $0x7b8] ss:$36 sps:$4 sm:$0xff]  }
 0xe62   : > { %v15007_v33 = vld [vmem:[%s15381_s24 + $0x578] ss:$36 sps:$4 sm:$0xff]  }
 0xe64   : > { %10814 = vmatpush2.bf16.msra.mxu0 %v14937_v38  ;;  %10837 = vmatpush1.bf16.msra.mxu1 %v14940_v24  ;;  %v15008_v38 = vld [vmem:[%s15381_s24 + $0x770] ss:$36 sps:$4 sm:$0xff]  }
 0xe65   : > { %10815 = vmatprep.subr.bf16.mxu0 %v14945_v0  ;;  %10838 = vmatprep.subr.bf16.mxu1 %v14948_v41  ;;  %v15009_v24 = vld [vmem:[%s15381_s24 + $0x530] ss:$36 sps:$4 sm:$0xff]   ;;  %v15010_v0 = vld [vmem:[%s15381_s24 + $0x728] ss:$36 sps:$4 sm:$0xff]  }
 0xe66   : > { %v15011_v41 = vld [vmem:[%s15381_s24 + $0x4e8] ss:$36 sps:$4 sm:$0xff]  }
 0xe68   : > { %10816 = vmatpush2.bf16.msra.mxu0 %v14943_v60  ;;  %10839 = vmatpush1.bf16.msra.mxu1 %v14946_v18  ;;  %v15012_v60 = vld [vmem:[%s15381_s24 + $0x6e0] ss:$36 sps:$4 sm:$0xff]  }
 0xe69   : > { %10817 = vmatprep.subr.bf16.mxu0 %v14951_v34  ;;  %10840 = vmatprep.subr.bf16.mxu1 %v14954_v11  ;;  %v15013_v18 = vld [vmem:[%s15381_s24 + $0x4a0] ss:$36 sps:$4 sm:$0xff]  }
 0xe6c   : > { %10818 = vmatpush2.bf16.msra.mxu0 %v14949_v6  ;;  %10841 = vmatpush1.bf16.msra.mxu1 %v14952_v37 }
 0xe6d   : > { %10842 = vmatprep.subr.bf16.mxu1 %v14957_v9  ;;  %13003 = vmatprep.subr.bf16.mxu0 %v14982_v5  ;;  %v10052_v9 = vrot.slane %v7820_v29, %v16544_v36  ;;  %v10056_v5 = vrot.slane %v7821_v43, %v16544_v36  ;;  %v10064_v43 = vrot.slane %v7823_v61, %v16544_v36 }
 0xe6f   : > { %10820 = vmatmul.mubr.bf16.vlgmr.msra.gmra.mxu0 %v16959_v35  ;;  %v14966_v35 = vld [vmem:[%s15381_s24 + $0x844] ss:$36 sps:$4 sm:$0xff]  }
 0xe70   : > { %10843 = vmatpush1.bf16.msra.mxu1 %v14955_v40  ;;  %13004 = vmatpush3.bf16.msra.mxu0 %v14983_v46 }
 0xe71   : > { %10844 = vmatprep.subr.bf16.mxu1 %v14960_v1  ;;  %13005 = vmatprep.subr.bf16.mxu0 %v14984_v42 }
 0xe74   : > { %10845 = vmatpush2.bf16.msra.mxu1 %v14958_v8  ;;  %13006 = vmatpush3.bf16.msra.mxu0 %v14985_v45 }
 0xe75   : > { %10846 = vmatprep.subr.bf16.mxu1 %v14963_v28  ;;  %13007 = vmatprep.subr.bf16.mxu0 %v14986_v17 }
 0xe78   : > { %10847 = vmatpush2.bf16.msra.mxu1 %v14961_v22  ;;  %13008 = vmatpush3.bf16.msra.mxu0 %v14987_v47 }
 0xe79   : > { %10848 = vmatprep.subr.bf16.mxu1 %v14966_v35  ;;  %13009 = vmatprep.subr.bf16.mxu0 %v14988_v52 }
 0xe7c   : > { %10849 = vmatpush2.bf16.msra.mxu1 %v14964_v7  ;;  %13010 = vmatpush3.bf16.msra.mxu0 %v14989_v49 }
 0xe7d   : > { %10850 = vmatprep.subr.bf16.mxu1 %v14969_v39  ;;  %13011 = vmatprep.subr.bf16.mxu0 %v14990_v14 }
 0xe80   : > { %10851 = vmatpush2.bf16.msra.mxu1 %v14967_v50  ;;  %13012 = vmatpush3.bf16.msra.mxu0 %v14991_v51 }
 0xe81   : > { %10852 = vmatprep.subr.bf16.mxu1 %v14972_v53  ;;  %13013 = vmatprep.subr.bf16.mxu0 %v14992_v54 }
 0xe84   : > { %10853 = vmatpush2.bf16.msra.mxu1 %v14970_v55  ;;  %13014 = vmatpush3.bf16.msra.mxu0 %v14993_v57 }
 0xe85   : > { %10854 = vmatprep.subr.bf16.mxu1 %v14975_v59  ;;  %13015 = vmatprep.subr.bf16.mxu0 %v14994_v26 }
 0xe88   : > { %10855 = vmatpush2.bf16.msra.mxu1 %v14973_v62  ;;  %13016 = vmatpush3.bf16.msra.mxu0 %v14995_v19 }
 0xe89   : > { %10856 = vmatprep.subr.bf16.mxu1 %v14978_v44  ;;  %13017 = vmatprep.subr.bf16.mxu0 %v14996_v30 }
 0xe8c   : > { %10857 = vmatpush2.bf16.msra.mxu1 %v14976_v15  ;;  %13018 = vmatpush3.bf16.msra.mxu0 %v14997_v16 }
 0xe8d   : > { %10858 = vmatprep.subr.bf16.mxu1 %v14981_v20 }
 0xe90   : > { %10859 = vmatpush2.bf16.msra.mxu1 %v14979_v21 }
 0xe91   : > { %13025 = vmatprep.subr.bf16.mxu1 %v14998_v4 }
 0xe93   : > { %10861 = vmatmul.mubr.bf16.vlgmr.msra.gmra.mxu1 %v16984_v48  ;;  %v15001_v48 = vld [vmem:[%s15381_s24 + $0x650] ss:$36 sps:$4 sm:$0xff]  }
 0xe94   : > { %13026 = vmatpush3.bf16.msra.mxu1 %v14999_v13 }
 0xe95   : > { %13027 = vmatprep.subr.bf16.mxu1 %v15000_v23 }
 0xe98   : > { %13028 = vmatpush3.bf16.msra.mxu1 %v15001_v48 }
 0xe99   : > { %13029 = vmatprep.subr.bf16.mxu1 %v15002_v27 }
 0xe9c   : > { %13030 = vmatpush3.bf16.msra.mxu1 %v15003_v58 }
 0xe9d   : > { %13031 = vmatprep.subr.bf16.mxu1 %v15004_v10 }
 0xea0   : > { %13032 = vmatpush3.bf16.msra.mxu1 %v15005_v31 }
 0xea1   : > { %13033 = vmatprep.subr.bf16.mxu1 %v15006_v32 }
 0xea4   : > { %13034 = vmatpush3.bf16.msra.mxu1 %v15007_v33 }
 0xea5   : > { %13035 = vmatprep.subr.bf16.mxu1 %v15008_v38 }
 0xea8   : > { %13036 = vmatpush3.bf16.msra.mxu1 %v15009_v24 }
 0xea9   : > { %13037 = vmatprep.subr.bf16.mxu1 %v15010_v0 }
 0xeac   : > { %13038 = vmatpush3.bf16.msra.mxu1 %v15011_v41 }
 0xead   : > { %13039 = vmatprep.subr.bf16.mxu1 %v15012_v60 }
 0xeb0   : > { %13040 = vmatpush3.bf16.msra.mxu1 %v15013_v18 }
 0xeef   : > { %v10739_v34 = vpop.f32.mrf.mxu0 }
 0xef0   : > { %v10740_v40 = vadd.f32 %v10739_v34, %v10052_v9 }
 0xef1   : > { %v10741_v11 = vpop.f32.mrf.mxu0 }
 0xef2   : > { %v10742_v1 = vadd.f32 %v10741_v11, %v10056_v5 }
 0xef3   : > { %v10743_v6 = vpop.f32.mrf.mxu0 }
 0xef5   : > { %v10744_v37 = vpop.f32.mrf.mxu0 }
 0xf13   : > { %v10780_v46 = vpop.f32.mrf.mxu1 }
 0xf14   : > { %v10781_v42 = vadd.f32 %v10780_v46, %v10740_v40 }
 0xf15   : > { %v10782_v8 = vpop.f32.mrf.mxu1 }
 0xf16   : > { %v10783_v45 = vadd.f32 %v10782_v8, %v10742_v1  ;;  %v10869_v28 = vmax.f32 %v10781_v42, 0.0 }
 0xf17   : > { %v10784_v17 = vpop.f32.mrf.mxu1 }
 0xf18   : > { %v10870_v22 = vmax.f32 %v10783_v45, 0.0  ;;  %v10873_v52 = vpack.c.bf16 %v10869_v28, %v10869_v28 }
 0xf19   : > { %v10785_v47 = vpop.f32.mrf.mxu1 }
 0xf1a   : > { %v10874_v35 = vpack.c.bf16 %v10870_v22, %v10870_v22 }
 0xf1c   : > { %11105 = vmatprep.mubr.bf16.mxu0 %v10874_v35 }
 0xf1d   : > { %11106 = vmatmul.mubr.bf16.vlgmr.msra.gmra.mxu0 %v10873_v52 }
 0xf2f   : > { %v10821_v7 = vpop.f32.mrf.mxu0 }
 0xf30   : > { %v10822_v14 = vadd.f32 %v10821_v7, %v10060_v2 }
 0xf31   : > { %v10823_v29 = vpop.f32.mrf.mxu0 }
 0xf32   : > { %v10824_v51 = vadd.f32 %v10823_v29, %v10064_v43 }
 0xf33   : > { %v10825_v49 = vpop.f32.mrf.mxu0 }
 0xf35   : > { %v10826_v39 = vpop.f32.mrf.mxu0 }
 0xf53   : > { %v10862_v50 = vpop.f32.mrf.mxu1 }
 0xf54   : > { %v10863_v53 = vadd.f32 %v10862_v50, %v10822_v14 }
 0xf55   : > { %v10864_v54 = vpop.f32.mrf.mxu1 }
 0xf56   : > { %v10865_v55 = vadd.f32 %v10864_v54, %v10824_v51  ;;  %v10871_v57 = vmax.f32 %v10863_v53, 0.0 }
 0xf57   : > { %v10866_v59 = vpop.f32.mrf.mxu1 }
 0xf58   : > { %v10872_v62 = vmax.f32 %v10865_v55, 0.0  ;;  %v10875_v20 = vpack.c.bf16 %v10871_v57, %v10871_v57 }
 0xf59   : > { %v10867_v44 = vpop.f32.mrf.mxu1 }
 0xf5a   : > { %v10876_v15 = vpack.c.bf16 %v10872_v62, %v10872_v62 }
 0xf5c   : > { %11145 = vmatprep.mubr.bf16.mxu1 %v10876_v15 }
 0xf5d   : > { %11146 = vmatmul.mubr.bf16.vlgmr.msra.gmra.mxu1 %v10875_v20 }
 0xfdd   : > { %v13019_v21 = vpop.f32.mrf.mxu0 }
 0xfdf   : > { %v13020_v63 = vpop.f32.mrf.mxu0 }
 0xfe0   : > { %v13021_v61 = vadd.f32 %v13020_v63, %v13019_v21 }
 0xfe1   : > { %v13022_v26 = vpop.f32.mrf.mxu0 }
 0xfe2   : > { %v11108_v4 = vadd.f32 %v13021_v61, %v10880_v25 }
 0xfe3   : > { %v13023_v19 = vpop.f32.mrf.mxu0 }
0x101d   : > { %v13041_v30 = vpop.f32.mrf.mxu1 }
0x101f   : > { %v13042_v16 = vpop.f32.mrf.mxu1 }
0x1020   : > { %v13043_v13 = vadd.f32 %v13042_v16, %v13041_v30 }
0x1021   : > { %v13044_v23 = vpop.f32.mrf.mxu1 }
0x1022   : > { %v11148_v48 = vadd.f32 %v13043_v13, %v11108_v4 }
0x1023   : > { %v13045_v27 = vpop.f32.mrf.mxu1 }
0x1024   : > { %v11153_v58 = vmax.f32 %v11148_v48, 0.0 }
0x1026   : > { %11154 = vst [vmem:[#allocation2] sm:$0x3f] %v11153_v58 }
0x1027 PF: > { %p12793_p9 = scmp.ne.s32.totalorder %s15272_s28, 4 }
0x1029   : > { %11159 = sbr.rel (%p12793_p9) target bundleno = 4774 (0x12a6), region = 72 }
0x102e   : > { %v15014_v10 = vld [vmem:[#allocation7 + $0xc0] sm:$0xff]   ;;  %v15210_v31 = vmov 0.0   ;;  %v15015_v36 = vld [vmem:[#allocation7 + $0xb8] sm:$0xff]   ;;  %vm15211_vm11 = vmmov 0   ;;  %v15016_v56 = vld [vmem:[#allocation7 + $0xb0] sm:$0xff]   ;;  %v11215_v22 = vsub.s32 0, %v15387_v3 }
0x102f   : > { %13177 = vmatprep.subr.bf16.mxu0 %v15210_v31  ;;  %13197 = vmatprep.subr.bf16.mxu1 %v15210_v31  ;;  %v15022_v12 = vld [vmem:[#allocation7 + $0x100] sm:$0xff]   ;;  %v15017_v32 = vld [vmem:[#allocation7 + $0xa8] sm:$0xff]   ;;  %v15023_v33 = vld [vmem:[#allocation7 + $0xf8] sm:$0xff]   ;;  %v11311_v51 = vsub.s32 1, %v15387_v3  ;;  %v11408_v26 = vsub.s32 2, %v15387_v3 }
0x1030   : > { %13178 = vmatpush3.bf16.msra.mxu0 %v15014_v10  ;;  %13193 = vmatprep.mubr.msk.bf16.mxu0 %vm15211_vm11, %v15210_v31  ;;  %v15018_v38 = vld [vmem:[#allocation7 + $0xa0] sm:$0xff]   ;;  %v15024_v24 = vld [vmem:[#allocation7 + $0xf0] sm:$0xff]   ;;  %v15019_v0 = vld [vmem:[#allocation7 + $0x98] sm:$0xff]  }
0x1031   : > { %13179 = vmatprep.subr.bf16.mxu0 %v15210_v31  ;;  %13213 = vmatprep.mubr.msk.bf16.mxu1 %vm15211_vm11, %v15210_v31  ;;  %v15025_v41 = vld [vmem:[#allocation7 + $0xe8] sm:$0xff]   ;;  %v15020_v60 = vld [vmem:[#allocation7 + $0x90] sm:$0xff]   ;;  %v15026_v18 = vld [vmem:[#allocation7 + $0xe0] sm:$0xff]  }
0x1032   : > { %13198 = vmatpush3.bf16.msra.mxu1 %v15022_v12  ;;  %v15021_v34 = vld [vmem:[#allocation7 + $0x88] sm:$0xff]   ;;  %v15027_v6 = vld [vmem:[#allocation7 + $0xd8] sm:$0xff]   ;;  %v15028_v9 = vld [vmem:[#allocation7 + $0xd0] sm:$0xff]  }
0x1033   : > { %13199 = vmatprep.subr.bf16.mxu1 %v15210_v31  ;;  %v11210_v11 = vld [vmem:[#allocation3] sm:$0xff]  ;;  %v15030_v40 = vld [vmem:[#allocation7 + $0x140] sm:$0xff]   ;;  %v15031_v46 = vld [vmem:[#allocation7 + $0x138] sm:$0xff]  }
0x1034   : > { %13180 = vmatpush3.bf16.msra.mxu0 %v15015_v36  ;;  %v11211_v37 = vpack.c.bf16 %v11210_v11, %v11210_v11  ;;  %v15029_v5 = vld [vmem:[#allocation7 + $0xc8] sm:$0xff]   ;;  %v15032_v1 = vld [vmem:[#allocation7 + $0x130] sm:$0xff]   ;;  %v15034_v8 = vld [vmem:[#allocation7 + $0x120] sm:$0xff]  }
0x1035   : > { %13181 = vmatprep.subr.bf16.mxu0 %v15210_v31  ;;  %v15033_v42 = vld [vmem:[#allocation7 + $0x128] sm:$0xff]   ;;  %v15035_v45 = vld [vmem:[#allocation7 + $0x118] sm:$0xff]   ;;  %v15036_v14 = vld [vmem:[#allocation7 + $0x110] sm:$0xff]  }
0x1036   : > { %13200 = vmatpush3.bf16.msra.mxu1 %v15023_v33  ;;  %v11208_v28 = vld [vmem:[#allocation7 + $0x148] sm:$0x1]  ;;  %v11209_v21 = vld [vmem:[#allocation7 + $0x148] sm:$0x2] }
0x1037   : > { %13201 = vmatprep.subr.bf16.mxu1 %v15210_v31  ;;  %v11212_v17 = vunpack.c.l.bf16 %v11208_v28  ;;  %v15037_v50 = vld [vmem:[#allocation7 + $0x108] sm:$0xff]   ;;  %v11405_v63 = vunpack.c.l.bf16 %v11209_v21 }
0x1038   : > { %13182 = vmatpush3.bf16.msra.mxu0 %v15016_v56 }
0x1039   : > { %13183 = vmatprep.subr.bf16.mxu0 %v15210_v31  ;;  %v11216_v47 = vrot.slane %v11212_v17, %v11215_v22  ;;  %v11312_v53 = vrot.slane %v11212_v17, %v11311_v51  ;;  %v11409_v19 = vrot.slane %v11405_v63, %v11408_v26 }
0x103a   : > { %13202 = vmatpush3.bf16.msra.mxu1 %v15024_v24 }
0x103b   : > { %13203 = vmatprep.subr.bf16.mxu1 %v15210_v31 }
0x103c   : > { %13184 = vmatpush3.bf16.msra.mxu0 %v15017_v32 }
0x103d   : > { %13185 = vmatprep.subr.bf16.mxu0 %v15210_v31 }
0x103e   : > { %13204 = vmatpush3.bf16.msra.mxu1 %v15025_v41 }
0x103f   : > { %13205 = vmatprep.subr.bf16.mxu1 %v15210_v31 }
0x1040   : > { %13186 = vmatpush3.bf16.msra.mxu0 %v15018_v38 }
0x1041   : > { %13187 = vmatprep.subr.bf16.mxu0 %v15210_v31 }
0x1042   : > { %13206 = vmatpush3.bf16.msra.mxu1 %v15026_v18 }
0x1043   : > { %13207 = vmatprep.subr.bf16.mxu1 %v15210_v31 }
0x1044   : > { %13188 = vmatpush3.bf16.msra.mxu0 %v15019_v0 }
0x1045   : > { %13189 = vmatprep.subr.bf16.mxu0 %v15210_v31 }
0x1046   : > { %13208 = vmatpush3.bf16.msra.mxu1 %v15027_v6 }
0x1047   : > { %13209 = vmatprep.subr.bf16.mxu1 %v15210_v31 }
0x1048   : > { %13190 = vmatpush3.bf16.msra.mxu0 %v15020_v60 }
0x1049   : > { %13191 = vmatprep.subr.bf16.mxu0 %v15210_v31 }
0x104a   : > { %13210 = vmatpush3.bf16.msra.mxu1 %v15028_v9 }
0x104b   : > { %13211 = vmatprep.subr.bf16.mxu1 %v15210_v31 }
0x104c   : > { %13192 = vmatpush3.bf16.msra.mxu0 %v15021_v34 }
0x104d   : > { %13217 = vmatprep.subr.bf16.mxu0 %v15210_v31 }
0x104e   : > { %13212 = vmatpush3.bf16.msra.mxu1 %v15029_v5 }
0x104f   : > { %13194 = vmatmul.mubr.bf16.vlgmr.msra.gmra.mxu0 %v11211_v37 }
0x1050   : > { %13233 = vmatprep.mubr.msk.bf16.mxu0 %vm15211_vm11, %v15210_v31  ;;  %13218 = vmatpush3.bf16.msra.mxu0 %v15030_v40 }
0x1051   : > { %13219 = vmatprep.subr.bf16.mxu0 %v15210_v31 }
0x1054   : > { %13220 = vmatpush3.bf16.msra.mxu0 %v15031_v46 }
0x1055   : > { %13221 = vmatprep.subr.bf16.mxu0 %v15210_v31 }
0x1058   : > { %13222 = vmatpush3.bf16.msra.mxu0 %v15032_v1 }
0x1059   : > { %13223 = vmatprep.subr.bf16.mxu0 %v15210_v31 }
0x105c   : > { %13224 = vmatpush3.bf16.msra.mxu0 %v15033_v42 }
0x105d   : > { %13225 = vmatprep.subr.bf16.mxu0 %v15210_v31 }
0x1060   : > { %13226 = vmatpush3.bf16.msra.mxu0 %v15034_v8 }
0x1061   : > { %13227 = vmatprep.subr.bf16.mxu0 %v15210_v31 }
0x1064   : > { %13228 = vmatpush3.bf16.msra.mxu0 %v15035_v45 }
0x1065   : > { %13229 = vmatprep.subr.bf16.mxu0 %v15210_v31 }
0x1068   : > { %13230 = vmatpush3.bf16.msra.mxu0 %v15036_v14 }
0x1069   : > { %13231 = vmatprep.subr.bf16.mxu0 %v15210_v31 }
0x106c   : > { %13232 = vmatpush3.bf16.msra.mxu0 %v15037_v50 }
0x110f   : > { %v11299_v35 = vpop.f32.mrf.mxu0 }
0x1110   : > { %v11300_v52 = vadd.f32 %v11299_v35, %v11216_v47 }
0x1111   : > { %v13195_v7 = vpop.f32.mrf.mxu0 }
0x1112   : > { %vm11305_vm12 = vcmp.gt.f32.partialorder %v11300_v52, 0.0  ;;  %v11306_v29 = vmul.f32 0.01, %v11300_v52 }
0x1113   : > { %v11302_v49 = vpop.f32.mrf.mxu0 }
0x1114   : > { %v11307_v39 = vsel %vm11305_vm12, %v11300_v52, %v11306_v29 }
0x1115   : > { %v13196_v2 = vpop.f32.mrf.mxu0  ;;  %v11308_v43 = vpack.c.bf16 %v11307_v39, %v11307_v39 }
0x1117   : > { %13214 = vmatmul.mubr.bf16.vlgmr.msra.gmra.mxu1 %v11308_v43 }
0x11d7   : > { %v11395_v54 = vpop.f32.mrf.mxu1 }
0x11d8   : > { %v11396_v55 = vadd.f32 %v11395_v54, %v11312_v53 }
0x11d9   : > { %v13215_v57 = vpop.f32.mrf.mxu1 }
0x11da   : > { %vm11401_vm13 = vcmp.gt.f32.partialorder %v11396_v55, 0.0  ;;  %v11402_v59 = vmul.f32 0.01, %v11396_v55 }
0x11db   : > { %v11398_v62 = vpop.f32.mrf.mxu1 }
0x11dc   : > { %v11403_v44 = vsel %vm11401_vm13, %v11396_v55, %v11402_v59 }
0x11dd   : > { %v11404_v15 = vpack.c.bf16 %v11403_v44, %v11403_v44  ;;  %v13216_v20 = vpop.f32.mrf.mxu1 }
0x11df   : > { %13234 = vmatmul.mubr.bf16.vlgmr.msra.gmra.mxu0 %v11404_v15 }
0x129f   : > { %v11492_v25 = vpop.f32.mrf.mxu0 }
0x12a0   : > { %v11493_v61 = vadd.f32 %v11492_v25, %v11409_v19 }
0x12a1   : > { %v13235_v30 = vpop.f32.mrf.mxu0 }
0x12a2   : > { %11498 = vst [vmem:[#allocation10] sm:$0xff] %v11493_v61 }
0x12a3   : > { %v11495_v16 = vpop.f32.mrf.mxu0 }
0x12a5   : > { %v13236_v4 = vpop.f32.mrf.mxu0 }
0x12a6 PF: > { %p13271_p5 = scmp.eq.s32.totalorder %s15272_s28, 4  ;;  %s15212_s24 = smov [#allocation10]  }
0x12a7   : > { %s11506_s30 = sshll.u32 %s15212_s24, 4  ;;  %s11507_s30 = int_to_ptr.vmem [resolvable:$true] %s11506_s30 }
0x12a8   : > { %s15118_s8 = scalar_lea.vmem %s11507_s30, 128  ;;  %p15125_p7 = scmp.lt.s32.totalorder %s11507_s30, %s11507_s30 }
0x12a9   : > { %p15119_p3 = scmp.ne.s32.totalorder %s11507_s30, %s15118_s8  ;;  %p15126_p1 = scmp.lt.s32.totalorder %s15118_s8, %s15118_s8 }
0x12ab   : > { %p15120_p6 = pnand %p15119_p3, %p13271_p5  ;;  %p15127_p11 = por %p15126_p1, %p15125_p7 }
0x12ad   : > { %p15121_p12 = pneg %p15120_p6 }
0x12af   : > { %p15128_p4 = pnand %p15127_p11, %p15121_p12 }
0x12b1   : > { %15131 = shalt.err (!%p15128_p4)
}
0x12b2   : > { %13252 = dma.vmem_to_hbm [thread:$0]  (%p13271_p5), %s11507_s30, 128, %s17144_s7, [#allocation6]  }
0x12b3   : > { %15171 = dma.done.wait (%p13271_p5), [#allocation6], 128  }
0x12b4   : > { %15173 = vsyncadd (%p13271_p5), [#allocation6], 4294967168 }
0x12b5 PF: > { %p17_p8 = scmp.ge.s32.totalorder %s15275_s29, 7   ;;  %s17162_s24 = smov %s15180_s25 }
0x12b6   : > { %s17163_s25 = smov %s15184_s26  ;;  %s17164_s26 = smov %s15285_s9 }
0x12b7   : > { %s17165_s27 = smov %s15275_s29  ;;  %19 = sbr.rel (!%p17_p8) target bundleno = 6 (0x6), region = 104 }
0x12bc   :  { %11519 = vsyncpa [#allocation5], 1 }
0x12bd   :  { %11521 = vsyncpa [#allocation5 + $0x1], 1 }
0x12be   :  { %11522 = vsyncpa [#allocation8], 1 }
0x12bf   :  { %11523 = vsyncpa [#allocation6], 1 }
0x12c0   :  { %11525 = vsyncpa [#allocation6 + $0x1], 1 }

</bundles_post_ra>
